<compile_context>
chip_gen: v7x
topology: tpu7x:2x2x1
jax: 0.10.0
libtpu: 0.0.40
codegen_flags: <defaults>
</compile_context>

<pallas_src>
import jax
import jax.numpy as jnp
from jax.experimental import pallas as pl
from jax.experimental.pallas import tpu as pltpu

# ----------------------------- model hyperparams -----------------------------
B = 2            # batch
C = 3            # image channels
IMG = 16         # image height = width
PATCH = 4        # patch size -> 4x4 = 16 patches
D = 32           # embed dim
NH = 2           # attention heads
DH = D // NH     # head dim
HIDDEN = 4 * D   # MLP hidden
DEPTH = 2        # transformer blocks
PCA_COMPONENTS = 16
NUM_CLASSES = 10
LN_EPS = 1e-6
N_PATCHES = (IMG // PATCH) ** 2
S_TOK = N_PATCHES + 1            # cls + patch tokens
CPP = C * PATCH * PATCH          # flattened patch pixels


# ------------------------------ in-kernel helpers -----------------------------
def _mm(x, w):
    """x @ w with bf16 operands and f32 accumulation (MXU)."""
    return jax.lax.dot_general(
        x.astype(jnp.bfloat16), w.astype(jnp.bfloat16),
        dimension_numbers=(((1,), (0,)), ((), ())),
        preferred_element_type=jnp.float32)


def _mm_nt(x, y):
    """x @ y^T with bf16 operands and f32 accumulation (MXU)."""
    return jax.lax.dot_general(
        x.astype(jnp.bfloat16), y.astype(jnp.bfloat16),
        dimension_numbers=(((1,), (1,)), ((), ())),
        preferred_element_type=jnp.float32)


def _ln(x, g, b):
    """LayerNorm over the last axis; statistics in f32."""
    mean = jnp.mean(x, axis=-1, keepdims=True)
    xc = x - mean
    var = jnp.mean(xc * xc, axis=-1, keepdims=True)
    return xc * jax.lax.rsqrt(var + LN_EPS) * g + b


def _gelu(x):
    # TODO(synk): PyTorch nn.GELU default is exact erf; tanh approximation used here.
    return 0.5 * x * (1.0 + jnp.tanh(0.7978845608028654 *
                                     (x + 0.044715 * x * x * x)))


# ------------------------------ fused backbone kernel -------------------------
def _backbone_kernel(patches_ref, w_pe_ref, add_cls_ref, add_patch_ref,
                     ln1_g_ref, ln1_b_ref,
                     w_q_ref, b_q_ref, w_k_ref, b_k_ref, w_v_ref, b_v_ref,
                     w_proj_ref, b_proj_ref, ln2_g_ref, ln2_b_ref,
                     w_fc1_ref, b_fc1_ref, w_fc2_ref, b_fc2_ref,
                     norm_g_ref, norm_b_ref, o_ref):
    n_pat = add_patch_ref.shape[0]           # patches per image (static)
    n_img = patches_ref.shape[0] // n_pat    # images in the folded batch (static)
    s_tok = n_pat + 1

    # Patch embedding for the whole batch in one matmul, then assemble the
    # batch-folded (B*S, D) token slab in VMEM: for each image prepend the
    # (cls_token + pos_embed[0]) row and add (patch bias + pos_embed[1:]).
    pe = _mm(patches_ref[...], w_pe_ref[...])                       # (B*N, D) f32
    add_cls = add_cls_ref[...]                                      # (1, D)
    add_patch = add_patch_ref[...]                                  # (N, D)
    pieces = []
    for b in range(n_img):
        pieces.append(add_cls)
        pieces.append(pe[b * n_pat:(b + 1) * n_pat] + add_patch)
    x = jnp.concatenate(pieces, axis=0)                             # (B*S, D) f32

    scale = 1.0 / (DH ** 0.5)
    for l in range(DEPTH):                                          # static unroll
        # ---- attention sub-block (pre-norm) ----
        h = _ln(x, ln1_g_ref[l], ln1_b_ref[l])                      # (B*S, D)
        # Per-head q/k/v via pre-split weights (no lane-offset slicing of a
        # fused qkv result); folded over the whole batch (M = B*S).
        q_heads, k_heads, v_heads = [], [], []
        for hh in range(NH):
            idx = l * NH + hh
            q_heads.append(_mm(h, w_q_ref[idx]) + b_q_ref[idx])     # (B*S, DH)
            k_heads.append(_mm(h, w_k_ref[idx]) + b_k_ref[idx])
            v_heads.append(_mm(h, w_v_ref[idx]) + b_v_ref[idx])
        # Split per image only for the (S, S) scores; lane-concat the head
        # outputs and do ONE (B*S, D) @ (D, D) output projection.
        img_outs = []
        for b in range(n_img):
            lo = b * s_tok
            head_outs = []
            for hh in range(NH):
                qb = q_heads[hh][lo:lo + s_tok]                      # (S, DH)
                kb = k_heads[hh][lo:lo + s_tok]
                vb = v_heads[hh][lo:lo + s_tok]
                s = _mm_nt(qb, kb) * scale                           # (S, S) f32
                m = jnp.max(s, axis=-1, keepdims=True)
                p = jnp.exp(s - m)
                # exact reciprocal (review correctness note); EUP either way
                p = p * pl.reciprocal(jnp.sum(p, axis=-1, keepdims=True),
                                      approx=False)
                head_outs.append(_mm(p, vb))                         # (S, DH)
            img_outs.append(jnp.concatenate(head_outs, axis=-1))     # (S, D)
        attn = jnp.concatenate(img_outs, axis=0)                     # (B*S, D)
        x = x + _mm(attn, w_proj_ref[l]) + b_proj_ref[l]  # LayerScale folded in W/b

        # ---- MLP sub-block (pre-norm) ----
        h = _ln(x, ln2_g_ref[l], ln2_b_ref[l])
        h = _gelu(_mm(h, w_fc1_ref[l]) + b_fc1_ref[l])
        x = x + _mm(h, w_fc2_ref[l]) + b_fc2_ref[l]       # LayerScale folded in W/b

    o_ref[...] = _ln(x, norm_g_ref[...], norm_b_ref[...])            # (B*S, D)


# ------------------------------ fused epilogue kernel --------------------------
def _epilogue_kernel(x_ref, w_pca_ref, b_pca_ref, w_head_ref, b_head_ref,
                     comp_ref, logits_ref):
    # One PCA matmul over every token of every image; output stored as one
    # un-sliced slab (cls = row b*S of each image, patch tokens follow).
    comp = _mm(x_ref[...], w_pca_ref[...]) + b_pca_ref[...]          # (B*S, P)
    comp_ref[...] = comp
    n_img = logits_ref.shape[0]
    s_tok = x_ref.shape[0] // n_img
    cls_rows = jnp.concatenate(
        [comp[b * s_tok:b * s_tok + 1] for b in range(n_img)], axis=0)  # (B, P)
    logits_ref[...] = _mm(cls_rows, w_head_ref[...]) + b_head_ref[...]  # (B, NC)


# ------------------------------ pallas_call wrappers ---------------------------
def _full_spec(a):
    nd = a.ndim
    return pl.BlockSpec(a.shape, lambda i, _n=nd: (0,) * _n)


def vit_backbone_call(patches, params, n_img):
    n_pat = params['add_patch'].shape[0]
    bs = n_img * (n_pat + 1)
    args = (patches, params['w_pe'], params['add_cls'], params['add_patch'],
            params['ln1_g'], params['ln1_b'],
            params['w_q'], params['b_q'], params['w_k'], params['b_k'],
            params['w_v'], params['b_v'],
            params['w_proj'], params['b_proj'],
            params['ln2_g'], params['ln2_b'],
            params['w_fc1'], params['b_fc1'], params['w_fc2'], params['b_fc2'],
            params['norm_g'], params['norm_b'])
    return pl.pallas_call(
        _backbone_kernel,
        out_shape=jax.ShapeDtypeStruct((bs, D), jnp.float32),
        grid=(1,),                                   # single step: batch folded
        in_specs=[_full_spec(a) for a in args],
        out_specs=pl.BlockSpec((bs, D), lambda i: (0, 0)),
        compiler_params=pltpu.CompilerParams(dimension_semantics=("arbitrary",)),
    )(*args)


def epilogue_call(x_norm, w_pca, b_pca, w_head, b_head, n_img):
    bs, _ = x_norm.shape
    p = w_pca.shape[1]
    nc = w_head.shape[1]
    args = (x_norm, w_pca, b_pca, w_head, b_head)
    return pl.pallas_call(
        _epilogue_kernel,
        out_shape=(jax.ShapeDtypeStruct((bs, p), jnp.float32),
                   jax.ShapeDtypeStruct((n_img, nc), jnp.float32)),
        grid=(1,),                                   # single step: batch folded
        in_specs=[_full_spec(a) for a in args],
        out_specs=(pl.BlockSpec((bs, p), lambda i: (0, 0)),
                   pl.BlockSpec((n_img, nc), lambda i: (0, 0))),
        compiler_params=pltpu.CompilerParams(dimension_semantics=("arbitrary",)),
    )(*args)


# ------------------------------ parameter init --------------------------------
def init_params(key):
    ks = jax.random.split(key, 8)
    n01 = lambda k, shp: 0.02 * jax.random.normal(k, shp, jnp.float32)

    w_pe = n01(ks[0], (CPP, D))
    b_pe = jnp.zeros((D,), jnp.float32)
    cls_token = n01(ks[1], (1, D))
    pos_embed = n01(ks[2], (S_TOK, D))

    # Fused qkv weight, pre-split per q/k/v and per head AT INIT TIME so the
    # kernel never has to slice at 16-lane offsets.
    w_qkv = n01(ks[3], (DEPTH, D, 3 * D))

    def per_head(w):  # (DEPTH, D, D) -> (DEPTH*NH, D, DH), head-major per layer
        return (w.reshape(DEPTH, D, NH, DH)
                 .transpose(0, 2, 1, 3)
                 .reshape(DEPTH * NH, D, DH))

    w_q = per_head(w_qkv[:, :, 0:D])
    w_k = per_head(w_qkv[:, :, D:2 * D])
    w_v = per_head(w_qkv[:, :, 2 * D:3 * D])
    b_head_split = jnp.zeros((DEPTH * NH, 1, DH), jnp.float32)

    # LayerScale gammas (DINOv2) -- folded into proj / fc2: (xW + b)*g == x(Wg) + bg
    ls1 = jnp.ones((DEPTH, 1, D), jnp.float32)
    ls2 = jnp.ones((DEPTH, 1, D), jnp.float32)
    w_proj = n01(ks[4], (DEPTH, D, D))
    w_fc2 = n01(ks[6], (DEPTH, HIDDEN, D))

    return {
        # matmul weights stored bf16 (f32 accumulation in-kernel); everything
        # elementwise (biases, LN params, cls/pos) stays f32.
        'w_pe': w_pe.astype(jnp.bfloat16),
        # cls/pos/patch-bias additive init hoisted here (parameter-only, no
        # per-forward concat): row for cls, rows for patch tokens.
        'add_cls': cls_token + pos_embed[0:1],                       # (1, D)
        'add_patch': pos_embed[1:] + b_pe[None, :],                  # (N, D)
        'ln1_g': jnp.ones((DEPTH, 1, D), jnp.float32),
        'ln1_b': jnp.zeros((DEPTH, 1, D), jnp.float32),
        'w_q': w_q.astype(jnp.bfloat16), 'b_q': b_head_split,
        'w_k': w_k.astype(jnp.bfloat16), 'b_k': b_head_split,
        'w_v': w_v.astype(jnp.bfloat16), 'b_v': b_head_split,
        'w_proj': (w_proj * ls1).astype(jnp.bfloat16),
        'b_proj': jnp.zeros((DEPTH, 1, D), jnp.float32) * ls1,
        'ln2_g': jnp.ones((DEPTH, 1, D), jnp.float32),
        'ln2_b': jnp.zeros((DEPTH, 1, D), jnp.float32),
        'w_fc1': n01(ks[5], (DEPTH, D, HIDDEN)).astype(jnp.bfloat16),
        'b_fc1': jnp.zeros((DEPTH, 1, HIDDEN), jnp.float32),
        'w_fc2': (w_fc2 * ls2).astype(jnp.bfloat16),
        'b_fc2': jnp.zeros((DEPTH, 1, D), jnp.float32) * ls2,
        'norm_g': jnp.ones((1, D), jnp.float32),
        'norm_b': jnp.zeros((1, D), jnp.float32),
        'w_head': n01(ks[7], (PCA_COMPONENTS, NUM_CLASSES)).astype(jnp.bfloat16),
        'b_head': jnp.zeros((1, NUM_CLASSES), jnp.float32),
    }


# --------------------------------- forward ------------------------------------
def nascon_dino_forward(x_imgs, params):
    Bn, Cn, H, W = x_imgs.shape
    p = PATCH
    gh, gw = H // p, W // p
    # patchify (pure layout glue); pixel order (c, ph, pw) matches a flattened
    # PyTorch conv weight of shape (D, C, p, p).  (npatch == N and w == h ->
    # interpolate_pos_encoding is the identity path, as in the reference.)
    patches = (x_imgs.reshape(Bn, Cn, gh, p, gw, p)
               .transpose(0, 2, 4, 1, 3, 5)
               .reshape(Bn * gh * gw, Cn * p * p))

    x_norm = vit_backbone_call(patches, params, Bn)                  # (Bn*S, D)

    # PCA fit (SVD over the batch's patch tokens): no Pallas equivalent -> plain JAX.
    # TODO(synk): PCA is refit from the current batch every forward (matches the
    # first-call behavior of the reference); components have SVD sign ambiguity.
    x3 = x_norm.reshape(Bn, S_TOK, D)
    flat = x3[:, 1:, :].reshape(-1, D)
    mean = jnp.mean(flat, axis=0)
    _, _, vt = jnp.linalg.svd(flat - mean, full_matrices=False)
    comps = vt[:PCA_COMPONENTS]                                      # (pca, D)
    # PCA transform == affine projection: (X - mean) @ comps.T
    w_pca = comps.T.astype(jnp.bfloat16)                             # (D, pca)
    b_pca = (-(mean @ comps.T)).reshape(1, PCA_COMPONENTS)

    comp, logits = epilogue_call(x_norm, w_pca, b_pca,
                                 params['w_head'], params['b_head'], Bn)
    comp3 = comp.reshape(Bn, S_TOK, PCA_COMPONENTS)
    tok_c = comp3[:, 1:, :]                                          # (Bn, N, pca)
    cls_c = comp3[:, 0, :]                                           # (Bn, pca)
    return tok_c, cls_c, logits


# ----------------------------------- main --------------------------------------
if __name__ == "__main__":
    key = jax.random.PRNGKey(0)
    k_params, k_x = jax.random.split(key)
    params = init_params(k_params)
    x = jax.random.normal(k_x, (B, C, IMG, IMG), jnp.float32)

    fwd = jax.jit(nascon_dino_forward)
    tok_c, cls_c, logits = fwd(x, params)
    jax.block_until_ready((tok_c, cls_c, logits))

    assert tok_c.shape == (B, N_PATCHES, PCA_COMPONENTS)
    assert cls_c.shape == (B, PCA_COMPONENTS)
    assert logits.shape == (B, NUM_CLASSES)
    print("KERNEL_OK")
</pallas_src>

<mosaic_0001>
module attributes {stable_mosaic.version = 11 : i64} {
  func.func @_backbone_kernel(%arg0: i32, %arg1: memref<32x48xf32, #tpu.memory_space<vmem>>, %arg2: memref<48x32xbf16, #tpu.memory_space<vmem>>, %arg3: memref<1x32xf32, #tpu.memory_space<vmem>>, %arg4: memref<16x32xf32, #tpu.memory_space<vmem>>, %arg5: memref<2x1x32xf32, #tpu.memory_space<vmem>>, %arg6: memref<2x1x32xf32, #tpu.memory_space<vmem>>, %arg7: memref<4x32x16xbf16, #tpu.memory_space<vmem>>, %arg8: memref<4x1x16xf32, #tpu.memory_space<vmem>>, %arg9: memref<4x32x16xbf16, #tpu.memory_space<vmem>>, %arg10: memref<4x1x16xf32, #tpu.memory_space<vmem>>, %arg11: memref<4x32x16xbf16, #tpu.memory_space<vmem>>, %arg12: memref<4x1x16xf32, #tpu.memory_space<vmem>>, %arg13: memref<2x32x32xbf16, #tpu.memory_space<vmem>>, %arg14: memref<2x1x32xf32, #tpu.memory_space<vmem>>, %arg15: memref<2x1x32xf32, #tpu.memory_space<vmem>>, %arg16: memref<2x1x32xf32, #tpu.memory_space<vmem>>, %arg17: memref<2x32x128xbf16, #tpu.memory_space<vmem>>, %arg18: memref<2x1x128xf32, #tpu.memory_space<vmem>>, %arg19: memref<2x128x32xbf16, #tpu.memory_space<vmem>>, %arg20: memref<2x1x32xf32, #tpu.memory_space<vmem>>, %arg21: memref<1x32xf32, #tpu.memory_space<vmem>>, %arg22: memref<1x32xf32, #tpu.memory_space<vmem>>, %arg23: memref<34x32xf32, #tpu.memory_space<vmem>>) attributes {dimension_semantics = [#tpu.dimension_semantics<arbitrary>], iteration_bounds = array<i64: 1>, scalar_prefetch = 0 : i64, scratch_operands = 0 : i64, tpu.core_type = #tpu.core_type<tc>, window_params = [{pipeline_mode = #tpu.pipeline_mode<synchronous>, transform_indices = @transform_0, window_bounds = array<i64: 32, 48>}, {pipeline_mode = #tpu.pipeline_mode<synchronous>, transform_indices = @transform_1, window_bounds = array<i64: 48, 32>}, {pipeline_mode = #tpu.pipeline_mode<synchronous>, transform_indices = @transform_2, window_bounds = array<i64: 1, 32>}, {pipeline_mode = #tpu.pipeline_mode<synchronous>, transform_indices = @transform_3, window_bounds = array<i64: 16, 32>}, {pipeline_mode = #tpu.pipeline_mode<synchronous>, transform_indices = @transform_4, window_bounds = array<i64: 2, 1, 32>}, {pipeline_mode = #tpu.pipeline_mode<synchronous>, transform_indices = @transform_5, window_bounds = array<i64: 2, 1, 32>}, {pipeline_mode = #tpu.pipeline_mode<synchronous>, transform_indices = @transform_6, window_bounds = array<i64: 4, 32, 16>}, {pipeline_mode = #tpu.pipeline_mode<synchronous>, transform_indices = @transform_7, window_bounds = array<i64: 4, 1, 16>}, {pipeline_mode = #tpu.pipeline_mode<synchronous>, transform_indices = @transform_8, window_bounds = array<i64: 4, 32, 16>}, {pipeline_mode = #tpu.pipeline_mode<synchronous>, transform_indices = @transform_9, window_bounds = array<i64: 4, 1, 16>}, {pipeline_mode = #tpu.pipeline_mode<synchronous>, transform_indices = @transform_10, window_bounds = array<i64: 4, 32, 16>}, {pipeline_mode = #tpu.pipeline_mode<synchronous>, transform_indices = @transform_11, window_bounds = array<i64: 4, 1, 16>}, {pipeline_mode = #tpu.pipeline_mode<synchronous>, transform_indices = @transform_12, window_bounds = array<i64: 2, 32, 32>}, {pipeline_mode = #tpu.pipeline_mode<synchronous>, transform_indices = @transform_13, window_bounds = array<i64: 2, 1, 32>}, {pipeline_mode = #tpu.pipeline_mode<synchronous>, transform_indices = @transform_14, window_bounds = array<i64: 2, 1, 32>}, {pipeline_mode = #tpu.pipeline_mode<synchronous>, transform_indices = @transform_15, window_bounds = array<i64: 2, 1, 32>}, {pipeline_mode = #tpu.pipeline_mode<synchronous>, transform_indices = @transform_16, window_bounds = array<i64: 2, 32, 128>}, {pipeline_mode = #tpu.pipeline_mode<synchronous>, transform_indices = @transform_17, window_bounds = array<i64: 2, 1, 128>}, {pipeline_mode = #tpu.pipeline_mode<synchronous>, transform_indices = @transform_18, window_bounds = array<i64: 2, 128, 32>}, {pipeline_mode = #tpu.pipeline_mode<synchronous>, transform_indices = @transform_19, window_bounds = array<i64: 2, 1, 32>}, {pipeline_mode = #tpu.pipeline_mode<synchronous>, transform_indices = @transform_20, window_bounds = array<i64: 1, 32>}, {pipeline_mode = #tpu.pipeline_mode<synchronous>, transform_indices = @transform_21, window_bounds = array<i64: 1, 32>}, {pipeline_mode = #tpu.pipeline_mode<synchronous>, transform_indices = @transform_22, window_bounds = array<i64: 34, 32>}]} {
    %c0 = arith.constant 0 : index
    %c0_0 = arith.constant 0 : index
    %0 = vector.load %arg1[%c0, %c0_0] : memref<32x48xf32, #tpu.memory_space<vmem>>, vector<32x48xf32>
    %c0_1 = arith.constant 0 : index
    %c0_2 = arith.constant 0 : index
    %1 = vector.load %arg2[%c0_1, %c0_2] : memref<48x32xbf16, #tpu.memory_space<vmem>>, vector<48x32xbf16>
    %2 = arith.truncf %0 : vector<32x48xf32> to vector<32x48xbf16>
    %cst = arith.constant dense<0.000000e+00> : vector<32x32xf32>
    %3 = tpu.matmul %2, %1, %cst {dimension_numbers = #tpu.dot_dimension_numbers<[1], [0], [0], [1], [0, 0, 1, 1], [], []>} : vector<32x48xbf16>, vector<48x32xbf16>, vector<32x32xf32> -> vector<32x32xf32>
    %c0_3 = arith.constant 0 : index
    %c0_4 = arith.constant 0 : index
    %4 = vector.load %arg3[%c0_3, %c0_4] : memref<1x32xf32, #tpu.memory_space<vmem>>, vector<1x32xf32>
    %c0_5 = arith.constant 0 : index
    %c0_6 = arith.constant 0 : index
    %5 = vector.load %arg4[%c0_5, %c0_6] : memref<16x32xf32, #tpu.memory_space<vmem>>, vector<16x32xf32>
    %6 = vector.extract_strided_slice %3 {offsets = [0, 0], sizes = [16, 32], strides = [1, 1]} : vector<32x32xf32> to vector<16x32xf32>
    %7 = arith.addf %6, %5 : vector<16x32xf32>
    %8 = vector.extract_strided_slice %3 {offsets = [16, 0], sizes = [16, 32], strides = [1, 1]} : vector<32x32xf32> to vector<16x32xf32>
    %9 = arith.addf %8, %5 : vector<16x32xf32>
    %10 = tpu.concatenate %4, %7, %4, %9 in 0 : vector<1x32xf32>, vector<16x32xf32>, vector<1x32xf32>, vector<16x32xf32> -> vector<34x32xf32>
    %c0_7 = arith.constant 0 : index
    %c0_8 = arith.constant 0 : index
    %c0_9 = arith.constant 0 : index
    %11 = vector.load %arg5[%c0_7, %c0_8, %c0_9] : memref<2x1x32xf32, #tpu.memory_space<vmem>>, vector<1x1x32xf32>
    %12 = vector.shape_cast %11 : vector<1x1x32xf32> to vector<1x32xf32>
    %c0_10 = arith.constant 0 : index
    %c0_11 = arith.constant 0 : index
    %c0_12 = arith.constant 0 : index
    %13 = vector.load %arg6[%c0_10, %c0_11, %c0_12] : memref<2x1x32xf32, #tpu.memory_space<vmem>>, vector<1x1x32xf32>
    %14 = vector.shape_cast %13 : vector<1x1x32xf32> to vector<1x32xf32>
    %cst_13 = arith.constant dense<0.000000e+00> : vector<34xf32>
    %15 = vector.multi_reduction <add>, %10, %cst_13 [1] : vector<34x32xf32> to vector<34xf32>
    %16 = vector.shape_cast %15 : vector<34xf32> to vector<34x1xf32>
    %cst_14 = arith.constant 3.200000e+01 : f32
    %17 = vector.broadcast %cst_14 : f32 to vector<34x1xf32>
    %18 = arith.divf %16, %17 : vector<34x1xf32>
    %19 = vector.broadcast %18 : vector<34x1xf32> to vector<34x32xf32>
    %20 = arith.subf %10, %19 : vector<34x32xf32>
    %21 = arith.mulf %20, %20 : vector<34x32xf32>
    %cst_15 = arith.constant dense<0.000000e+00> : vector<34xf32>
    %22 = vector.multi_reduction <add>, %21, %cst_15 [1] : vector<34x32xf32> to vector<34xf32>
    %23 = vector.shape_cast %22 : vector<34xf32> to vector<34x1xf32>
    %cst_16 = arith.constant 3.200000e+01 : f32
    %24 = vector.broadcast %cst_16 : f32 to vector<34x1xf32>
    %25 = arith.divf %23, %24 : vector<34x1xf32>
    %cst_17 = arith.constant 9.99999997E-7 : f32
    %26 = vector.broadcast %cst_17 : f32 to vector<34x1xf32>
    %27 = arith.addf %25, %26 : vector<34x1xf32>
    %28 = math.rsqrt %27 : vector<34x1xf32>
    %29 = vector.broadcast %28 : vector<34x1xf32> to vector<34x32xf32>
    %30 = arith.mulf %20, %29 : vector<34x32xf32>
    %31 = vector.broadcast %12 : vector<1x32xf32> to vector<34x32xf32>
    %32 = arith.mulf %30, %31 : vector<34x32xf32>
    %33 = vector.broadcast %14 : vector<1x32xf32> to vector<34x32xf32>
    %34 = arith.addf %32, %33 : vector<34x32xf32>
    %c0_18 = arith.constant 0 : index
    %c0_19 = arith.constant 0 : index
    %c0_20 = arith.constant 0 : index
    %35 = vector.load %arg7[%c0_18, %c0_19, %c0_20] : memref<4x32x16xbf16, #tpu.memory_space<vmem>>, vector<1x32x16xbf16>
    %36 = vector.shape_cast %35 : vector<1x32x16xbf16> to vector<32x16xbf16>
    %37 = arith.truncf %34 : vector<34x32xf32> to vector<34x32xbf16>
    %cst_21 = arith.constant dense<0.000000e+00> : vector<34x16xf32>
    %38 = tpu.matmul %37, %36, %cst_21 {dimension_numbers = #tpu.dot_dimension_numbers<[1], [0], [0], [1], [0, 0, 1, 1], [], []>} : vector<34x32xbf16>, vector<32x16xbf16>, vector<34x16xf32> -> vector<34x16xf32>
    %c0_22 = arith.constant 0 : index
    %c0_23 = arith.constant 0 : index
    %c0_24 = arith.constant 0 : index
    %39 = vector.load %arg8[%c0_22, %c0_23, %c0_24] : memref<4x1x16xf32, #tpu.memory_space<vmem>>, vector<1x1x16xf32>
    %40 = vector.shape_cast %39 : vector<1x1x16xf32> to vector<1x16xf32>
    %41 = vector.broadcast %40 : vector<1x16xf32> to vector<34x16xf32>
    %42 = arith.addf %38, %41 : vector<34x16xf32>
    %c0_25 = arith.constant 0 : index
    %c0_26 = arith.constant 0 : index
    %c0_27 = arith.constant 0 : index
    %43 = vector.load %arg9[%c0_25, %c0_26, %c0_27] : memref<4x32x16xbf16, #tpu.memory_space<vmem>>, vector<1x32x16xbf16>
    %44 = vector.shape_cast %43 : vector<1x32x16xbf16> to vector<32x16xbf16>
    %45 = arith.truncf %34 : vector<34x32xf32> to vector<34x32xbf16>
    %cst_28 = arith.constant dense<0.000000e+00> : vector<34x16xf32>
    %46 = tpu.matmul %45, %44, %cst_28 {dimension_numbers = #tpu.dot_dimension_numbers<[1], [0], [0], [1], [0, 0, 1, 1], [], []>} : vector<34x32xbf16>, vector<32x16xbf16>, vector<34x16xf32> -> vector<34x16xf32>
    %c0_29 = arith.constant 0 : index
    %c0_30 = arith.constant 0 : index
    %c0_31 = arith.constant 0 : index
    %47 = vector.load %arg10[%c0_29, %c0_30, %c0_31] : memref<4x1x16xf32, #tpu.memory_space<vmem>>, vector<1x1x16xf32>
    %48 = vector.shape_cast %47 : vector<1x1x16xf32> to vector<1x16xf32>
    %49 = vector.broadcast %48 : vector<1x16xf32> to vector<34x16xf32>
    %50 = arith.addf %46, %49 : vector<34x16xf32>
    %c0_32 = arith.constant 0 : index
    %c0_33 = arith.constant 0 : index
    %c0_34 = arith.constant 0 : index
    %51 = vector.load %arg11[%c0_32, %c0_33, %c0_34] : memref<4x32x16xbf16, #tpu.memory_space<vmem>>, vector<1x32x16xbf16>
    %52 = vector.shape_cast %51 : vector<1x32x16xbf16> to vector<32x16xbf16>
    %53 = arith.truncf %34 : vector<34x32xf32> to vector<34x32xbf16>
    %cst_35 = arith.constant dense<0.000000e+00> : vector<34x16xf32>
    %54 = tpu.matmul %53, %52, %cst_35 {dimension_numbers = #tpu.dot_dimension_numbers<[1], [0], [0], [1], [0, 0, 1, 1], [], []>} : vector<34x32xbf16>, vector<32x16xbf16>, vector<34x16xf32> -> vector<34x16xf32>
    %c0_36 = arith.constant 0 : index
    %c0_37 = arith.constant 0 : index
    %c0_38 = arith.constant 0 : index
    %55 = vector.load %arg12[%c0_36, %c0_37, %c0_38] : memref<4x1x16xf32, #tpu.memory_space<vmem>>, vector<1x1x16xf32>
    %56 = vector.shape_cast %55 : vector<1x1x16xf32> to vector<1x16xf32>
    %57 = vector.broadcast %56 : vector<1x16xf32> to vector<34x16xf32>
    %58 = arith.addf %54, %57 : vector<34x16xf32>
    %c1 = arith.constant 1 : index
    %c0_39 = arith.constant 0 : index
    %c0_40 = arith.constant 0 : index
    %59 = vector.load %arg7[%c1, %c0_39, %c0_40] : memref<4x32x16xbf16, #tpu.memory_space<vmem>>, vector<1x32x16xbf16>
    %60 = vector.shape_cast %59 : vector<1x32x16xbf16> to vector<32x16xbf16>
    %61 = arith.truncf %34 : vector<34x32xf32> to vector<34x32xbf16>
    %cst_41 = arith.constant dense<0.000000e+00> : vector<34x16xf32>
    %62 = tpu.matmul %61, %60, %cst_41 {dimension_numbers = #tpu.dot_dimension_numbers<[1], [0], [0], [1], [0, 0, 1, 1], [], []>} : vector<34x32xbf16>, vector<32x16xbf16>, vector<34x16xf32> -> vector<34x16xf32>
    %c1_42 = arith.constant 1 : index
    %c0_43 = arith.constant 0 : index
    %c0_44 = arith.constant 0 : index
    %63 = vector.load %arg8[%c1_42, %c0_43, %c0_44] : memref<4x1x16xf32, #tpu.memory_space<vmem>>, vector<1x1x16xf32>
    %64 = vector.shape_cast %63 : vector<1x1x16xf32> to vector<1x16xf32>
    %65 = vector.broadcast %64 : vector<1x16xf32> to vector<34x16xf32>
    %66 = arith.addf %62, %65 : vector<34x16xf32>
    %c1_45 = arith.constant 1 : index
    %c0_46 = arith.constant 0 : index
    %c0_47 = arith.constant 0 : index
    %67 = vector.load %arg9[%c1_45, %c0_46, %c0_47] : memref<4x32x16xbf16, #tpu.memory_space<vmem>>, vector<1x32x16xbf16>
    %68 = vector.shape_cast %67 : vector<1x32x16xbf16> to vector<32x16xbf16>
    %69 = arith.truncf %34 : vector<34x32xf32> to vector<34x32xbf16>
    %cst_48 = arith.constant dense<0.000000e+00> : vector<34x16xf32>
    %70 = tpu.matmul %69, %68, %cst_48 {dimension_numbers = #tpu.dot_dimension_numbers<[1], [0], [0], [1], [0, 0, 1, 1], [], []>} : vector<34x32xbf16>, vector<32x16xbf16>, vector<34x16xf32> -> vector<34x16xf32>
    %c1_49 = arith.constant 1 : index
    %c0_50 = arith.constant 0 : index
    %c0_51 = arith.constant 0 : index
    %71 = vector.load %arg10[%c1_49, %c0_50, %c0_51] : memref<4x1x16xf32, #tpu.memory_space<vmem>>, vector<1x1x16xf32>
    %72 = vector.shape_cast %71 : vector<1x1x16xf32> to vector<1x16xf32>
    %73 = vector.broadcast %72 : vector<1x16xf32> to vector<34x16xf32>
    %74 = arith.addf %70, %73 : vector<34x16xf32>
    %c1_52 = arith.constant 1 : index
    %c0_53 = arith.constant 0 : index
    %c0_54 = arith.constant 0 : index
    %75 = vector.load %arg11[%c1_52, %c0_53, %c0_54] : memref<4x32x16xbf16, #tpu.memory_space<vmem>>, vector<1x32x16xbf16>
    %76 = vector.shape_cast %75 : vector<1x32x16xbf16> to vector<32x16xbf16>
    %77 = arith.truncf %34 : vector<34x32xf32> to vector<34x32xbf16>
    %cst_55 = arith.constant dense<0.000000e+00> : vector<34x16xf32>
    %78 = tpu.matmul %77, %76, %cst_55 {dimension_numbers = #tpu.dot_dimension_numbers<[1], [0], [0], [1], [0, 0, 1, 1], [], []>} : vector<34x32xbf16>, vector<32x16xbf16>, vector<34x16xf32> -> vector<34x16xf32>
    %c1_56 = arith.constant 1 : index
    %c0_57 = arith.constant 0 : index
    %c0_58 = arith.constant 0 : index
    %79 = vector.load %arg12[%c1_56, %c0_57, %c0_58] : memref<4x1x16xf32, #tpu.memory_space<vmem>>, vector<1x1x16xf32>
    %80 = vector.shape_cast %79 : vector<1x1x16xf32> to vector<1x16xf32>
    %81 = vector.broadcast %80 : vector<1x16xf32> to vector<34x16xf32>
    %82 = arith.addf %78, %81 : vector<34x16xf32>
    %83 = vector.extract_strided_slice %42 {offsets = [0, 0], sizes = [17, 16], strides = [1, 1]} : vector<34x16xf32> to vector<17x16xf32>
    %84 = vector.extract_strided_slice %50 {offsets = [0, 0], sizes = [17, 16], strides = [1, 1]} : vector<34x16xf32> to vector<17x16xf32>
    %85 = vector.extract_strided_slice %58 {offsets = [0, 0], sizes = [17, 16], strides = [1, 1]} : vector<34x16xf32> to vector<17x16xf32>
    %86 = arith.truncf %83 : vector<17x16xf32> to vector<17x16xbf16>
    %87 = arith.truncf %84 : vector<17x16xf32> to vector<17x16xbf16>
    %cst_59 = arith.constant dense<0.000000e+00> : vector<17x17xf32>
    %88 = tpu.matmul %86, %87, %cst_59 {dimension_numbers = #tpu.dot_dimension_numbers<[1], [1], [0], [0], [0, 0, 1, 0], [], []>} : vector<17x16xbf16>, vector<17x16xbf16>, vector<17x17xf32> -> vector<17x17xf32>
    %cst_60 = arith.constant 2.500000e-01 : f32
    %89 = vector.broadcast %cst_60 : f32 to vector<17x17xf32>
    %90 = arith.mulf %88, %89 : vector<17x17xf32>
    %cst_61 = arith.constant dense<0xFF800000> : vector<17xf32>
    %91 = vector.multi_reduction <maximumf>, %90, %cst_61 [1] : vector<17x17xf32> to vector<17xf32>
    %92 = vector.shape_cast %91 : vector<17xf32> to vector<17x1xf32>
    %93 = vector.broadcast %92 : vector<17x1xf32> to vector<17x17xf32>
    %94 = arith.subf %90, %93 : vector<17x17xf32>
    %95 = math.exp %94 : vector<17x17xf32>
    %cst_62 = arith.constant dense<0.000000e+00> : vector<17xf32>
    %96 = vector.multi_reduction <add>, %95, %cst_62 [1] : vector<17x17xf32> to vector<17xf32>
    %97 = vector.shape_cast %96 : vector<17xf32> to vector<17x1xf32>
    %98 = tpu.reciprocal %97 : vector<17x1xf32> -> vector<17x1xf32>
    %99 = vector.broadcast %98 : vector<17x1xf32> to vector<17x17xf32>
    %100 = arith.mulf %95, %99 : vector<17x17xf32>
    %101 = arith.truncf %100 : vector<17x17xf32> to vector<17x17xbf16>
    %102 = arith.truncf %85 : vector<17x16xf32> to vector<17x16xbf16>
    %cst_63 = arith.constant dense<0.000000e+00> : vector<17x16xf32>
    %103 = tpu.matmul %101, %102, %cst_63 {dimension_numbers = #tpu.dot_dimension_numbers<[1], [0], [0], [1], [0, 0, 1, 1], [], []>} : vector<17x17xbf16>, vector<17x16xbf16>, vector<17x16xf32> -> vector<17x16xf32>
    %104 = vector.extract_strided_slice %66 {offsets = [0, 0], sizes = [17, 16], strides = [1, 1]} : vector<34x16xf32> to vector<17x16xf32>
    %105 = vector.extract_strided_slice %74 {offsets = [0, 0], sizes = [17, 16], strides = [1, 1]} : vector<34x16xf32> to vector<17x16xf32>
    %106 = vector.extract_strided_slice %82 {offsets = [0, 0], sizes = [17, 16], strides = [1, 1]} : vector<34x16xf32> to vector<17x16xf32>
    %107 = arith.truncf %104 : vector<17x16xf32> to vector<17x16xbf16>
    %108 = arith.truncf %105 : vector<17x16xf32> to vector<17x16xbf16>
    %cst_64 = arith.constant dense<0.000000e+00> : vector<17x17xf32>
    %109 = tpu.matmul %107, %108, %cst_64 {dimension_numbers = #tpu.dot_dimension_numbers<[1], [1], [0], [0], [0, 0, 1, 0], [], []>} : vector<17x16xbf16>, vector<17x16xbf16>, vector<17x17xf32> -> vector<17x17xf32>
    %cst_65 = arith.constant 2.500000e-01 : f32
    %110 = vector.broadcast %cst_65 : f32 to vector<17x17xf32>
    %111 = arith.mulf %109, %110 : vector<17x17xf32>
    %cst_66 = arith.constant dense<0xFF800000> : vector<17xf32>
    %112 = vector.multi_reduction <maximumf>, %111, %cst_66 [1] : vector<17x17xf32> to vector<17xf32>
    %113 = vector.shape_cast %112 : vector<17xf32> to vector<17x1xf32>
    %114 = vector.broadcast %113 : vector<17x1xf32> to vector<17x17xf32>
    %115 = arith.subf %111, %114 : vector<17x17xf32>
    %116 = math.exp %115 : vector<17x17xf32>
    %cst_67 = arith.constant dense<0.000000e+00> : vector<17xf32>
    %117 = vector.multi_reduction <add>, %116, %cst_67 [1] : vector<17x17xf32> to vector<17xf32>
    %118 = vector.shape_cast %117 : vector<17xf32> to vector<17x1xf32>
    %119 = tpu.reciprocal %118 : vector<17x1xf32> -> vector<17x1xf32>
    %120 = vector.broadcast %119 : vector<17x1xf32> to vector<17x17xf32>
    %121 = arith.mulf %116, %120 : vector<17x17xf32>
    %122 = arith.truncf %121 : vector<17x17xf32> to vector<17x17xbf16>
    %123 = arith.truncf %106 : vector<17x16xf32> to vector<17x16xbf16>
    %cst_68 = arith.constant dense<0.000000e+00> : vector<17x16xf32>
    %124 = tpu.matmul %122, %123, %cst_68 {dimension_numbers = #tpu.dot_dimension_numbers<[1], [0], [0], [1], [0, 0, 1, 1], [], []>} : vector<17x17xbf16>, vector<17x16xbf16>, vector<17x16xf32> -> vector<17x16xf32>
    %125 = tpu.concatenate %103, %124 in 1 : vector<17x16xf32>, vector<17x16xf32> -> vector<17x32xf32>
    %126 = vector.extract_strided_slice %42 {offsets = [17, 0], sizes = [17, 16], strides = [1, 1]} : vector<34x16xf32> to vector<17x16xf32>
    %127 = vector.extract_strided_slice %50 {offsets = [17, 0], sizes = [17, 16], strides = [1, 1]} : vector<34x16xf32> to vector<17x16xf32>
    %128 = vector.extract_strided_slice %58 {offsets = [17, 0], sizes = [17, 16], strides = [1, 1]} : vector<34x16xf32> to vector<17x16xf32>
    %129 = arith.truncf %126 : vector<17x16xf32> to vector<17x16xbf16>
    %130 = arith.truncf %127 : vector<17x16xf32> to vector<17x16xbf16>
    %cst_69 = arith.constant dense<0.000000e+00> : vector<17x17xf32>
    %131 = tpu.matmul %129, %130, %cst_69 {dimension_numbers = #tpu.dot_dimension_numbers<[1], [1], [0], [0], [0, 0, 1, 0], [], []>} : vector<17x16xbf16>, vector<17x16xbf16>, vector<17x17xf32> -> vector<17x17xf32>
    %cst_70 = arith.constant 2.500000e-01 : f32
    %132 = vector.broadcast %cst_70 : f32 to vector<17x17xf32>
    %133 = arith.mulf %131, %132 : vector<17x17xf32>
    %cst_71 = arith.constant dense<0xFF800000> : vector<17xf32>
    %134 = vector.multi_reduction <maximumf>, %133, %cst_71 [1] : vector<17x17xf32> to vector<17xf32>
    %135 = vector.shape_cast %134 : vector<17xf32> to vector<17x1xf32>
    %136 = vector.broadcast %135 : vector<17x1xf32> to vector<17x17xf32>
    %137 = arith.subf %133, %136 : vector<17x17xf32>
    %138 = math.exp %137 : vector<17x17xf32>
    %cst_72 = arith.constant dense<0.000000e+00> : vector<17xf32>
    %139 = vector.multi_reduction <add>, %138, %cst_72 [1] : vector<17x17xf32> to vector<17xf32>
    %140 = vector.shape_cast %139 : vector<17xf32> to vector<17x1xf32>
    %141 = tpu.reciprocal %140 : vector<17x1xf32> -> vector<17x1xf32>
    %142 = vector.broadcast %141 : vector<17x1xf32> to vector<17x17xf32>
    %143 = arith.mulf %138, %142 : vector<17x17xf32>
    %144 = arith.truncf %143 : vector<17x17xf32> to vector<17x17xbf16>
    %145 = arith.truncf %128 : vector<17x16xf32> to vector<17x16xbf16>
    %cst_73 = arith.constant dense<0.000000e+00> : vector<17x16xf32>
    %146 = tpu.matmul %144, %145, %cst_73 {dimension_numbers = #tpu.dot_dimension_numbers<[1], [0], [0], [1], [0, 0, 1, 1], [], []>} : vector<17x17xbf16>, vector<17x16xbf16>, vector<17x16xf32> -> vector<17x16xf32>
    %147 = vector.extract_strided_slice %66 {offsets = [17, 0], sizes = [17, 16], strides = [1, 1]} : vector<34x16xf32> to vector<17x16xf32>
    %148 = vector.extract_strided_slice %74 {offsets = [17, 0], sizes = [17, 16], strides = [1, 1]} : vector<34x16xf32> to vector<17x16xf32>
    %149 = vector.extract_strided_slice %82 {offsets = [17, 0], sizes = [17, 16], strides = [1, 1]} : vector<34x16xf32> to vector<17x16xf32>
    %150 = arith.truncf %147 : vector<17x16xf32> to vector<17x16xbf16>
    %151 = arith.truncf %148 : vector<17x16xf32> to vector<17x16xbf16>
    %cst_74 = arith.constant dense<0.000000e+00> : vector<17x17xf32>
    %152 = tpu.matmul %150, %151, %cst_74 {dimension_numbers = #tpu.dot_dimension_numbers<[1], [1], [0], [0], [0, 0, 1, 0], [], []>} : vector<17x16xbf16>, vector<17x16xbf16>, vector<17x17xf32> -> vector<17x17xf32>
    %cst_75 = arith.constant 2.500000e-01 : f32
    %153 = vector.broadcast %cst_75 : f32 to vector<17x17xf32>
    %154 = arith.mulf %152, %153 : vector<17x17xf32>
    %cst_76 = arith.constant dense<0xFF800000> : vector<17xf32>
    %155 = vector.multi_reduction <maximumf>, %154, %cst_76 [1] : vector<17x17xf32> to vector<17xf32>
    %156 = vector.shape_cast %155 : vector<17xf32> to vector<17x1xf32>
    %157 = vector.broadcast %156 : vector<17x1xf32> to vector<17x17xf32>
    %158 = arith.subf %154, %157 : vector<17x17xf32>
    %159 = math.exp %158 : vector<17x17xf32>
    %cst_77 = arith.constant dense<0.000000e+00> : vector<17xf32>
    %160 = vector.multi_reduction <add>, %159, %cst_77 [1] : vector<17x17xf32> to vector<17xf32>
    %161 = vector.shape_cast %160 : vector<17xf32> to vector<17x1xf32>
    %162 = tpu.reciprocal %161 : vector<17x1xf32> -> vector<17x1xf32>
    %163 = vector.broadcast %162 : vector<17x1xf32> to vector<17x17xf32>
    %164 = arith.mulf %159, %163 : vector<17x17xf32>
    %165 = arith.truncf %164 : vector<17x17xf32> to vector<17x17xbf16>
    %166 = arith.truncf %149 : vector<17x16xf32> to vector<17x16xbf16>
    %cst_78 = arith.constant dense<0.000000e+00> : vector<17x16xf32>
    %167 = tpu.matmul %165, %166, %cst_78 {dimension_numbers = #tpu.dot_dimension_numbers<[1], [0], [0], [1], [0, 0, 1, 1], [], []>} : vector<17x17xbf16>, vector<17x16xbf16>, vector<17x16xf32> -> vector<17x16xf32>
    %168 = tpu.concatenate %146, %167 in 1 : vector<17x16xf32>, vector<17x16xf32> -> vector<17x32xf32>
    %169 = tpu.concatenate %125, %168 in 0 : vector<17x32xf32>, vector<17x32xf32> -> vector<34x32xf32>
    %c0_79 = arith.constant 0 : index
    %c0_80 = arith.constant 0 : index
    %c0_81 = arith.constant 0 : index
    %170 = vector.load %arg13[%c0_79, %c0_80, %c0_81] : memref<2x32x32xbf16, #tpu.memory_space<vmem>>, vector<1x32x32xbf16>
    %171 = vector.shape_cast %170 : vector<1x32x32xbf16> to vector<32x32xbf16>
    %172 = arith.truncf %169 : vector<34x32xf32> to vector<34x32xbf16>
    %cst_82 = arith.constant dense<0.000000e+00> : vector<34x32xf32>
    %173 = tpu.matmul %172, %171, %cst_82 {dimension_numbers = #tpu.dot_dimension_numbers<[1], [0], [0], [1], [0, 0, 1, 1], [], []>} : vector<34x32xbf16>, vector<32x32xbf16>, vector<34x32xf32> -> vector<34x32xf32>
    %174 = arith.addf %10, %173 : vector<34x32xf32>
    %c0_83 = arith.constant 0 : index
    %c0_84 = arith.constant 0 : index
    %c0_85 = arith.constant 0 : index
    %175 = vector.load %arg14[%c0_83, %c0_84, %c0_85] : memref<2x1x32xf32, #tpu.memory_space<vmem>>, vector<1x1x32xf32>
    %176 = vector.shape_cast %175 : vector<1x1x32xf32> to vector<1x32xf32>
    %177 = vector.broadcast %176 : vector<1x32xf32> to vector<34x32xf32>
    %178 = arith.addf %174, %177 : vector<34x32xf32>
    %c0_86 = arith.constant 0 : index
    %c0_87 = arith.constant 0 : index
    %c0_88 = arith.constant 0 : index
    %179 = vector.load %arg15[%c0_86, %c0_87, %c0_88] : memref<2x1x32xf32, #tpu.memory_space<vmem>>, vector<1x1x32xf32>
    %180 = vector.shape_cast %179 : vector<1x1x32xf32> to vector<1x32xf32>
    %c0_89 = arith.constant 0 : index
    %c0_90 = arith.constant 0 : index
    %c0_91 = arith.constant 0 : index
    %181 = vector.load %arg16[%c0_89, %c0_90, %c0_91] : memref<2x1x32xf32, #tpu.memory_space<vmem>>, vector<1x1x32xf32>
    %182 = vector.shape_cast %181 : vector<1x1x32xf32> to vector<1x32xf32>
    %cst_92 = arith.constant dense<0.000000e+00> : vector<34xf32>
    %183 = vector.multi_reduction <add>, %178, %cst_92 [1] : vector<34x32xf32> to vector<34xf32>
    %184 = vector.shape_cast %183 : vector<34xf32> to vector<34x1xf32>
    %cst_93 = arith.constant 3.200000e+01 : f32
    %185 = vector.broadcast %cst_93 : f32 to vector<34x1xf32>
    %186 = arith.divf %184, %185 : vector<34x1xf32>
    %187 = vector.broadcast %186 : vector<34x1xf32> to vector<34x32xf32>
    %188 = arith.subf %178, %187 : vector<34x32xf32>
    %189 = arith.mulf %188, %188 : vector<34x32xf32>
    %cst_94 = arith.constant dense<0.000000e+00> : vector<34xf32>
    %190 = vector.multi_reduction <add>, %189, %cst_94 [1] : vector<34x32xf32> to vector<34xf32>
    %191 = vector.shape_cast %190 : vector<34xf32> to vector<34x1xf32>
    %cst_95 = arith.constant 3.200000e+01 : f32
    %192 = vector.broadcast %cst_95 : f32 to vector<34x1xf32>
    %193 = arith.divf %191, %192 : vector<34x1xf32>
    %cst_96 = arith.constant 9.99999997E-7 : f32
    %194 = vector.broadcast %cst_96 : f32 to vector<34x1xf32>
    %195 = arith.addf %193, %194 : vector<34x1xf32>
    %196 = math.rsqrt %195 : vector<34x1xf32>
    %197 = vector.broadcast %196 : vector<34x1xf32> to vector<34x32xf32>
    %198 = arith.mulf %188, %197 : vector<34x32xf32>
    %199 = vector.broadcast %180 : vector<1x32xf32> to vector<34x32xf32>
    %200 = arith.mulf %198, %199 : vector<34x32xf32>
    %201 = vector.broadcast %182 : vector<1x32xf32> to vector<34x32xf32>
    %202 = arith.addf %200, %201 : vector<34x32xf32>
    %c0_97 = arith.constant 0 : index
    %c0_98 = arith.constant 0 : index
    %c0_99 = arith.constant 0 : index
    %203 = vector.load %arg17[%c0_97, %c0_98, %c0_99] : memref<2x32x128xbf16, #tpu.memory_space<vmem>>, vector<1x32x128xbf16>
    %204 = vector.shape_cast %203 : vector<1x32x128xbf16> to vector<32x128xbf16>
    %205 = arith.truncf %202 : vector<34x32xf32> to vector<34x32xbf16>
    %cst_100 = arith.constant dense<0.000000e+00> : vector<34x128xf32>
    %206 = tpu.matmul %205, %204, %cst_100 {dimension_numbers = #tpu.dot_dimension_numbers<[1], [0], [0], [1], [0, 0, 1, 1], [], []>} : vector<34x32xbf16>, vector<32x128xbf16>, vector<34x128xf32> -> vector<34x128xf32>
    %c0_101 = arith.constant 0 : index
    %c0_102 = arith.constant 0 : index
    %c0_103 = arith.constant 0 : index
    %207 = vector.load %arg18[%c0_101, %c0_102, %c0_103] : memref<2x1x128xf32, #tpu.memory_space<vmem>>, vector<1x1x128xf32>
    %208 = vector.shape_cast %207 : vector<1x1x128xf32> to vector<1x128xf32>
    %209 = vector.broadcast %208 : vector<1x128xf32> to vector<34x128xf32>
    %210 = arith.addf %206, %209 : vector<34x128xf32>
    %cst_104 = arith.constant 5.000000e-01 : f32
    %211 = vector.broadcast %cst_104 : f32 to vector<34x128xf32>
    %212 = arith.mulf %211, %210 : vector<34x128xf32>
    %cst_105 = arith.constant 4.471500e-02 : f32
    %213 = vector.broadcast %cst_105 : f32 to vector<34x128xf32>
    %214 = arith.mulf %213, %210 : vector<34x128xf32>
    %215 = arith.mulf %214, %210 : vector<34x128xf32>
    %216 = arith.mulf %215, %210 : vector<34x128xf32>
    %217 = arith.addf %210, %216 : vector<34x128xf32>
    %cst_106 = arith.constant 0.797884583 : f32
    %218 = vector.broadcast %cst_106 : f32 to vector<34x128xf32>
    %219 = arith.mulf %218, %217 : vector<34x128xf32>
    %220 = math.tanh %219 : vector<34x128xf32>
    %cst_107 = arith.constant 1.000000e+00 : f32
    %221 = vector.broadcast %cst_107 : f32 to vector<34x128xf32>
    %222 = arith.addf %221, %220 : vector<34x128xf32>
    %223 = arith.mulf %212, %222 : vector<34x128xf32>
    %c0_108 = arith.constant 0 : index
    %c0_109 = arith.constant 0 : index
    %c0_110 = arith.constant 0 : index
    %224 = vector.load %arg19[%c0_108, %c0_109, %c0_110] : memref<2x128x32xbf16, #tpu.memory_space<vmem>>, vector<1x128x32xbf16>
    %225 = vector.shape_cast %224 : vector<1x128x32xbf16> to vector<128x32xbf16>
    %226 = arith.truncf %223 : vector<34x128xf32> to vector<34x128xbf16>
    %cst_111 = arith.constant dense<0.000000e+00> : vector<34x32xf32>
    %227 = tpu.matmul %226, %225, %cst_111 {dimension_numbers = #tpu.dot_dimension_numbers<[1], [0], [0], [1], [0, 0, 1, 1], [], []>} : vector<34x128xbf16>, vector<128x32xbf16>, vector<34x32xf32> -> vector<34x32xf32>
    %228 = arith.addf %178, %227 : vector<34x32xf32>
    %c0_112 = arith.constant 0 : index
    %c0_113 = arith.constant 0 : index
    %c0_114 = arith.constant 0 : index
    %229 = vector.load %arg20[%c0_112, %c0_113, %c0_114] : memref<2x1x32xf32, #tpu.memory_space<vmem>>, vector<1x1x32xf32>
    %230 = vector.shape_cast %229 : vector<1x1x32xf32> to vector<1x32xf32>
    %231 = vector.broadcast %230 : vector<1x32xf32> to vector<34x32xf32>
    %232 = arith.addf %228, %231 : vector<34x32xf32>
    %c1_115 = arith.constant 1 : index
    %c0_116 = arith.constant 0 : index
    %c0_117 = arith.constant 0 : index
    %233 = vector.load %arg5[%c1_115, %c0_116, %c0_117] : memref<2x1x32xf32, #tpu.memory_space<vmem>>, vector<1x1x32xf32>
    %234 = vector.shape_cast %233 : vector<1x1x32xf32> to vector<1x32xf32>
    %c1_118 = arith.constant 1 : index
    %c0_119 = arith.constant 0 : index
    %c0_120 = arith.constant 0 : index
    %235 = vector.load %arg6[%c1_118, %c0_119, %c0_120] : memref<2x1x32xf32, #tpu.memory_space<vmem>>, vector<1x1x32xf32>
    %236 = vector.shape_cast %235 : vector<1x1x32xf32> to vector<1x32xf32>
    %cst_121 = arith.constant dense<0.000000e+00> : vector<34xf32>
    %237 = vector.multi_reduction <add>, %232, %cst_121 [1] : vector<34x32xf32> to vector<34xf32>
    %238 = vector.shape_cast %237 : vector<34xf32> to vector<34x1xf32>
    %cst_122 = arith.constant 3.200000e+01 : f32
    %239 = vector.broadcast %cst_122 : f32 to vector<34x1xf32>
    %240 = arith.divf %238, %239 : vector<34x1xf32>
    %241 = vector.broadcast %240 : vector<34x1xf32> to vector<34x32xf32>
    %242 = arith.subf %232, %241 : vector<34x32xf32>
    %243 = arith.mulf %242, %242 : vector<34x32xf32>
    %cst_123 = arith.constant dense<0.000000e+00> : vector<34xf32>
    %244 = vector.multi_reduction <add>, %243, %cst_123 [1] : vector<34x32xf32> to vector<34xf32>
    %245 = vector.shape_cast %244 : vector<34xf32> to vector<34x1xf32>
    %cst_124 = arith.constant 3.200000e+01 : f32
    %246 = vector.broadcast %cst_124 : f32 to vector<34x1xf32>
    %247 = arith.divf %245, %246 : vector<34x1xf32>
    %cst_125 = arith.constant 9.99999997E-7 : f32
    %248 = vector.broadcast %cst_125 : f32 to vector<34x1xf32>
    %249 = arith.addf %247, %248 : vector<34x1xf32>
    %250 = math.rsqrt %249 : vector<34x1xf32>
    %251 = vector.broadcast %250 : vector<34x1xf32> to vector<34x32xf32>
    %252 = arith.mulf %242, %251 : vector<34x32xf32>
    %253 = vector.broadcast %234 : vector<1x32xf32> to vector<34x32xf32>
    %254 = arith.mulf %252, %253 : vector<34x32xf32>
    %255 = vector.broadcast %236 : vector<1x32xf32> to vector<34x32xf32>
    %256 = arith.addf %254, %255 : vector<34x32xf32>
    %c2 = arith.constant 2 : index
    %c0_126 = arith.constant 0 : index
    %c0_127 = arith.constant 0 : index
    %257 = vector.load %arg7[%c2, %c0_126, %c0_127] : memref<4x32x16xbf16, #tpu.memory_space<vmem>>, vector<1x32x16xbf16>
    %258 = vector.shape_cast %257 : vector<1x32x16xbf16> to vector<32x16xbf16>
    %259 = arith.truncf %256 : vector<34x32xf32> to vector<34x32xbf16>
    %cst_128 = arith.constant dense<0.000000e+00> : vector<34x16xf32>
    %260 = tpu.matmul %259, %258, %cst_128 {dimension_numbers = #tpu.dot_dimension_numbers<[1], [0], [0], [1], [0, 0, 1, 1], [], []>} : vector<34x32xbf16>, vector<32x16xbf16>, vector<34x16xf32> -> vector<34x16xf32>
    %c2_129 = arith.constant 2 : index
    %c0_130 = arith.constant 0 : index
    %c0_131 = arith.constant 0 : index
    %261 = vector.load %arg8[%c2_129, %c0_130, %c0_131] : memref<4x1x16xf32, #tpu.memory_space<vmem>>, vector<1x1x16xf32>
    %262 = vector.shape_cast %261 : vector<1x1x16xf32> to vector<1x16xf32>
    %263 = vector.broadcast %262 : vector<1x16xf32> to vector<34x16xf32>
    %264 = arith.addf %260, %263 : vector<34x16xf32>
    %c2_132 = arith.constant 2 : index
    %c0_133 = arith.constant 0 : index
    %c0_134 = arith.constant 0 : index
    %265 = vector.load %arg9[%c2_132, %c0_133, %c0_134] : memref<4x32x16xbf16, #tpu.memory_space<vmem>>, vector<1x32x16xbf16>
    %266 = vector.shape_cast %265 : vector<1x32x16xbf16> to vector<32x16xbf16>
    %267 = arith.truncf %256 : vector<34x32xf32> to vector<34x32xbf16>
    %cst_135 = arith.constant dense<0.000000e+00> : vector<34x16xf32>
    %268 = tpu.matmul %267, %266, %cst_135 {dimension_numbers = #tpu.dot_dimension_numbers<[1], [0], [0], [1], [0, 0, 1, 1], [], []>} : vector<34x32xbf16>, vector<32x16xbf16>, vector<34x16xf32> -> vector<34x16xf32>
    %c2_136 = arith.constant 2 : index
    %c0_137 = arith.constant 0 : index
    %c0_138 = arith.constant 0 : index
    %269 = vector.load %arg10[%c2_136, %c0_137, %c0_138] : memref<4x1x16xf32, #tpu.memory_space<vmem>>, vector<1x1x16xf32>
    %270 = vector.shape_cast %269 : vector<1x1x16xf32> to vector<1x16xf32>
    %271 = vector.broadcast %270 : vector<1x16xf32> to vector<34x16xf32>
    %272 = arith.addf %268, %271 : vector<34x16xf32>
    %c2_139 = arith.constant 2 : index
    %c0_140 = arith.constant 0 : index
    %c0_141 = arith.constant 0 : index
    %273 = vector.load %arg11[%c2_139, %c0_140, %c0_141] : memref<4x32x16xbf16, #tpu.memory_space<vmem>>, vector<1x32x16xbf16>
    %274 = vector.shape_cast %273 : vector<1x32x16xbf16> to vector<32x16xbf16>
    %275 = arith.truncf %256 : vector<34x32xf32> to vector<34x32xbf16>
    %cst_142 = arith.constant dense<0.000000e+00> : vector<34x16xf32>
    %276 = tpu.matmul %275, %274, %cst_142 {dimension_numbers = #tpu.dot_dimension_numbers<[1], [0], [0], [1], [0, 0, 1, 1], [], []>} : vector<34x32xbf16>, vector<32x16xbf16>, vector<34x16xf32> -> vector<34x16xf32>
    %c2_143 = arith.constant 2 : index
    %c0_144 = arith.constant 0 : index
    %c0_145 = arith.constant 0 : index
    %277 = vector.load %arg12[%c2_143, %c0_144, %c0_145] : memref<4x1x16xf32, #tpu.memory_space<vmem>>, vector<1x1x16xf32>
    %278 = vector.shape_cast %277 : vector<1x1x16xf32> to vector<1x16xf32>
    %279 = vector.broadcast %278 : vector<1x16xf32> to vector<34x16xf32>
    %280 = arith.addf %276, %279 : vector<34x16xf32>
    %c3 = arith.constant 3 : index
    %c0_146 = arith.constant 0 : index
    %c0_147 = arith.constant 0 : index
    %281 = vector.load %arg7[%c3, %c0_146, %c0_147] : memref<4x32x16xbf16, #tpu.memory_space<vmem>>, vector<1x32x16xbf16>
    %282 = vector.shape_cast %281 : vector<1x32x16xbf16> to vector<32x16xbf16>
    %283 = arith.truncf %256 : vector<34x32xf32> to vector<34x32xbf16>
    %cst_148 = arith.constant dense<0.000000e+00> : vector<34x16xf32>
    %284 = tpu.matmul %283, %282, %cst_148 {dimension_numbers = #tpu.dot_dimension_numbers<[1], [0], [0], [1], [0, 0, 1, 1], [], []>} : vector<34x32xbf16>, vector<32x16xbf16>, vector<34x16xf32> -> vector<34x16xf32>
    %c3_149 = arith.constant 3 : index
    %c0_150 = arith.constant 0 : index
    %c0_151 = arith.constant 0 : index
    %285 = vector.load %arg8[%c3_149, %c0_150, %c0_151] : memref<4x1x16xf32, #tpu.memory_space<vmem>>, vector<1x1x16xf32>
    %286 = vector.shape_cast %285 : vector<1x1x16xf32> to vector<1x16xf32>
    %287 = vector.broadcast %286 : vector<1x16xf32> to vector<34x16xf32>
    %288 = arith.addf %284, %287 : vector<34x16xf32>
    %c3_152 = arith.constant 3 : index
    %c0_153 = arith.constant 0 : index
    %c0_154 = arith.constant 0 : index
    %289 = vector.load %arg9[%c3_152, %c0_153, %c0_154] : memref<4x32x16xbf16, #tpu.memory_space<vmem>>, vector<1x32x16xbf16>
    %290 = vector.shape_cast %289 : vector<1x32x16xbf16> to vector<32x16xbf16>
    %291 = arith.truncf %256 : vector<34x32xf32> to vector<34x32xbf16>
    %cst_155 = arith.constant dense<0.000000e+00> : vector<34x16xf32>
    %292 = tpu.matmul %291, %290, %cst_155 {dimension_numbers = #tpu.dot_dimension_numbers<[1], [0], [0], [1], [0, 0, 1, 1], [], []>} : vector<34x32xbf16>, vector<32x16xbf16>, vector<34x16xf32> -> vector<34x16xf32>
    %c3_156 = arith.constant 3 : index
    %c0_157 = arith.constant 0 : index
    %c0_158 = arith.constant 0 : index
    %293 = vector.load %arg10[%c3_156, %c0_157, %c0_158] : memref<4x1x16xf32, #tpu.memory_space<vmem>>, vector<1x1x16xf32>
    %294 = vector.shape_cast %293 : vector<1x1x16xf32> to vector<1x16xf32>
    %295 = vector.broadcast %294 : vector<1x16xf32> to vector<34x16xf32>
    %296 = arith.addf %292, %295 : vector<34x16xf32>
    %c3_159 = arith.constant 3 : index
    %c0_160 = arith.constant 0 : index
    %c0_161 = arith.constant 0 : index
    %297 = vector.load %arg11[%c3_159, %c0_160, %c0_161] : memref<4x32x16xbf16, #tpu.memory_space<vmem>>, vector<1x32x16xbf16>
    %298 = vector.shape_cast %297 : vector<1x32x16xbf16> to vector<32x16xbf16>
    %299 = arith.truncf %256 : vector<34x32xf32> to vector<34x32xbf16>
    %cst_162 = arith.constant dense<0.000000e+00> : vector<34x16xf32>
    %300 = tpu.matmul %299, %298, %cst_162 {dimension_numbers = #tpu.dot_dimension_numbers<[1], [0], [0], [1], [0, 0, 1, 1], [], []>} : vector<34x32xbf16>, vector<32x16xbf16>, vector<34x16xf32> -> vector<34x16xf32>
    %c3_163 = arith.constant 3 : index
    %c0_164 = arith.constant 0 : index
    %c0_165 = arith.constant 0 : index
    %301 = vector.load %arg12[%c3_163, %c0_164, %c0_165] : memref<4x1x16xf32, #tpu.memory_space<vmem>>, vector<1x1x16xf32>
    %302 = vector.shape_cast %301 : vector<1x1x16xf32> to vector<1x16xf32>
    %303 = vector.broadcast %302 : vector<1x16xf32> to vector<34x16xf32>
    %304 = arith.addf %300, %303 : vector<34x16xf32>
    %305 = vector.extract_strided_slice %264 {offsets = [0, 0], sizes = [17, 16], strides = [1, 1]} : vector<34x16xf32> to vector<17x16xf32>
    %306 = vector.extract_strided_slice %272 {offsets = [0, 0], sizes = [17, 16], strides = [1, 1]} : vector<34x16xf32> to vector<17x16xf32>
    %307 = vector.extract_strided_slice %280 {offsets = [0, 0], sizes = [17, 16], strides = [1, 1]} : vector<34x16xf32> to vector<17x16xf32>
    %308 = arith.truncf %305 : vector<17x16xf32> to vector<17x16xbf16>
    %309 = arith.truncf %306 : vector<17x16xf32> to vector<17x16xbf16>
    %cst_166 = arith.constant dense<0.000000e+00> : vector<17x17xf32>
    %310 = tpu.matmul %308, %309, %cst_166 {dimension_numbers = #tpu.dot_dimension_numbers<[1], [1], [0], [0], [0, 0, 1, 0], [], []>} : vector<17x16xbf16>, vector<17x16xbf16>, vector<17x17xf32> -> vector<17x17xf32>
    %cst_167 = arith.constant 2.500000e-01 : f32
    %311 = vector.broadcast %cst_167 : f32 to vector<17x17xf32>
    %312 = arith.mulf %310, %311 : vector<17x17xf32>
    %cst_168 = arith.constant dense<0xFF800000> : vector<17xf32>
    %313 = vector.multi_reduction <maximumf>, %312, %cst_168 [1] : vector<17x17xf32> to vector<17xf32>
    %314 = vector.shape_cast %313 : vector<17xf32> to vector<17x1xf32>
    %315 = vector.broadcast %314 : vector<17x1xf32> to vector<17x17xf32>
    %316 = arith.subf %312, %315 : vector<17x17xf32>
    %317 = math.exp %316 : vector<17x17xf32>
    %cst_169 = arith.constant dense<0.000000e+00> : vector<17xf32>
    %318 = vector.multi_reduction <add>, %317, %cst_169 [1] : vector<17x17xf32> to vector<17xf32>
    %319 = vector.shape_cast %318 : vector<17xf32> to vector<17x1xf32>
    %320 = tpu.reciprocal %319 : vector<17x1xf32> -> vector<17x1xf32>
    %321 = vector.broadcast %320 : vector<17x1xf32> to vector<17x17xf32>
    %322 = arith.mulf %317, %321 : vector<17x17xf32>
    %323 = arith.truncf %322 : vector<17x17xf32> to vector<17x17xbf16>
    %324 = arith.truncf %307 : vector<17x16xf32> to vector<17x16xbf16>
    %cst_170 = arith.constant dense<0.000000e+00> : vector<17x16xf32>
    %325 = tpu.matmul %323, %324, %cst_170 {dimension_numbers = #tpu.dot_dimension_numbers<[1], [0], [0], [1], [0, 0, 1, 1], [], []>} : vector<17x17xbf16>, vector<17x16xbf16>, vector<17x16xf32> -> vector<17x16xf32>
    %326 = vector.extract_strided_slice %288 {offsets = [0, 0], sizes = [17, 16], strides = [1, 1]} : vector<34x16xf32> to vector<17x16xf32>
    %327 = vector.extract_strided_slice %296 {offsets = [0, 0], sizes = [17, 16], strides = [1, 1]} : vector<34x16xf32> to vector<17x16xf32>
    %328 = vector.extract_strided_slice %304 {offsets = [0, 0], sizes = [17, 16], strides = [1, 1]} : vector<34x16xf32> to vector<17x16xf32>
    %329 = arith.truncf %326 : vector<17x16xf32> to vector<17x16xbf16>
    %330 = arith.truncf %327 : vector<17x16xf32> to vector<17x16xbf16>
    %cst_171 = arith.constant dense<0.000000e+00> : vector<17x17xf32>
    %331 = tpu.matmul %329, %330, %cst_171 {dimension_numbers = #tpu.dot_dimension_numbers<[1], [1], [0], [0], [0, 0, 1, 0], [], []>} : vector<17x16xbf16>, vector<17x16xbf16>, vector<17x17xf32> -> vector<17x17xf32>
    %cst_172 = arith.constant 2.500000e-01 : f32
    %332 = vector.broadcast %cst_172 : f32 to vector<17x17xf32>
    %333 = arith.mulf %331, %332 : vector<17x17xf32>
    %cst_173 = arith.constant dense<0xFF800000> : vector<17xf32>
    %334 = vector.multi_reduction <maximumf>, %333, %cst_173 [1] : vector<17x17xf32> to vector<17xf32>
    %335 = vector.shape_cast %334 : vector<17xf32> to vector<17x1xf32>
    %336 = vector.broadcast %335 : vector<17x1xf32> to vector<17x17xf32>
    %337 = arith.subf %333, %336 : vector<17x17xf32>
    %338 = math.exp %337 : vector<17x17xf32>
    %cst_174 = arith.constant dense<0.000000e+00> : vector<17xf32>
    %339 = vector.multi_reduction <add>, %338, %cst_174 [1] : vector<17x17xf32> to vector<17xf32>
    %340 = vector.shape_cast %339 : vector<17xf32> to vector<17x1xf32>
    %341 = tpu.reciprocal %340 : vector<17x1xf32> -> vector<17x1xf32>
    %342 = vector.broadcast %341 : vector<17x1xf32> to vector<17x17xf32>
    %343 = arith.mulf %338, %342 : vector<17x17xf32>
    %344 = arith.truncf %343 : vector<17x17xf32> to vector<17x17xbf16>
    %345 = arith.truncf %328 : vector<17x16xf32> to vector<17x16xbf16>
    %cst_175 = arith.constant dense<0.000000e+00> : vector<17x16xf32>
    %346 = tpu.matmul %344, %345, %cst_175 {dimension_numbers = #tpu.dot_dimension_numbers<[1], [0], [0], [1], [0, 0, 1, 1], [], []>} : vector<17x17xbf16>, vector<17x16xbf16>, vector<17x16xf32> -> vector<17x16xf32>
    %347 = tpu.concatenate %325, %346 in 1 : vector<17x16xf32>, vector<17x16xf32> -> vector<17x32xf32>
    %348 = vector.extract_strided_slice %264 {offsets = [17, 0], sizes = [17, 16], strides = [1, 1]} : vector<34x16xf32> to vector<17x16xf32>
    %349 = vector.extract_strided_slice %272 {offsets = [17, 0], sizes = [17, 16], strides = [1, 1]} : vector<34x16xf32> to vector<17x16xf32>
    %350 = vector.extract_strided_slice %280 {offsets = [17, 0], sizes = [17, 16], strides = [1, 1]} : vector<34x16xf32> to vector<17x16xf32>
    %351 = arith.truncf %348 : vector<17x16xf32> to vector<17x16xbf16>
    %352 = arith.truncf %349 : vector<17x16xf32> to vector<17x16xbf16>
    %cst_176 = arith.constant dense<0.000000e+00> : vector<17x17xf32>
    %353 = tpu.matmul %351, %352, %cst_176 {dimension_numbers = #tpu.dot_dimension_numbers<[1], [1], [0], [0], [0, 0, 1, 0], [], []>} : vector<17x16xbf16>, vector<17x16xbf16>, vector<17x17xf32> -> vector<17x17xf32>
    %cst_177 = arith.constant 2.500000e-01 : f32
    %354 = vector.broadcast %cst_177 : f32 to vector<17x17xf32>
    %355 = arith.mulf %353, %354 : vector<17x17xf32>
    %cst_178 = arith.constant dense<0xFF800000> : vector<17xf32>
    %356 = vector.multi_reduction <maximumf>, %355, %cst_178 [1] : vector<17x17xf32> to vector<17xf32>
    %357 = vector.shape_cast %356 : vector<17xf32> to vector<17x1xf32>
    %358 = vector.broadcast %357 : vector<17x1xf32> to vector<17x17xf32>
    %359 = arith.subf %355, %358 : vector<17x17xf32>
    %360 = math.exp %359 : vector<17x17xf32>
    %cst_179 = arith.constant dense<0.000000e+00> : vector<17xf32>
    %361 = vector.multi_reduction <add>, %360, %cst_179 [1] : vector<17x17xf32> to vector<17xf32>
    %362 = vector.shape_cast %361 : vector<17xf32> to vector<17x1xf32>
    %363 = tpu.reciprocal %362 : vector<17x1xf32> -> vector<17x1xf32>
    %364 = vector.broadcast %363 : vector<17x1xf32> to vector<17x17xf32>
    %365 = arith.mulf %360, %364 : vector<17x17xf32>
    %366 = arith.truncf %365 : vector<17x17xf32> to vector<17x17xbf16>
    %367 = arith.truncf %350 : vector<17x16xf32> to vector<17x16xbf16>
    %cst_180 = arith.constant dense<0.000000e+00> : vector<17x16xf32>
    %368 = tpu.matmul %366, %367, %cst_180 {dimension_numbers = #tpu.dot_dimension_numbers<[1], [0], [0], [1], [0, 0, 1, 1], [], []>} : vector<17x17xbf16>, vector<17x16xbf16>, vector<17x16xf32> -> vector<17x16xf32>
    %369 = vector.extract_strided_slice %288 {offsets = [17, 0], sizes = [17, 16], strides = [1, 1]} : vector<34x16xf32> to vector<17x16xf32>
    %370 = vector.extract_strided_slice %296 {offsets = [17, 0], sizes = [17, 16], strides = [1, 1]} : vector<34x16xf32> to vector<17x16xf32>
    %371 = vector.extract_strided_slice %304 {offsets = [17, 0], sizes = [17, 16], strides = [1, 1]} : vector<34x16xf32> to vector<17x16xf32>
    %372 = arith.truncf %369 : vector<17x16xf32> to vector<17x16xbf16>
    %373 = arith.truncf %370 : vector<17x16xf32> to vector<17x16xbf16>
    %cst_181 = arith.constant dense<0.000000e+00> : vector<17x17xf32>
    %374 = tpu.matmul %372, %373, %cst_181 {dimension_numbers = #tpu.dot_dimension_numbers<[1], [1], [0], [0], [0, 0, 1, 0], [], []>} : vector<17x16xbf16>, vector<17x16xbf16>, vector<17x17xf32> -> vector<17x17xf32>
    %cst_182 = arith.constant 2.500000e-01 : f32
    %375 = vector.broadcast %cst_182 : f32 to vector<17x17xf32>
    %376 = arith.mulf %374, %375 : vector<17x17xf32>
    %cst_183 = arith.constant dense<0xFF800000> : vector<17xf32>
    %377 = vector.multi_reduction <maximumf>, %376, %cst_183 [1] : vector<17x17xf32> to vector<17xf32>
    %378 = vector.shape_cast %377 : vector<17xf32> to vector<17x1xf32>
    %379 = vector.broadcast %378 : vector<17x1xf32> to vector<17x17xf32>
    %380 = arith.subf %376, %379 : vector<17x17xf32>
    %381 = math.exp %380 : vector<17x17xf32>
    %cst_184 = arith.constant dense<0.000000e+00> : vector<17xf32>
    %382 = vector.multi_reduction <add>, %381, %cst_184 [1] : vector<17x17xf32> to vector<17xf32>
    %383 = vector.shape_cast %382 : vector<17xf32> to vector<17x1xf32>
    %384 = tpu.reciprocal %383 : vector<17x1xf32> -> vector<17x1xf32>
    %385 = vector.broadcast %384 : vector<17x1xf32> to vector<17x17xf32>
    %386 = arith.mulf %381, %385 : vector<17x17xf32>
    %387 = arith.truncf %386 : vector<17x17xf32> to vector<17x17xbf16>
    %388 = arith.truncf %371 : vector<17x16xf32> to vector<17x16xbf16>
    %cst_185 = arith.constant dense<0.000000e+00> : vector<17x16xf32>
    %389 = tpu.matmul %387, %388, %cst_185 {dimension_numbers = #tpu.dot_dimension_numbers<[1], [0], [0], [1], [0, 0, 1, 1], [], []>} : vector<17x17xbf16>, vector<17x16xbf16>, vector<17x16xf32> -> vector<17x16xf32>
    %390 = tpu.concatenate %368, %389 in 1 : vector<17x16xf32>, vector<17x16xf32> -> vector<17x32xf32>
    %391 = tpu.concatenate %347, %390 in 0 : vector<17x32xf32>, vector<17x32xf32> -> vector<34x32xf32>
    %c1_186 = arith.constant 1 : index
    %c0_187 = arith.constant 0 : index
    %c0_188 = arith.constant 0 : index
    %392 = vector.load %arg13[%c1_186, %c0_187, %c0_188] : memref<2x32x32xbf16, #tpu.memory_space<vmem>>, vector<1x32x32xbf16>
    %393 = vector.shape_cast %392 : vector<1x32x32xbf16> to vector<32x32xbf16>
    %394 = arith.truncf %391 : vector<34x32xf32> to vector<34x32xbf16>
    %cst_189 = arith.constant dense<0.000000e+00> : vector<34x32xf32>
    %395 = tpu.matmul %394, %393, %cst_189 {dimension_numbers = #tpu.dot_dimension_numbers<[1], [0], [0], [1], [0, 0, 1, 1], [], []>} : vector<34x32xbf16>, vector<32x32xbf16>, vector<34x32xf32> -> vector<34x32xf32>
    %396 = arith.addf %232, %395 : vector<34x32xf32>
    %c1_190 = arith.constant 1 : index
    %c0_191 = arith.constant 0 : index
    %c0_192 = arith.constant 0 : index
    %397 = vector.load %arg14[%c1_190, %c0_191, %c0_192] : memref<2x1x32xf32, #tpu.memory_space<vmem>>, vector<1x1x32xf32>
    %398 = vector.shape_cast %397 : vector<1x1x32xf32> to vector<1x32xf32>
    %399 = vector.broadcast %398 : vector<1x32xf32> to vector<34x32xf32>
    %400 = arith.addf %396, %399 : vector<34x32xf32>
    %c1_193 = arith.constant 1 : index
    %c0_194 = arith.constant 0 : index
    %c0_195 = arith.constant 0 : index
    %401 = vector.load %arg15[%c1_193, %c0_194, %c0_195] : memref<2x1x32xf32, #tpu.memory_space<vmem>>, vector<1x1x32xf32>
    %402 = vector.shape_cast %401 : vector<1x1x32xf32> to vector<1x32xf32>
    %c1_196 = arith.constant 1 : index
    %c0_197 = arith.constant 0 : index
    %c0_198 = arith.constant 0 : index
    %403 = vector.load %arg16[%c1_196, %c0_197, %c0_198] : memref<2x1x32xf32, #tpu.memory_space<vmem>>, vector<1x1x32xf32>
    %404 = vector.shape_cast %403 : vector<1x1x32xf32> to vector<1x32xf32>
    %cst_199 = arith.constant dense<0.000000e+00> : vector<34xf32>
    %405 = vector.multi_reduction <add>, %400, %cst_199 [1] : vector<34x32xf32> to vector<34xf32>
    %406 = vector.shape_cast %405 : vector<34xf32> to vector<34x1xf32>
    %cst_200 = arith.constant 3.200000e+01 : f32
    %407 = vector.broadcast %cst_200 : f32 to vector<34x1xf32>
    %408 = arith.divf %406, %407 : vector<34x1xf32>
    %409 = vector.broadcast %408 : vector<34x1xf32> to vector<34x32xf32>
    %410 = arith.subf %400, %409 : vector<34x32xf32>
    %411 = arith.mulf %410, %410 : vector<34x32xf32>
    %cst_201 = arith.constant dense<0.000000e+00> : vector<34xf32>
    %412 = vector.multi_reduction <add>, %411, %cst_201 [1] : vector<34x32xf32> to vector<34xf32>
    %413 = vector.shape_cast %412 : vector<34xf32> to vector<34x1xf32>
    %cst_202 = arith.constant 3.200000e+01 : f32
    %414 = vector.broadcast %cst_202 : f32 to vector<34x1xf32>
    %415 = arith.divf %413, %414 : vector<34x1xf32>
    %cst_203 = arith.constant 9.99999997E-7 : f32
    %416 = vector.broadcast %cst_203 : f32 to vector<34x1xf32>
    %417 = arith.addf %415, %416 : vector<34x1xf32>
    %418 = math.rsqrt %417 : vector<34x1xf32>
    %419 = vector.broadcast %418 : vector<34x1xf32> to vector<34x32xf32>
    %420 = arith.mulf %410, %419 : vector<34x32xf32>
    %421 = vector.broadcast %402 : vector<1x32xf32> to vector<34x32xf32>
    %422 = arith.mulf %420, %421 : vector<34x32xf32>
    %423 = vector.broadcast %404 : vector<1x32xf32> to vector<34x32xf32>
    %424 = arith.addf %422, %423 : vector<34x32xf32>
    %c1_204 = arith.constant 1 : index
    %c0_205 = arith.constant 0 : index
    %c0_206 = arith.constant 0 : index
    %425 = vector.load %arg17[%c1_204, %c0_205, %c0_206] : memref<2x32x128xbf16, #tpu.memory_space<vmem>>, vector<1x32x128xbf16>
    %426 = vector.shape_cast %425 : vector<1x32x128xbf16> to vector<32x128xbf16>
    %427 = arith.truncf %424 : vector<34x32xf32> to vector<34x32xbf16>
    %cst_207 = arith.constant dense<0.000000e+00> : vector<34x128xf32>
    %428 = tpu.matmul %427, %426, %cst_207 {dimension_numbers = #tpu.dot_dimension_numbers<[1], [0], [0], [1], [0, 0, 1, 1], [], []>} : vector<34x32xbf16>, vector<32x128xbf16>, vector<34x128xf32> -> vector<34x128xf32>
    %c1_208 = arith.constant 1 : index
    %c0_209 = arith.constant 0 : index
    %c0_210 = arith.constant 0 : index
    %429 = vector.load %arg18[%c1_208, %c0_209, %c0_210] : memref<2x1x128xf32, #tpu.memory_space<vmem>>, vector<1x1x128xf32>
    %430 = vector.shape_cast %429 : vector<1x1x128xf32> to vector<1x128xf32>
    %431 = vector.broadcast %430 : vector<1x128xf32> to vector<34x128xf32>
    %432 = arith.addf %428, %431 : vector<34x128xf32>
    %cst_211 = arith.constant 5.000000e-01 : f32
    %433 = vector.broadcast %cst_211 : f32 to vector<34x128xf32>
    %434 = arith.mulf %433, %432 : vector<34x128xf32>
    %cst_212 = arith.constant 4.471500e-02 : f32
    %435 = vector.broadcast %cst_212 : f32 to vector<34x128xf32>
    %436 = arith.mulf %435, %432 : vector<34x128xf32>
    %437 = arith.mulf %436, %432 : vector<34x128xf32>
    %438 = arith.mulf %437, %432 : vector<34x128xf32>
    %439 = arith.addf %432, %438 : vector<34x128xf32>
    %cst_213 = arith.constant 0.797884583 : f32
    %440 = vector.broadcast %cst_213 : f32 to vector<34x128xf32>
    %441 = arith.mulf %440, %439 : vector<34x128xf32>
    %442 = math.tanh %441 : vector<34x128xf32>
    %cst_214 = arith.constant 1.000000e+00 : f32
    %443 = vector.broadcast %cst_214 : f32 to vector<34x128xf32>
    %444 = arith.addf %443, %442 : vector<34x128xf32>
    %445 = arith.mulf %434, %444 : vector<34x128xf32>
    %c1_215 = arith.constant 1 : index
    %c0_216 = arith.constant 0 : index
    %c0_217 = arith.constant 0 : index
    %446 = vector.load %arg19[%c1_215, %c0_216, %c0_217] : memref<2x128x32xbf16, #tpu.memory_space<vmem>>, vector<1x128x32xbf16>
    %447 = vector.shape_cast %446 : vector<1x128x32xbf16> to vector<128x32xbf16>
    %448 = arith.truncf %445 : vector<34x128xf32> to vector<34x128xbf16>
    %cst_218 = arith.constant dense<0.000000e+00> : vector<34x32xf32>
    %449 = tpu.matmul %448, %447, %cst_218 {dimension_numbers = #tpu.dot_dimension_numbers<[1], [0], [0], [1], [0, 0, 1, 1], [], []>} : vector<34x128xbf16>, vector<128x32xbf16>, vector<34x32xf32> -> vector<34x32xf32>
    %450 = arith.addf %400, %449 : vector<34x32xf32>
    %c1_219 = arith.constant 1 : index
    %c0_220 = arith.constant 0 : index
    %c0_221 = arith.constant 0 : index
    %451 = vector.load %arg20[%c1_219, %c0_220, %c0_221] : memref<2x1x32xf32, #tpu.memory_space<vmem>>, vector<1x1x32xf32>
    %452 = vector.shape_cast %451 : vector<1x1x32xf32> to vector<1x32xf32>
    %453 = vector.broadcast %452 : vector<1x32xf32> to vector<34x32xf32>
    %454 = arith.addf %450, %453 : vector<34x32xf32>
    %c0_222 = arith.constant 0 : index
    %c0_223 = arith.constant 0 : index
    %455 = vector.load %arg21[%c0_222, %c0_223] : memref<1x32xf32, #tpu.memory_space<vmem>>, vector<1x32xf32>
    %c0_224 = arith.constant 0 : index
    %c0_225 = arith.constant 0 : index
    %456 = vector.load %arg22[%c0_224, %c0_225] : memref<1x32xf32, #tpu.memory_space<vmem>>, vector<1x32xf32>
    %cst_226 = arith.constant dense<0.000000e+00> : vector<34xf32>
    %457 = vector.multi_reduction <add>, %454, %cst_226 [1] : vector<34x32xf32> to vector<34xf32>
    %458 = vector.shape_cast %457 : vector<34xf32> to vector<34x1xf32>
    %cst_227 = arith.constant 3.200000e+01 : f32
    %459 = vector.broadcast %cst_227 : f32 to vector<34x1xf32>
    %460 = arith.divf %458, %459 : vector<34x1xf32>
    %461 = vector.broadcast %460 : vector<34x1xf32> to vector<34x32xf32>
    %462 = arith.subf %454, %461 : vector<34x32xf32>
    %463 = arith.mulf %462, %462 : vector<34x32xf32>
    %cst_228 = arith.constant dense<0.000000e+00> : vector<34xf32>
    %464 = vector.multi_reduction <add>, %463, %cst_228 [1] : vector<34x32xf32> to vector<34xf32>
    %465 = vector.shape_cast %464 : vector<34xf32> to vector<34x1xf32>
    %cst_229 = arith.constant 3.200000e+01 : f32
    %466 = vector.broadcast %cst_229 : f32 to vector<34x1xf32>
    %467 = arith.divf %465, %466 : vector<34x1xf32>
    %cst_230 = arith.constant 9.99999997E-7 : f32
    %468 = vector.broadcast %cst_230 : f32 to vector<34x1xf32>
    %469 = arith.addf %467, %468 : vector<34x1xf32>
    %470 = math.rsqrt %469 : vector<34x1xf32>
    %471 = vector.broadcast %470 : vector<34x1xf32> to vector<34x32xf32>
    %472 = arith.mulf %462, %471 : vector<34x32xf32>
    %473 = vector.broadcast %455 : vector<1x32xf32> to vector<34x32xf32>
    %474 = arith.mulf %472, %473 : vector<34x32xf32>
    %475 = vector.broadcast %456 : vector<1x32xf32> to vector<34x32xf32>
    %476 = arith.addf %474, %475 : vector<34x32xf32>
    %c0_231 = arith.constant 0 : index
    %c0_232 = arith.constant 0 : index
    %477 = vector.load %arg23[%c0_231, %c0_232] : memref<34x32xf32, #tpu.memory_space<vmem>>, vector<34x32xf32>
    tpu.vector_store %arg23[%c0_231, %c0_232], %476 {strides = array<i32>} : memref<34x32xf32, #tpu.memory_space<vmem>>, vector<34x32xf32>,
    return
  }
  func.func @transform_0(%arg0: i32) -> (i32, i32) {
    %c0_i32 = arith.constant 0 : i32
    %c0_i32_0 = arith.constant 0 : i32
    %c0_i32_1 = arith.constant 0 : i32
    return %c0_i32, %c0_i32_0 : i32, i32
  }
  func.func @transform_1(%arg0: i32) -> (i32, i32) {
    %c0_i32 = arith.constant 0 : i32
    %c0_i32_0 = arith.constant 0 : i32
    %c0_i32_1 = arith.constant 0 : i32
    return %c0_i32, %c0_i32_0 : i32, i32
  }
  func.func @transform_2(%arg0: i32) -> (i32, i32) {
    %c0_i32 = arith.constant 0 : i32
    %c0_i32_0 = arith.constant 0 : i32
    %c0_i32_1 = arith.constant 0 : i32
    return %c0_i32, %c0_i32_0 : i32, i32
  }
  func.func @transform_3(%arg0: i32) -> (i32, i32) {
    %c0_i32 = arith.constant 0 : i32
    %c0_i32_0 = arith.constant 0 : i32
    %c0_i32_1 = arith.constant 0 : i32
    return %c0_i32, %c0_i32_0 : i32, i32
  }
  func.func @transform_4(%arg0: i32) -> (i32, i32, i32) {
    %c0_i32 = arith.constant 0 : i32
    %c0_i32_0 = arith.constant 0 : i32
    %c0_i32_1 = arith.constant 0 : i32
    %c0_i32_2 = arith.constant 0 : i32
    return %c0_i32, %c0_i32_0, %c0_i32_1 : i32, i32, i32
  }
  func.func @transform_5(%arg0: i32) -> (i32, i32, i32) {
    %c0_i32 = arith.constant 0 : i32
    %c0_i32_0 = arith.constant 0 : i32
    %c0_i32_1 = arith.constant 0 : i32
    %c0_i32_2 = arith.constant 0 : i32
    return %c0_i32, %c0_i32_0, %c0_i32_1 : i32, i32, i32
  }
  func.func @transform_6(%arg0: i32) -> (i32, i32, i32) {
    %c0_i32 = arith.constant 0 : i32
    %c0_i32_0 = arith.constant 0 : i32
    %c0_i32_1 = arith.constant 0 : i32
    %c0_i32_2 = arith.constant 0 : i32
    return %c0_i32, %c0_i32_0, %c0_i32_1 : i32, i32, i32
  }
  func.func @transform_7(%arg0: i32) -> (i32, i32, i32) {
    %c0_i32 = arith.constant 0 : i32
    %c0_i32_0 = arith.constant 0 : i32
    %c0_i32_1 = arith.constant 0 : i32
    %c0_i32_2 = arith.constant 0 : i32
    return %c0_i32, %c0_i32_0, %c0_i32_1 : i32, i32, i32
  }
  func.func @transform_8(%arg0: i32) -> (i32, i32, i32) {
    %c0_i32 = arith.constant 0 : i32
    %c0_i32_0 = arith.constant 0 : i32
    %c0_i32_1 = arith.constant 0 : i32
    %c0_i32_2 = arith.constant 0 : i32
    return %c0_i32, %c0_i32_0, %c0_i32_1 : i32, i32, i32
  }
  func.func @transform_9(%arg0: i32) -> (i32, i32, i32) {
    %c0_i32 = arith.constant 0 : i32
    %c0_i32_0 = arith.constant 0 : i32
    %c0_i32_1 = arith.constant 0 : i32
    %c0_i32_2 = arith.constant 0 : i32
    return %c0_i32, %c0_i32_0, %c0_i32_1 : i32, i32, i32
  }
  func.func @transform_10(%arg0: i32) -> (i32, i32, i32) {
    %c0_i32 = arith.constant 0 : i32
    %c0_i32_0 = arith.constant 0 : i32
    %c0_i32_1 = arith.constant 0 : i32
    %c0_i32_2 = arith.constant 0 : i32
    return %c0_i32, %c0_i32_0, %c0_i32_1 : i32, i32, i32
  }
  func.func @transform_11(%arg0: i32) -> (i32, i32, i32) {
    %c0_i32 = arith.constant 0 : i32
    %c0_i32_0 = arith.constant 0 : i32
    %c0_i32_1 = arith.constant 0 : i32
    %c0_i32_2 = arith.constant 0 : i32
    return %c0_i32, %c0_i32_0, %c0_i32_1 : i32, i32, i32
  }
  func.func @transform_12(%arg0: i32) -> (i32, i32, i32) {
    %c0_i32 = arith.constant 0 : i32
    %c0_i32_0 = arith.constant 0 : i32
    %c0_i32_1 = arith.constant 0 : i32
    %c0_i32_2 = arith.constant 0 : i32
    return %c0_i32, %c0_i32_0, %c0_i32_1 : i32, i32, i32
  }
  func.func @transform_13(%arg0: i32) -> (i32, i32, i32) {
    %c0_i32 = arith.constant 0 : i32
    %c0_i32_0 = arith.constant 0 : i32
    %c0_i32_1 = arith.constant 0 : i32
    %c0_i32_2 = arith.constant 0 : i32
    return %c0_i32, %c0_i32_0, %c0_i32_1 : i32, i32, i32
  }
  func.func @transform_14(%arg0: i32) -> (i32, i32, i32) {
    %c0_i32 = arith.constant 0 : i32
    %c0_i32_0 = arith.constant 0 : i32
    %c0_i32_1 = arith.constant 0 : i32
    %c0_i32_2 = arith.constant 0 : i32
    return %c0_i32, %c0_i32_0, %c0_i32_1 : i32, i32, i32
  }
  func.func @transform_15(%arg0: i32) -> (i32, i32, i32) {
    %c0_i32 = arith.constant 0 : i32
    %c0_i32_0 = arith.constant 0 : i32
    %c0_i32_1 = arith.constant 0 : i32
    %c0_i32_2 = arith.constant 0 : i32
    return %c0_i32, %c0_i32_0, %c0_i32_1 : i32, i32, i32
  }
  func.func @transform_16(%arg0: i32) -> (i32, i32, i32) {
    %c0_i32 = arith.constant 0 : i32
    %c0_i32_0 = arith.constant 0 : i32
    %c0_i32_1 = arith.constant 0 : i32
    %c0_i32_2 = arith.constant 0 : i32
    return %c0_i32, %c0_i32_0, %c0_i32_1 : i32, i32, i32
  }
  func.func @transform_17(%arg0: i32) -> (i32, i32, i32) {
    %c0_i32 = arith.constant 0 : i32
    %c0_i32_0 = arith.constant 0 : i32
    %c0_i32_1 = arith.constant 0 : i32
    %c0_i32_2 = arith.constant 0 : i32
    return %c0_i32, %c0_i32_0, %c0_i32_1 : i32, i32, i32
  }
  func.func @transform_18(%arg0: i32) -> (i32, i32, i32) {
    %c0_i32 = arith.constant 0 : i32
    %c0_i32_0 = arith.constant 0 : i32
    %c0_i32_1 = arith.constant 0 : i32
    %c0_i32_2 = arith.constant 0 : i32
    return %c0_i32, %c0_i32_0, %c0_i32_1 : i32, i32, i32
  }
  func.func @transform_19(%arg0: i32) -> (i32, i32, i32) {
    %c0_i32 = arith.constant 0 : i32
    %c0_i32_0 = arith.constant 0 : i32
    %c0_i32_1 = arith.constant 0 : i32
    %c0_i32_2 = arith.constant 0 : i32
    return %c0_i32, %c0_i32_0, %c0_i32_1 : i32, i32, i32
  }
  func.func @transform_20(%arg0: i32) -> (i32, i32) {
    %c0_i32 = arith.constant 0 : i32
    %c0_i32_0 = arith.constant 0 : i32
    %c0_i32_1 = arith.constant 0 : i32
    return %c0_i32, %c0_i32_0 : i32, i32
  }
  func.func @transform_21(%arg0: i32) -> (i32, i32) {
    %c0_i32 = arith.constant 0 : i32
    %c0_i32_0 = arith.constant 0 : i32
    %c0_i32_1 = arith.constant 0 : i32
    return %c0_i32, %c0_i32_0 : i32, i32
  }
  func.func @transform_22(%arg0: i32) -> (i32, i32) {
    %c0_i32 = arith.constant 0 : i32
    %c0_i32_0 = arith.constant 0 : i32
    %c0_i32_1 = arith.constant 0 : i32
    return %c0_i32, %c0_i32_0 : i32, i32
  }
}

module attributes {stable_mosaic.version = 11 : i64} {
  func.func @_epilogue_kernel(%arg0: i32, %arg1: memref<34x32xf32, #tpu.memory_space<vmem>>, %arg2: memref<32x16xbf16, #tpu.memory_space<vmem>>, %arg3: memref<1x16xf32, #tpu.memory_space<vmem>>, %arg4: memref<16x10xbf16, #tpu.memory_space<vmem>>, %arg5: memref<1x10xf32, #tpu.memory_space<vmem>>, %arg6: memref<34x16xf32, #tpu.memory_space<vmem>>, %arg7: memref<2x10xf32, #tpu.memory_space<vmem>>) attributes {dimension_semantics = [#tpu.dimension_semantics<arbitrary>], iteration_bounds = array<i64: 1>, scalar_prefetch = 0 : i64, scratch_operands = 0 : i64, tpu.core_type = #tpu.core_type<tc>, window_params = [{pipeline_mode = #tpu.pipeline_mode<synchronous>, transform_indices = @transform_0, window_bounds = array<i64: 34, 32>}, {pipeline_mode = #tpu.pipeline_mode<synchronous>, transform_indices = @transform_1, window_bounds = array<i64: 32, 16>}, {pipeline_mode = #tpu.pipeline_mode<synchronous>, transform_indices = @transform_2, window_bounds = array<i64: 1, 16>}, {pipeline_mode = #tpu.pipeline_mode<synchronous>, transform_indices = @transform_3, window_bounds = array<i64: 16, 10>}, {pipeline_mode = #tpu.pipeline_mode<synchronous>, transform_indices = @transform_4, window_bounds = array<i64: 1, 10>}, {pipeline_mode = #tpu.pipeline_mode<synchronous>, transform_indices = @transform_5, window_bounds = array<i64: 34, 16>}, {pipeline_mode = #tpu.pipeline_mode<synchronous>, transform_indices = @transform_6, window_bounds = array<i64: 2, 10>}]} {
    %c0 = arith.constant 0 : index
    %c0_0 = arith.constant 0 : index
    %0 = vector.load %arg1[%c0, %c0_0] : memref<34x32xf32, #tpu.memory_space<vmem>>, vector<34x32xf32>
    %c0_1 = arith.constant 0 : index
    %c0_2 = arith.constant 0 : index
    %1 = vector.load %arg2[%c0_1, %c0_2] : memref<32x16xbf16, #tpu.memory_space<vmem>>, vector<32x16xbf16>
    %2 = arith.truncf %0 : vector<34x32xf32> to vector<34x32xbf16>
    %cst = arith.constant dense<0.000000e+00> : vector<34x16xf32>
    %3 = tpu.matmul %2, %1, %cst {dimension_numbers = #tpu.dot_dimension_numbers<[1], [0], [0], [1], [0, 0, 1, 1], [], []>} : vector<34x32xbf16>, vector<32x16xbf16>, vector<34x16xf32> -> vector<34x16xf32>
    %c0_3 = arith.constant 0 : index
    %c0_4 = arith.constant 0 : index
    %4 = vector.load %arg3[%c0_3, %c0_4] : memref<1x16xf32, #tpu.memory_space<vmem>>, vector<1x16xf32>
    %5 = vector.broadcast %4 : vector<1x16xf32> to vector<34x16xf32>
    %6 = arith.addf %3, %5 : vector<34x16xf32>
    %c0_5 = arith.constant 0 : index
    %c0_6 = arith.constant 0 : index
    %7 = vector.load %arg6[%c0_5, %c0_6] : memref<34x16xf32, #tpu.memory_space<vmem>>, vector<34x16xf32>
    tpu.vector_store %arg6[%c0_5, %c0_6], %6 {strides = array<i32>} : memref<34x16xf32, #tpu.memory_space<vmem>>, vector<34x16xf32>,
    %8 = vector.extract_strided_slice %6 {offsets = [0, 0], sizes = [1, 16], strides = [1, 1]} : vector<34x16xf32> to vector<1x16xf32>
    %9 = vector.extract_strided_slice %6 {offsets = [17, 0], sizes = [1, 16], strides = [1, 1]} : vector<34x16xf32> to vector<1x16xf32>
    %10 = tpu.concatenate %8, %9 in 0 : vector<1x16xf32>, vector<1x16xf32> -> vector<2x16xf32>
    %c0_7 = arith.constant 0 : index
    %c0_8 = arith.constant 0 : index
    %11 = vector.load %arg4[%c0_7, %c0_8] : memref<16x10xbf16, #tpu.memory_space<vmem>>, vector<16x10xbf16>
    %12 = arith.truncf %10 : vector<2x16xf32> to vector<2x16xbf16>
    %cst_9 = arith.constant dense<0.000000e+00> : vector<2x10xf32>
    %13 = tpu.matmul %12, %11, %cst_9 {dimension_numbers = #tpu.dot_dimension_numbers<[1], [0], [0], [1], [0, 0, 1, 1], [], []>} : vector<2x16xbf16>, vector<16x10xbf16>, vector<2x10xf32> -> vector<2x10xf32>
    %c0_10 = arith.constant 0 : index
    %c0_11 = arith.constant 0 : index
    %14 = vector.load %arg5[%c0_10, %c0_11] : memref<1x10xf32, #tpu.memory_space<vmem>>, vector<1x10xf32>
    %15 = vector.broadcast %14 : vector<1x10xf32> to vector<2x10xf32>
    %16 = arith.addf %13, %15 : vector<2x10xf32>
    %c0_12 = arith.constant 0 : index
    %c0_13 = arith.constant 0 : index
    %17 = vector.load %arg7[%c0_12, %c0_13] : memref<2x10xf32, #tpu.memory_space<vmem>>, vector<2x10xf32>
    tpu.vector_store %arg7[%c0_12, %c0_13], %16 {strides = array<i32>} : memref<2x10xf32, #tpu.memory_space<vmem>>, vector<2x10xf32>,
    return
  }
  func.func @transform_0(%arg0: i32) -> (i32, i32) {
    %c0_i32 = arith.constant 0 : i32
    %c0_i32_0 = arith.constant 0 : i32
    %c0_i32_1 = arith.constant 0 : i32
    return %c0_i32, %c0_i32_0 : i32, i32
  }
  func.func @transform_1(%arg0: i32) -> (i32, i32) {
    %c0_i32 = arith.constant 0 : i32
    %c0_i32_0 = arith.constant 0 : i32
    %c0_i32_1 = arith.constant 0 : i32
    return %c0_i32, %c0_i32_0 : i32, i32
  }
  func.func @transform_2(%arg0: i32) -> (i32, i32) {
    %c0_i32 = arith.constant 0 : i32
    %c0_i32_0 = arith.constant 0 : i32
    %c0_i32_1 = arith.constant 0 : i32
    return %c0_i32, %c0_i32_0 : i32, i32
  }
  func.func @transform_3(%arg0: i32) -> (i32, i32) {
    %c0_i32 = arith.constant 0 : i32
    %c0_i32_0 = arith.constant 0 : i32
    %c0_i32_1 = arith.constant 0 : i32
    return %c0_i32, %c0_i32_0 : i32, i32
  }
  func.func @transform_4(%arg0: i32) -> (i32, i32) {
    %c0_i32 = arith.constant 0 : i32
    %c0_i32_0 = arith.constant 0 : i32
    %c0_i32_1 = arith.constant 0 : i32
    return %c0_i32, %c0_i32_0 : i32, i32
  }
  func.func @transform_5(%arg0: i32) -> (i32, i32) {
    %c0_i32 = arith.constant 0 : i32
    %c0_i32_0 = arith.constant 0 : i32
    %c0_i32_1 = arith.constant 0 : i32
    return %c0_i32, %c0_i32_0 : i32, i32
  }
  func.func @transform_6(%arg0: i32) -> (i32, i32) {
    %c0_i32 = arith.constant 0 : i32
    %c0_i32_0 = arith.constant 0 : i32
    %c0_i32_1 = arith.constant 0 : i32
    return %c0_i32, %c0_i32_0 : i32, i32
  }
}

</mosaic_0001>

<bundles_post_ra>
// kernel: custom-call.56
= control target key start
LH: loop header
LB: loop body
LE: loop exit
PB: predicated region body
PF: predicated region fallthrough
CT: control target
= control target key end

     0   :  { %v839_v6 = vmov 0.0   ;;  %s880_s25 = smov 0   ;;  %s1203_s0 = inlined_call_operand.vmem [shape: f32[64,32], index: 0, kind: input, shape index: {}]   ;;  %s1204_s1 = inlined_call_operand.vmem [shape: f32[64,32], index: 1, kind: output, shape index: {0}]   ;;  %s1205_s2 = inlined_call_operand.vmem [shape: f32[32], index: 2, kind: output, shape index: {1}]  }
   0x1   :  { %v45_v0 = vld [vmem:[%s1203_s0] sm:$0xff]  ;;  %v47_v1 = vld [vmem:[%s1203_s0 + $0x8] sm:$0xff]  ;;  %v49_v2 = vld [vmem:[%s1203_s0 + $0x10] sm:$0xff]  ;;  %94 = vst [vmem:[#allocation2] sm:$0x1] %v839_v6 }
   0x2   :  { %v51_v3 = vld [vmem:[%s1203_s0 + $0x18] sm:$0xff]  ;;  %v53_v4 = vld [vmem:[%s1203_s0 + $0x20] sm:$0xff]  ;;  %v55_v5 = vld [vmem:[%s1203_s0 + $0x28] sm:$0xff]  ;;  %65 = vst [vmem:[#allocation1] sm:$0xff] %v45_v0 }
   0x3   :  { %69 = vst [vmem:[#allocation1 + $0x8] sm:$0xff] %v47_v1  ;;  %73 = vst [vmem:[#allocation1 + $0x10] sm:$0xff] %v49_v2  ;;  %v57_v7 = vld [vmem:[%s1203_s0 + $0x30] sm:$0xff]  ;;  %v59_v8 = vld [vmem:[%s1203_s0 + $0x38] sm:$0xff] }
   0x4   :  { %77 = vst [vmem:[#allocation1 + $0x18] sm:$0xff] %v51_v3  ;;  %81 = vst [vmem:[#allocation1 + $0x20] sm:$0xff] %v53_v4 }
   0x5   :  { %85 = vst [vmem:[#allocation1 + $0x28] sm:$0xff] %v55_v5  ;;  %89 = vst [vmem:[#allocation1 + $0x30] sm:$0xff] %v57_v7 }
   0x6   :  { %93 = vst [vmem:[#allocation1 + $0x38] sm:$0xff] %v59_v8 }
   0x7 LB: > { %v102_v9 = vlaneseq  ;;  %v889_v12 = vstv %s837_s25  ;;  %s199_s0 = scalar_lea.vmem [#allocation1], %s837_s25  ;;  %s933_s26 = smov [#allocation1]  ;;  %s837_s25 = sphi %s880_s25, %s100_s25  }
   0x8   : > { %s383_s27 = scalar_lea.vmem [#allocation4], %s837_s25  ;;  %s1013_s28 = smov [#allocation1] }
   0x9   : > { %v101_v10 = vld [vmem:[#allocation1] sm:$0xff]  ;;  %v886_v11 = vshrl.u32 %v102_v9, 7  ;;  %s1015_s29 = smov [#allocation4] }
   0xa   : > { %v110_v13 = vld [vmem:[#allocation1 + $0x8] sm:$0xff]  ;;  %v120_v15 = vld [vmem:[#allocation1 + $0x10] sm:$0xff] }
   0xb   : > { %vm106_vm0 = vcmp.gt.s32.totalorder %v886_v11, %v889_v12  ;;  %v113_v14 = vadd.s32 8, %v886_v11  ;;  %v123_v16 = vadd.s32 16, %v886_v11  ;;  %v130_v17 = vld [vmem:[#allocation1 + $0x18] sm:$0xff]  ;;  %v133_v18 = vadd.s32 24, %v886_v11  ;;  %v140_v24 = vld [vmem:[#allocation1 + $0x20] sm:$0xff] }
   0xc   : > { %v107_v19 = vsel %vm106_vm0, %v101_v10, 0.0  ;;  %v143_v20 = vadd.s32 32, %v886_v11  ;;  %v153_v21 = vadd.s32 40, %v886_v11  ;;  %v163_v22 = vadd.s32 48, %v886_v11  ;;  %v150_v30 = vld [vmem:[#allocation1 + $0x28] sm:$0xff]  ;;  %v160_v35 = vld [vmem:[#allocation1 + $0x30] sm:$0xff] }
   0xd   : > { %v108_v23 = vmul.f32 %v107_v19, %v107_v19  ;;  %vm115_vm1 = vcmp.gt.s32.totalorder %v113_v14, %v889_v12  ;;  %vm125_vm2 = vcmp.gt.s32.totalorder %v123_v16, %v889_v12  ;;  %vm135_vm3 = vcmp.gt.s32.totalorder %v133_v18, %v889_v12  ;;  %v170_v39 = vld [vmem:[#allocation1 + $0x38] sm:$0xff]  ;;  %v911_v56 = vld [vmem:[%s199_s0] ss:$0 sm:$0xff] }
   0xe   : > { %v116_v25 = vsel %vm115_vm1, %v110_v13, 0.0  ;;  %v126_v26 = vsel %vm125_vm2, %v120_v15, 0.0  ;;  %v136_v27 = vsel %vm135_vm3, %v130_v17, 0.0  ;;  %vm145_vm4 = vcmp.gt.s32.totalorder %v143_v20, %v889_v12 }
   0xf   : > { %v117_v28 = vmul.f32 %v116_v25, %v116_v25  ;;  %v127_v29 = vmul.f32 %v126_v26, %v126_v26  ;;  %v146_v31 = vsel %vm145_vm4, %v140_v24, 0.0  ;;  %vm155_vm5 = vcmp.gt.s32.totalorder %v153_v21, %v889_v12 }
  0x10   : > { %v173_v32 = vadd.s32 56, %v886_v11  ;;  %v137_v34 = vmul.f32 %v136_v27, %v136_v27  ;;  %vm165_vm6 = vcmp.gt.s32.totalorder %v163_v22, %v889_v12  ;;  %v156_v36 = vsel %vm155_vm5, %v150_v30, 0.0  ;;  %v770_v30 = vld [vmem:[%s933_s26 + $0x10] sm:$0xff] }
  0x11   : > { %v118_v33 = vadd.f32 %v117_v28, %v108_v23  ;;  %v147_v38 = vmul.f32 %v146_v31, %v146_v31  ;;  %v166_v40 = vsel %vm165_vm6, %v160_v35, 0.0  ;;  %v157_v42 = vmul.f32 %v156_v36, %v156_v36  ;;  %v239_v31 = vld [vmem:[%s933_s26] sm:$0xff]  ;;  %v773_v36 = vld [vmem:[%s933_s26 + $0x28] sm:$0xff] }
  0x12   : > { %vm175_vm7 = vcmp.gt.s32.totalorder %v173_v32, %v889_v12  ;;  %v167_v45 = vmul.f32 %v166_v40, %v166_v40  ;;  %v201_v57 = vand.u32 2147483647, %v911_v56  ;;  %vm226_vm13 = vcmp.lt.f32.partialorder %v911_v56, 0.0  ;;  %v771_v32 = vld [vmem:[%s933_s26 + $0x18] sm:$0xff] }
  0x13   : > { %v128_v37 = vadd.f32 %v127_v29, %v118_v33  ;;  %v178_v43 = vsel %vm175_vm7, %v170_v39, 0.0  ;;  %v238_v11 = vmov %v886_v11  ;;  %v944_v35 = vand.u32 127, %v102_v9 }
  0x14   : > { %v179_v47 = vmul.f32 %v178_v43, %v178_v43  ;;  %v202_v62 = vmax.f32 %v201_v57, 0.0  ;;  %v275_v25 = vadd.s32 16, %v238_v11  ;;  %v293_v26 = vadd.s32 24, %v238_v11 }
  0x15   : > { %v138_v41 = vadd.f32 %v137_v34, %v128_v37  ;;  %v257_v27 = vadd.s32 8, %v238_v11  ;;  %v329_v28 = vadd.s32 40, %v238_v11  ;;  %v311_v29 = vadd.s32 32, %v238_v11  ;;  %v769_v34 = vld [vmem:[%s933_s26 + $0x8] sm:$0xff]  ;;  %v772_v37 = vld [vmem:[%s933_s26 + $0x20] sm:$0xff] }
  0x16   : > { %vm277_vm14 = vcmp.gt.s32.totalorder %v275_v25, %v889_v12  ;;  %vm242_vm15 = vcmp.gt.s32.totalorder %v238_v11, %v889_v12  ;;  %vm295_vm0 = vcmp.gt.s32.totalorder %v293_v26, %v889_v12  ;;  %v365_v33 = vadd.s32 56, %v238_v11 }
  0x17   : > { %v148_v44 = vadd.f32 %v147_v38, %v138_v41  ;;  %vm259_vm1 = vcmp.gt.s32.totalorder %v257_v27, %v889_v12  ;;  %vm331_vm2 = vcmp.gt.s32.totalorder %v329_v28, %v889_v12  ;;  %vm313_vm3 = vcmp.gt.s32.totalorder %v311_v29, %v889_v12  ;;  %v396_v29 = vld [vmem:[#allocation2] ss:$0 sm:$0xff] }
  0x18   : > { %v347_v38 = vadd.s32 48, %v238_v11  ;;  %v278_v39 = vsel %vm277_vm14, %v770_v30, 0.0  ;;  %v243_v40 = vsel %vm242_vm15, %v239_v31, 0.0  ;;  %v296_v41 = vsel %vm295_vm0, %v771_v32, 0.0  ;;  %v406_v32 = vld [vmem:[%s1013_s28] sm:$0xff] }
  0x19   : > { %v158_v46 = vadd.f32 %v157_v42, %v148_v44  ;;  %v260_v42 = vsel %vm259_vm1, %v769_v34, 0.0  ;;  %vm367_vm4 = vcmp.gt.s32.totalorder %v365_v33, %v889_v12  ;;  %vm368_vm5 = vcmp.lt.s32.totalorder %v365_v33, 64  ;;  %v777_v33 = vld [vmem:[%s1013_s28 + $0x8] sm:$0xff] }
  0x1a   : > { %v332_v9 = vsel %vm331_vm2, %v773_v36, 0.0  ;;  %v314_v43 = vsel %vm313_vm3, %v772_v37, 0.0  ;;  %vm954_vm6 = vcmp.eq.s32.totalorder %v944_v35, %v889_v12  ;;  %vm349_vm7 = vcmp.gt.s32.totalorder %v347_v38, %v889_v12 }
  0x1b   : > { %v168_v48 = vadd.f32 %v167_v45, %v158_v46  ;;  %v840_v28 = vmov 1.0   ;;  %v403_v11 = vmov %v886_v11  ;;  %vm1086_vm3 = vcmp.gt.s32.totalorder %v944_v35, %v889_v12 }
  0x1d   : > { %v180_v49 = vadd.f32 %v179_v47, %v168_v48 }
  0x1f   : > { %v181_v50 = vrot.slane %v180_v49, 4 }
  0x21   : > { %v182_v51 = vadd.f32 %v181_v50, %v180_v49  ;;  %v775_v50 = vld [vmem:[%s933_s26 + $0x38] sm:$0xff] }
  0x23   : > { %v183_v52 = vrot.slane %v182_v51, 2 }
  0x25   : > { %v184_v53 = vadd.f32 %v183_v52, %v182_v51  ;;  %v774_v52 = vld [vmem:[%s933_s26 + $0x30] sm:$0xff] }
  0x27   : > { %v185_v54 = vrot.slane %v184_v53, 1 }
  0x29   : > { %v907_v55 = vadd.f32 %v185_v54, %v184_v53 }
  0x2b   : > { %821 = vrsqrt.f32 %v907_v55  ;;  %vm189_vm8 = vcmp.eq.f32.partialorder %v907_v55, inf  ;;  %v192_v59 = vand.u32 2147483648, %v907_v55  ;;  %vm191_vm9 = vcmp.eq.f32.partialorder %v907_v55, 0.0 }
  0x35   : > { %v822_v58 = vpop.eup %821 }
  0x36   : > { %v188_v60 = vmul.f32 %v822_v58, %v907_v55 }
  0x38   : > { %v190_v61 = vsel %vm189_vm8, %v907_v55, %v188_v60  ;;  %vm960_vm8 = vmand %vm367_vm4, %vm368_vm5 }
  0x39   : > { %v193_v63 = vsel %vm191_vm9, %v192_v59, %v190_v61 }
  0x3a   : > { %v203_v0 = vand.u32 2147483647, %v193_v63  ;;  %v370_v63 = vsel %vm960_vm8, %v775_v50, 0.0  ;;  %v785_v50 = vld [vmem:[%s1013_s28 + $0x28] sm:$0xff] }
  0x3c   : > { %v204_v1 = vmax.f32 %v202_v62, %v203_v0 }
  0x3e   : > { %823 = vrcp.f32 %v204_v1  ;;  %vm216_vm12 = vcmp.eq.f32.partialorder %v204_v1, 0.0 }
  0x48   : > { %v824_v2 = vpop.eup %823 }
  0x49   : > { %v206_v3 = vmul.f32 %v824_v2, %v201_v57  ;;  %v209_v4 = vmul.f32 0.0, %v824_v2  ;;  %v213_v5 = vmul.f32 %v824_v2, %v203_v0  ;;  %v350_v0 = vsel %vm349_vm7, %v774_v52, 0.0 }
  0x4b   : > { %v207_v6 = vmul.f32 %v206_v3, %v206_v3  ;;  %v210_v7 = vmul.f32 %v209_v4, %v209_v4  ;;  %v214_v8 = vmul.f32 %v213_v5, %v213_v5 }
  0x4d   : > { %v211_v10 = vadd.f32 %v210_v7, %v207_v6 }
  0x4f   : > { %v215_v13 = vadd.f32 %v214_v8, %v211_v10 }
  0x51   : > { %825 = vrsqrt.f32 %v215_v13  ;;  %vm219_vm10 = vcmp.eq.f32.partialorder %v215_v13, inf  ;;  %v222_v15 = vand.u32 2147483648, %v215_v13  ;;  %vm221_vm11 = vcmp.eq.f32.partialorder %v215_v13, 0.0 }
  0x5b   : > { %v826_v14 = vpop.eup %825 }
  0x5c   : > { %v218_v16 = vmul.f32 %v826_v14, %v215_v13 }
  0x5e   : > { %v220_v17 = vsel %vm219_vm10, %v215_v13, %v218_v16 }
  0x5f   : > { %v223_v18 = vsel %vm221_vm11, %v222_v15, %v220_v17 }
  0x60   : > { %v224_v19 = vmul.f32 %v223_v18, %v204_v1 }
  0x62   : > { %v225_v20 = vsel %vm216_vm12, 0.0, %v224_v19 }
  0x63   : > { %v227_v21 = vxor.u32 2147483648, %v225_v20 }
  0x65   : > { %v922_v22 = vsel %vm226_vm13, %v225_v20, %v227_v21 }
  0x66   : > { %v928_v23 = vsel %vm191_vm9, %v911_v56, %v922_v22  ;;  %v229_v3 = vsub.f32 %v922_v22, %v911_v56 }
  0x67   : > { %v234_v24 = vsub.f32 %v911_v56, %v928_v23 }
  0x69   : > { %827 = vrcp.f32 %v234_v24 }
  0x6a   : > { %829 = vrcp.f32 %v922_v22 }
  0x73   : > { %v828_v44 = vpop.eup %827 }
  0x74   : > { %v280_v46 = vmul.f32 %v828_v44, %v278_v39  ;;  %v245_v47 = vmul.f32 %v828_v44, %v243_v40  ;;  %v298_v48 = vmul.f32 %v828_v44, %v296_v41  ;;  %v262_v49 = vmul.f32 %v828_v44, %v260_v42  ;;  %v830_v8 = vpop.eup %829  ;;  %v779_v39 = vld [vmem:[%s1013_s28 + $0x10] sm:$0xff]  ;;  %v781_v42 = vld [vmem:[%s1013_s28 + $0x18] sm:$0xff] }
  0x75   : > { %v334_v53 = vmul.f32 %v828_v44, %v332_v9  ;;  %v316_v54 = vmul.f32 %v828_v44, %v314_v43  ;;  %v372_v6 = vmul.f32 %v828_v44, %v370_v63  ;;  %v352_v7 = vmul.f32 %v828_v44, %v350_v0 }
  0x76   : > { %v281_v57 = vsel %vm191_vm9, 0.0, %v280_v46  ;;  %v246_v58 = vsel %vm191_vm9, 0.0, %v245_v47  ;;  %v299_v59 = vsel %vm191_vm9, 0.0, %v298_v48  ;;  %v263_v60 = vsel %vm191_vm9, 0.0, %v262_v49  ;;  %v783_v46 = vld [vmem:[%s1013_s28 + $0x20] sm:$0xff] }
  0x77   : > { %v286_v61 = vsel %vm954_vm6, %v281_v57, 0.0  ;;  %v251_v62 = vsel %vm954_vm6, %v246_v58, 0.0  ;;  %v304_v1 = vsel %vm954_vm6, %v299_v59, 0.0  ;;  %v268_v2 = vsel %vm954_vm6, %v263_v60, 0.0  ;;  %v789_v57 = vld [vmem:[%s1013_s28 + $0x38] sm:$0xff]  ;;  %v787_v59 = vld [vmem:[%s1013_s28 + $0x30] sm:$0xff]  ;;  %s1038_s28 = smov %s1013_s28 }
  0x78   : > { %287 = vadd.xlane.f32.xlu1 %v286_v61  ;;  %252 = vadd.xlane.f32.xlu0 %v251_v62  ;;  %v335_v4 = vsel %vm191_vm9, 0.0, %v334_v53  ;;  %v317_v5 = vsel %vm191_vm9, 0.0, %v316_v54  ;;  %v373_v56 = vsel %vm191_vm9, 0.0, %v372_v6  ;;  %v353_v14 = vsel %vm191_vm9, 0.0, %v352_v7  ;;  %s637_s30 = scalar_lea.vmem %s1038_s28, %s837_s25  ;;  %s100_s25 = sadd.s32 1, %s837_s25  }
  0x79   : > { %v340_v10 = vsel %vm954_vm6, %v335_v4, 0.0  ;;  %v322_v13 = vsel %vm954_vm6, %v317_v5, 0.0  ;;  %v231_v15 = vmul.f32 %v830_v8, %v229_v3  ;;  %v378_v16 = vsel %vm954_vm6, %v373_v56, 0.0  ;;  %p97_p0 = scmp.ge.s32.totalorder %s100_s25, 32  }
  0x7a   : > { %v358_v17 = vsel %vm954_vm6, %v353_v14, 0.0  ;;  %v450_v53 = vadd.s32 56, %v403_v11  ;;  %v469_v11 = vmov %v886_v11 }
  0x7b   : > { %v233_v18 = vsel %vm191_vm9, 0.0, %v231_v15  ;;  %v490_v6 = vadd.s32 8, %v469_v11  ;;  %v511_v8 = vadd.s32 16, %v469_v11  ;;  %vm486_vm10 = vcmp.ge.s32.totalorder %v469_v11, %v889_v12 }
  0x7c   : > { %305 = vadd.xlane.f32.xlu1 %v304_v1  ;;  %269 = vadd.xlane.f32.xlu0 %v268_v2  ;;  %v389_v19 = vsel %vm954_vm6, %v233_v18, 0.0  ;;  %vm456_vm9 = vcmp.lt.s32.totalorder %v450_v53, 64  ;;  %v553_v14 = vadd.s32 32, %v469_v11  ;;  %vm1046_vm13 = vmand %vm954_vm6, %vm486_vm10  ;;  %v616_v18 = vadd.s32 56, %v469_v11 }
  0x7d   : > { %vm507_vm11 = vcmp.ge.s32.totalorder %v490_v6, %v889_v12  ;;  %vm528_vm12 = vcmp.ge.s32.totalorder %v511_v8, %v889_v12 }
  0x7e   : > { %vm1053_vm15 = vmand %vm954_vm6, %vm507_vm11  ;;  %vm570_vm2 = vcmp.ge.s32.totalorder %v553_v14, %v889_v12  ;;  %vm633_vm7 = vcmp.ge.s32.totalorder %v616_v18, %v889_v12 }
  0x7f   : > { %vm1062_vm0 = vmand %vm954_vm6, %vm528_vm12 }
  0x80   : > { %341 = vadd.xlane.f32.xlu1 %v340_v10  ;;  %323 = vadd.xlane.f32.xlu0 %v322_v13  ;;  %v532_v10 = vadd.s32 24, %v469_v11  ;;  %vm1100_vm8 = vmand %vm954_vm6, %vm570_vm2 }
  0x81   : > { %vm1124_vm11 = vmand %vm954_vm6, %vm633_vm7 }
  0x82   : > { %vm549_vm14 = vcmp.ge.s32.totalorder %v532_v10, %v889_v12 }
  0x83   : > { %vm1071_vm1 = vmand %vm954_vm6, %vm549_vm14 }
  0x84   : > { %379 = vadd.xlane.f32.xlu1 %v378_v16  ;;  %359 = vadd.xlane.f32.xlu0 %v358_v17  ;;  %v574_v16 = vadd.s32 40, %v469_v11  ;;  %v595_v17 = vadd.s32 48, %v469_v11  ;;  %v797_v11 = vld [vmem:[%s1038_s28 + $0x18] sm:$0xff] }
  0x86   : > { %vm591_vm4 = vcmp.ge.s32.totalorder %v574_v16, %v889_v12  ;;  %vm612_vm5 = vcmp.ge.s32.totalorder %v595_v17, %v889_v12 }
  0x87   : > { %vm1116_vm10 = vmand %vm954_vm6, %vm612_vm5 }
  0x88   : > { %390 = vadd.xlane.f32.xlu0 %v389_v19 }
 0x105   : > { %v288_v20 = vpop.xlane.xlu1 %287  ;;  %v253_v21 = vpop.xlane.xlu0 %252 }
 0x106   : > { %290 = vst [vmem:[#allocation4 + $0x10] sm:$0xff] %v288_v20  ;;  %254 = vst [vmem:[#allocation4] sm:$0xff] %v253_v21  ;;  %v476_v21 = vld [vmem:[%s1038_s28] sm:$0xff] }
 0x109   : > { %v306_v22 = vpop.xlane.xlu1 %305  ;;  %v270_v24 = vpop.xlane.xlu0 %269 }
 0x10a   : > { %308 = vst [vmem:[#allocation4 + $0x18] sm:$0xff] %v306_v22  ;;  %272 = vst [vmem:[#allocation4 + $0x8] sm:$0xff] %v270_v24  ;;  %v791_v22 = vld [vmem:[%s1038_s28 + $0x8] sm:$0xff]  ;;  %v794_v24 = vld [vmem:[%s1038_s28 + $0x10] sm:$0xff] }
 0x10d   : > { %v342_v25 = vpop.xlane.xlu1 %341  ;;  %v324_v26 = vpop.xlane.xlu0 %323 }
 0x10e   : > { %344 = vst [vmem:[#allocation4 + $0x28] sm:$0xff] %v342_v25  ;;  %326 = vst [vmem:[#allocation4 + $0x20] sm:$0xff] %v324_v26 }
 0x111   : > { %v380_v55 = vpop.xlane.xlu1 %379  ;;  %v360_v27 = vpop.xlane.xlu0 %359 }
 0x112   : > { %382 = vst [vmem:[#allocation4 + $0x38] sm:$0xff] %v380_v55  ;;  %362 = vst [vmem:[#allocation4 + $0x30] sm:$0xff] %v360_v27 }
 0x113   : > { %384 = vst [vmem:[%s383_s27] sm:$0x1] %v840_v28  ;;  %v800_v28 = vld [vmem:[%s1038_s28 + $0x20] sm:$0xff] }
 0x115   : > { %v1008_v30 = vpop.xlane.xlu0 %390 }
 0x116   : > { %v397_v31 = vsel %vm954_vm6, %v1008_v30, %v396_v29  ;;  %v803_v29 = vld [vmem:[%s1038_s28 + $0x28] sm:$0xff] }
 0x117   : > { %398 = vst [vmem:[#allocation2] sm:$0x1] %v397_v31  ;;  %v806_v31 = vld [vmem:[%s1038_s28 + $0x30] sm:$0xff] }
 0x11a   : > { %v405_v34 = vld [vmem:[%s1015_s29] sm:$0xff]  ;;  %v776_v37 = vld [vmem:[%s1015_s29 + $0x8] sm:$0xff]  ;;  %v778_v38 = vld [vmem:[%s1015_s29 + $0x10] sm:$0xff] }
 0x11b   : > { %v407_v36 = vmul.f32 %v406_v32, %v405_v34  ;;  %v413_v40 = vmul.f32 %v777_v33, %v776_v37  ;;  %v780_v41 = vld [vmem:[%s1015_s29 + $0x18] sm:$0xff]  ;;  %v420_v43 = vmul.f32 %v779_v39, %v778_v38  ;;  %v782_v44 = vld [vmem:[%s1015_s29 + $0x20] sm:$0xff]  ;;  %v784_v49 = vld [vmem:[%s1015_s29 + $0x28] sm:$0xff] }
 0x11c   : > { %v427_v48 = vmul.f32 %v781_v42, %v780_v41  ;;  %v434_v52 = vmul.f32 %v783_v46, %v782_v44  ;;  %v788_v54 = vld [vmem:[%s1015_s29 + $0x38] sm:$0xff]  ;;  %v786_v58 = vld [vmem:[%s1015_s29 + $0x30] sm:$0xff]  ;;  %v441_v61 = vmul.f32 %v785_v50, %v784_v49  ;;  %s1042_s29 = smov %s1015_s29 }
 0x11d   : > { %v414_v9 = vadd.f32 %v413_v40, %v407_v36  ;;  %v455_v62 = vmul.f32 %v789_v57, %v788_v54  ;;  %v448_v0 = vmul.f32 %v787_v59, %v786_v58  ;;  %v474_v26 = vld [vmem:[%s1042_s29] sm:$0xff]  ;;  %v790_v55 = vld [vmem:[%s1042_s29 + $0x8] sm:$0xff]  ;;  %v809_v32 = vld [vmem:[%s1038_s28 + $0x38] sm:$0xff] }
 0x11e   : > { %v793_v34 = vld [vmem:[%s1042_s29 + $0x10] sm:$0xff]  ;;  %v796_v36 = vld [vmem:[%s1042_s29 + $0x18] sm:$0xff]  ;;  %v799_v37 = vld [vmem:[%s1042_s29 + $0x20] sm:$0xff] }
 0x11f   : > { %v421_v47 = vadd.f32 %v420_v43, %v414_v9  ;;  %v457_v2 = vsel %vm456_vm9, %v455_v62, 0.0  ;;  %v802_v39 = vld [vmem:[%s1042_s29 + $0x28] sm:$0xff]  ;;  %v805_v40 = vld [vmem:[%s1042_s29 + $0x30] sm:$0xff]  ;;  %v808_v41 = vld [vmem:[%s1042_s29 + $0x38] sm:$0xff] }
 0x120   : > { %vm1108_vm9 = vmand %vm954_vm6, %vm591_vm4  ;;  %v648_v17 = vld [vmem:[#allocation2] sm:$0x1] (%p97_p0) }
 0x121   : > { %v428_v51 = vadd.f32 %v427_v48, %v421_v47  ;;  %650 = vst [vmem:[#allocation3] sm:$0x1] (%p97_p0), %v648_v17 }
 0x123   : > { %v435_v60 = vadd.f32 %v434_v52, %v428_v51 }
 0x125   : > { %v442_v63 = vadd.f32 %v441_v61, %v435_v60 }
 0x127   : > { %v449_v1 = vadd.f32 %v448_v0, %v442_v63 }
 0x128   :  { %v728_v25 = vld [vmem:[#allocation3] sm:$0x1] (%p97_p0) }
 0x129   : > { %v458_v3 = vadd.f32 %v457_v2, %v449_v1  ;;  %729 = vst [vmem:[%s1205_s2] sm:$0x1] (%p97_p0), %v728_v25 }
 0x12b   : > { %v459_v4 = vrot.slane %v458_v3, 4 }
 0x12d   : > { %v460_v5 = vadd.f32 %v459_v4, %v458_v3 }
 0x12f   : > { %v461_v7 = vrot.slane %v460_v5, 2 }
 0x131   : > { %v462_v13 = vadd.f32 %v461_v7, %v460_v5 }
 0x133   : > { %v463_v56 = vrot.slane %v462_v13, 1 }
 0x135   : > { %v464_v19 = vadd.f32 %v463_v56, %v462_v13 }
 0x137   : > { %v470_v33 = vmul.f32 %v464_v19, %v1008_v30 }
 0x139   : > { %v475_v42 = vmul.f32 %v474_v26, %v470_v33  ;;  %v495_v30 = vmul.f32 %v790_v55, %v470_v33  ;;  %v516_v9 = vmul.f32 %v793_v34, %v470_v33  ;;  %v537_v43 = vmul.f32 %v796_v36, %v470_v33 }
 0x13a   : > { %v558_v44 = vmul.f32 %v799_v37, %v470_v33  ;;  %v579_v46 = vmul.f32 %v802_v39, %v470_v33  ;;  %v600_v47 = vmul.f32 %v805_v40, %v470_v33  ;;  %v621_v48 = vmul.f32 %v808_v41, %v470_v33 }
 0x13b   : > { %v479_v50 = vsub.f32 %v476_v21, %v475_v42  ;;  %v500_v51 = vsub.f32 %v791_v22, %v495_v30  ;;  %v521_v52 = vsub.f32 %v794_v24, %v516_v9  ;;  %v542_v53 = vsub.f32 %v797_v11, %v537_v43 }
 0x13c   : > { %v563_v57 = vsub.f32 %v800_v28, %v558_v44  ;;  %v584_v58 = vsub.f32 %v803_v29, %v579_v46  ;;  %v605_v59 = vsub.f32 %v806_v31, %v600_v47  ;;  %v626_v60 = vsub.f32 %v809_v32, %v621_v48 }
 0x13d   : > { %v480_v62 = vsel %vm1086_vm3, %v479_v50, %v476_v21  ;;  %v501_v63 = vsel %vm1086_vm3, %v500_v51, %v791_v22  ;;  %v522_v0 = vsel %vm1086_vm3, %v521_v52, %v794_v24  ;;  %v543_v1 = vsel %vm1086_vm3, %v542_v53, %v797_v11 }
 0x13e   : > { %v488_v12 = vsel %vm1046_vm13, %v474_v26, %v480_v62  ;;  %v509_v2 = vsel %vm1053_vm15, %v790_v55, %v501_v63  ;;  %v530_v3 = vsel %vm1062_vm0, %v793_v34, %v522_v0  ;;  %v551_v4 = vsel %vm1071_vm1, %v796_v36, %v543_v1 }
 0x13f   : > { %489 = vst [vmem:[%s1038_s28] sm:$0xff] %v488_v12  ;;  %792 = vst [vmem:[%s1038_s28 + $0x8] sm:$0xff] %v509_v2  ;;  %v564_v5 = vsel %vm1086_vm3, %v563_v57, %v800_v28  ;;  %v585_v6 = vsel %vm1086_vm3, %v584_v58, %v803_v29  ;;  %v606_v7 = vsel %vm1086_vm3, %v605_v59, %v806_v31 }
 0x140   : > { %795 = vst [vmem:[%s1038_s28 + $0x10] sm:$0xff] %v530_v3  ;;  %798 = vst [vmem:[%s1038_s28 + $0x18] sm:$0xff] %v551_v4  ;;  %v627_v8 = vsel %vm1086_vm3, %v626_v60, %v809_v32  ;;  %v572_v10 = vsel %vm1100_vm8, %v799_v37, %v564_v5  ;;  %v593_v13 = vsel %vm1108_vm9, %v802_v39, %v585_v6 }
 0x141   : > { %v614_v56 = vsel %vm1116_vm10, %v805_v40, %v606_v7  ;;  %v635_v14 = vsel %vm1124_vm11, %v808_v41, %v627_v8  ;;  %801 = vst [vmem:[%s1038_s28 + $0x20] sm:$0xff] %v572_v10  ;;  %804 = vst [vmem:[%s1038_s28 + $0x28] sm:$0xff] %v593_v13 }
 0x142   : > { %807 = vst [vmem:[%s1038_s28 + $0x30] sm:$0xff] %v614_v56  ;;  %810 = vst [vmem:[%s1038_s28 + $0x38] sm:$0xff] %v635_v14 }
 0x145   :  { %99 = sbr.rel (!%p97_p0) target bundleno = 7 (0x7), region = 202 }
 0x149   : > { %v638_v15 = vld [vmem:[%s637_s30] ss:$0 sm:$0xff] }
 0x14a   : > { %v643_v16 = vsel %vm954_vm6, %v928_v23, %v638_v15 }
 0x14b   : > { %644 = vst [vmem:[%s637_s30] sm:$0x1] %v643_v16 }
 0x152   :  { %v692_v18 = vld [vmem:[#allocation1] sm:$0xff]  ;;  %v694_v19 = vld [vmem:[#allocation1 + $0x8] sm:$0xff]  ;;  %v696_v23 = vld [vmem:[#allocation1 + $0x10] sm:$0xff] }
 0x153   :  { %693 = vst [vmem:[%s1204_s1] sm:$0xff] %v692_v18  ;;  %695 = vst [vmem:[%s1204_s1 + $0x8] sm:$0xff] %v694_v19  ;;  %v698_v45 = vld [vmem:[#allocation1 + $0x18] sm:$0xff]  ;;  %v700_v20 = vld [vmem:[#allocation1 + $0x20] sm:$0xff] }
 0x154   :  { %697 = vst [vmem:[%s1204_s1 + $0x10] sm:$0xff] %v696_v23  ;;  %699 = vst [vmem:[%s1204_s1 + $0x18] sm:$0xff] %v698_v45  ;;  %v702_v21 = vld [vmem:[#allocation1 + $0x28] sm:$0xff]  ;;  %v704_v22 = vld [vmem:[#allocation1 + $0x30] sm:$0xff] }
 0x155   :  { %701 = vst [vmem:[%s1204_s1 + $0x20] sm:$0xff] %v700_v20  ;;  %v706_v24 = vld [vmem:[#allocation1 + $0x38] sm:$0xff]  ;;  %703 = vst [vmem:[%s1204_s1 + $0x28] sm:$0xff] %v702_v21 }
 0x156   :  { %705 = vst [vmem:[%s1204_s1 + $0x30] sm:$0xff] %v704_v22  ;;  %707 = vst [vmem:[%s1204_s1 + $0x38] sm:$0xff] %v706_v24 }

// kernel: custom-call.57
= control target key start
LH: loop header
LB: loop body
LE: loop exit
PB: predicated region body
PF: predicated region fallthrough
CT: control target
= control target key end

     0   :  { %s1100_s0 = inlined_call_operand.vmem [shape: f32[32,32], index: 0, kind: input, shape index: {}]   ;;  %s1101_s1 = inlined_call_operand.vmem [shape: f32[32,32], index: 1, kind: output, shape index: {}]  }
   0x1   :  { %s15_s8 = scalar_lea.vmem %s1100_s0, 24 }
   0x2   :  { %p719_p0 = scmp.gt.s32.totalorder %s1100_s0, %s15_s8 }
   0x3   :  { %s921_s11 = smov (!%p719_p0), [#allocation0]   ;;  %s925_s14 = smov (!%p719_p0), %s1100_s0  }
   0x4   :  { %720 = sbr.rel (%p719_p0) target bundleno = 21 (0x15), region = 108 }
   0xb LB: > { %v49_v0 = vld [vmem:[%s927_s14] sm:$0xff]  ;;  %s51_s14 = scalar_lea.vmem %s927_s14, 8   ;;  %s927_s14 = sphi %s925_s14, %s51_s14   ;;  %s923_s11 = sphi %s921_s11, %s52_s11  }
   0xc   : > { %50 = vst [vmem:[%s923_s11] sm:$0xff] %v49_v0  ;;  %s52_s11 = scalar_lea.vmem %s923_s11, 8   ;;  %p46_p1 = scmp.gt.s32.totalorder %s51_s14, %s15_s8 }
   0xe   :  { %48 = sbr.rel (!%p46_p1) target bundleno = 11 (0xb), region = 114 }
  0x15 PF:  { %v64_v1 = vlaneseq  ;;  %v98_v2 = vld [vmem:[#allocation0 + $0x1] ss:$0 sm:$0xff]  ;;  %vm99_vm0 = vcmask 261120   ;;  %v109_v10 = vld [vmem:[#allocation0 + $0x2] ss:$0 sm:$0xff]  ;;  %v937_v41 = vmov 0.0   ;;  %s929_s16 = smov %s1101_s1  }
  0x16   :  { %v70_v5 = vld [vmem:[#allocation0] sm:$0xff]  ;;  %v100_v6 = vsel %vm99_vm0, %v98_v2, 0.0  ;;  %v111_v11 = vsel %vm99_vm0, %v109_v10, 0.0  ;;  %v175_v37 = vld [vmem:[#allocation0 + $0x8] ss:$0 sm:$0xff]  ;;  %s933_s17 = smov [#allocation1]  }
  0x17   :  { %v957_v3 = vand.u32 127, %v64_v1  ;;  %v959_v4 = vshrl.u32 %v64_v1, 7  ;;  %v120_v15 = vld [vmem:[#allocation0 + $0x3] ss:$0 sm:$0xff]  ;;  %v131_v20 = vld [vmem:[#allocation0 + $0x4] ss:$0 sm:$0xff] }
  0x18   :  { %v122_v16 = vsel %vm99_vm0, %v120_v15, 0.0  ;;  %v133_v21 = vsel %vm99_vm0, %v131_v20, 0.0  ;;  %v142_v25 = vld [vmem:[#allocation0 + $0x5] ss:$0 sm:$0xff]  ;;  %v153_v30 = vld [vmem:[#allocation0 + $0x6] ss:$0 sm:$0xff] }
  0x19   :  { %vm69_vm1 = vcmp.eq.s32.totalorder %v957_v3, %v959_v4  ;;  %vm73_vm2 = vcmp.eq.s32.totalorder %v957_v3, 0  ;;  %vm103_vm3 = vcmp.eq.s32.totalorder %v957_v3, 1  ;;  %vm114_vm4 = vcmp.eq.s32.totalorder %v957_v3, 2  ;;  %v164_v36 = vld [vmem:[#allocation0 + $0x7] ss:$0 sm:$0xff] }
  0x1a   :  { %v74_v7 = vsel %vm73_vm2, %v70_v5, 1.0  ;;  %vm125_vm5 = vcmp.eq.s32.totalorder %v957_v3, 3  ;;  %vm136_vm6 = vcmp.eq.s32.totalorder %v957_v3, 4  ;;  %v144_v26 = vsel %vm99_vm0, %v142_v25, 0.0  ;;  %v190_v47 = vld [vmem:[#allocation0 + $0x9] ss:$0 sm:$0xff] }
  0x1b   :  { %v75_v8 = vsel %vm69_vm1, %v74_v7, 0.0  ;;  %vm147_vm7 = vcmp.eq.s32.totalorder %v957_v3, 5  ;;  %v155_v31 = vsel %vm99_vm0, %v153_v30, 0.0  ;;  %v80_v35 = vadd.s32 8, %v959_v4  ;;  %v205_v55 = vld [vmem:[#allocation0 + $0xa] ss:$0 sm:$0xff] }
  0x1c   :  { %v104_v9 = vmul.f32 %v100_v6, %v75_v8  ;;  %vm158_vm8 = vcmp.eq.s32.totalorder %v957_v3, 6  ;;  %v166_v38 = vsel %vm99_vm0, %v164_v36, 0.0  ;;  %v177_v43 = vsel %vm99_vm0, %v175_v37, 0.0  ;;  %v220_v63 = vld [vmem:[#allocation0 + $0xb] ss:$0 sm:$0xff] }
  0x1d   :  { %vm81_vm9 = vcmp.eq.s32.totalorder %v957_v3, %v80_v35  ;;  %vm169_vm10 = vcmp.eq.s32.totalorder %v957_v3, 7  ;;  %vm180_vm11 = vcmp.eq.s32.totalorder %v957_v3, 8  ;;  %v192_v50 = vsel %vm99_vm0, %v190_v47, 0.0  ;;  %v265_v25 = vld [vmem:[#allocation0 + $0xe] ss:$0 sm:$0xff] }
  0x1e   :  { %105 = vadd.xlane.f32.xlu0 %v104_v9  ;;  %v82_v42 = vsel %vm81_vm9, 1.0, %v937_v41  ;;  %vm195_vm12 = vcmp.eq.s32.totalorder %v957_v3, 9  ;;  %v207_v58 = vsel %vm99_vm0, %v205_v55, 0.0  ;;  %vm210_vm13 = vcmp.eq.s32.totalorder %v957_v3, 10  ;;  %v235_v9 = vld [vmem:[#allocation0 + $0xc] ss:$0 sm:$0xff] }
  0x1f   :  { %v185_v45 = vmul.f32 %v177_v43, %v82_v42  ;;  %v222_v2 = vsel %vm99_vm0, %v220_v63, 0.0  ;;  %vm225_vm14 = vcmp.eq.s32.totalorder %v957_v3, 11  ;;  %vm240_vm15 = vcmp.eq.s32.totalorder %v957_v3, 12 }
  0x20   :  { %vm255_vm1 = vcmp.eq.s32.totalorder %v957_v3, 13  ;;  %vm270_vm2 = vcmp.eq.s32.totalorder %v957_v3, 14  ;;  %vm376_vm9 = vcmp.eq.s32.totalorder %v957_v3, 20 }
  0xab   :  { %v106_v12 = vpop.xlane.xlu0 %105 }
  0xac   :  { %v107_v13 = vsel %vm103_vm3, %v106_v12, %v75_v8  ;;  %v237_v12 = vsel %vm99_vm0, %v235_v9, 0.0  ;;  %vm285_vm3 = vcmp.eq.s32.totalorder %v957_v3, 15 }
  0xad   :  { %v115_v14 = vmul.f32 %v111_v11, %v107_v13 }
  0xaf   :  { %116 = vadd.xlane.f32.xlu0 %v115_v14 }
 0x13c   :  { %v117_v17 = vpop.xlane.xlu0 %116 }
 0x13d   :  { %v118_v18 = vsel %vm114_vm4, %v117_v17, %v107_v13  ;;  %v250_v17 = vld [vmem:[#allocation0 + $0xd] ss:$0 sm:$0xff] }
 0x13e   :  { %v126_v19 = vmul.f32 %v122_v16, %v118_v18  ;;  %v252_v20 = vsel %vm99_vm0, %v250_v17, 0.0 }
 0x140   :  { %127 = vadd.xlane.f32.xlu1 %v126_v19 }
 0x1cd   :  { %v128_v22 = vpop.xlane.xlu1 %127 }
 0x1ce   :  { %v129_v23 = vsel %vm125_vm5, %v128_v22, %v118_v18  ;;  %vm300_vm5 = vcmp.eq.s32.totalorder %v957_v3, 16 }
 0x1cf   :  { %v137_v24 = vmul.f32 %v133_v21, %v129_v23 }
 0x1d1   :  { %138 = vadd.xlane.f32.xlu1 %v137_v24 }
 0x25e   :  { %v139_v27 = vpop.xlane.xlu1 %138 }
 0x25f   :  { %v140_v28 = vsel %vm136_vm6, %v139_v27, %v129_v23  ;;  %vm319_vm6 = vcmp.eq.s32.totalorder %v957_v3, 17 }
 0x260   :  { %v148_v29 = vmul.f32 %v144_v26, %v140_v28 }
 0x262   :  { %149 = vadd.xlane.f32.xlu0 %v148_v29 }
 0x2ef   :  { %v150_v32 = vpop.xlane.xlu0 %149 }
 0x2f0   :  { %v151_v33 = vsel %vm147_vm7, %v150_v32, %v140_v28  ;;  %v267_v28 = vsel %vm99_vm0, %v265_v25, 0.0  ;;  %vm338_vm7 = vcmp.eq.s32.totalorder %v957_v3, 18 }
 0x2f1   :  { %v159_v34 = vmul.f32 %v155_v31, %v151_v33 }
 0x2f3   :  { %160 = vadd.xlane.f32.xlu1 %v159_v34 }
 0x380   :  { %v161_v39 = vpop.xlane.xlu1 %160 }
 0x381   :  { %v162_v40 = vsel %vm158_vm8, %v161_v39, %v151_v33  ;;  %v280_v33 = vld [vmem:[#allocation0 + $0xf] ss:$0 sm:$0xff]  ;;  %vm357_vm8 = vcmp.eq.s32.totalorder %v957_v3, 19 }
 0x382   :  { %v170_v44 = vmul.f32 %v166_v38, %v162_v40  ;;  %v282_v36 = vsel %vm99_vm0, %v280_v33, 0.0 }
 0x384   :  { %171 = vadd.xlane.f32.xlu0 %v170_v44 }
 0x388   :  { %186 = vadd.xlane.f32.xlu0 %v185_v45 }
 0x411   :  { %v172_v46 = vpop.xlane.xlu0 %171 }
 0x412   :  { %v173_v48 = vsel %vm169_vm10, %v172_v46, %v162_v40  ;;  %vm395_vm10 = vcmp.eq.s32.totalorder %v957_v3, 21 }
 0x413   :  { %v181_v49 = vmul.f32 %v177_v43, %v173_v48 }
 0x415   :  { %182 = vadd.xlane.f32.xlu1 %v181_v49  ;;  %v187_v51 = vpop.xlane.xlu0 %186  ;;  %v87_v49 = vadd.s32 16, %v959_v4 }
 0x416   :  { %v188_v52 = vsel %vm180_vm11, %v187_v51, %v82_v42  ;;  %v295_v42 = vld [vmem:[#allocation0 + $0x10] ss:$0 sm:$0xff] }
 0x417   :  { %v200_v53 = vmul.f32 %v192_v50, %v188_v52  ;;  %v297_v45 = vsel %vm99_vm0, %v295_v42, 0.0  ;;  %vm88_vm4 = vcmp.eq.s32.totalorder %v957_v3, %v87_v49 }
 0x419   :  { %201 = vadd.xlane.f32.xlu0 %v200_v53 }
 0x4a2   :  { %v183_v54 = vpop.xlane.xlu1 %182 }
 0x4a3   :  { %v184_v56 = vsel %vm180_vm11, %v183_v54, %v173_v48  ;;  %vm414_vm11 = vcmp.eq.s32.totalorder %v957_v3, 22 }
 0x4a4   :  { %v196_v57 = vmul.f32 %v192_v50, %v184_v56 }
 0x4a6   :  { %197 = vadd.xlane.f32.xlu1 %v196_v57  ;;  %v202_v59 = vpop.xlane.xlu0 %201 }
 0x4a7   :  { %v203_v60 = vsel %vm195_vm12, %v202_v59, %v188_v52  ;;  %v89_v52 = vsel %vm88_vm4, 1.0, %v937_v41  ;;  %vm567_vm4 = vcmp.eq.s32.totalorder %v957_v3, 29 }
 0x4a8   :  { %v215_v61 = vmul.f32 %v207_v58, %v203_v60  ;;  %v309_v55 = vmul.f32 %v297_v45, %v89_v52 }
 0x4aa   :  { %216 = vadd.xlane.f32.xlu0 %v215_v61 }
 0x533   :  { %v198_v62 = vpop.xlane.xlu1 %197 }
 0x534   :  { %v199_v0 = vsel %vm195_vm12, %v198_v62, %v184_v56  ;;  %v314_v56 = vld [vmem:[#allocation0 + $0x11] ss:$0 sm:$0xff]  ;;  %vm433_vm12 = vcmp.eq.s32.totalorder %v957_v3, 23 }
 0x535   :  { %v211_v1 = vmul.f32 %v207_v58, %v199_v0  ;;  %v316_v58 = vsel %vm99_vm0, %v314_v56, 0.0 }
 0x537   :  { %212 = vadd.xlane.f32.xlu1 %v211_v1  ;;  %v217_v5 = vpop.xlane.xlu0 %216 }
 0x538   :  { %v218_v6 = vsel %vm210_vm13, %v217_v5, %v203_v60 }
 0x539   :  { %v230_v7 = vmul.f32 %v222_v2, %v218_v6 }
 0x53b   :  { %231 = vadd.xlane.f32.xlu0 %v230_v7 }
 0x5c4   :  { %v213_v8 = vpop.xlane.xlu1 %212 }
 0x5c5   :  { %v214_v10 = vsel %vm210_vm13, %v213_v8, %v199_v0  ;;  %v333_v0 = vld [vmem:[#allocation0 + $0x12] ss:$0 sm:$0xff] }
 0x5c6   :  { %v226_v11 = vmul.f32 %v222_v2, %v214_v10  ;;  %v335_v5 = vsel %vm99_vm0, %v333_v0, 0.0 }
 0x5c8   :  { %227 = vadd.xlane.f32.xlu1 %v226_v11  ;;  %v232_v13 = vpop.xlane.xlu0 %231 }
 0x5c9   :  { %v233_v14 = vsel %vm225_vm14, %v232_v13, %v218_v6  ;;  %v352_v13 = vld [vmem:[#allocation0 + $0x13] ss:$0 sm:$0xff] }
 0x5ca   :  { %v245_v15 = vmul.f32 %v237_v12, %v233_v14 }
 0x5cc   :  { %246 = vadd.xlane.f32.xlu0 %v245_v15 }
 0x655   :  { %v228_v16 = vpop.xlane.xlu1 %227 }
 0x656   :  { %v229_v18 = vsel %vm225_vm14, %v228_v16, %v214_v10  ;;  %v354_v16 = vsel %vm99_vm0, %v352_v13, 0.0  ;;  %vm452_vm14 = vcmp.eq.s32.totalorder %v957_v3, 24 }
 0x657   :  { %v241_v19 = vmul.f32 %v237_v12, %v229_v18 }
 0x659   :  { %242 = vadd.xlane.f32.xlu1 %v241_v19  ;;  %v247_v21 = vpop.xlane.xlu0 %246 }
 0x65a   :  { %v248_v22 = vsel %vm240_vm15, %v247_v21, %v233_v14 }
 0x65b   :  { %v260_v23 = vmul.f32 %v252_v20, %v248_v22 }
 0x65d   :  { %261 = vadd.xlane.f32.xlu0 %v260_v23 }
 0x6e6   :  { %v243_v24 = vpop.xlane.xlu1 %242 }
 0x6e7   :  { %v244_v26 = vsel %vm240_vm15, %v243_v24, %v229_v18  ;;  %v371_v24 = vld [vmem:[#allocation0 + $0x14] ss:$0 sm:$0xff]  ;;  %vm475_vm15 = vcmp.eq.s32.totalorder %v957_v3, 25 }
 0x6e8   :  { %v256_v27 = vmul.f32 %v252_v20, %v244_v26 }
 0x6ea   :  { %257 = vadd.xlane.f32.xlu1 %v256_v27  ;;  %v262_v29 = vpop.xlane.xlu0 %261  ;;  %v373_v27 = vsel %vm99_vm0, %v371_v24, 0.0 }
 0x6eb   :  { %v263_v30 = vsel %vm255_vm1, %v262_v29, %v248_v22 }
 0x6ec   :  { %v275_v31 = vmul.f32 %v267_v28, %v263_v30 }
 0x6ee   :  { %276 = vadd.xlane.f32.xlu0 %v275_v31 }
 0x777   :  { %v258_v32 = vpop.xlane.xlu1 %257 }
 0x778   :  { %v259_v34 = vsel %vm255_vm1, %v258_v32, %v244_v26  ;;  %vm498_vm1 = vcmp.eq.s32.totalorder %v957_v3, 26 }
 0x779   :  { %v271_v35 = vmul.f32 %v267_v28, %v259_v34 }
 0x77b   :  { %272 = vadd.xlane.f32.xlu1 %v271_v35  ;;  %v277_v37 = vpop.xlane.xlu0 %276  ;;  %v390_v35 = vld [vmem:[#allocation0 + $0x15] ss:$0 sm:$0xff] }
 0x77c   :  { %v278_v38 = vsel %vm270_vm2, %v277_v37, %v263_v30 }
 0x77d   :  { %v290_v39 = vmul.f32 %v282_v36, %v278_v38 }
 0x77f   :  { %291 = vadd.xlane.f32.xlu0 %v290_v39 }
 0x808   :  { %v273_v40 = vpop.xlane.xlu1 %272 }
 0x809   :  { %v274_v43 = vsel %vm270_vm2, %v273_v40, %v259_v34  ;;  %vm521_vm2 = vcmp.eq.s32.totalorder %v957_v3, 27 }
 0x80a   :  { %v286_v44 = vmul.f32 %v282_v36, %v274_v43 }
 0x80c   :  { %287 = vadd.xlane.f32.xlu1 %v286_v44  ;;  %v292_v46 = vpop.xlane.xlu0 %291 }
 0x80d   :  { %v293_v47 = vsel %vm285_vm3, %v292_v46, %v278_v38  ;;  %v392_v38 = vsel %vm99_vm0, %v390_v35, 0.0 }
 0x80e   :  { %v305_v48 = vmul.f32 %v297_v45, %v293_v47 }
 0x810   :  { %306 = vadd.xlane.f32.xlu0 %v305_v48 }
 0x899   :  { %v288_v50 = vpop.xlane.xlu1 %287 }
 0x89a   :  { %v289_v51 = vsel %vm285_vm3, %v288_v50, %v274_v43  ;;  %vm544_vm3 = vcmp.eq.s32.totalorder %v957_v3, 28 }
 0x89b   :  { %v301_v53 = vmul.f32 %v297_v45, %v289_v51 }
 0x89d   :  { %302 = vadd.xlane.f32.xlu1 %v301_v53  ;;  %v307_v54 = vpop.xlane.xlu0 %306 }
 0x89e   :  { %v308_v57 = vsel %vm300_vm5, %v307_v54, %v293_v47  ;;  %v409_v47 = vld [vmem:[#allocation0 + $0x16] ss:$0 sm:$0xff] }
 0x89f   :  { %v324_v59 = vmul.f32 %v316_v58, %v308_v57  ;;  %v411_v50 = vsel %vm99_vm0, %v409_v47, 0.0 }
 0x8a1   :  { %310 = vadd.xlane.f32.xlu1 %v309_v55 }
 0x8a5   :  { %325 = vadd.xlane.f32.xlu1 %v324_v59 }
 0x92a   :  { %v303_v60 = vpop.xlane.xlu1 %302 }
 0x92b   :  { %v304_v61 = vsel %vm300_vm5, %v303_v60, %v289_v51 }
 0x92c   :  { %v320_v62 = vmul.f32 %v316_v58, %v304_v61 }
 0x92e   :  { %v311_v63 = vpop.xlane.xlu1 %310  ;;  %321 = vadd.xlane.f32.xlu0 %v320_v62 }
 0x92f   :  { %v312_v1 = vsel %vm300_vm5, %v311_v63, %v89_v52  ;;  %vm590_vm5 = vcmp.eq.s32.totalorder %v957_v3, 30 }
 0x930   :  { %v328_v2 = vmul.f32 %v316_v58, %v312_v1  ;;  %v428_v58 = vld [vmem:[#allocation0 + $0x17] ss:$0 sm:$0xff] }
 0x932   :  { %329 = vadd.xlane.f32.xlu0 %v328_v2  ;;  %v326_v6 = vpop.xlane.xlu1 %325 }
 0x933   :  { %v327_v7 = vsel %vm319_vm6, %v326_v6, %v308_v57  ;;  %v94_v6 = vadd.s32 24, %v959_v4 }
 0x934   :  { %v343_v8 = vmul.f32 %v335_v5, %v327_v7 }
 0x935   :  { %vm95_vm13 = vcmp.eq.s32.totalorder %v957_v3, %v94_v6 }
 0x936   :  { %344 = vadd.xlane.f32.xlu0 %v343_v8  ;;  %v447_v8 = vld [vmem:[#allocation0 + $0x18] ss:$0 sm:$0xff] }
 0x9bb   :  { %v322_v9 = vpop.xlane.xlu0 %321 }
 0x9bc   :  { %v323_v10 = vsel %vm319_vm6, %v322_v9, %v304_v61  ;;  %v430_v61 = vsel %vm99_vm0, %v428_v58, 0.0 }
 0x9bd   :  { %v339_v11 = vmul.f32 %v335_v5, %v323_v10 }
 0x9bf   :  { %340 = vadd.xlane.f32.xlu1 %v339_v11  ;;  %v330_v12 = vpop.xlane.xlu0 %329  ;;  %v449_v11 = vsel %vm99_vm0, %v447_v8, 0.0 }
 0x9c0   :  { %v331_v14 = vsel %vm319_vm6, %v330_v12, %v312_v1 }
 0x9c1   :  { %v347_v15 = vmul.f32 %v335_v5, %v331_v14 }
 0x9c3   :  { %348 = vadd.xlane.f32.xlu1 %v347_v15  ;;  %v345_v17 = vpop.xlane.xlu0 %344 }
 0x9c4   :  { %v346_v18 = vsel %vm338_vm7, %v345_v17, %v327_v7 }
 0x9c5   :  { %v362_v19 = vmul.f32 %v354_v16, %v346_v18 }
 0x9c7   :  { %363 = vadd.xlane.f32.xlu1 %v362_v19 }
 0xa4c   :  { %v341_v20 = vpop.xlane.xlu1 %340 }
 0xa4d   :  { %v342_v21 = vsel %vm338_vm7, %v341_v20, %v323_v10  ;;  %v470_v20 = vld [vmem:[#allocation0 + $0x19] ss:$0 sm:$0xff] }
 0xa4e   :  { %v358_v22 = vmul.f32 %v354_v16, %v342_v21 }
 0xa50   :  { %359 = vadd.xlane.f32.xlu0 %v358_v22  ;;  %v349_v23 = vpop.xlane.xlu1 %348 }
 0xa51   :  { %v350_v25 = vsel %vm338_vm7, %v349_v23, %v331_v14  ;;  %v96_v14 = vsel %vm95_vm13, 1.0, %v937_v41  ;;  %v472_v41 = vsel %vm99_vm0, %v470_v20, 0.0 }
 0xa52   :  { %v366_v26 = vmul.f32 %v354_v16, %v350_v25  ;;  %v465_v4 = vmul.f32 %v449_v11, %v96_v14 }
 0xa54   :  { %367 = vadd.xlane.f32.xlu0 %v366_v26  ;;  %v364_v28 = vpop.xlane.xlu1 %363 }
 0xa55   :  { %v365_v29 = vsel %vm357_vm8, %v364_v28, %v346_v18 }
 0xa56   :  { %v381_v30 = vmul.f32 %v373_v27, %v365_v29 }
 0xa58   :  { %382 = vadd.xlane.f32.xlu0 %v381_v30 }
 0xadd   :  { %v360_v31 = vpop.xlane.xlu0 %359 }
 0xade   :  { %v361_v32 = vsel %vm357_vm8, %v360_v31, %v342_v21 }
 0xadf   :  { %v377_v33 = vmul.f32 %v373_v27, %v361_v32 }
 0xae1   :  { %378 = vadd.xlane.f32.xlu1 %v377_v33  ;;  %v368_v34 = vpop.xlane.xlu0 %367  ;;  %v493_v33 = vld [vmem:[#allocation0 + $0x1a] ss:$0 sm:$0xff] }
 0xae2   :  { %v369_v36 = vsel %vm357_vm8, %v368_v34, %v350_v25 }
 0xae3   :  { %v385_v37 = vmul.f32 %v373_v27, %v369_v36 }
 0xae5   :  { %386 = vadd.xlane.f32.xlu1 %v385_v37  ;;  %v383_v39 = vpop.xlane.xlu0 %382 }
 0xae6   :  { %v384_v40 = vsel %vm376_vm9, %v383_v39, %v365_v29 }
 0xae7   :  { %v400_v42 = vmul.f32 %v392_v38, %v384_v40 }
 0xae9   :  { %401 = vadd.xlane.f32.xlu1 %v400_v42 }
 0xb6e   :  { %v379_v43 = vpop.xlane.xlu1 %378 }
 0xb6f   :  { %v380_v44 = vsel %vm376_vm9, %v379_v43, %v361_v32 }
 0xb70   :  { %v396_v45 = vmul.f32 %v392_v38, %v380_v44 }
 0xb72   :  { %397 = vadd.xlane.f32.xlu0 %v396_v45  ;;  %v387_v46 = vpop.xlane.xlu1 %386 }
 0xb73   :  { %v388_v48 = vsel %vm376_vm9, %v387_v46, %v369_v36  ;;  %v495_v36 = vsel %vm99_vm0, %v493_v33, 0.0 }
 0xb74   :  { %v404_v49 = vmul.f32 %v392_v38, %v388_v48 }
 0xb76   :  { %405 = vadd.xlane.f32.xlu0 %v404_v49  ;;  %v402_v51 = vpop.xlane.xlu1 %401 }
 0xb77   :  { %v403_v52 = vsel %vm395_vm10, %v402_v51, %v384_v40 }
 0xb78   :  { %v419_v53 = vmul.f32 %v411_v50, %v403_v52 }
 0xb7a   :  { %420 = vadd.xlane.f32.xlu0 %v419_v53 }
 0xbff   :  { %v398_v54 = vpop.xlane.xlu0 %397 }
 0xc00   :  { %v399_v55 = vsel %vm395_vm10, %v398_v54, %v380_v44 }
 0xc01   :  { %v415_v56 = vmul.f32 %v411_v50, %v399_v55 }
 0xc03   :  { %416 = vadd.xlane.f32.xlu1 %v415_v56  ;;  %v406_v57 = vpop.xlane.xlu0 %405 }
 0xc04   :  { %v407_v59 = vsel %vm395_vm10, %v406_v57, %v388_v48  ;;  %v516_v48 = vld [vmem:[#allocation0 + $0x1b] ss:$0 sm:$0xff] }
 0xc05   :  { %v423_v60 = vmul.f32 %v411_v50, %v407_v59  ;;  %v518_v51 = vsel %vm99_vm0, %v516_v48, 0.0 }
 0xc07   :  { %424 = vadd.xlane.f32.xlu1 %v423_v60  ;;  %v421_v62 = vpop.xlane.xlu0 %420 }
 0xc08   :  { %v422_v63 = vsel %vm414_vm11, %v421_v62, %v403_v52  ;;  %v539_v62 = vld [vmem:[#allocation0 + $0x1c] ss:$0 sm:$0xff] }
 0xc09   :  { %v438_v0 = vmul.f32 %v430_v61, %v422_v63 }
 0xc0b   :  { %439 = vadd.xlane.f32.xlu1 %v438_v0 }
 0xc90   :  { %v417_v1 = vpop.xlane.xlu1 %416 }
 0xc91   :  { %v418_v2 = vsel %vm414_vm11, %v417_v1, %v399_v55  ;;  %v541_v1 = vsel %vm99_vm0, %v539_v62, 0.0 }
 0xc92   :  { %v434_v5 = vmul.f32 %v430_v61, %v418_v2 }
 0xc94   :  { %435 = vadd.xlane.f32.xlu0 %v434_v5  ;;  %v425_v7 = vpop.xlane.xlu1 %424 }
 0xc95   :  { %v426_v9 = vsel %vm414_vm11, %v425_v7, %v407_v59 }
 0xc96   :  { %v442_v10 = vmul.f32 %v430_v61, %v426_v9 }
 0xc98   :  { %443 = vadd.xlane.f32.xlu0 %v442_v10  ;;  %v440_v12 = vpop.xlane.xlu1 %439 }
 0xc99   :  { %v441_v13 = vsel %vm433_vm12, %v440_v12, %v422_v63 }
 0xc9a   :  { %v457_v15 = vmul.f32 %v449_v11, %v441_v13 }
 0xc9c   :  { %458 = vadd.xlane.f32.xlu0 %v457_v15 }
 0xca0   :  { %466 = vadd.xlane.f32.xlu0 %v465_v4 }
 0xd21   :  { %v436_v16 = vpop.xlane.xlu0 %435 }
 0xd22   :  { %v437_v17 = vsel %vm433_vm12, %v436_v16, %v418_v2 }
 0xd23   :  { %v453_v18 = vmul.f32 %v449_v11, %v437_v17 }
 0xd25   :  { %454 = vadd.xlane.f32.xlu1 %v453_v18  ;;  %v444_v19 = vpop.xlane.xlu0 %443 }
 0xd26   :  { %v445_v21 = vsel %vm433_vm12, %v444_v19, %v426_v9 }
 0xd27   :  { %v461_v22 = vmul.f32 %v449_v11, %v445_v21 }
 0xd29   :  { %462 = vadd.xlane.f32.xlu1 %v461_v22  ;;  %v459_v23 = vpop.xlane.xlu0 %458 }
 0xd2a   :  { %v460_v24 = vsel %vm452_vm14, %v459_v23, %v441_v13 }
 0xd2b   :  { %v480_v25 = vmul.f32 %v472_v41, %v460_v24 }
 0xd2d   :  { %481 = vadd.xlane.f32.xlu0 %v480_v25  ;;  %v467_v26 = vpop.xlane.xlu0 %466 }
 0xd2e   :  { %v468_v27 = vsel %vm452_vm14, %v467_v26, %v96_v14  ;;  %v562_v14 = vld [vmem:[#allocation0 + $0x1d] ss:$0 sm:$0xff]  ;;  %v585_v26 = vld [vmem:[#allocation0 + $0x1e] ss:$0 sm:$0xff] }
 0xd2f   :  { %v488_v28 = vmul.f32 %v472_v41, %v468_v27  ;;  %v564_v16 = vsel %vm99_vm0, %v562_v14, 0.0 }
 0xd31   :  { %489 = vadd.xlane.f32.xlu0 %v488_v28 }
 0xdb2   :  { %v455_v29 = vpop.xlane.xlu1 %454 }
 0xdb3   :  { %v456_v30 = vsel %vm452_vm14, %v455_v29, %v437_v17  ;;  %v587_v29 = vsel %vm99_vm0, %v585_v26, 0.0 }
 0xdb4   :  { %v476_v31 = vmul.f32 %v472_v41, %v456_v30 }
 0xdb6   :  { %477 = vadd.xlane.f32.xlu1 %v476_v31  ;;  %v463_v32 = vpop.xlane.xlu1 %462 }
 0xdb7   :  { %v464_v34 = vsel %vm452_vm14, %v463_v32, %v445_v21 }
 0xdb8   :  { %v484_v35 = vmul.f32 %v472_v41, %v464_v34 }
 0xdba   :  { %485 = vadd.xlane.f32.xlu1 %v484_v35  ;;  %v482_v37 = vpop.xlane.xlu0 %481 }
 0xdbb   :  { %v483_v38 = vsel %vm475_vm15, %v482_v37, %v460_v24 }
 0xdbc   :  { %v503_v39 = vmul.f32 %v495_v36, %v483_v38 }
 0xdbe   :  { %504 = vadd.xlane.f32.xlu0 %v503_v39  ;;  %v490_v40 = vpop.xlane.xlu0 %489 }
 0xdbf   :  { %v491_v42 = vsel %vm475_vm15, %v490_v40, %v468_v27  ;;  %v608_v40 = vld [vmem:[#allocation0 + $0x1f] ss:$0 sm:$0xff] }
 0xdc0   :  { %v511_v43 = vmul.f32 %v495_v36, %v491_v42 }
 0xdc2   :  { %512 = vadd.xlane.f32.xlu0 %v511_v43 }
 0xe43   :  { %v478_v44 = vpop.xlane.xlu1 %477 }
 0xe44   :  { %v479_v45 = vsel %vm475_vm15, %v478_v44, %v456_v30  ;;  %v610_v44 = vsel %vm99_vm0, %v608_v40, 0.0  ;;  %vm613_vm0 = vcmp.eq.s32.totalorder %v957_v3, 31 }
 0xe45   :  { %v499_v46 = vmul.f32 %v495_v36, %v479_v45 }
 0xe47   :  { %500 = vadd.xlane.f32.xlu1 %v499_v46  ;;  %v486_v47 = vpop.xlane.xlu1 %485 }
 0xe48   :  { %v487_v49 = vsel %vm475_vm15, %v486_v47, %v464_v34 }
 0xe49   :  { %v507_v50 = vmul.f32 %v495_v36, %v487_v49 }
 0xe4b   :  { %508 = vadd.xlane.f32.xlu1 %v507_v50  ;;  %v505_v52 = vpop.xlane.xlu0 %504 }
 0xe4c   :  { %v506_v53 = vsel %vm498_vm1, %v505_v52, %v483_v38 }
 0xe4d   :  { %v526_v54 = vmul.f32 %v518_v51, %v506_v53 }
 0xe4f   :  { %527 = vadd.xlane.f32.xlu0 %v526_v54  ;;  %v513_v55 = vpop.xlane.xlu0 %512 }
 0xe50   :  { %v514_v56 = vsel %vm498_vm1, %v513_v55, %v491_v42 }
 0xe51   :  { %v534_v57 = vmul.f32 %v518_v51, %v514_v56 }
 0xe53   :  { %535 = vadd.xlane.f32.xlu0 %v534_v57 }
 0xed4   :  { %v501_v58 = vpop.xlane.xlu1 %500 }
 0xed5   :  { %v502_v59 = vsel %vm498_vm1, %v501_v58, %v479_v45 }
 0xed6   :  { %v522_v60 = vmul.f32 %v518_v51, %v502_v59 }
 0xed8   :  { %523 = vadd.xlane.f32.xlu1 %v522_v60  ;;  %v509_v61 = vpop.xlane.xlu1 %508 }
 0xed9   :  { %v510_v63 = vsel %vm498_vm1, %v509_v61, %v487_v49 }
 0xeda   :  { %v530_v0 = vmul.f32 %v518_v51, %v510_v63 }
 0xedc   :  { %531 = vadd.xlane.f32.xlu1 %v530_v0  ;;  %v528_v2 = vpop.xlane.xlu0 %527 }
 0xedd   :  { %v529_v5 = vsel %vm521_vm2, %v528_v2, %v506_v53 }
 0xede   :  { %v549_v6 = vmul.f32 %v541_v1, %v529_v5 }
 0xee0   :  { %550 = vadd.xlane.f32.xlu0 %v549_v6  ;;  %v536_v7 = vpop.xlane.xlu0 %535 }
 0xee1   :  { %v537_v8 = vsel %vm521_vm2, %v536_v7, %v514_v56 }
 0xee2   :  { %v557_v9 = vmul.f32 %v541_v1, %v537_v8 }
 0xee4   :  { %558 = vadd.xlane.f32.xlu0 %v557_v9 }
 0xf65   :  { %v524_v10 = vpop.xlane.xlu1 %523 }
 0xf66   :  { %v525_v11 = vsel %vm521_vm2, %v524_v10, %v502_v59 }
 0xf67   :  { %v545_v12 = vmul.f32 %v541_v1, %v525_v11 }
 0xf69   :  { %546 = vadd.xlane.f32.xlu1 %v545_v12  ;;  %v532_v13 = vpop.xlane.xlu1 %531 }
 0xf6a   :  { %v533_v15 = vsel %vm521_vm2, %v532_v13, %v510_v63 }
 0xf6b   :  { %v553_v4 = vmul.f32 %v541_v1, %v533_v15 }
 0xf6d   :  { %554 = vadd.xlane.f32.xlu1 %v553_v4  ;;  %v551_v17 = vpop.xlane.xlu0 %550 }
 0xf6e   :  { %v552_v18 = vsel %vm544_vm3, %v551_v17, %v529_v5 }
 0xf6f   :  { %v572_v19 = vmul.f32 %v564_v16, %v552_v18 }
 0xf71   :  { %573 = vadd.xlane.f32.xlu0 %v572_v19  ;;  %v559_v20 = vpop.xlane.xlu0 %558 }
 0xf72   :  { %v560_v21 = vsel %vm544_vm3, %v559_v20, %v537_v8 }
 0xf73   :  { %v580_v22 = vmul.f32 %v564_v16, %v560_v21 }
 0xf75   :  { %581 = vadd.xlane.f32.xlu0 %v580_v22 }
 0xff6   :  { %v547_v41 = vpop.xlane.xlu1 %546 }
 0xff7   :  { %v548_v23 = vsel %vm544_vm3, %v547_v41, %v525_v11 }
 0xff8   :  { %v568_v24 = vmul.f32 %v564_v16, %v548_v23 }
 0xffa   :  { %569 = vadd.xlane.f32.xlu1 %v568_v24  ;;  %v555_v25 = vpop.xlane.xlu1 %554 }
 0xffb   :  { %v556_v27 = vsel %vm544_vm3, %v555_v25, %v533_v15 }
 0xffc   :  { %v576_v28 = vmul.f32 %v564_v16, %v556_v27 }
 0xffe   :  { %577 = vadd.xlane.f32.xlu1 %v576_v28  ;;  %v574_v30 = vpop.xlane.xlu0 %573 }
 0xfff   :  { %v575_v31 = vsel %vm567_vm4, %v574_v30, %v552_v18 }
0x1000   :  { %v595_v32 = vmul.f32 %v587_v29, %v575_v31 }
0x1002   :  { %596 = vadd.xlane.f32.xlu0 %v595_v32  ;;  %v582_v33 = vpop.xlane.xlu0 %581 }
0x1003   :  { %v583_v34 = vsel %vm567_vm4, %v582_v33, %v560_v21 }
0x1004   :  { %v603_v35 = vmul.f32 %v587_v29, %v583_v34 }
0x1006   :  { %604 = vadd.xlane.f32.xlu0 %v603_v35 }
0x1087   :  { %v570_v36 = vpop.xlane.xlu1 %569 }
0x1088   :  { %v571_v37 = vsel %vm567_vm4, %v570_v36, %v548_v23 }
0x1089   :  { %v591_v38 = vmul.f32 %v587_v29, %v571_v37 }
0x108b   :  { %592 = vadd.xlane.f32.xlu1 %v591_v38  ;;  %v578_v39 = vpop.xlane.xlu1 %577 }
0x108c   :  { %v579_v42 = vsel %vm567_vm4, %v578_v39, %v556_v27 }
0x108d   :  { %v599_v43 = vmul.f32 %v587_v29, %v579_v42 }
0x108f   :  { %600 = vadd.xlane.f32.xlu1 %v599_v43  ;;  %v597_v45 = vpop.xlane.xlu0 %596 }
0x1090   :  { %v598_v46 = vsel %vm590_vm5, %v597_v45, %v575_v31 }
0x1091   :  { %v618_v47 = vmul.f32 %v610_v44, %v598_v46 }
0x1093   :  { %619 = vadd.xlane.f32.xlu0 %v618_v47  ;;  %v605_v48 = vpop.xlane.xlu0 %604 }
0x1094   :  { %v606_v49 = vsel %vm590_vm5, %v605_v48, %v583_v34 }
0x1095   :  { %v626_v50 = vmul.f32 %v610_v44, %v606_v49 }
0x1097   :  { %627 = vadd.xlane.f32.xlu0 %v626_v50 }
0x1118   :  { %v593_v51 = vpop.xlane.xlu1 %592 }
0x1119   :  { %v594_v52 = vsel %vm590_vm5, %v593_v51, %v571_v37 }
0x111a   :  { %v614_v53 = vmul.f32 %v610_v44, %v594_v52 }
0x111c   :  { %615 = vadd.xlane.f32.xlu1 %v614_v53  ;;  %v601_v54 = vpop.xlane.xlu1 %600 }
0x111d   :  { %v602_v55 = vsel %vm590_vm5, %v601_v54, %v579_v42 }
0x111e   :  { %v622_v56 = vmul.f32 %v610_v44, %v602_v55 }
0x1120   :  { %623 = vadd.xlane.f32.xlu1 %v622_v56  ;;  %v620_v57 = vpop.xlane.xlu0 %619 }
0x1121   :  { %v621_v58 = vsel %vm613_vm0, %v620_v57, %v598_v46 }
0x1122   :  { %632 = vst [vmem:[#allocation1 + $0x8] sm:$0xff] %v621_v58 }
0x1124   :  { %v628_v59 = vpop.xlane.xlu0 %627 }
0x1125   :  { %v629_v60 = vsel %vm613_vm0, %v628_v59, %v606_v49 }
0x1126   :  { %636 = vst [vmem:[#allocation1 + $0x18] sm:$0xff] %v629_v60 }
0x11a9   :  { %v616_v61 = vpop.xlane.xlu1 %615 }
0x11aa   :  { %v617_v62 = vsel %vm613_vm0, %v616_v61, %v594_v52  }
0x11ab   :  { %630 = vst [vmem:[#allocation1] sm:$0xff] %v617_v62 }
0x11ad   :  { %v624_v63 = vpop.xlane.xlu1 %623 }
0x11ae   :  { %v625_v0 = vsel %vm613_vm0, %v624_v63, %v602_v55 }
0x11af   :  { %634 = vst [vmem:[#allocation1 + $0x10] sm:$0xff] %v625_v0 }
0x11b0 LB:  { %s935_s17 = sphi %s933_s17, %s686_s17   ;;  %s931_s16 = sphi %s929_s16, %s687_s16  }
0x11b6   : > { %v684_v3 = vld [vmem:[%s935_s17] sm:$0xff]  ;;  %s686_s17 = scalar_lea.vmem %s935_s17, 8  }
0x11b7   : > { %685 = vst [vmem:[%s931_s16] sm:$0xff] %v684_v3  ;;  %s687_s16 = scalar_lea.vmem %s931_s16, 8   ;;  %p681_p2 = scmp.gt.s32.totalorder %s686_s17, [#allocation1 + $0x18] }
0x11b9   :  { %683 = sbr.rel (!%p681_p2) target bundleno = 4528 (0x11b0), region = 136 }

// kernel: custom-call.54
= control target key start
LH: loop header
LB: loop body
LE: loop exit
PB: predicated region body
PF: predicated region fallthrough
CT: control target
= control target key end

     0   :  { %v1561_v0 = vmov 0.0   ;;  %vm53_vm0 = vcmask 7168   ;;  %vm110_vm1 = vcmask 15368   ;;  %vm127_vm2 = vcmask 1047553   ;;  %s1900_s0 = inlined_call_operand.vmem [shape: f32[32,32], index: 0, kind: input, shape index: {}]   ;;  %s1901_s1 = inlined_call_operand.vmem [shape: f32[32,32], index: 1, kind: output, shape index: {}]  }
   0x1   :  { %46 = vst [vmem:[#allocation1] sm:$0xff] %v1561_v0  ;;  %v1575_v4 = vld [vmem:[%s1900_s0] sm:$0xff]  ;;  %v1581_v5 = vld [vmem:[%s1900_s0 + $0x8] sm:$0xff]  ;;  %v1601_v22 = vld [vmem:[%s1900_s0 + $0x10] sm:$0xff]  ;;  %vm171_vm4 = vcmask 23568   ;;  %vm188_vm5 = vcmask 1047554  }
   0x2   :  { %36 = vst [vmem:[#allocation0] sm:$0xff] %v1575_v4  ;;  %38 = vst [vmem:[#allocation0 + $0x8] sm:$0xff] %v1581_v5  ;;  %v1626_v46 = vld [vmem:[%s1900_s0 + $0x18] sm:$0xff]  ;;  %vm232_vm7 = vcmask 31768   ;;  %vm249_vm8 = vcmask 1047555   ;;  %vm293_vm10 = vcmask 39968  }
   0x3   :  { %40 = vst [vmem:[#allocation0 + $0x10] sm:$0xff] %v1601_v22  ;;  %vm128_vm3 = vmand %vm110_vm1, %vm127_vm2  ;;  %vm310_vm11 = vcmask 1047556   ;;  %vm354_vm13 = vcmask 48168   ;;  %vm371_vm14 = vcmask 1047557  }
   0x4   :  { %42 = vst [vmem:[#allocation0 + $0x18] sm:$0xff] %v1626_v46  ;;  %vm189_vm6 = vmand %vm171_vm4, %vm188_vm5 }
   0x5   :  { %vm250_vm9 = vmand %vm232_vm7, %vm249_vm8 }
   0x6   :  { %vm311_vm12 = vmand %vm293_vm10, %vm310_vm11 }
   0x7   :  { %vm372_vm15 = vmand %vm354_vm13, %vm371_vm14 }
   0x8   :  { %v54_v1 = vld [vmem:[#allocation1] ss:$0 sm:$0xff] }
   0x9   :  { %v56_v2 = vmul.f32 %v54_v1, %v54_v1  ;;  %v75_v3 = vmul.f32 0.0, %v54_v1  ;;  %v55_v6 = vld [vmem:[#allocation0] ss:$0 sm:$0xff]  ;;  %v114_v23 = vld [vmem:[#allocation0 + $0x1] ss:$0 sm:$0xff] }
   0xa   :  { %v175_v47 = vld [vmem:[#allocation0 + $0x2] ss:$0 sm:$0xff] }
   0xb   :  { %57 = vadd.xlane.f32.xlu0 %v56_v2  ;;  %76 = vadd.xlane.f32.xlu1 %v75_v3 }
   0xf   :  { %64 = vadd.xlane.f32.xlu0 %v75_v3 }
  0x98   :  { %v58_v7 = vpop.xlane.xlu0 %57  ;;  %v77_v13 = vpop.xlane.xlu1 %76 }
  0x99   :  { %v59_v8 = vsub.f32 %v55_v6, %v58_v7  ;;  %v78_v15 = vsub.f32 %v1581_v5, %v77_v13 }
  0x9b   :  { %1496 = vrsqrt.f32 %v59_v8 }
  0x9c   :  { %v65_v9 = vpop.xlane.xlu0 %64 }
  0x9d   :  { %v66_v10 = vsub.f32 %v1575_v4, %v65_v9 }
  0xa5   :  { %v1585_v11 = vpop.eup %1496 }
  0xa6   :  { %v67_v12 = vmul.f32 %v1585_v11, %v66_v10  ;;  %v79_v16 = vmul.f32 %v1585_v11, %v78_v15 }
  0xa8   :  { %v68_v14 = vsel %vm53_vm0, %v67_v12, 0.0  ;;  %v80_v17 = vsel %vm53_vm0, %v79_v16, 0.0 }
  0xa9   :  { %70 = vst [vmem:[#allocation1] sm:$0xff] %v68_v14 }
  0xb0   :  { %v1592_v18 = vld [vmem:[#allocation1 + $0x1] ss:$0 sm:$0xff] }
  0xb1   :  { %v122_v19 = vmul.f32 %v1592_v18, %v68_v14  ;;  %v115_v20 = vmul.f32 %v1592_v18, %v1592_v18  ;;  %v136_v21 = vmul.f32 %v1592_v18, %v80_v17 }
  0xb3   :  { %123 = vadd.xlane.f32.xlu0 %v122_v19  ;;  %116 = vadd.xlane.f32.xlu1 %v115_v20 }
  0xb7   :  { %137 = vadd.xlane.f32.xlu0 %v136_v21  ;;  %89 = vadd.xlane.f32.xlu1 %v75_v3 }
 0x140   :  { %v117_v24 = vpop.xlane.xlu1 %116  ;;  %v124_v26 = vpop.xlane.xlu0 %123 }
 0x141   :  { %v118_v25 = vsub.f32 %v114_v23, %v117_v24  ;;  %v125_v27 = vsub.f32 %v1575_v4, %v124_v26 }
 0x143   :  { %1498 = vrsqrt.f32 %v118_v25 }
 0x144   :  { %v90_v29 = vpop.xlane.xlu1 %89  ;;  %v138_v35 = vpop.xlane.xlu0 %137 }
 0x145   :  { %v91_v32 = vsub.f32 %v1601_v22, %v90_v29  ;;  %v139_v36 = vsub.f32 %v1581_v5, %v138_v35 }
 0x147   :  { %v92_v34 = vmul.f32 %v1585_v11, %v91_v32 }
 0x149   :  { %v93_v37 = vsel %vm53_vm0, %v92_v34, 0.0 }
 0x14a   :  { %v149_v43 = vmul.f32 %v1592_v18, %v93_v37 }
 0x14d   :  { %v1605_v28 = vpop.eup %1498 }
 0x14e   :  { %v126_v30 = vmul.f32 %v1605_v28, %v125_v27  ;;  %v140_v38 = vmul.f32 %v1605_v28, %v139_v36 }
 0x150   :  { %v129_v31 = vsel %vm128_vm3, %v126_v30, 0.0  ;;  %v141_v42 = vsel %vm110_vm1, %v140_v38, 0.0 }
 0x151   :  { %v130_v33 = vadd.f32 %v129_v31, %v68_v14  ;;  %v142_v44 = vadd.f32 %v141_v42, %v80_v17  ;;  %v236_v14 = vld [vmem:[#allocation0 + $0x3] ss:$0 sm:$0xff] }
 0x153   :  { %131 = vst [vmem:[#allocation1] sm:$0xff] %v130_v33 }
 0x15a   :  { %v1615_v39 = vld [vmem:[#allocation1 + $0x2] ss:$0 sm:$0xff] }
 0x15b   :  { %v183_v40 = vmul.f32 %v1615_v39, %v130_v33  ;;  %v176_v41 = vmul.f32 %v1615_v39, %v1615_v39  ;;  %v197_v45 = vmul.f32 %v1615_v39, %v142_v44 }
 0x15d   :  { %184 = vadd.xlane.f32.xlu0 %v183_v40  ;;  %177 = vadd.xlane.f32.xlu1 %v176_v41 }
 0x161   :  { %102 = vadd.xlane.f32.xlu1 %v75_v3  ;;  %150 = vadd.xlane.f32.xlu0 %v149_v43 }
 0x165   :  { %198 = vadd.xlane.f32.xlu1 %v197_v45 }
 0x1ea   :  { %v178_v48 = vpop.xlane.xlu1 %177  ;;  %v185_v50 = vpop.xlane.xlu0 %184 }
 0x1eb   :  { %v179_v49 = vsub.f32 %v175_v47, %v178_v48  ;;  %v186_v51 = vsub.f32 %v1575_v4, %v185_v50  ;;  %v297_v47 = vld [vmem:[#allocation0 + $0x4] ss:$0 sm:$0xff] }
 0x1ed   :  { %1500 = vrsqrt.f32 %v179_v49 }
 0x1ee   :  { %v151_v53 = vpop.xlane.xlu0 %150  ;;  %v103_v54 = vpop.xlane.xlu1 %102 }
 0x1ef   :  { %v152_v56 = vsub.f32 %v1601_v22, %v151_v53  ;;  %v104_v57 = vsub.f32 %v1626_v46, %v103_v54 }
 0x1f1   :  { %v153_v60 = vmul.f32 %v1605_v28, %v152_v56  ;;  %v105_v61 = vmul.f32 %v1585_v11, %v104_v57 }
 0x1f2   :  { %v199_v62 = vpop.xlane.xlu1 %198 }
 0x1f3   :  { %v154_v63 = vsel %vm110_vm1, %v153_v60, 0.0  ;;  %v106_v0 = vsel %vm53_vm0, %v105_v61, 0.0  ;;  %v200_v1 = vsub.f32 %v1581_v5, %v199_v62  ;;  %vm415_vm0 = vcmask 56368  }
 0x1f4   :  { %v155_v6 = vadd.f32 %v154_v63, %v93_v37  ;;  %v162_v11 = vmul.f32 %v1592_v18, %v106_v0 }
 0x1f6   :  { %v210_v10 = vmul.f32 %v1615_v39, %v155_v6 }
 0x1f7   :  { %v1630_v52 = vpop.eup %1500 }
 0x1f8   :  { %v187_v55 = vmul.f32 %v1630_v52, %v186_v51  ;;  %v201_v2 = vmul.f32 %v1630_v52, %v200_v1 }
 0x1fa   :  { %v190_v58 = vsel %vm189_vm6, %v187_v55, 0.0  ;;  %v202_v9 = vsel %vm171_vm4, %v201_v2, 0.0  ;;  %vm537_vm6 = vcmask 72768  }
 0x1fb   :  { %v191_v59 = vadd.f32 %v190_v58, %v130_v33  ;;  %v203_v12 = vadd.f32 %v202_v9, %v142_v44 }
 0x1fd   :  { %192 = vst [vmem:[#allocation1] sm:$0xff] %v191_v59 }
 0x204   :  { %v1643_v3 = vld [vmem:[#allocation1 + $0x3] ss:$0 sm:$0xff] }
 0x205   :  { %v244_v7 = vmul.f32 %v1643_v3, %v191_v59  ;;  %v237_v8 = vmul.f32 %v1643_v3, %v1643_v3  ;;  %v258_v13 = vmul.f32 %v1643_v3, %v203_v12 }
 0x207   :  { %245 = vadd.xlane.f32.xlu1 %v244_v7  ;;  %238 = vadd.xlane.f32.xlu0 %v237_v8 }
 0x20b   :  { %211 = vadd.xlane.f32.xlu1 %v210_v10  ;;  %163 = vadd.xlane.f32.xlu0 %v162_v11 }
 0x20f   :  { %259 = vadd.xlane.f32.xlu0 %v258_v13 }
 0x294   :  { %v239_v15 = vpop.xlane.xlu0 %238  ;;  %v246_v17 = vpop.xlane.xlu1 %245 }
 0x295   :  { %v240_v16 = vsub.f32 %v236_v14, %v239_v15  ;;  %v247_v19 = vsub.f32 %v1575_v4, %v246_v17  ;;  %v358_v15 = vld [vmem:[#allocation0 + $0x5] ss:$0 sm:$0xff] }
 0x297   :  { %1502 = vrsqrt.f32 %v240_v16 }
 0x298   :  { %v164_v18 = vpop.xlane.xlu0 %163  ;;  %v212_v21 = vpop.xlane.xlu1 %211 }
 0x299   :  { %v165_v25 = vsub.f32 %v1626_v46, %v164_v18  ;;  %v213_v26 = vsub.f32 %v1601_v22, %v212_v21 }
 0x29b   :  { %v166_v29 = vmul.f32 %v1605_v28, %v165_v25  ;;  %v214_v30 = vmul.f32 %v1630_v52, %v213_v26 }
 0x29c   :  { %v260_v31 = vpop.xlane.xlu0 %259 }
 0x29d   :  { %v167_v32 = vsel %vm110_vm1, %v166_v29, 0.0  ;;  %v215_v33 = vsel %vm171_vm4, %v214_v30, 0.0  ;;  %v261_v34 = vsub.f32 %v1581_v5, %v260_v31  ;;  %vm432_vm1 = vcmask 1047558  }
 0x29e   :  { %v168_v37 = vadd.f32 %v167_v32, %v106_v0  ;;  %v216_v38 = vadd.f32 %v215_v33, %v155_v6  ;;  %vm433_vm3 = vmand %vm415_vm0, %vm432_vm1 }
 0x2a0   :  { %v223_v42 = vmul.f32 %v1615_v39, %v168_v37  ;;  %v271_v43 = vmul.f32 %v1643_v3, %v216_v38 }
 0x2a1   :  { %v1653_v20 = vpop.eup %1502 }
 0x2a2   :  { %v248_v23 = vmul.f32 %v1653_v20, %v247_v19  ;;  %v262_v35 = vmul.f32 %v1653_v20, %v261_v34 }
 0x2a4   :  { %v251_v24 = vsel %vm250_vm9, %v248_v23, 0.0  ;;  %v263_v41 = vsel %vm232_vm7, %v262_v35, 0.0 }
 0x2a5   :  { %v252_v27 = vadd.f32 %v251_v24, %v191_v59  ;;  %v264_v44 = vadd.f32 %v263_v41, %v203_v12 }
 0x2a7   :  { %253 = vst [vmem:[#allocation1] sm:$0xff] %v252_v27 }
 0x2ae   :  { %v1666_v36 = vld [vmem:[#allocation1 + $0x4] ss:$0 sm:$0xff] }
 0x2af   :  { %v305_v40 = vmul.f32 %v1666_v36, %v252_v27  ;;  %v298_v28 = vmul.f32 %v1666_v36, %v1666_v36  ;;  %v319_v45 = vmul.f32 %v1666_v36, %v264_v44 }
 0x2b1   :  { %306 = vadd.xlane.f32.xlu0 %v305_v40  ;;  %299 = vadd.xlane.f32.xlu1 %v298_v28 }
 0x2b5   :  { %224 = vadd.xlane.f32.xlu1 %v223_v42  ;;  %272 = vadd.xlane.f32.xlu0 %v271_v43 }
 0x2b9   :  { %320 = vadd.xlane.f32.xlu1 %v319_v45 }
 0x33e   :  { %v300_v48 = vpop.xlane.xlu1 %299  ;;  %v307_v50 = vpop.xlane.xlu0 %306 }
 0x33f   :  { %v301_v49 = vsub.f32 %v297_v47, %v300_v48  ;;  %v308_v51 = vsub.f32 %v1575_v4, %v307_v50  ;;  %v419_v48 = vld [vmem:[#allocation0 + $0x6] ss:$0 sm:$0xff] }
 0x341   :  { %1504 = vrsqrt.f32 %v301_v49 }
 0x342   :  { %v273_v39 = vpop.xlane.xlu0 %272  ;;  %v225_v54 = vpop.xlane.xlu1 %224 }
 0x343   :  { %v274_v56 = vsub.f32 %v1601_v22, %v273_v39  ;;  %v226_v57 = vsub.f32 %v1626_v46, %v225_v54 }
 0x345   :  { %v275_v60 = vmul.f32 %v1653_v20, %v274_v56  ;;  %v227_v61 = vmul.f32 %v1630_v52, %v226_v57 }
 0x346   :  { %v321_v62 = vpop.xlane.xlu1 %320 }
 0x347   :  { %v276_v63 = vsel %vm232_vm7, %v275_v60, 0.0  ;;  %v228_v0 = vsel %vm171_vm4, %v227_v61, 0.0  ;;  %v322_v1 = vsub.f32 %v1581_v5, %v321_v62  ;;  %vm476_vm4 = vcmask 64568  }
 0x348   :  { %v277_v7 = vadd.f32 %v276_v63, %v216_v38  ;;  %v229_v8 = vadd.f32 %v228_v0, %v168_v37 }
 0x34a   :  { %v332_v11 = vmul.f32 %v1666_v36, %v277_v7  ;;  %v284_v12 = vmul.f32 %v1643_v3, %v229_v8 }
 0x34b   :  { %v1676_v53 = vpop.eup %1504 }
 0x34c   :  { %v309_v55 = vmul.f32 %v1676_v53, %v308_v51  ;;  %v323_v2 = vmul.f32 %v1676_v53, %v322_v1 }
 0x34e   :  { %v312_v58 = vsel %vm311_vm12, %v309_v55, 0.0  ;;  %v324_v52 = vsel %vm293_vm10, %v323_v2, 0.0 }
 0x34f   :  { %v313_v59 = vadd.f32 %v312_v58, %v252_v27  ;;  %v325_v13 = vadd.f32 %v324_v52, %v264_v44 }
 0x351   :  { %314 = vst [vmem:[#allocation1] sm:$0xff] %v313_v59 }
 0x358   :  { %v1689_v6 = vld [vmem:[#allocation1 + $0x5] ss:$0 sm:$0xff] }
 0x359   :  { %v366_v9 = vmul.f32 %v1689_v6, %v313_v59  ;;  %v359_v10 = vmul.f32 %v1689_v6, %v1689_v6  ;;  %v380_v14 = vmul.f32 %v1689_v6, %v325_v13 }
 0x35b   :  { %367 = vadd.xlane.f32.xlu1 %v366_v9  ;;  %360 = vadd.xlane.f32.xlu0 %v359_v10 }
 0x35f   :  { %333 = vadd.xlane.f32.xlu1 %v332_v11  ;;  %285 = vadd.xlane.f32.xlu0 %v284_v12 }
 0x363   :  { %381 = vadd.xlane.f32.xlu0 %v380_v14 }
 0x3e8   :  { %v361_v16 = vpop.xlane.xlu0 %360  ;;  %v368_v19 = vpop.xlane.xlu1 %367 }
 0x3e9   :  { %v362_v17 = vsub.f32 %v358_v15, %v361_v16  ;;  %v369_v18 = vsub.f32 %v1575_v4, %v368_v19 }
 0x3eb   :  { %1506 = vrsqrt.f32 %v362_v17 }
 0x3ec   :  { %v286_v3 = vpop.xlane.xlu0 %285  ;;  %v334_v23 = vpop.xlane.xlu1 %333 }
 0x3ed   :  { %v287_v26 = vsub.f32 %v1626_v46, %v286_v3  ;;  %v335_v27 = vsub.f32 %v1601_v22, %v334_v23 }
 0x3ef   :  { %v288_v30 = vmul.f32 %v1653_v20, %v287_v26  ;;  %v336_v31 = vmul.f32 %v1676_v53, %v335_v27 }
 0x3f0   :  { %v382_v32 = vpop.xlane.xlu0 %381 }
 0x3f1   :  { %v289_v33 = vsel %vm232_vm7, %v288_v30, 0.0  ;;  %v337_v34 = vsel %vm293_vm10, %v336_v31, 0.0  ;;  %v383_v35 = vsub.f32 %v1581_v5, %v382_v32  ;;  %vm586_vm7 = vcmask 80968  }
 0x3f2   :  { %v290_v40 = vadd.f32 %v289_v33, %v229_v8  ;;  %v338_v28 = vadd.f32 %v337_v34, %v277_v7  ;;  %vm606_vm9 = vmand %vm586_vm7, %vm127_vm2 }
 0x3f4   :  { %v345_v43 = vmul.f32 %v1666_v36, %v290_v40  ;;  %v393_v44 = vmul.f32 %v1689_v6, %v338_v28 }
 0x3f5   :  { %v1699_v21 = vpop.eup %1506 }
 0x3f6   :  { %v370_v24 = vmul.f32 %v1699_v21, %v369_v18  ;;  %v384_v37 = vmul.f32 %v1699_v21, %v383_v35  ;;  %v480_v18 = vld [vmem:[#allocation0 + $0x7] ss:$0 sm:$0xff] }
 0x3f8   :  { %v373_v25 = vsel %vm372_vm15, %v370_v24, 0.0  ;;  %v385_v20 = vsel %vm354_vm13, %v384_v37, 0.0 }
 0x3f9   :  { %v374_v29 = vadd.f32 %v373_v25, %v313_v59  ;;  %v386_v45 = vadd.f32 %v385_v20, %v325_v13 }
 0x3fb   :  { %375 = vst [vmem:[#allocation1] sm:$0xff] %v374_v29 }
 0x402   :  { %v417_v38 = vld [vmem:[#allocation1 + $0x6] ss:$0 sm:$0xff] }
 0x403   :  { %v427_v41 = vmul.f32 %v417_v38, %v374_v29  ;;  %v420_v42 = vmul.f32 %v417_v38, %v417_v38  ;;  %v441_v47 = vmul.f32 %v417_v38, %v386_v45 }
 0x405   :  { %428 = vadd.xlane.f32.xlu0 %v427_v41  ;;  %421 = vadd.xlane.f32.xlu1 %v420_v42 }
 0x409   :  { %346 = vadd.xlane.f32.xlu1 %v345_v43  ;;  %394 = vadd.xlane.f32.xlu0 %v393_v44 }
 0x40d   :  { %442 = vadd.xlane.f32.xlu1 %v441_v47 }
 0x492   :  { %v422_v49 = vpop.xlane.xlu1 %421  ;;  %v429_v54 = vpop.xlane.xlu0 %428 }
 0x493   :  { %v423_v50 = vsub.f32 %v419_v48, %v422_v49  ;;  %v430_v57 = vsub.f32 %v1575_v4, %v429_v54 }
 0x495   :  { %1508 = vrsqrt.f32 %v423_v50 }
 0x496   :  { %v347_v51 = vpop.xlane.xlu1 %346  ;;  %v395_v60 = vpop.xlane.xlu0 %394 }
 0x497   :  { %v348_v39 = vsub.f32 %v1626_v46, %v347_v51  ;;  %v396_v63 = vsub.f32 %v1601_v22, %v395_v60 }
 0x499   :  { %v349_v55 = vmul.f32 %v1676_v53, %v348_v39  ;;  %v397_v4 = vmul.f32 %v1699_v21, %v396_v63  ;;  %v541_v39 = vld [vmem:[#allocation0 + $0x8] ss:$0 sm:$0xff] }
 0x49a   :  { %v443_v61 = vpop.xlane.xlu1 %442 }
 0x49b   :  { %v350_v56 = vsel %vm293_vm10, %v349_v55, 0.0  ;;  %v444_v0 = vsub.f32 %v1581_v5, %v443_v61  ;;  %v398_v7 = vsel %vm354_vm13, %v397_v4, 0.0  ;;  %vm637_vm10 = vcmask 89168  }
 0x49c   :  { %v351_v36 = vadd.f32 %v350_v56, %v290_v40  ;;  %v399_v10 = vadd.f32 %v398_v7, %v338_v28  ;;  %vm657_vm12 = vmand %vm637_vm10, %vm188_vm5 }
 0x49e   :  { %v406_v58 = vmul.f32 %v1689_v6, %v351_v36  ;;  %v454_v12 = vmul.f32 %v417_v38, %v399_v10 }
 0x49f   :  { %v1509_v59 = vpop.eup %1508 }
 0x4a0   :  { %v431_v62 = vmul.f32 %v1509_v59, %v430_v57  ;;  %407 = vadd.xlane.f32.xlu1 %v406_v58  ;;  %v445_v2 = vmul.f32 %v1509_v59, %v444_v0 }
 0x4a2   :  { %v434_v53 = vsel %vm433_vm3, %v431_v62, 0.0  ;;  %v446_v6 = vsel %vm415_vm0, %v445_v2, 0.0 }
 0x4a3   :  { %v435_v1 = vadd.f32 %v434_v53, %v374_v29  ;;  %v447_v8 = vadd.f32 %v446_v6, %v386_v45 }
 0x4a5   :  { %436 = vst [vmem:[#allocation1] sm:$0xff] %v435_v1 }
 0x4ac   :  { %v478_v9 = vld [vmem:[#allocation1 + $0x7] ss:$0 sm:$0xff] }
 0x4ad   :  { %v481_v52 = vmul.f32 %v478_v9, %v478_v9  ;;  %v502_v11 = vmul.f32 %v478_v9, %v447_v8 }
 0x4af   :  { %482 = vadd.xlane.f32.xlu0 %v481_v52  ;;  %503 = vadd.xlane.f32.xlu1 %v502_v11 }
 0x4b3   :  { %455 = vadd.xlane.f32.xlu0 %v454_v12  ;;  %v590_v12 = vld [vmem:[#allocation0 + $0x9] ss:$0 sm:$0xff] }
 0x52d   :  { %v408_v13 = vpop.xlane.xlu1 %407 }
 0x52e   :  { %v409_v14 = vsub.f32 %v1626_v46, %v408_v13 }
 0x530   :  { %v410_v15 = vmul.f32 %v1699_v21, %v409_v14 }
 0x532   :  { %v411_v16 = vsel %vm354_vm13, %v410_v15, 0.0  ;;  %vm688_vm13 = vcmask 97368  }
 0x533   :  { %v412_v17 = vadd.f32 %v411_v16, %v351_v36  ;;  %vm708_vm15 = vmand %vm688_vm13, %vm249_vm8 }
 0x535   :  { %v467_v19 = vmul.f32 %v417_v38, %v412_v17 }
 0x537   :  { %468 = vadd.xlane.f32.xlu0 %v467_v19 }
 0x53c   :  { %v483_v3 = vpop.xlane.xlu0 %482  ;;  %v504_v27 = vpop.xlane.xlu1 %503 }
 0x53d   :  { %v484_v23 = vsub.f32 %v480_v18, %v483_v3  ;;  %v505_v31 = vsub.f32 %v1581_v5, %v504_v27 }
 0x53f   :  { %1510 = vrsqrt.f32 %v484_v23 }
 0x540   :  { %v456_v24 = vpop.xlane.xlu0 %455 }
 0x541   :  { %v457_v25 = vsub.f32 %v1601_v22, %v456_v24 }
 0x543   :  { %v458_v26 = vmul.f32 %v1509_v59, %v457_v25 }
 0x545   :  { %v459_v29 = vsel %vm415_vm0, %v458_v26, 0.0 }
 0x546   :  { %v460_v30 = vadd.f32 %v459_v29, %v399_v10 }
 0x548   :  { %v515_v21 = vmul.f32 %v478_v9, %v460_v30 }
 0x549   :  { %v1733_v32 = vpop.eup %1510 }
 0x54a   :  { %v506_v33 = vmul.f32 %v1733_v32, %v505_v31  ;;  %516 = vadd.xlane.f32.xlu1 %v515_v21 }
 0x54c   :  { %v507_v34 = vsel %vm476_vm4, %v506_v33, 0.0 }
 0x54d   :  { %v508_v35 = vadd.f32 %v507_v34, %v447_v8 }
 0x54f   :  { %510 = vst [vmem:[#allocation1 + $0x8] sm:$0xff] %v508_v35 }
 0x556   :  { %v539_v37 = vld [vmem:[#allocation1 + $0x8] ss:$0 sm:$0xff] }
 0x557   :  { %v551_v38 = vmul.f32 %v539_v37, %v508_v35  ;;  %v542_v40 = vmul.f32 %v539_v37, %v539_v37 }
 0x559   :  { %552 = vadd.xlane.f32.xlu1 %v551_v38  ;;  %543 = vadd.xlane.f32.xlu0 %v542_v40 }
 0x5c4   :  { %v469_v28 = vpop.xlane.xlu0 %468 }
 0x5c5   :  { %v470_v41 = vsub.f32 %v1626_v46, %v469_v28  ;;  %v641_v28 = vld [vmem:[#allocation0 + $0xa] ss:$0 sm:$0xff] }
 0x5c7   :  { %v471_v42 = vmul.f32 %v1509_v59, %v470_v41 }
 0x5c9   :  { %v472_v20 = vsel %vm415_vm0, %v471_v42, 0.0  ;;  %vm739_vm0 = vcmask 105568  }
 0x5ca   :  { %v473_v43 = vadd.f32 %v472_v20, %v412_v17  ;;  %vm759_vm3 = vmand %vm739_vm0, %vm310_vm11 }
 0x5cc   :  { %v528_v44 = vmul.f32 %v478_v9, %v473_v43 }
 0x5ce   :  { %529 = vadd.xlane.f32.xlu0 %v528_v44 }
 0x5d7   :  { %v517_v45 = vpop.xlane.xlu1 %516 }
 0x5d8   :  { %v518_v47 = vsub.f32 %v1601_v22, %v517_v45 }
 0x5da   :  { %v519_v48 = vmul.f32 %v1733_v32, %v518_v47 }
 0x5dc   :  { %v520_v49 = vsel %vm476_vm4, %v519_v48, 0.0 }
 0x5dd   :  { %v521_v50 = vadd.f32 %v520_v49, %v460_v30 }
 0x5df   :  { %v564_v51 = vmul.f32 %v539_v37, %v521_v50 }
 0x5e1   :  { %565 = vadd.xlane.f32.xlu1 %v564_v51 }
 0x5e6   :  { %v544_v54 = vpop.xlane.xlu0 %543  ;;  %v553_v56 = vpop.xlane.xlu1 %552 }
 0x5e7   :  { %v545_v55 = vsub.f32 %v541_v39, %v544_v54  ;;  %v554_v36 = vsub.f32 %v1581_v5, %v553_v56 }
 0x5e9   :  { %1512 = vrsqrt.f32 %v545_v55 }
 0x5f3   :  { %v1513_v57 = vpop.eup %1512 }
 0x5f4   :  { %v555_v58 = vmul.f32 %v1513_v57, %v554_v36 }
 0x5f6   :  { %v556_v59 = vsel %vm537_vm6, %v555_v58, 0.0 }
 0x5f7   :  { %v557_v60 = vadd.f32 %v556_v59, %v508_v35 }
 0x5f9   :  { %559 = vst [vmem:[#allocation1 + $0x8] sm:$0xff] %v557_v60 }
 0x600   :  { %v588_v61 = vld [vmem:[#allocation1 + $0x9] ss:$0 sm:$0xff] }
 0x601   :  { %v600_v62 = vmul.f32 %v588_v61, %v557_v60  ;;  %v591_v63 = vmul.f32 %v588_v61, %v588_v61 }
 0x603   :  { %601 = vadd.xlane.f32.xlu1 %v600_v62  ;;  %592 = vadd.xlane.f32.xlu0 %v591_v63 }
 0x65b   :  { %v530_v53 = vpop.xlane.xlu0 %529 }
 0x65c   :  { %v531_v0 = vsub.f32 %v1626_v46, %v530_v53  ;;  %v692_v53 = vld [vmem:[#allocation0 + $0xb] ss:$0 sm:$0xff] }
 0x65e   :  { %v532_v1 = vmul.f32 %v1733_v32, %v531_v0 }
 0x660   :  { %v533_v2 = vsel %vm476_vm4, %v532_v1, 0.0 }
 0x661   :  { %v534_v4 = vadd.f32 %v533_v2, %v473_v43 }
 0x663   :  { %v577_v6 = vmul.f32 %v539_v37, %v534_v4 }
 0x665   :  { %578 = vadd.xlane.f32.xlu0 %v577_v6 }
 0x66e   :  { %v566_v7 = vpop.xlane.xlu1 %565 }
 0x66f   :  { %v567_v8 = vsub.f32 %v1601_v22, %v566_v7 }
 0x671   :  { %v568_v9 = vmul.f32 %v1513_v57, %v567_v8 }
 0x673   :  { %v569_v10 = vsel %vm537_vm6, %v568_v9, 0.0 }
 0x674   :  { %v570_v52 = vadd.f32 %v569_v10, %v521_v50 }
 0x676   :  { %v615_v11 = vmul.f32 %v588_v61, %v570_v52 }
 0x678   :  { %616 = vadd.xlane.f32.xlu1 %v615_v11 }
 0x690   :  { %v593_v13 = vpop.xlane.xlu0 %592  ;;  %v602_v15 = vpop.xlane.xlu1 %601 }
 0x691   :  { %v594_v14 = vsub.f32 %v590_v12, %v593_v13  ;;  %v603_v16 = vsub.f32 %v1581_v5, %v602_v15 }
 0x693   :  { %1514 = vrsqrt.f32 %v594_v14 }
 0x69d   :  { %v1515_v17 = vpop.eup %1514 }
 0x69e   :  { %v604_v19 = vmul.f32 %v1515_v17, %v603_v16 }
 0x6a0   :  { %v607_v18 = vsel %vm606_vm9, %v604_v19, 0.0  ;;  %vm841_vm9 = vcmask 121968  }
 0x6a1   :  { %v608_v3 = vadd.f32 %v607_v18, %v557_v60 }
 0x6a3   :  { %610 = vst [vmem:[#allocation1 + $0x8] sm:$0xff] %v608_v3 }
 0x6aa   :  { %v639_v23 = vld [vmem:[#allocation1 + $0xa] ss:$0 sm:$0xff] }
 0x6ab   :  { %v651_v24 = vmul.f32 %v639_v23, %v608_v3  ;;  %v642_v25 = vmul.f32 %v639_v23, %v639_v23 }
 0x6ad   :  { %652 = vadd.xlane.f32.xlu1 %v651_v24  ;;  %643 = vadd.xlane.f32.xlu0 %v642_v25  ;;  %v743_v25 = vld [vmem:[#allocation0 + $0xc] ss:$0 sm:$0xff] }
 0x6f2   :  { %v579_v26 = vpop.xlane.xlu0 %578 }
 0x6f3   :  { %v580_v27 = vsub.f32 %v1626_v46, %v579_v26 }
 0x6f5   :  { %v581_v29 = vmul.f32 %v1513_v57, %v580_v27 }
 0x6f7   :  { %v582_v30 = vsel %vm537_vm6, %v581_v29, 0.0  ;;  %v1770_v29 = vld [vmem:[#allocation0 + $0x8] sm:$0xff]  ;;  %vm790_vm6 = vcmask 113768  }
 0x6f8   :  { %v583_v31 = vadd.f32 %v582_v30, %v534_v4 }
 0x6fa   :  { %v628_v21 = vmul.f32 %v588_v61, %v583_v31 }
 0x6fc   :  { %629 = vadd.xlane.f32.xlu0 %v628_v21 }
 0x705   :  { %v617_v33 = vpop.xlane.xlu1 %616 }
 0x706   :  { %v618_v34 = vsub.f32 %v1601_v22, %v617_v33 }
 0x708   :  { %v619_v35 = vmul.f32 %v1515_v17, %v618_v34 }
 0x70a   :  { %v620_v37 = vsel %vm586_vm7, %v619_v35, 0.0 }
 0x70b   :  { %v621_v38 = vadd.f32 %v620_v37, %v570_v52 }
 0x70d   :  { %v666_v40 = vmul.f32 %v639_v23, %v621_v38 }
 0x70f   :  { %667 = vadd.xlane.f32.xlu1 %v666_v40 }
 0x73a   :  { %v644_v41 = vpop.xlane.xlu0 %643  ;;  %v653_v20 = vpop.xlane.xlu1 %652 }
 0x73b   :  { %v645_v42 = vsub.f32 %v641_v28, %v644_v41  ;;  %v654_v43 = vsub.f32 %v1581_v5, %v653_v20 }
 0x73d   :  { %1516 = vrsqrt.f32 %v645_v42 }
 0x747   :  { %v1517_v44 = vpop.eup %1516 }
 0x748   :  { %v655_v45 = vmul.f32 %v1517_v44, %v654_v43 }
 0x74a   :  { %v658_v47 = vsel %vm657_vm12, %v655_v45, 0.0  ;;  %vm892_vm12 = vcmask 130168  }
 0x74b   :  { %v659_v48 = vadd.f32 %v658_v47, %v608_v3 }
 0x74d   :  { %661 = vst [vmem:[#allocation1 + $0x8] sm:$0xff] %v659_v48 }
 0x754   :  { %v690_v49 = vld [vmem:[#allocation1 + $0xb] ss:$0 sm:$0xff] }
 0x755   :  { %v702_v50 = vmul.f32 %v690_v49, %v659_v48  ;;  %v693_v51 = vmul.f32 %v690_v49, %v690_v49 }
 0x757   :  { %703 = vadd.xlane.f32.xlu1 %v702_v50  ;;  %694 = vadd.xlane.f32.xlu0 %v693_v51 }
 0x789   :  { %v630_v39 = vpop.xlane.xlu0 %629 }
 0x78a   :  { %v631_v54 = vsub.f32 %v1626_v46, %v630_v39  ;;  %v794_v39 = vld [vmem:[#allocation0 + $0xd] ss:$0 sm:$0xff] }
 0x78c   :  { %v632_v55 = vmul.f32 %v1515_v17, %v631_v54 }
 0x78e   :  { %v633_v56 = vsel %vm586_vm7, %v632_v55, 0.0  ;;  %vm810_vm7 = vmand %vm790_vm6, %vm371_vm14 }
 0x78f   :  { %v634_v36 = vadd.f32 %v633_v56, %v583_v31 }
 0x791   :  { %v679_v57 = vmul.f32 %v639_v23, %v634_v36 }
 0x793   :  { %680 = vadd.xlane.f32.xlu0 %v679_v57 }
 0x79c   :  { %v668_v58 = vpop.xlane.xlu1 %667 }
 0x79d   :  { %v669_v59 = vsub.f32 %v1601_v22, %v668_v58 }
 0x79f   :  { %v670_v60 = vmul.f32 %v1517_v44, %v669_v59 }
 0x7a1   :  { %v671_v61 = vsel %vm637_vm10, %v670_v60, 0.0  ;;  %v1784_v60 = vld [vmem:[#allocation0 + $0x18] sm:$0xff] }
 0x7a2   :  { %v672_v62 = vadd.f32 %v671_v61, %v621_v38 }
 0x7a4   :  { %v717_v63 = vmul.f32 %v690_v49, %v672_v62 }
 0x7a6   :  { %718 = vadd.xlane.f32.xlu1 %v717_v63 }
 0x7e4   :  { %v695_v0 = vpop.xlane.xlu0 %694  ;;  %v704_v2 = vpop.xlane.xlu1 %703 }
 0x7e5   :  { %v696_v1 = vsub.f32 %v692_v53, %v695_v0  ;;  %v705_v4 = vsub.f32 %v1581_v5, %v704_v2 }
 0x7e7   :  { %1518 = vrsqrt.f32 %v696_v1 }
 0x7f1   :  { %v1519_v6 = vpop.eup %1518 }
 0x7f2   :  { %v706_v7 = vmul.f32 %v1519_v6, %v705_v4 }
 0x7f4   :  { %v709_v8 = vsel %vm708_vm15, %v706_v7, 0.0  ;;  %vm979_vm15 = vcmask 146568  }
 0x7f5   :  { %v710_v9 = vadd.f32 %v709_v8, %v659_v48 }
 0x7f7   :  { %712 = vst [vmem:[#allocation1 + $0x8] sm:$0xff] %v710_v9 }
 0x7fe   :  { %v741_v10 = vld [vmem:[#allocation1 + $0xc] ss:$0 sm:$0xff] }
 0x7ff   :  { %v753_v52 = vmul.f32 %v741_v10, %v710_v9  ;;  %v744_v11 = vmul.f32 %v741_v10, %v741_v10 }
 0x801   :  { %754 = vadd.xlane.f32.xlu1 %v753_v52  ;;  %745 = vadd.xlane.f32.xlu0 %v744_v11 }
 0x820   :  { %v681_v12 = vpop.xlane.xlu0 %680 }
 0x821   :  { %v682_v13 = vsub.f32 %v1626_v46, %v681_v12  ;;  %v845_v12 = vld [vmem:[#allocation0 + $0xe] ss:$0 sm:$0xff] }
 0x823   :  { %v683_v14 = vmul.f32 %v1517_v44, %v682_v13  ;;  %v1777_v44 = vld [vmem:[#allocation0 + $0x10] sm:$0xff] }
 0x825   :  { %v684_v15 = vsel %vm637_vm10, %v683_v14, 0.0  ;;  %vm861_vm10 = vmand %vm841_vm9, %vm432_vm1 }
 0x826   :  { %v685_v5 = vadd.f32 %v684_v15, %v634_v36 }
 0x828   :  { %v730_v16 = vmul.f32 %v690_v49, %v685_v5 }
 0x82a   :  { %731 = vadd.xlane.f32.xlu0 %v730_v16 }
 0x833   :  { %v719_v17 = vpop.xlane.xlu1 %718 }
 0x834   :  { %v720_v19 = vsub.f32 %v1601_v22, %v719_v17 }
 0x836   :  { %v721_v18 = vmul.f32 %v1519_v6, %v720_v19 }
 0x838   :  { %v722_v3 = vsel %vm688_vm13, %v721_v18, 0.0 }
 0x839   :  { %v723_v23 = vadd.f32 %v722_v3, %v672_v62 }
 0x83b   :  { %v768_v24 = vmul.f32 %v741_v10, %v723_v23 }
 0x83d   :  { %769 = vadd.xlane.f32.xlu1 %v768_v24 }
 0x88e   :  { %v746_v26 = vpop.xlane.xlu0 %745  ;;  %v755_v30 = vpop.xlane.xlu1 %754 }
 0x88f   :  { %v747_v27 = vsub.f32 %v743_v25, %v746_v26  ;;  %v756_v31 = vsub.f32 %v1770_v29, %v755_v30 }
 0x891   :  { %1520 = vrsqrt.f32 %v747_v27 }
 0x89b   :  { %v1521_v21 = vpop.eup %1520 }
 0x89c   :  { %v757_v22 = vmul.f32 %v1521_v21, %v756_v31 }
 0x89e   :  { %v760_v33 = vsel %vm759_vm3, %v757_v22, 0.0  ;;  %vm1017_vm3 = vcmask 154768  }
 0x89f   :  { %v761_v34 = vadd.f32 %v760_v33, %v710_v9 }
 0x8a1   :  { %763 = vst [vmem:[#allocation1 + $0x8] sm:$0xff] %v761_v34 }
 0x8a8   :  { %v792_v35 = vld [vmem:[#allocation1 + $0xd] ss:$0 sm:$0xff] }
 0x8a9   :  { %v804_v37 = vmul.f32 %v792_v35, %v761_v34  ;;  %v795_v38 = vmul.f32 %v792_v35, %v792_v35 }
 0x8ab   :  { %805 = vadd.xlane.f32.xlu1 %v804_v37  ;;  %796 = vadd.xlane.f32.xlu0 %v795_v38 }
 0x8b7   :  { %v732_v40 = vpop.xlane.xlu0 %731 }
 0x8b8   :  { %v733_v28 = vsub.f32 %v1626_v46, %v732_v40 }
 0x8ba   :  { %v734_v41 = vmul.f32 %v1519_v6, %v733_v28 }
 0x8bc   :  { %v735_v42 = vsel %vm688_vm13, %v734_v41, 0.0  ;;  %vm943_vm13 = vcmask 138368  }
 0x8bd   :  { %v736_v20 = vadd.f32 %v735_v42, %v685_v5 }
 0x8bf   :  { %v781_v43 = vmul.f32 %v741_v10, %v736_v20 }
 0x8c1   :  { %782 = vadd.xlane.f32.xlu0 %v781_v43 }
 0x8ca   :  { %v770_v45 = vpop.xlane.xlu1 %769 }
 0x8cb   :  { %v771_v47 = vsub.f32 %v1777_v44, %v770_v45 }
 0x8cd   :  { %v772_v48 = vmul.f32 %v1521_v21, %v771_v47 }
 0x8cf   :  { %v773_v49 = vsel %vm739_vm0, %v772_v48, 0.0 }
 0x8d0   :  { %v774_v50 = vadd.f32 %v773_v49, %v723_v23 }
 0x8d2   :  { %v819_v51 = vmul.f32 %v792_v35, %v774_v50 }
 0x8d4   :  { %820 = vadd.xlane.f32.xlu1 %v819_v51 }
 0x938   :  { %v797_v54 = vpop.xlane.xlu0 %796  ;;  %v806_v55 = vpop.xlane.xlu1 %805 }
 0x939   :  { %v798_v46 = vsub.f32 %v794_v39, %v797_v54  ;;  %v807_v56 = vsub.f32 %v1770_v29, %v806_v55 }
 0x93b   :  { %1522 = vrsqrt.f32 %v798_v46 }
 0x945   :  { %v1523_v36 = vpop.eup %1522 }
 0x946   :  { %v808_v57 = vmul.f32 %v1523_v36, %v807_v56 }
 0x948   :  { %v811_v58 = vsel %vm810_vm7, %v808_v57, 0.0  ;;  %vm1055_vm7 = vcmask 162968  }
 0x949   :  { %v812_v59 = vadd.f32 %v811_v58, %v761_v34 }
 0x94b   :  { %814 = vst [vmem:[#allocation1 + $0x8] sm:$0xff] %v812_v59 }
 0x94e   :  { %v783_v61 = vpop.xlane.xlu0 %782 }
 0x94f   :  { %v784_v62 = vsub.f32 %v1784_v60, %v783_v61 }
 0x951   :  { %v785_v63 = vmul.f32 %v1521_v21, %v784_v62  ;;  %v947_v62 = vld [vmem:[#allocation0 + $0x10] ss:$0 sm:$0xff] }
 0x952   :  { %v843_v53 = vld [vmem:[#allocation1 + $0xe] ss:$0 sm:$0xff] }
 0x953   :  { %v855_v0 = vmul.f32 %v843_v53, %v812_v59  ;;  %v846_v1 = vmul.f32 %v843_v53, %v843_v53  ;;  %v786_v2 = vsel %vm739_vm0, %v785_v63, 0.0  ;;  %vm999_vm0 = vmand %vm979_vm15, %vm127_vm2 }
 0x954   :  { %v787_v4 = vadd.f32 %v786_v2, %v736_v20  ;;  %v896_v20 = vld [vmem:[#allocation0 + $0xf] ss:$0 sm:$0xff] }
 0x955   :  { %856 = vadd.xlane.f32.xlu1 %v855_v0  ;;  %847 = vadd.xlane.f32.xlu0 %v846_v1 }
 0x956   :  { %v832_v6 = vmul.f32 %v792_v35, %v787_v4 }
 0x959   :  { %833 = vadd.xlane.f32.xlu0 %v832_v6 }
 0x961   :  { %v821_v7 = vpop.xlane.xlu1 %820 }
 0x962   :  { %v822_v8 = vsub.f32 %v1777_v44, %v821_v7 }
 0x964   :  { %v823_v9 = vmul.f32 %v1523_v36, %v822_v8 }
 0x966   :  { %v824_v10 = vsel %vm790_vm6, %v823_v9, 0.0 }
 0x967   :  { %v825_v52 = vadd.f32 %v824_v10, %v774_v50 }
 0x969   :  { %v870_v11 = vmul.f32 %v843_v53, %v825_v52 }
 0x96b   :  { %871 = vadd.xlane.f32.xlu1 %v870_v11 }
 0x9e2   :  { %v848_v13 = vpop.xlane.xlu0 %847  ;;  %v857_v17 = vpop.xlane.xlu1 %856 }
 0x9e3   :  { %v849_v14 = vsub.f32 %v845_v12, %v848_v13  ;;  %v858_v3 = vsub.f32 %v1770_v29, %v857_v17 }
 0x9e5   :  { %1524 = vrsqrt.f32 %v849_v14 }
 0x9e6   :  { %v834_v15 = vpop.xlane.xlu0 %833 }
 0x9e7   :  { %v835_v5 = vsub.f32 %v1784_v60, %v834_v15 }
 0x9e9   :  { %v836_v16 = vmul.f32 %v1523_v36, %v835_v5  ;;  %v983_v5 = vld [vmem:[#allocation0 + $0x11] ss:$0 sm:$0xff] }
 0x9eb   :  { %v837_v19 = vsel %vm790_vm6, %v836_v16, 0.0  ;;  %vm1037_vm6 = vmand %vm1017_vm3, %vm188_vm5 }
 0x9ec   :  { %v838_v18 = vadd.f32 %v837_v19, %v787_v4 }
 0x9ee   :  { %v883_v23 = vmul.f32 %v843_v53, %v838_v18 }
 0x9ef   :  { %v1525_v24 = vpop.eup %1524 }
 0x9f0   :  { %v859_v25 = vmul.f32 %v1525_v24, %v858_v3  ;;  %884 = vadd.xlane.f32.xlu1 %v883_v23 }
 0x9f2   :  { %v862_v26 = vsel %vm861_vm10, %v859_v25, 0.0  ;;  %vm1093_vm10 = vcmask 171168  }
 0x9f3   :  { %v1795_v27 = vadd.f32 %v862_v26, %v812_v59 }
 0x9f5   :  { %865 = vst [vmem:[#allocation1 + $0x8] sm:$0xff] %v1795_v27 }
 0x9f8   :  { %v872_v30 = vpop.xlane.xlu1 %871 }
 0x9f9   :  { %v873_v31 = vsub.f32 %v1777_v44, %v872_v30 }
 0x9fb   :  { %v874_v21 = vmul.f32 %v1525_v24, %v873_v31 }
 0x9fc   :  { %v1799_v22 = vld [vmem:[#allocation1 + $0xf] ss:$0 sm:$0xff] }
 0x9fd   :  { %v897_v29 = vmul.f32 %v1799_v22, %v1799_v22  ;;  %v875_v33 = vsel %vm841_vm9, %v874_v21, 0.0 }
 0x9fe   :  { %v876_v34 = vadd.f32 %v875_v33, %v825_v52 }
 0x9ff   :  { %898 = vadd.xlane.f32.xlu0 %v897_v29 }
 0xa00   :  { %v921_v35 = vmul.f32 %v1799_v22, %v876_v34 }
 0xa03   :  { %922 = vadd.xlane.f32.xlu0 %v921_v35 }
 0xa7d   :  { %v885_v37 = vpop.xlane.xlu1 %884 }
 0xa7e   :  { %v886_v38 = vsub.f32 %v1784_v60, %v885_v37 }
 0xa80   :  { %v887_v40 = vmul.f32 %v1525_v24, %v886_v38  ;;  %v1021_v38 = vld [vmem:[#allocation0 + $0x12] ss:$0 sm:$0xff] }
 0xa82   :  { %v888_v28 = vsel %vm841_vm9, %v887_v40, 0.0  ;;  %vm1075_vm9 = vmand %vm1055_vm7, %vm249_vm8 }
 0xa83   :  { %v889_v41 = vadd.f32 %v888_v28, %v838_v18 }
 0xa85   :  { %v934_v42 = vmul.f32 %v1799_v22, %v889_v41 }
 0xa87   :  { %935 = vadd.xlane.f32.xlu1 %v934_v42 }
 0xa8c   :  { %v899_v43 = vpop.xlane.xlu0 %898 }
 0xa8d   :  { %v900_v45 = vsub.f32 %v896_v20, %v899_v43 }
 0xa8f   :  { %1526 = vrsqrt.f32 %v900_v45 }
 0xa90   :  { %v923_v47 = vpop.xlane.xlu0 %922 }
 0xa91   :  { %v924_v48 = vsub.f32 %v1777_v44, %v923_v47 }
 0xa99   :  { %v1809_v49 = vpop.eup %1526 }
 0xa9a   :  { %v925_v50 = vmul.f32 %v1809_v49, %v924_v48 }
 0xa9c   :  { %v926_v51 = vsel %vm892_vm12, %v925_v50, 0.0 }
 0xa9d   :  { %v927_v39 = vadd.f32 %v926_v51, %v876_v34 }
 0xa9f   :  { %929 = vst [vmem:[#allocation1 + $0x10] sm:$0xff] %v927_v39 }
 0xaa6   :  { %v945_v54 = vld [vmem:[#allocation1 + $0x10] ss:$0 sm:$0xff] }
 0xaa7   :  { %v948_v46 = vmul.f32 %v945_v54, %v945_v54  ;;  %v957_v55 = vmul.f32 %v945_v54, %v927_v39 }
 0xaa9   :  { %949 = vadd.xlane.f32.xlu0 %v948_v46  ;;  %958 = vadd.xlane.f32.xlu1 %v957_v55 }
 0xb14   :  { %v936_v56 = vpop.xlane.xlu1 %935 }
 0xb15   :  { %v937_v36 = vsub.f32 %v1784_v60, %v936_v56 }
 0xb17   :  { %v938_v57 = vmul.f32 %v1809_v49, %v937_v36 }
 0xb19   :  { %v939_v58 = vsel %vm892_vm12, %v938_v57, 0.0  ;;  %v1059_v57 = vld [vmem:[#allocation0 + $0x13] ss:$0 sm:$0xff] }
 0xb1a   :  { %v940_v59 = vadd.f32 %v939_v58, %v889_v41 }
 0xb1c   :  { %v970_v61 = vmul.f32 %v945_v54, %v940_v59 }
 0xb1e   :  { %971 = vadd.xlane.f32.xlu0 %v970_v61 }
 0xb36   :  { %v950_v63 = vpop.xlane.xlu0 %949  ;;  %v959_v0 = vpop.xlane.xlu1 %958 }
 0xb37   :  { %v951_v53 = vsub.f32 %v947_v62, %v950_v63  ;;  %v960_v1 = vsub.f32 %v1777_v44, %v959_v0 }
 0xb39   :  { %1528 = vrsqrt.f32 %v951_v53 }
 0xb43   :  { %v1529_v2 = vpop.eup %1528 }
 0xb44   :  { %v961_v4 = vmul.f32 %v1529_v2, %v960_v1 }
 0xb46   :  { %v962_v6 = vsel %vm943_vm13, %v961_v4, 0.0 }
 0xb47   :  { %v963_v7 = vadd.f32 %v962_v6, %v927_v39 }
 0xb49   :  { %965 = vst [vmem:[#allocation1 + $0x10] sm:$0xff] %v963_v7 }
 0xb50   :  { %v981_v8 = vld [vmem:[#allocation1 + $0x11] ss:$0 sm:$0xff] }
 0xb51   :  { %v993_v9 = vmul.f32 %v981_v8, %v963_v7  ;;  %v984_v10 = vmul.f32 %v981_v8, %v981_v8 }
 0xb53   :  { %994 = vadd.xlane.f32.xlu0 %v993_v9  ;;  %985 = vadd.xlane.f32.xlu1 %v984_v10 }
 0xbab   :  { %v972_v52 = vpop.xlane.xlu0 %971 }
 0xbac   :  { %v973_v11 = vsub.f32 %v1784_v60, %v972_v52 }
 0xbae   :  { %v974_v12 = vmul.f32 %v1529_v2, %v973_v11 }
 0xbb0   :  { %v975_v13 = vsel %vm943_vm13, %v974_v12, 0.0  ;;  %v1097_v12 = vld [vmem:[#allocation0 + $0x14] ss:$0 sm:$0xff]  ;;  %vm1113_vm13 = vmand %vm1093_vm10, %vm310_vm11 }
 0xbb1   :  { %v976_v14 = vadd.f32 %v975_v13, %v940_v59 }
 0xbb3   :  { %v1008_v15 = vmul.f32 %v981_v8, %v976_v14 }
 0xbb5   :  { %1009 = vadd.xlane.f32.xlu1 %v1008_v15 }
 0xbe0   :  { %v986_v16 = vpop.xlane.xlu1 %985  ;;  %v995_v19 = vpop.xlane.xlu0 %994 }
 0xbe1   :  { %v987_v17 = vsub.f32 %v983_v5, %v986_v16  ;;  %v996_v18 = vsub.f32 %v1777_v44, %v995_v19 }
 0xbe3   :  { %1530 = vrsqrt.f32 %v987_v17 }
 0xbed   :  { %v1531_v3 = vpop.eup %1530 }
 0xbee   :  { %v997_v23 = vmul.f32 %v1531_v3, %v996_v18 }
 0xbf0   :  { %v1000_v24 = vsel %vm999_vm0, %v997_v23, 0.0 }
 0xbf1   :  { %v1001_v25 = vadd.f32 %v1000_v24, %v963_v7 }
 0xbf3   :  { %1003 = vst [vmem:[#allocation1 + $0x10] sm:$0xff] %v1001_v25 }
 0xbfa   :  { %v1019_v26 = vld [vmem:[#allocation1 + $0x12] ss:$0 sm:$0xff] }
 0xbfb   :  { %v1031_v30 = vmul.f32 %v1019_v26, %v1001_v25  ;;  %v1022_v31 = vmul.f32 %v1019_v26, %v1019_v26 }
 0xbfd   :  { %1032 = vadd.xlane.f32.xlu1 %v1031_v30  ;;  %1023 = vadd.xlane.f32.xlu0 %v1022_v31 }
 0xc42   :  { %v1010_v21 = vpop.xlane.xlu1 %1009 }
 0xc43   :  { %v1011_v29 = vsub.f32 %v1784_v60, %v1010_v21 }
 0xc45   :  { %v1012_v33 = vmul.f32 %v1531_v3, %v1011_v29 }
 0xc47   :  { %v1013_v34 = vsel %vm979_vm15, %v1012_v33, 0.0  ;;  %v1135_v33 = vld [vmem:[#allocation0 + $0x15] ss:$0 sm:$0xff]  ;;  %vm1131_vm15 = vcmask 179368  }
 0xc48   :  { %v1014_v35 = vadd.f32 %v1013_v34, %v976_v14  ;;  %vm1151_vm0 = vmand %vm1131_vm15, %vm371_vm14 }
 0xc4a   :  { %v1046_v37 = vmul.f32 %v1019_v26, %v1014_v35 }
 0xc4c   :  { %1047 = vadd.xlane.f32.xlu0 %v1046_v37 }
 0xc8a   :  { %v1024_v40 = vpop.xlane.xlu0 %1023  ;;  %v1033_v41 = vpop.xlane.xlu1 %1032 }
 0xc8b   :  { %v1025_v28 = vsub.f32 %v1021_v38, %v1024_v40  ;;  %v1034_v42 = vsub.f32 %v1777_v44, %v1033_v41 }
 0xc8d   :  { %1532 = vrsqrt.f32 %v1025_v28 }
 0xc97   :  { %v1533_v20 = vpop.eup %1532 }
 0xc98   :  { %v1035_v43 = vmul.f32 %v1533_v20, %v1034_v42 }
 0xc9a   :  { %v1038_v45 = vsel %vm1037_vm6, %v1035_v43, 0.0 }
 0xc9b   :  { %v1039_v47 = vadd.f32 %v1038_v45, %v1001_v25 }
 0xc9d   :  { %1041 = vst [vmem:[#allocation1 + $0x10] sm:$0xff] %v1039_v47 }
 0xca4   :  { %v1057_v48 = vld [vmem:[#allocation1 + $0x13] ss:$0 sm:$0xff] }
 0xca5   :  { %v1069_v50 = vmul.f32 %v1057_v48, %v1039_v47  ;;  %v1060_v51 = vmul.f32 %v1057_v48, %v1057_v48 }
 0xca7   :  { %1070 = vadd.xlane.f32.xlu0 %v1069_v50  ;;  %1061 = vadd.xlane.f32.xlu1 %v1060_v51 }
 0xcd9   :  { %v1048_v39 = vpop.xlane.xlu0 %1047 }
 0xcda   :  { %v1049_v54 = vsub.f32 %v1784_v60, %v1048_v39 }
 0xcdc   :  { %v1050_v46 = vmul.f32 %v1533_v20, %v1049_v54 }
 0xcde   :  { %v1051_v55 = vsel %vm1017_vm3, %v1050_v46, 0.0  ;;  %v1173_v46 = vld [vmem:[#allocation0 + $0x16] ss:$0 sm:$0xff]  ;;  %vm1169_vm3 = vcmask 187568  }
 0xcdf   :  { %v1052_v56 = vadd.f32 %v1051_v55, %v1014_v35  ;;  %vm1189_vm6 = vmand %vm1169_vm3, %vm432_vm1 }
 0xce1   :  { %v1084_v36 = vmul.f32 %v1057_v48, %v1052_v56 }
 0xce3   :  { %1085 = vadd.xlane.f32.xlu1 %v1084_v36 }
 0xd34   :  { %v1062_v58 = vpop.xlane.xlu1 %1061  ;;  %v1071_v61 = vpop.xlane.xlu0 %1070 }
 0xd35   :  { %v1063_v59 = vsub.f32 %v1059_v57, %v1062_v58  ;;  %v1072_v62 = vsub.f32 %v1777_v44, %v1071_v61 }
 0xd37   :  { %1534 = vrsqrt.f32 %v1063_v59 }
 0xd41   :  { %v1535_v63 = vpop.eup %1534 }
 0xd42   :  { %v1073_v53 = vmul.f32 %v1535_v63, %v1072_v62 }
 0xd44   :  { %v1076_v0 = vsel %vm1075_vm9, %v1073_v53, 0.0  ;;  %vm1245_vm9 = vcmask 203968  }
 0xd45   :  { %v1077_v1 = vadd.f32 %v1076_v0, %v1039_v47 }
 0xd47   :  { %1079 = vst [vmem:[#allocation1 + $0x10] sm:$0xff] %v1077_v1 }
 0xd4e   :  { %v1095_v2 = vld [vmem:[#allocation1 + $0x14] ss:$0 sm:$0xff] }
 0xd4f   :  { %v1107_v4 = vmul.f32 %v1095_v2, %v1077_v1  ;;  %v1098_v6 = vmul.f32 %v1095_v2, %v1095_v2 }
 0xd51   :  { %1108 = vadd.xlane.f32.xlu1 %v1107_v4  ;;  %1099 = vadd.xlane.f32.xlu0 %v1098_v6 }
 0xd70   :  { %v1086_v7 = vpop.xlane.xlu1 %1085 }
 0xd71   :  { %v1087_v8 = vsub.f32 %v1784_v60, %v1086_v7 }
 0xd73   :  { %v1088_v9 = vmul.f32 %v1535_v63, %v1087_v8  ;;  %v1211_v8 = vld [vmem:[#allocation0 + $0x17] ss:$0 sm:$0xff] }
 0xd75   :  { %v1089_v10 = vsel %vm1055_vm7, %v1088_v9, 0.0  ;;  %vm1207_vm7 = vcmask 195768  }
 0xd76   :  { %v1090_v52 = vadd.f32 %v1089_v10, %v1052_v56 }
 0xd78   :  { %v1122_v11 = vmul.f32 %v1095_v2, %v1090_v52 }
 0xd7a   :  { %1123 = vadd.xlane.f32.xlu0 %v1122_v11 }
 0xdde   :  { %v1100_v13 = vpop.xlane.xlu0 %1099  ;;  %v1109_v15 = vpop.xlane.xlu1 %1108 }
 0xddf   :  { %v1101_v14 = vsub.f32 %v1097_v12, %v1100_v13  ;;  %v1110_v5 = vsub.f32 %v1777_v44, %v1109_v15 }
 0xde1   :  { %1536 = vrsqrt.f32 %v1101_v14 }
 0xdeb   :  { %v1537_v16 = vpop.eup %1536 }
 0xdec   :  { %v1111_v17 = vmul.f32 %v1537_v16, %v1110_v5 }
 0xdee   :  { %v1114_v19 = vsel %vm1113_vm13, %v1111_v17, 0.0 }
 0xdef   :  { %v1115_v18 = vadd.f32 %v1114_v19, %v1077_v1  ;;  %v1249_v19 = vld [vmem:[#allocation0 + $0x18] ss:$0 sm:$0xff] }
 0xdf1   :  { %1117 = vst [vmem:[#allocation1 + $0x10] sm:$0xff] %v1115_v18 }
 0xdf8   :  { %v1133_v3 = vld [vmem:[#allocation1 + $0x15] ss:$0 sm:$0xff] }
 0xdf9   :  { %v1145_v23 = vmul.f32 %v1133_v3, %v1115_v18  ;;  %v1136_v24 = vmul.f32 %v1133_v3, %v1133_v3 }
 0xdfb   :  { %1146 = vadd.xlane.f32.xlu0 %v1145_v23  ;;  %1137 = vadd.xlane.f32.xlu1 %v1136_v24 }
 0xe07   :  { %v1124_v25 = vpop.xlane.xlu0 %1123 }
 0xe08   :  { %v1125_v26 = vsub.f32 %v1784_v60, %v1124_v25 }
 0xe0a   :  { %v1126_v30 = vmul.f32 %v1537_v16, %v1125_v26 }
 0xe0c   :  { %v1127_v31 = vsel %vm1093_vm10, %v1126_v30, 0.0  ;;  %vm1268_vm10 = vcmask 212168  }
 0xe0d   :  { %v1128_v21 = vadd.f32 %v1127_v31, %v1090_v52  ;;  %vm1288_vm13 = vmand %vm1268_vm10, %vm127_vm2  ;;  %vm1393_vm10 = vcmask 253168  }
 0xe0f   :  { %v1160_v29 = vmul.f32 %v1133_v3, %v1128_v21 }
 0xe11   :  { %1161 = vadd.xlane.f32.xlu1 %v1160_v29 }
 0xe88   :  { %v1138_v34 = vpop.xlane.xlu1 %1137  ;;  %v1147_v37 = vpop.xlane.xlu0 %1146 }
 0xe89   :  { %v1139_v35 = vsub.f32 %v1135_v33, %v1138_v34  ;;  %v1148_v38 = vsub.f32 %v1777_v44, %v1147_v37  ;;  %v1272_v34 = vld [vmem:[#allocation0 + $0x19] ss:$0 sm:$0xff] }
 0xe8b   :  { %1538 = vrsqrt.f32 %v1139_v35 }
 0xe95   :  { %v1539_v40 = vpop.eup %1538 }
 0xe96   :  { %v1149_v28 = vmul.f32 %v1539_v40, %v1148_v38 }
 0xe98   :  { %v1152_v41 = vsel %vm1151_vm0, %v1149_v28, 0.0  ;;  %vm1318_vm0 = vcmask 228568  }
 0xe99   :  { %v1153_v42 = vadd.f32 %v1152_v41, %v1115_v18 }
 0xe9b   :  { %1155 = vst [vmem:[#allocation1 + $0x10] sm:$0xff] %v1153_v42 }
 0xe9e   :  { %v1162_v20 = vpop.xlane.xlu1 %1161 }
 0xe9f   :  { %v1163_v43 = vsub.f32 %v1784_v60, %v1162_v20 }
 0xea1   :  { %v1164_v45 = vmul.f32 %v1539_v40, %v1163_v43 }
 0xea2   :  { %v1171_v47 = vld [vmem:[#allocation1 + $0x16] ss:$0 sm:$0xff] }
 0xea3   :  { %v1183_v48 = vmul.f32 %v1171_v47, %v1153_v42  ;;  %v1174_v50 = vmul.f32 %v1171_v47, %v1171_v47  ;;  %v1165_v51 = vsel %vm1131_vm15, %v1164_v45, 0.0  ;;  %vm1293_vm15 = vcmask 220368  }
 0xea4   :  { %v1166_v39 = vadd.f32 %v1165_v51, %v1128_v21  ;;  %vm1313_vm2 = vmand %vm1293_vm15, %vm188_vm5 }
 0xea5   :  { %1184 = vadd.xlane.f32.xlu1 %v1183_v48  ;;  %1175 = vadd.xlane.f32.xlu0 %v1174_v50  ;;  %v1297_v48 = vld [vmem:[#allocation0 + $0x1a] ss:$0 sm:$0xff]  ;;  %vm1338_vm5 = vmand %vm1318_vm0, %vm249_vm8 }
 0xea6   :  { %v1198_v54 = vmul.f32 %v1171_v47, %v1166_v39 }
 0xea9   :  { %1199 = vadd.xlane.f32.xlu0 %v1198_v54 }
 0xf32   :  { %v1176_v55 = vpop.xlane.xlu0 %1175  ;;  %v1185_v36 = vpop.xlane.xlu1 %1184 }
 0xf33   :  { %v1177_v56 = vsub.f32 %v1173_v46, %v1176_v55  ;;  %v1186_v57 = vsub.f32 %v1777_v44, %v1185_v36 }
 0xf35   :  { %1540 = vrsqrt.f32 %v1177_v56 }
 0xf36   :  { %v1200_v59 = vpop.xlane.xlu0 %1199 }
 0xf37   :  { %v1201_v63 = vsub.f32 %v1784_v60, %v1200_v59 }
 0xf3f   :  { %v1541_v58 = vpop.eup %1540 }
 0xf40   :  { %v1187_v61 = vmul.f32 %v1541_v58, %v1186_v57  ;;  %v1202_v0 = vmul.f32 %v1541_v58, %v1201_v63 }
 0xf42   :  { %v1190_v62 = vsel %vm1189_vm6, %v1187_v61, 0.0  ;;  %v1203_v1 = vsel %vm1169_vm3, %v1202_v0, 0.0  ;;  %v1322_v61 = vld [vmem:[#allocation0 + $0x1b] ss:$0 sm:$0xff]  ;;  %vm1343_vm3 = vcmask 236768   ;;  %vm1368_vm6 = vcmask 244968  }
 0xf43   :  { %v1844_v53 = vadd.f32 %v1190_v62, %v1153_v42  ;;  %v1204_v2 = vadd.f32 %v1203_v1, %v1166_v39  ;;  %vm1363_vm8 = vmand %vm1343_vm3, %vm310_vm11 }
 0xf44   :  { %vm1388_vm11 = vmand %vm1368_vm6, %vm371_vm14  ;;  %vm493_vm14 = vcmask 1047559  }
 0xf45   :  { %1193 = vst [vmem:[#allocation1 + $0x10] sm:$0xff] %v1844_v53 }
 0xf4c   :  { %v1847_v4 = vld [vmem:[#allocation1 + $0x17] ss:$0 sm:$0xff] }
 0xf4d   :  { %v1212_v6 = vmul.f32 %v1847_v4, %v1847_v4  ;;  %v1236_v7 = vmul.f32 %v1847_v4, %v1204_v2 }
 0xf4f   :  { %1213 = vadd.xlane.f32.xlu1 %v1212_v6  ;;  %1237 = vadd.xlane.f32.xlu0 %v1236_v7 }
 0xfdc   :  { %v1214_v9 = vpop.xlane.xlu1 %1213  ;;  %v1238_v52 = vpop.xlane.xlu0 %1237 }
 0xfdd   :  { %v1215_v10 = vsub.f32 %v1211_v8, %v1214_v9  ;;  %v1239_v11 = vsub.f32 %v1784_v60, %v1238_v52 }
 0xfdf   :  { %1542 = vrsqrt.f32 %v1215_v10 }
 0xfe9   :  { %v1853_v12 = vpop.eup %1542 }
 0xfea   :  { %v1240_v13 = vmul.f32 %v1853_v12, %v1239_v11  ;;  %v1347_v11 = vld [vmem:[#allocation0 + $0x1c] ss:$0 sm:$0xff] }
 0xfec   :  { %v1241_v14 = vsel %vm1207_vm7, %v1240_v13, 0.0 }
 0xfed   :  { %v1242_v15 = vadd.f32 %v1241_v14, %v1204_v2 }
 0xfef   :  { %1244 = vst [vmem:[#allocation1 + $0x18] sm:$0xff] %v1242_v15 }
 0xff6   :  { %v1247_v5 = vld [vmem:[#allocation1 + $0x18] ss:$0 sm:$0xff] }
 0xff7   :  { %v1259_v16 = vmul.f32 %v1247_v5, %v1242_v15  ;;  %v1250_v17 = vmul.f32 %v1247_v5, %v1247_v5 }
 0xff9   :  { %1260 = vadd.xlane.f32.xlu0 %v1259_v16  ;;  %1251 = vadd.xlane.f32.xlu1 %v1250_v17 }
0x1086   :  { %v1252_v18 = vpop.xlane.xlu1 %1251  ;;  %v1261_v23 = vpop.xlane.xlu0 %1260 }
0x1087   :  { %v1253_v3 = vsub.f32 %v1249_v19, %v1252_v18  ;;  %v1262_v24 = vsub.f32 %v1784_v60, %v1261_v23 }
0x1089   :  { %1544 = vrsqrt.f32 %v1253_v3 }
0x1093   :  { %v1545_v25 = vpop.eup %1544 }
0x1094   :  { %v1263_v26 = vmul.f32 %v1545_v25, %v1262_v24  ;;  %v1372_v25 = vld [vmem:[#allocation0 + $0x1d] ss:$0 sm:$0xff] }
0x1096   :  { %v1264_v30 = vsel %vm1245_vm9, %v1263_v26, 0.0  ;;  %vm494_vm9 = vmand %vm476_vm4, %vm493_vm14 }
0x1097   :  { %v1265_v31 = vadd.f32 %v1264_v30, %v1242_v15  ;;  %vm1413_vm4 = vmand %vm1393_vm10, %vm432_vm1 }
0x1098   :  { %vm912_vm1 = vmand %vm892_vm12, %vm493_vm14 }
0x1099   :  { %1267 = vst [vmem:[#allocation1 + $0x18] sm:$0xff] %v1265_v31 }
0x10a0   :  { %v1270_v21 = vld [vmem:[#allocation1 + $0x19] ss:$0 sm:$0xff] }
0x10a1   :  { %v1282_v29 = vmul.f32 %v1270_v21, %v1265_v31  ;;  %v1273_v33 = vmul.f32 %v1270_v21, %v1270_v21 }
0x10a3   :  { %1283 = vadd.xlane.f32.xlu0 %v1282_v29  ;;  %1274 = vadd.xlane.f32.xlu1 %v1273_v33 }
0x1130   :  { %v1275_v35 = vpop.xlane.xlu1 %1274  ;;  %v1284_v38 = vpop.xlane.xlu0 %1283 }
0x1131   :  { %v1276_v37 = vsub.f32 %v1272_v34, %v1275_v35  ;;  %v1285_v40 = vsub.f32 %v1784_v60, %v1284_v38 }
0x1133   :  { %1546 = vrsqrt.f32 %v1276_v37 }
0x113d   :  { %v1547_v28 = vpop.eup %1546 }
0x113e   :  { %v1286_v41 = vmul.f32 %v1547_v28, %v1285_v40  ;;  %v487_v28 = vld [vmem:[#allocation1] sm:$0xff] }
0x1140   :  { %v1289_v42 = vsel %vm1288_vm13, %v1286_v41, 0.0  ;;  %v1560_v41 = vld [vmem:[#allocation1 + $0x7] ss:$0 sm:$0xff]  ;;  %vm1227_vm13 = vmand %vm1207_vm7, %vm493_vm14  ;;  %vm1418_vm7 = vcmask 261368  }
0x1141   :  { %v1290_v20 = vadd.f32 %v1289_v42, %v1265_v31  ;;  %v488_v42 = vmul.f32 %v1560_v41, %v487_v28  ;;  %vm1438_vm15 = vmand %vm1418_vm7, %vm493_vm14 }
0x1143   :  { %1292 = vst [vmem:[#allocation1 + $0x18] sm:$0xff] %v1290_v20 }
0x114a   :  { %v1295_v43 = vld [vmem:[#allocation1 + $0x1a] ss:$0 sm:$0xff] }
0x114b   :  { %v1307_v45 = vmul.f32 %v1295_v43, %v1290_v20  ;;  %v1298_v47 = vmul.f32 %v1295_v43, %v1295_v43  ;;  %v1397_v43 = vld [vmem:[#allocation0 + $0x1e] ss:$0 sm:$0xff] }
0x114d   :  { %1308 = vadd.xlane.f32.xlu0 %v1307_v45  ;;  %1299 = vadd.xlane.f32.xlu1 %v1298_v47 }
0x11da   :  { %v1300_v50 = vpop.xlane.xlu1 %1299  ;;  %v1309_v39 = vpop.xlane.xlu0 %1308 }
0x11db   :  { %v1301_v51 = vsub.f32 %v1297_v48, %v1300_v50  ;;  %v1310_v54 = vsub.f32 %v1784_v60, %v1309_v39  ;;  %v486_v50 = vld [vmem:[#allocation0] sm:$0xff] }
0x11dd   :  { %1548 = vrsqrt.f32 %v1301_v51 }
0x11e7   :  { %v1549_v46 = vpop.eup %1548 }
0x11e8   :  { %v1311_v55 = vmul.f32 %v1549_v46, %v1310_v54 }
0x11ea   :  { %v1314_v56 = vsel %vm1313_vm2, %v1311_v55, 0.0 }
0x11eb   :  { %v1315_v36 = vadd.f32 %v1314_v56, %v1290_v20  ;;  %v1221_v20 = vmul.f32 %v1847_v4, %v1844_v53 }
0x11ed   :  { %1317 = vst [vmem:[#allocation1 + $0x18] sm:$0xff] %v1315_v36 }
0x11f4   :  { %v1320_v57 = vld [vmem:[#allocation1 + $0x1b] ss:$0 sm:$0xff] }
0x11f5   :  { %v1332_v58 = vmul.f32 %v1320_v57, %v1315_v36  ;;  %v1323_v59 = vmul.f32 %v1320_v57, %v1320_v57 }
0x11f7   :  { %1333 = vadd.xlane.f32.xlu0 %v1332_v58  ;;  %1324 = vadd.xlane.f32.xlu1 %v1323_v59 }
0x1284   :  { %v1325_v62 = vpop.xlane.xlu1 %1324  ;;  %v1334_v0 = vpop.xlane.xlu0 %1333 }
0x1285   :  { %v1326_v63 = vsub.f32 %v1322_v61, %v1325_v62  ;;  %v1335_v1 = vsub.f32 %v1784_v60, %v1334_v0  ;;  %v906_v0 = vmul.f32 %v1799_v22, %v1795_v27 }
0x1287   :  { %1550 = vrsqrt.f32 %v1326_v63 }
0x1291   :  { %v1551_v2 = vpop.eup %1550 }
0x1292   :  { %v1336_v6 = vmul.f32 %v1551_v2, %v1335_v1  ;;  %v1422_v2 = vld [vmem:[#allocation0 + $0x1f] ss:$0 sm:$0xff] }
0x1294   :  { %v1339_v7 = vsel %vm1338_vm5, %v1336_v6, 0.0 }
0x1295   :  { %v1340_v8 = vadd.f32 %v1339_v7, %v1315_v36  ;;  %v903_v7 = vld [vmem:[#allocation0 + $0x8] sm:$0xff] }
0x1297   :  { %1342 = vst [vmem:[#allocation1 + $0x18] sm:$0xff] %v1340_v8 }
0x129e   :  { %v1345_v9 = vld [vmem:[#allocation1 + $0x1c] ss:$0 sm:$0xff] }
0x129f   :  { %v1357_v10 = vmul.f32 %v1345_v9, %v1340_v8  ;;  %v1348_v52 = vmul.f32 %v1345_v9, %v1345_v9 }
0x12a1   :  { %1358 = vadd.xlane.f32.xlu0 %v1357_v10  ;;  %1349 = vadd.xlane.f32.xlu1 %v1348_v52 }
0x132e   :  { %v1350_v13 = vpop.xlane.xlu1 %1349  ;;  %v1359_v15 = vpop.xlane.xlu0 %1358 }
0x132f   :  { %v1351_v14 = vsub.f32 %v1347_v11, %v1350_v13  ;;  %v1360_v5 = vsub.f32 %v1784_v60, %v1359_v15 }
0x1331   :  { %1552 = vrsqrt.f32 %v1351_v14 }
0x133b   :  { %v1553_v16 = vpop.eup %1552 }
0x133c   :  { %v1361_v17 = vmul.f32 %v1553_v16, %v1360_v5 }
0x133e   :  { %v1364_v19 = vsel %vm1363_vm8, %v1361_v17, 0.0 }
0x133f   :  { %v1365_v18 = vadd.f32 %v1364_v19, %v1340_v8 }
0x1341   :  { %1367 = vst [vmem:[#allocation1 + $0x18] sm:$0xff] %v1365_v18 }
0x1348   :  { %v1370_v3 = vld [vmem:[#allocation1 + $0x1d] ss:$0 sm:$0xff] }
0x1349   :  { %v1382_v23 = vmul.f32 %v1370_v3, %v1365_v18  ;;  %v1373_v24 = vmul.f32 %v1370_v3, %v1370_v3 }
0x134b   :  { %1383 = vadd.xlane.f32.xlu0 %v1382_v23  ;;  %1374 = vadd.xlane.f32.xlu1 %v1373_v24 }
0x13d8   :  { %v1375_v26 = vpop.xlane.xlu1 %1374  ;;  %v1384_v31 = vpop.xlane.xlu0 %1383 }
0x13d9   :  { %v1376_v30 = vsub.f32 %v1372_v25, %v1375_v26  ;;  %v1385_v21 = vsub.f32 %v1784_v60, %v1384_v31 }
0x13db   :  { %1554 = vrsqrt.f32 %v1376_v30 }
0x13e5   :  { %v1555_v29 = vpop.eup %1554 }
0x13e6   :  { %v1386_v33 = vmul.f32 %v1555_v29, %v1385_v21 }
0x13e8   :  { %v1389_v34 = vsel %vm1388_vm11, %v1386_v33, 0.0 }
0x13e9   :  { %v1390_v35 = vadd.f32 %v1389_v34, %v1365_v18 }
0x13eb   :  { %1392 = vst [vmem:[#allocation1 + $0x18] sm:$0xff] %v1390_v35 }
0x13f2   :  { %v1395_v37 = vld [vmem:[#allocation1 + $0x1e] ss:$0 sm:$0xff] }
0x13f3   :  { %v1407_v38 = vmul.f32 %v1395_v37, %v1390_v35  ;;  %v1398_v40 = vmul.f32 %v1395_v37, %v1395_v37 }
0x13f5   :  { %1408 = vadd.xlane.f32.xlu0 %v1407_v38  ;;  %1399 = vadd.xlane.f32.xlu1 %v1398_v40 }
0x13f9   :  { %489 = vadd.xlane.f32.xlu0 %v488_v42 }
0x13fd   :  { %1222 = vadd.xlane.f32.xlu0 %v1221_v20 }
0x1482   :  { %v1409_v45 = vpop.xlane.xlu0 %1408  ;;  %v1400_v47 = vpop.xlane.xlu1 %1399 }
0x1483   :  { %v1401_v48 = vsub.f32 %v1397_v43, %v1400_v47  ;;  %v1410_v57 = vsub.f32 %v1784_v60, %v1409_v45 }
0x1485   :  { %1556 = vrsqrt.f32 %v1401_v48 }
0x1486   :  { %v490_v51 = vpop.xlane.xlu0 %489 }
0x1487   :  { %v491_v39 = vsub.f32 %v486_v50, %v490_v51 }
0x1489   :  { %v492_v54 = vmul.f32 %v1733_v32, %v491_v39 }
0x148a   :  { %v1223_v46 = vpop.xlane.xlu0 %1222 }
0x148b   :  { %v495_v55 = vsel %vm494_vm9, %v492_v54, 0.0  ;;  %v1224_v56 = vsub.f32 %v1777_v44, %v1223_v46 }
0x148c   :  { %v496_v4 = vadd.f32 %v495_v55, %v487_v28 }
0x148d   :  { %v1225_v36 = vmul.f32 %v1853_v12, %v1224_v56 }
0x148e   :  { %497 = vst [vmem:[#allocation1] sm:$0xff] %v496_v4  ;;  %1477 = vst [vmem:[%s1901_s1] sm:$0xff] %v496_v4 }
0x148f   :  { %v1557_v58 = vpop.eup %1556  ;;  %v1228_v32 = vsel %vm1227_vm13, %v1225_v36, 0.0 }
0x1490   :  { %v1411_v59 = vmul.f32 %v1557_v58, %v1410_v57  ;;  %v1229_v44 = vadd.f32 %v1228_v32, %v1844_v53 }
0x1492   :  { %v1414_v61 = vsel %vm1413_vm4, %v1411_v59, 0.0  ;;  %1231 = vst [vmem:[#allocation1 + $0x10] sm:$0xff] %v1229_v44  ;;  %1481 = vst [vmem:[%s1901_s1 + $0x10] sm:$0xff] %v1229_v44 }
0x1493   :  { %v1415_v12 = vadd.f32 %v1414_v61, %v1390_v35 }
0x1495   :  { %1417 = vst [vmem:[#allocation1 + $0x18] sm:$0xff] %v1415_v12 }
0x149c   :  { %v1420_v62 = vld [vmem:[#allocation1 + $0x1f] ss:$0 sm:$0xff] }
0x149d   :  { %v1423_v63 = vmul.f32 %v1420_v62, %v1420_v62  ;;  %v1432_v1 = vmul.f32 %v1420_v62, %v1415_v12 }
0x149f   :  { %1424 = vadd.xlane.f32.xlu1 %v1423_v63 }
0x14a3   :  { %907 = vadd.xlane.f32.xlu1 %v906_v0 }
0x14a7   :  { %1433 = vadd.xlane.f32.xlu1 %v1432_v1 }
0x152c   :  { %v1425_v6 = vpop.xlane.xlu1 %1424 }
0x152d   :  { %v1426_v53 = vsub.f32 %v1422_v2, %v1425_v6 }
0x152f   :  { %1558 = vrsqrt.f32 %v1426_v53 }
0x1530   :  { %v908_v8 = vpop.xlane.xlu1 %907 }
0x1531   :  { %v909_v9 = vsub.f32 %v903_v7, %v908_v8 }
0x1533   :  { %v910_v10 = vmul.f32 %v1809_v49, %v909_v9 }
0x1534   :  { %v1434_v11 = vpop.xlane.xlu1 %1433 }
0x1535   :  { %v913_v52 = vsel %vm912_vm1, %v910_v10, 0.0  ;;  %v1435_v22 = vsub.f32 %v1784_v60, %v1434_v11 }
0x1536   :  { %v914_v13 = vadd.f32 %v913_v52, %v1795_v27 }
0x1538   :  { %916 = vst [vmem:[#allocation1 + $0x8] sm:$0xff] %v914_v13  ;;  %1479 = vst [vmem:[%s1901_s1 + $0x8] sm:$0xff] %v914_v13 }
0x1539   :  { %v1559_v14 = vpop.eup %1558 }
0x153a   :  { %v1436_v15 = vmul.f32 %v1559_v14, %v1435_v22 }
0x153c   :  { %v1439_v5 = vsel %vm1438_vm15, %v1436_v15, 0.0 }
0x153d   :  { %v1440_v16 = vadd.f32 %v1439_v5, %v1415_v12 }
0x153f   :  { %1442 = vst [vmem:[#allocation1 + $0x18] sm:$0xff] %v1440_v16  ;;  %1483 = vst [vmem:[%s1901_s1 + $0x18] sm:$0xff] %v1440_v16 }

// kernel: custom-call.55
= control target key start
LH: loop header
LB: loop body
LE: loop exit
PB: predicated region body
PF: predicated region fallthrough
CT: control target
= control target key end

     0   :  { %v46_v0 = vlaneseq  ;;  %v730_v9 = vmov -1.0   ;;  %v731_v53 = vmov 0.0   ;;  %s884_s0 = inlined_call_operand.vmem [shape: f32[1,32,32], index: 0, kind: input, shape index: {}]   ;;  %s885_s1 = inlined_call_operand.vmem [shape: f32[1,32,32], index: 1, kind: output, shape index: {}]  }
   0x1   :  { %v35_v1 = vld [vmem:[%s884_s0] sm:$0xff]  ;;  %v37_v36 = vld [vmem:[%s884_s0 + $0x8] sm:$0xff] }
   0x2   :  { %v745_v2 = vand.u32 127, %v46_v0  ;;  %v747_v3 = vshrl.u32 %v46_v0, 7 }
   0x4   :  { %vm52_vm0 = vcmp.eq.s32.totalorder %v747_v3, %v745_v2  ;;  %vm48_vm1 = vcmp.lt.s32.totalorder %v745_v2, 32  ;;  %vm57_vm2 = vcmp.ge.s32.totalorder %v747_v3, %v745_v2  ;;  %vm119_vm4 = vcmp.eq.s32.totalorder %v745_v2, 0 }
   0x5   :  { %v54_v4 = vsel %vm52_vm0, %v35_v1, 0.0  ;;  %vm58_vm3 = vmand %vm57_vm2, %vm48_vm1  ;;  %vm116_vm5 = vcmp.eq.s32.totalorder %v745_v2, %v747_v3  ;;  %v120_v10 = vsel %vm119_vm4, 1.0, %v730_v9  ;;  %vm148_vm6 = vcmp.eq.s32.totalorder %v745_v2, 1 }
   0x6   :  { %55 = vadd.xlane.f32.xlu0 %v54_v4  ;;  %v59_v6 = vsel %vm58_vm3, %v35_v1, 0.0  ;;  %v121_v11 = vsel %vm116_vm5, %v120_v10, 0.0  ;;  %vm158_vm7 = vcmp.eq.s32.totalorder %v745_v2, 2  ;;  %vm168_vm8 = vcmp.eq.s32.totalorder %v745_v2, 3 }
   0x7   :  { %vm178_vm9 = vcmp.eq.s32.totalorder %v745_v2, 4  ;;  %v67_v31 = vadd.s32 8, %v747_v3  ;;  %vm188_vm11 = vcmp.eq.s32.totalorder %v745_v2, 5  ;;  %vm198_vm14 = vcmp.eq.s32.totalorder %v745_v2, 6 }
   0x8   :  { %vm208_vm0 = vcmp.eq.s32.totalorder %v745_v2, 7  ;;  %vm218_vm2 = vcmp.eq.s32.totalorder %v745_v2, 8  ;;  %vm232_vm3 = vcmp.eq.s32.totalorder %v745_v2, 9  ;;  %vm246_vm4 = vcmp.eq.s32.totalorder %v745_v2, 10 }
   0x9   :  { %vm68_vm10 = vcmp.eq.s32.totalorder %v67_v31, %v745_v2  ;;  %vm73_vm12 = vcmp.ge.s32.totalorder %v67_v31, %v745_v2  ;;  %vm127_vm15 = vcmp.eq.s32.totalorder %v745_v2, %v67_v31  ;;  %vm260_vm5 = vcmp.eq.s32.totalorder %v745_v2, 11 }
   0xa   :  { %v70_v37 = vsel %vm68_vm10, %v37_v36, 0.0  ;;  %vm74_vm13 = vmand %vm73_vm12, %vm48_vm1  ;;  %v128_v54 = vsel %vm127_vm15, -1.0, %v731_v53  ;;  %vm316_vm12 = vcmp.eq.s32.totalorder %v745_v2, 15  ;;  %vm348_vm15 = vcmp.eq.s32.totalorder %v745_v2, 17 }
   0xb   :  { %v75_v44 = vsel %vm74_vm13, %v37_v36, 0.0 }
  0x93   :  { %v751_v5 = vpop.xlane.xlu0 %55 }
  0x94   :  { %722 = vrcp.f32 %v751_v5 }
  0x9e   :  { %v759_v7 = vpop.eup %722 }
  0x9f   :  { %v61_v8 = vmul.f32 %v759_v7, %v59_v6 }
  0xa1   :  { %62 = vst [vmem:[#allocation2] sm:$0xff] %v61_v8 }
  0xa8   :  { %v144_v12 = vld [vmem:[#allocation2 + $0x1] ss:$0 sm:$0xff]  ;;  %v154_v15 = vld [vmem:[#allocation2 + $0x2] ss:$0 sm:$0xff]  ;;  %v164_v20 = vld [vmem:[#allocation2 + $0x3] ss:$0 sm:$0xff] }
  0xa9   :  { %v145_v13 = vxor.u32 2147483648, %v144_v12  ;;  %v155_v17 = vxor.u32 2147483648, %v154_v15  ;;  %v165_v22 = vxor.u32 2147483648, %v164_v20  ;;  %v174_v25 = vld [vmem:[#allocation2 + $0x4] ss:$0 sm:$0xff] }
  0xaa   :  { %v175_v27 = vxor.u32 2147483648, %v174_v25  ;;  %v184_v30 = vld [vmem:[#allocation2 + $0x5] ss:$0 sm:$0xff]  ;;  %v194_v38 = vld [vmem:[#allocation2 + $0x6] ss:$0 sm:$0xff] }
  0xab   :  { %v149_v14 = vmul.f32 %v145_v13, %v121_v11  ;;  %v185_v33 = vxor.u32 2147483648, %v184_v30  ;;  %v195_v40 = vxor.u32 2147483648, %v194_v38  ;;  %v204_v47 = vld [vmem:[#allocation2 + $0x7] ss:$0 sm:$0xff] }
  0xac   :  { %v205_v50 = vxor.u32 2147483648, %v204_v47  ;;  %v83_v47 = vadd.s32 16, %v747_v3 }
  0xad   :  { %150 = vadd.xlane.f32.xlu0 %v149_v14 }
  0xae   :  { %vm89_vm10 = vcmp.ge.s32.totalorder %v83_v47, %v745_v2  ;;  %vm134_vm13 = vcmp.eq.s32.totalorder %v745_v2, %v83_v47 }
 0x13a   :  { %v151_v16 = vpop.xlane.xlu0 %150 }
 0x13b   :  { %v152_v18 = vsel %vm148_vm6, %v151_v16, %v121_v11  ;;  %vm274_vm6 = vcmp.eq.s32.totalorder %v745_v2, 12 }
 0x13c   :  { %v159_v19 = vmul.f32 %v155_v17, %v152_v18 }
 0x13e   :  { %160 = vadd.xlane.f32.xlu1 %v159_v19 }
 0x1cb   :  { %v161_v21 = vpop.xlane.xlu1 %160 }
 0x1cc   :  { %v162_v23 = vsel %vm158_vm7, %v161_v21, %v152_v18  ;;  %vm288_vm7 = vcmp.eq.s32.totalorder %v745_v2, 13 }
 0x1cd   :  { %v169_v24 = vmul.f32 %v165_v22, %v162_v23 }
 0x1cf   :  { %170 = vadd.xlane.f32.xlu1 %v169_v24 }
 0x25c   :  { %v171_v26 = vpop.xlane.xlu1 %170 }
 0x25d   :  { %v172_v28 = vsel %vm168_vm8, %v171_v26, %v162_v23  ;;  %vm84_vm8 = vcmp.eq.s32.totalorder %v83_v47, %v745_v2 }
 0x25e   :  { %v179_v29 = vmul.f32 %v175_v27, %v172_v28 }
 0x260   :  { %180 = vadd.xlane.f32.xlu0 %v179_v29 }
 0x2ed   :  { %v181_v32 = vpop.xlane.xlu0 %180 }
 0x2ee   :  { %v182_v34 = vsel %vm178_vm9, %v181_v32, %v172_v28  ;;  %vm302_vm9 = vcmp.eq.s32.totalorder %v745_v2, 14 }
 0x2ef   :  { %v189_v35 = vmul.f32 %v185_v33, %v182_v34 }
 0x2f1   :  { %190 = vadd.xlane.f32.xlu1 %v189_v35 }
 0x2f5   :  { %71 = vadd.xlane.f32.xlu1 %v70_v37 }
 0x37e   :  { %v191_v39 = vpop.xlane.xlu1 %190 }
 0x37f   :  { %v192_v41 = vsel %vm188_vm11, %v191_v39, %v182_v34  ;;  %vm90_vm11 = vmand %vm89_vm10, %vm48_vm1  ;;  %vm474_vm10 = vcmp.eq.s32.totalorder %v745_v2, 24 }
 0x380   :  { %v199_v42 = vmul.f32 %v195_v40, %v192_v41 }
 0x382   :  { %200 = vadd.xlane.f32.xlu0 %v199_v42  ;;  %v775_v43 = vpop.xlane.xlu1 %71 }
 0x383   :  { %724 = vrcp.f32 %v775_v43 }
 0x38d   :  { %v781_v45 = vpop.eup %724 }
 0x38e   :  { %v77_v46 = vmul.f32 %v781_v45, %v75_v44 }
 0x390   :  { %78 = vst [vmem:[#allocation2 + $0x8] sm:$0xff] %v77_v46 }
 0x397   :  { %v214_v48 = vld [vmem:[#allocation2 + $0x8] ss:$0 sm:$0xff]  ;;  %v228_v59 = vld [vmem:[#allocation2 + $0x9] ss:$0 sm:$0xff]  ;;  %v242_v6 = vld [vmem:[#allocation2 + $0xa] ss:$0 sm:$0xff] }
 0x398   :  { %v215_v51 = vxor.u32 2147483648, %v214_v48  ;;  %v229_v62 = vxor.u32 2147483648, %v228_v59  ;;  %v243_v10 = vxor.u32 2147483648, %v242_v6  ;;  %v256_v15 = vld [vmem:[#allocation2 + $0xb] ss:$0 sm:$0xff] }
 0x399   :  { %v257_v18 = vxor.u32 2147483648, %v256_v15  ;;  %v270_v23 = vld [vmem:[#allocation2 + $0xc] ss:$0 sm:$0xff]  ;;  %v284_v31 = vld [vmem:[#allocation2 + $0xd] ss:$0 sm:$0xff] }
 0x39a   :  { %v223_v56 = vmul.f32 %v215_v51, %v128_v54  ;;  %v271_v26 = vxor.u32 2147483648, %v270_v23  ;;  %v285_v34 = vxor.u32 2147483648, %v284_v31  ;;  %v298_v39 = vld [vmem:[#allocation2 + $0xe] ss:$0 sm:$0xff] }
 0x39b   :  { %v299_v42 = vxor.u32 2147483648, %v298_v39 }
 0x40f   :  { %v201_v49 = vpop.xlane.xlu0 %200 }
 0x410   :  { %v202_v52 = vsel %vm198_vm14, %v201_v49, %v192_v41  ;;  %vm330_vm14 = vcmp.eq.s32.totalorder %v745_v2, 16 }
 0x411   :  { %v209_v55 = vmul.f32 %v205_v50, %v202_v52 }
 0x413   :  { %210 = vadd.xlane.f32.xlu0 %v209_v55  ;;  %v312_v55 = vld [vmem:[#allocation2 + $0xf] ss:$0 sm:$0xff] }
 0x417   :  { %224 = vadd.xlane.f32.xlu0 %v223_v56 }
 0x4a0   :  { %v211_v57 = vpop.xlane.xlu0 %210 }
 0x4a1   :  { %v212_v58 = vsel %vm208_vm0, %v211_v57, %v202_v52  ;;  %v313_v57 = vxor.u32 2147483648, %v312_v55  ;;  %vm366_vm0 = vcmp.eq.s32.totalorder %v745_v2, 18 }
 0x4a2   :  { %v219_v60 = vmul.f32 %v215_v51, %v212_v58  ;;  %v39_v51 = vld [vmem:[%s884_s0 + $0x10] sm:$0xff] }
 0x4a4   :  { %v225_v61 = vpop.xlane.xlu0 %224  ;;  %220 = vadd.xlane.f32.xlu1 %v219_v60 }
 0x4a5   :  { %v226_v63 = vsel %vm218_vm2, %v225_v61, %v128_v54  ;;  %v86_v54 = vsel %vm84_vm8, %v39_v51, 0.0 }
 0x4a6   :  { %v237_v0 = vmul.f32 %v229_v62, %v226_v63 }
 0x4a8   :  { %238 = vadd.xlane.f32.xlu0 %v237_v0 }
 0x531   :  { %v221_v1 = vpop.xlane.xlu1 %220 }
 0x532   :  { %v222_v4 = vsel %vm218_vm2, %v221_v1, %v212_v58  ;;  %vm384_vm2 = vcmp.eq.s32.totalorder %v745_v2, 19 }
 0x533   :  { %v233_v8 = vmul.f32 %v229_v62, %v222_v4 }
 0x535   :  { %v239_v9 = vpop.xlane.xlu0 %238  ;;  %234 = vadd.xlane.f32.xlu1 %v233_v8 }
 0x536   :  { %v240_v11 = vsel %vm232_vm3, %v239_v9, %v226_v63  ;;  %v91_v63 = vsel %vm90_vm11, %v39_v51, 0.0  ;;  %vm496_vm11 = vcmp.eq.s32.totalorder %v745_v2, 25 }
 0x537   :  { %v251_v12 = vmul.f32 %v243_v10, %v240_v11 }
 0x539   :  { %252 = vadd.xlane.f32.xlu0 %v251_v12 }
 0x5c2   :  { %v235_v13 = vpop.xlane.xlu1 %234 }
 0x5c3   :  { %v236_v14 = vsel %vm232_vm3, %v235_v13, %v222_v4  ;;  %vm402_vm3 = vcmp.eq.s32.totalorder %v745_v2, 20 }
 0x5c4   :  { %v247_v16 = vmul.f32 %v243_v10, %v236_v14 }
 0x5c6   :  { %v253_v17 = vpop.xlane.xlu0 %252  ;;  %248 = vadd.xlane.f32.xlu1 %v247_v16 }
 0x5c7   :  { %v254_v19 = vsel %vm246_vm4, %v253_v17, %v240_v11 }
 0x5c8   :  { %v265_v20 = vmul.f32 %v257_v18, %v254_v19 }
 0x5ca   :  { %266 = vadd.xlane.f32.xlu0 %v265_v20 }
 0x653   :  { %v249_v21 = vpop.xlane.xlu1 %248 }
 0x654   :  { %v250_v22 = vsel %vm246_vm4, %v249_v21, %v236_v14  ;;  %v135_v14 = vsel %vm134_vm13, -1.0, %v731_v53  ;;  %vm420_vm4 = vcmp.eq.s32.totalorder %v745_v2, 21  ;;  %vm540_vm13 = vcmp.eq.s32.totalorder %v745_v2, 27 }
 0x655   :  { %v261_v24 = vmul.f32 %v257_v18, %v250_v22 }
 0x657   :  { %v267_v25 = vpop.xlane.xlu0 %266  ;;  %262 = vadd.xlane.f32.xlu1 %v261_v24 }
 0x658   :  { %v268_v27 = vsel %vm260_vm5, %v267_v25, %v254_v19 }
 0x659   :  { %v279_v28 = vmul.f32 %v271_v26, %v268_v27 }
 0x65b   :  { %280 = vadd.xlane.f32.xlu0 %v279_v28 }
 0x6e4   :  { %v263_v29 = vpop.xlane.xlu1 %262 }
 0x6e5   :  { %v264_v30 = vsel %vm260_vm5, %v263_v29, %v250_v22 }
 0x6e6   :  { %v275_v32 = vmul.f32 %v271_v26, %v264_v30 }
 0x6e8   :  { %v281_v33 = vpop.xlane.xlu0 %280  ;;  %276 = vadd.xlane.f32.xlu1 %v275_v32 }
 0x6e9   :  { %v282_v35 = vsel %vm274_vm6, %v281_v33, %v268_v27 }
 0x6ea   :  { %v293_v36 = vmul.f32 %v285_v34, %v282_v35 }
 0x6ec   :  { %294 = vadd.xlane.f32.xlu0 %v293_v36 }
 0x775   :  { %v277_v37 = vpop.xlane.xlu1 %276 }
 0x776   :  { %v278_v38 = vsel %vm274_vm6, %v277_v37, %v264_v30  ;;  %vm438_vm6 = vcmp.eq.s32.totalorder %v745_v2, 22 }
 0x777   :  { %v289_v40 = vmul.f32 %v285_v34, %v278_v38 }
 0x779   :  { %v295_v41 = vpop.xlane.xlu0 %294  ;;  %290 = vadd.xlane.f32.xlu1 %v289_v40 }
 0x77a   :  { %v296_v44 = vsel %vm288_vm7, %v295_v41, %v282_v35 }
 0x77b   :  { %v307_v46 = vmul.f32 %v299_v42, %v296_v44 }
 0x77d   :  { %308 = vadd.xlane.f32.xlu0 %v307_v46 }
 0x806   :  { %v291_v48 = vpop.xlane.xlu1 %290 }
 0x807   :  { %v292_v49 = vsel %vm288_vm7, %v291_v48, %v278_v38 }
 0x808   :  { %v303_v50 = vmul.f32 %v299_v42, %v292_v49 }
 0x80a   :  { %v309_v52 = vpop.xlane.xlu0 %308  ;;  %304 = vadd.xlane.f32.xlu1 %v303_v50 }
 0x80b   :  { %v310_v56 = vsel %vm302_vm9, %v309_v52, %v296_v44 }
 0x80c   :  { %v321_v58 = vmul.f32 %v313_v57, %v310_v56 }
 0x80e   :  { %87 = vadd.xlane.f32.xlu1 %v86_v54 }
 0x812   :  { %322 = vadd.xlane.f32.xlu1 %v321_v58 }
 0x897   :  { %v305_v59 = vpop.xlane.xlu1 %304 }
 0x898   :  { %v306_v60 = vsel %vm302_vm9, %v305_v59, %v292_v49 }
 0x899   :  { %v317_v61 = vmul.f32 %v313_v57, %v306_v60 }
 0x89b   :  { %318 = vadd.xlane.f32.xlu0 %v317_v61  ;;  %v800_v62 = vpop.xlane.xlu1 %87 }
 0x89c   :  { %726 = vrcp.f32 %v800_v62 }
 0x89f   :  { %v323_v4 = vpop.xlane.xlu1 %322 }
 0x8a0   :  { %v324_v9 = vsel %vm316_vm12, %v323_v4, %v310_v56 }
 0x8a6   :  { %v806_v0 = vpop.eup %726 }
 0x8a7   :  { %v93_v1 = vmul.f32 %v806_v0, %v91_v63 }
 0x8a9   :  { %94 = vst [vmem:[#allocation2 + $0x10] sm:$0xff] %v93_v1 }
 0x8b0   :  { %v326_v6 = vld [vmem:[#allocation2 + $0x10] ss:$0 sm:$0xff]  ;;  %v344_v16 = vld [vmem:[#allocation2 + $0x11] ss:$0 sm:$0xff]  ;;  %v362_v27 = vld [vmem:[#allocation2 + $0x12] ss:$0 sm:$0xff] }
 0x8b1   :  { %v327_v8 = vxor.u32 2147483648, %v326_v6  ;;  %v345_v18 = vxor.u32 2147483648, %v344_v16  ;;  %v363_v29 = vxor.u32 2147483648, %v362_v27  ;;  %v380_v38 = vld [vmem:[#allocation2 + $0x13] ss:$0 sm:$0xff] }
 0x8b2   :  { %v381_v40 = vxor.u32 2147483648, %v380_v38  ;;  %v398_v51 = vld [vmem:[#allocation2 + $0x14] ss:$0 sm:$0xff]  ;;  %v416_v1 = vld [vmem:[#allocation2 + $0x15] ss:$0 sm:$0xff] }
 0x8b3   :  { %v335_v10 = vmul.f32 %v327_v8, %v324_v9  ;;  %v339_v15 = vmul.f32 %v327_v8, %v135_v14  ;;  %v399_v54 = vxor.u32 2147483648, %v398_v51  ;;  %v417_v6 = vxor.u32 2147483648, %v416_v1  ;;  %v434_v16 = vld [vmem:[#allocation2 + $0x16] ss:$0 sm:$0xff] }
 0x8b5   :  { %336 = vadd.xlane.f32.xlu1 %v335_v10 }
 0x928   :  { %v319_v11 = vpop.xlane.xlu0 %318 }
 0x929   :  { %v320_v12 = vsel %vm316_vm12, %v319_v11, %v306_v60  ;;  %vm518_vm12 = vcmp.eq.s32.totalorder %v745_v2, 26 }
 0x92a   :  { %v331_v13 = vmul.f32 %v327_v8, %v320_v12 }
 0x92c   :  { %332 = vadd.xlane.f32.xlu0 %v331_v13 }
 0x930   :  { %340 = vadd.xlane.f32.xlu0 %v339_v15 }
 0x942   :  { %v337_v17 = vpop.xlane.xlu1 %336 }
 0x943   :  { %v338_v19 = vsel %vm330_vm14, %v337_v17, %v324_v9  ;;  %v99_v17 = vadd.s32 24, %v747_v3 }
 0x944   :  { %v353_v20 = vmul.f32 %v345_v18, %v338_v19 }
 0x945   :  { %vm100_vm5 = vcmp.eq.s32.totalorder %v99_v17, %v745_v2  ;;  %vm105_vm7 = vcmp.ge.s32.totalorder %v99_v17, %v745_v2  ;;  %vm141_vm9 = vcmp.eq.s32.totalorder %v745_v2, %v99_v17 }
 0x946   :  { %354 = vadd.xlane.f32.xlu0 %v353_v20  ;;  %vm106_vm8 = vmand %vm105_vm7, %vm48_vm1  ;;  %vm456_vm1 = vcmp.eq.s32.totalorder %v745_v2, 23 }
 0x9b9   :  { %v333_v21 = vpop.xlane.xlu0 %332 }
 0x9ba   :  { %v334_v22 = vsel %vm330_vm14, %v333_v21, %v320_v12 }
 0x9bb   :  { %v349_v23 = vmul.f32 %v345_v18, %v334_v22 }
 0x9bd   :  { %v341_v24 = vpop.xlane.xlu0 %340  ;;  %350 = vadd.xlane.f32.xlu1 %v349_v23 }
 0x9be   :  { %v342_v25 = vsel %vm330_vm14, %v341_v24, %v135_v14  ;;  %vm562_vm14 = vcmp.eq.s32.totalorder %v745_v2, 28 }
 0x9bf   :  { %v357_v26 = vmul.f32 %v345_v18, %v342_v25 }
 0x9c1   :  { %358 = vadd.xlane.f32.xlu1 %v357_v26 }
 0x9d3   :  { %v355_v28 = vpop.xlane.xlu0 %354 }
 0x9d4   :  { %v356_v30 = vsel %vm348_vm15, %v355_v28, %v338_v19  ;;  %v435_v19 = vxor.u32 2147483648, %v434_v16 }
 0x9d5   :  { %v371_v31 = vmul.f32 %v363_v29, %v356_v30 }
 0x9d7   :  { %372 = vadd.xlane.f32.xlu1 %v371_v31 }
 0xa4a   :  { %v351_v32 = vpop.xlane.xlu1 %350 }
 0xa4b   :  { %v352_v33 = vsel %vm348_vm15, %v351_v32, %v334_v22  ;;  %v41_v22 = vld [vmem:[%s884_s0 + $0x18] sm:$0xff] }
 0xa4c   :  { %v367_v34 = vmul.f32 %v363_v29, %v352_v33  ;;  %v102_v23 = vsel %vm100_vm5, %v41_v22, 0.0  ;;  %vm647_vm5 = vweird.f32 %v751_v5 }
 0xa4e   :  { %368 = vadd.xlane.f32.xlu0 %v367_v34  ;;  %v359_v35 = vpop.xlane.xlu1 %358 }
 0xa4f   :  { %v360_v36 = vsel %vm348_vm15, %v359_v35, %v342_v25  ;;  %v107_v35 = vsel %vm106_vm8, %v41_v22, 0.0  ;;  %vm584_vm15 = vcmp.eq.s32.totalorder %v745_v2, 29 }
 0xa50   :  { %v375_v37 = vmul.f32 %v363_v29, %v360_v36  ;;  %v452_v29 = vld [vmem:[#allocation2 + $0x17] ss:$0 sm:$0xff] }
 0xa51   :  { %v453_v31 = vxor.u32 2147483648, %v452_v29 }
 0xa52   :  { %376 = vadd.xlane.f32.xlu0 %v375_v37 }
 0xa64   :  { %v373_v39 = vpop.xlane.xlu1 %372 }
 0xa65   :  { %v374_v41 = vsel %vm366_vm0, %v373_v39, %v356_v30 }
 0xa66   :  { %v389_v42 = vmul.f32 %v381_v40, %v374_v41 }
 0xa68   :  { %390 = vadd.xlane.f32.xlu0 %v389_v42 }
 0xadb   :  { %v369_v44 = vpop.xlane.xlu0 %368 }
 0xadc   :  { %v370_v46 = vsel %vm366_vm0, %v369_v44, %v352_v33 }
 0xadd   :  { %v385_v47 = vmul.f32 %v381_v40, %v370_v46 }
 0xadf   :  { %386 = vadd.xlane.f32.xlu1 %v385_v47  ;;  %v377_v48 = vpop.xlane.xlu0 %376 }
 0xae0   :  { %v378_v49 = vsel %vm366_vm0, %v377_v48, %v360_v36  ;;  %vm606_vm0 = vcmp.eq.s32.totalorder %v745_v2, 30 }
 0xae1   :  { %v393_v50 = vmul.f32 %v381_v40, %v378_v49 }
 0xae3   :  { %394 = vadd.xlane.f32.xlu1 %v393_v50  ;;  %v142_v50 = vsel %vm141_vm9, -1.0, %v731_v53 }
 0xaf5   :  { %v391_v52 = vpop.xlane.xlu0 %390 }
 0xaf6   :  { %v392_v55 = vsel %vm384_vm2, %v391_v52, %v374_v41 }
 0xaf7   :  { %v407_v56 = vmul.f32 %v399_v54, %v392_v55 }
 0xaf9   :  { %408 = vadd.xlane.f32.xlu1 %v407_v56 }
 0xb6c   :  { %v387_v57 = vpop.xlane.xlu1 %386 }
 0xb6d   :  { %v388_v58 = vsel %vm384_vm2, %v387_v57, %v370_v46 }
 0xb6e   :  { %v403_v59 = vmul.f32 %v399_v54, %v388_v58 }
 0xb70   :  { %404 = vadd.xlane.f32.xlu0 %v403_v59  ;;  %v395_v60 = vpop.xlane.xlu1 %394 }
 0xb71   :  { %v396_v61 = vsel %vm384_vm2, %v395_v60, %v378_v49  ;;  %vm628_vm2 = vcmp.eq.s32.totalorder %v745_v2, 31 }
 0xb72   :  { %v411_v63 = vmul.f32 %v399_v54, %v396_v61 }
 0xb74   :  { %412 = vadd.xlane.f32.xlu0 %v411_v63 }
 0xb86   :  { %v409_v4 = vpop.xlane.xlu1 %408 }
 0xb87   :  { %v410_v8 = vsel %vm402_vm3, %v409_v4, %v392_v55 }
 0xb88   :  { %v425_v9 = vmul.f32 %v417_v6, %v410_v8 }
 0xb8a   :  { %426 = vadd.xlane.f32.xlu0 %v425_v9 }
 0xbfd   :  { %v405_v10 = vpop.xlane.xlu0 %404 }
 0xbfe   :  { %v406_v11 = vsel %vm402_vm3, %v405_v10, %v388_v58 }
 0xbff   :  { %v421_v12 = vmul.f32 %v417_v6, %v406_v11 }
 0xc01   :  { %422 = vadd.xlane.f32.xlu1 %v421_v12  ;;  %v413_v13 = vpop.xlane.xlu0 %412 }
 0xc02   :  { %v414_v14 = vsel %vm402_vm3, %v413_v13, %v396_v61  ;;  %vm652_vm3 = vweird.f32 %v775_v43 }
 0xc03   :  { %v429_v15 = vmul.f32 %v417_v6, %v414_v14 }
 0xc05   :  { %430 = vadd.xlane.f32.xlu1 %v429_v15 }
 0xc17   :  { %v427_v18 = vpop.xlane.xlu0 %426 }
 0xc18   :  { %v428_v20 = vsel %vm420_vm4, %v427_v18, %v410_v8 }
 0xc19   :  { %v443_v21 = vmul.f32 %v435_v19, %v428_v20 }
 0xc1b   :  { %444 = vadd.xlane.f32.xlu1 %v443_v21 }
 0xc1f   :  { %103 = vadd.xlane.f32.xlu1 %v102_v23 }
 0xc8e   :  { %v423_v24 = vpop.xlane.xlu1 %422 }
 0xc8f   :  { %v424_v25 = vsel %vm420_vm4, %v423_v24, %v406_v11 }
 0xc90   :  { %v439_v3 = vmul.f32 %v435_v19, %v424_v25 }
 0xc92   :  { %440 = vadd.xlane.f32.xlu0 %v439_v3  ;;  %v431_v26 = vpop.xlane.xlu1 %430 }
 0xc93   :  { %v432_v27 = vsel %vm420_vm4, %v431_v26, %v414_v14 }
 0xc94   :  { %v447_v28 = vmul.f32 %v435_v19, %v432_v27 }
 0xc96   :  { %448 = vadd.xlane.f32.xlu0 %v447_v28 }
 0xca8   :  { %v445_v30 = vpop.xlane.xlu1 %444 }
 0xca9   :  { %v446_v32 = vsel %vm438_vm6, %v445_v30, %v428_v20 }
 0xcaa   :  { %v461_v33 = vmul.f32 %v453_v31, %v446_v32 }
 0xcac   :  { %462 = vadd.xlane.f32.xlu1 %v461_v33  ;;  %v832_v34 = vpop.xlane.xlu1 %103 }
 0xcad   :  { %728 = vrcp.f32 %v832_v34  ;;  %vm664_vm4 = vweird.f32 %v832_v34 }
 0xcb7   :  { %v838_v36 = vpop.eup %728 }
 0xcb8   :  { %v109_v37 = vmul.f32 %v838_v36, %v107_v35 }
 0xcba   :  { %110 = vst [vmem:[#allocation2 + $0x18] sm:$0xff] %v109_v37 }
 0xcc1   :  { %v470_v46 = vld [vmem:[#allocation2 + $0x18] ss:$0 sm:$0xff]  ;;  %v492_v60 = vld [vmem:[#allocation2 + $0x19] ss:$0 sm:$0xff]  ;;  %v514_v15 = vld [vmem:[#allocation2 + $0x1a] ss:$0 sm:$0xff] }
 0xcc2   :  { %v471_v47 = vxor.u32 2147483648, %v470_v46  ;;  %v493_v63 = vxor.u32 2147483648, %v492_v60  ;;  %v515_v17 = vxor.u32 2147483648, %v514_v15  ;;  %v536_v28 = vld [vmem:[#allocation2 + $0x1b] ss:$0 sm:$0xff] }
 0xcc3   :  { %v537_v30 = vxor.u32 2147483648, %v536_v28  ;;  %v558_v46 = vld [vmem:[#allocation2 + $0x1c] ss:$0 sm:$0xff] }
 0xcc4   :  { %v487_v52 = vmul.f32 %v471_v47, %v142_v50 }
 0xd1f   :  { %v441_v38 = vpop.xlane.xlu0 %440 }
 0xd20   :  { %v442_v39 = vsel %vm438_vm6, %v441_v38, %v424_v25 }
 0xd21   :  { %v457_v40 = vmul.f32 %v453_v31, %v442_v39 }
 0xd23   :  { %458 = vadd.xlane.f32.xlu0 %v457_v40  ;;  %v449_v41 = vpop.xlane.xlu0 %448 }
 0xd24   :  { %v450_v42 = vsel %vm438_vm6, %v449_v41, %v432_v27  ;;  %vm658_vm6 = vweird.f32 %v800_v62 }
 0xd25   :  { %v465_v44 = vmul.f32 %v453_v31, %v450_v42 }
 0xd27   :  { %466 = vadd.xlane.f32.xlu0 %v465_v44 }
 0xd39   :  { %v463_v48 = vpop.xlane.xlu1 %462 }
 0xd3a   :  { %v464_v49 = vsel %vm456_vm1, %v463_v48, %v446_v32  ;;  %v559_v48 = vxor.u32 2147483648, %v558_v46 }
 0xd3b   :  { %v479_v51 = vmul.f32 %v471_v47, %v464_v49 }
 0xd3d   :  { %480 = vadd.xlane.f32.xlu0 %v479_v51 }
 0xd41   :  { %488 = vadd.xlane.f32.xlu0 %v487_v52 }
 0xdb0   :  { %v459_v54 = vpop.xlane.xlu0 %458 }
 0xdb1   :  { %v460_v55 = vsel %vm456_vm1, %v459_v54, %v442_v39 }
 0xdb2   :  { %v475_v56 = vmul.f32 %v471_v47, %v460_v55 }
 0xdb4   :  { %v467_v57 = vpop.xlane.xlu0 %466  ;;  %476 = vadd.xlane.f32.xlu1 %v475_v56 }
 0xdb5   :  { %v468_v58 = vsel %vm456_vm1, %v467_v57, %v450_v42 }
 0xdb6   :  { %v483_v59 = vmul.f32 %v471_v47, %v468_v58 }
 0xdb8   :  { %484 = vadd.xlane.f32.xlu1 %v483_v59 }
 0xdca   :  { %v481_v61 = vpop.xlane.xlu0 %480 }
 0xdcb   :  { %v482_v1 = vsel %vm474_vm10, %v481_v61, %v464_v49  ;;  %v580_v61 = vld [vmem:[#allocation2 + $0x1d] ss:$0 sm:$0xff] }
 0xdcc   :  { %v501_v4 = vmul.f32 %v493_v63, %v482_v1 }
 0xdce   :  { %502 = vadd.xlane.f32.xlu0 %v501_v4  ;;  %v489_v53 = vpop.xlane.xlu0 %488 }
 0xdcf   :  { %v490_v6 = vsel %vm474_vm10, %v489_v53, %v142_v50 }
 0xdd0   :  { %v509_v8 = vmul.f32 %v493_v63, %v490_v6 }
 0xdd2   :  { %510 = vadd.xlane.f32.xlu0 %v509_v8 }
 0xe41   :  { %v477_v9 = vpop.xlane.xlu1 %476 }
 0xe42   :  { %v478_v10 = vsel %vm474_vm10, %v477_v9, %v460_v55 }
 0xe43   :  { %v497_v11 = vmul.f32 %v493_v63, %v478_v10 }
 0xe45   :  { %498 = vadd.xlane.f32.xlu1 %v497_v11  ;;  %v485_v12 = vpop.xlane.xlu1 %484 }
 0xe46   :  { %v486_v13 = vsel %vm474_vm10, %v485_v12, %v468_v58 }
 0xe47   :  { %v505_v14 = vmul.f32 %v493_v63, %v486_v13 }
 0xe49   :  { %506 = vadd.xlane.f32.xlu1 %v505_v14 }
 0xe5b   :  { %v503_v16 = vpop.xlane.xlu0 %502 }
 0xe5c   :  { %v504_v18 = vsel %vm496_vm11, %v503_v16, %v482_v1  ;;  %v581_v1 = vxor.u32 2147483648, %v580_v61  ;;  %v602_v16 = vld [vmem:[#allocation2 + $0x1e] ss:$0 sm:$0xff] }
 0xe5d   :  { %v523_v19 = vmul.f32 %v515_v17, %v504_v18 }
 0xe5f   :  { %524 = vadd.xlane.f32.xlu0 %v523_v19  ;;  %v511_v20 = vpop.xlane.xlu0 %510 }
 0xe60   :  { %v512_v21 = vsel %vm496_vm11, %v511_v20, %v490_v6 }
 0xe61   :  { %v531_v22 = vmul.f32 %v515_v17, %v512_v21 }
 0xe63   :  { %532 = vadd.xlane.f32.xlu0 %v531_v22 }
 0xed2   :  { %v499_v23 = vpop.xlane.xlu1 %498 }
 0xed3   :  { %v500_v24 = vsel %vm496_vm11, %v499_v23, %v478_v10 }
 0xed4   :  { %v519_v25 = vmul.f32 %v515_v17, %v500_v24 }
 0xed6   :  { %520 = vadd.xlane.f32.xlu1 %v519_v25  ;;  %v507_v3 = vpop.xlane.xlu1 %506 }
 0xed7   :  { %v508_v26 = vsel %vm496_vm11, %v507_v3, %v486_v13 }
 0xed8   :  { %v527_v27 = vmul.f32 %v515_v17, %v508_v26 }
 0xeda   :  { %528 = vadd.xlane.f32.xlu1 %v527_v27 }
 0xeec   :  { %v525_v29 = vpop.xlane.xlu0 %524 }
 0xeed   :  { %v526_v31 = vsel %vm518_vm12, %v525_v29, %v504_v18  ;;  %v603_v18 = vxor.u32 2147483648, %v602_v16  ;;  %v624_v29 = vld [vmem:[#allocation2 + $0x1f] ss:$0 sm:$0xff] }
 0xeee   :  { %v545_v32 = vmul.f32 %v537_v30, %v526_v31 }
 0xef0   :  { %546 = vadd.xlane.f32.xlu0 %v545_v32  ;;  %v533_v33 = vpop.xlane.xlu0 %532 }
 0xef1   :  { %v534_v35 = vsel %vm518_vm12, %v533_v33, %v512_v21 }
 0xef2   :  { %v553_v37 = vmul.f32 %v537_v30, %v534_v35 }
 0xef4   :  { %554 = vadd.xlane.f32.xlu0 %v553_v37 }
 0xf63   :  { %v521_v38 = vpop.xlane.xlu1 %520 }
 0xf64   :  { %v522_v39 = vsel %vm518_vm12, %v521_v38, %v500_v24 }
 0xf65   :  { %v541_v40 = vmul.f32 %v537_v30, %v522_v39 }
 0xf67   :  { %542 = vadd.xlane.f32.xlu1 %v541_v40  ;;  %v529_v41 = vpop.xlane.xlu1 %528 }
 0xf68   :  { %v530_v42 = vsel %vm518_vm12, %v529_v41, %v508_v26 }
 0xf69   :  { %v549_v44 = vmul.f32 %v537_v30, %v530_v42 }
 0xf6b   :  { %550 = vadd.xlane.f32.xlu1 %v549_v44 }
 0xf7d   :  { %v547_v47 = vpop.xlane.xlu0 %546 }
 0xf7e   :  { %v548_v49 = vsel %vm540_vm13, %v547_v47, %v526_v31  ;;  %v625_v31 = vxor.u32 2147483648, %v624_v29 }
 0xf7f   :  { %v567_v50 = vmul.f32 %v559_v48, %v548_v49 }
 0xf81   :  { %568 = vadd.xlane.f32.xlu0 %v567_v50  ;;  %v555_v51 = vpop.xlane.xlu0 %554 }
 0xf82   :  { %v556_v52 = vsel %vm540_vm13, %v555_v51, %v534_v35 }
 0xf83   :  { %v575_v54 = vmul.f32 %v559_v48, %v556_v52 }
 0xf85   :  { %576 = vadd.xlane.f32.xlu0 %v575_v54 }
 0xff4   :  { %v543_v55 = vpop.xlane.xlu1 %542 }
 0xff5   :  { %v544_v56 = vsel %vm540_vm13, %v543_v55, %v522_v39 }
 0xff6   :  { %v563_v57 = vmul.f32 %v559_v48, %v544_v56 }
 0xff8   :  { %564 = vadd.xlane.f32.xlu1 %v563_v57  ;;  %v551_v58 = vpop.xlane.xlu1 %550 }
 0xff9   :  { %v552_v59 = vsel %vm540_vm13, %v551_v58, %v530_v42 }
 0xffa   :  { %v571_v60 = vmul.f32 %v559_v48, %v552_v59 }
 0xffc   :  { %572 = vadd.xlane.f32.xlu1 %v571_v60 }
0x100e   :  { %v569_v63 = vpop.xlane.xlu0 %568 }
0x100f   :  { %v570_v4 = vsel %vm562_vm14, %v569_v63, %v548_v49 }
0x1010   :  { %v589_v53 = vmul.f32 %v581_v1, %v570_v4 }
0x1012   :  { %590 = vadd.xlane.f32.xlu0 %v589_v53  ;;  %v577_v6 = vpop.xlane.xlu0 %576 }
0x1013   :  { %v578_v8 = vsel %vm562_vm14, %v577_v6, %v556_v52 }
0x1014   :  { %v597_v9 = vmul.f32 %v581_v1, %v578_v8 }
0x1016   :  { %598 = vadd.xlane.f32.xlu0 %v597_v9 }
0x1085   :  { %v565_v10 = vpop.xlane.xlu1 %564 }
0x1086   :  { %v566_v11 = vsel %vm562_vm14, %v565_v10, %v544_v56 }
0x1087   :  { %v585_v12 = vmul.f32 %v581_v1, %v566_v11 }
0x1089   :  { %586 = vadd.xlane.f32.xlu1 %v585_v12  ;;  %v573_v13 = vpop.xlane.xlu1 %572 }
0x108a   :  { %v574_v14 = vsel %vm562_vm14, %v573_v13, %v552_v59 }
0x108b   :  { %v593_v15 = vmul.f32 %v581_v1, %v574_v14 }
0x108d   :  { %594 = vadd.xlane.f32.xlu1 %v593_v15 }
0x109f   :  { %v591_v17 = vpop.xlane.xlu0 %590 }
0x10a0   :  { %v592_v19 = vsel %vm584_vm15, %v591_v17, %v570_v4 }
0x10a1   :  { %v611_v20 = vmul.f32 %v603_v18, %v592_v19 }
0x10a3   :  { %612 = vadd.xlane.f32.xlu0 %v611_v20  ;;  %v599_v21 = vpop.xlane.xlu0 %598 }
0x10a4   :  { %v600_v22 = vsel %vm584_vm15, %v599_v21, %v578_v8 }
0x10a5   :  { %v619_v23 = vmul.f32 %v603_v18, %v600_v22 }
0x10a7   :  { %620 = vadd.xlane.f32.xlu0 %v619_v23 }
0x1116   :  { %v587_v24 = vpop.xlane.xlu1 %586 }
0x1117   :  { %v588_v25 = vsel %vm584_vm15, %v587_v24, %v566_v11 }
0x1118   :  { %v607_v3 = vmul.f32 %v603_v18, %v588_v25 }
0x111a   :  { %608 = vadd.xlane.f32.xlu1 %v607_v3  ;;  %v595_v26 = vpop.xlane.xlu1 %594 }
0x111b   :  { %v596_v27 = vsel %vm584_vm15, %v595_v26, %v574_v14 }
0x111c   :  { %v615_v28 = vmul.f32 %v603_v18, %v596_v27 }
0x111e   :  { %616 = vadd.xlane.f32.xlu1 %v615_v28 }
0x1130   :  { %v613_v30 = vpop.xlane.xlu0 %612 }
0x1131   :  { %v614_v32 = vsel %vm606_vm0, %v613_v30, %v592_v19 }
0x1132   :  { %v633_v33 = vmul.f32 %v625_v31, %v614_v32 }
0x1134   :  { %634 = vadd.xlane.f32.xlu0 %v633_v33  ;;  %v621_v35 = vpop.xlane.xlu0 %620 }
0x1135   :  { %v622_v37 = vsel %vm606_vm0, %v621_v35, %v600_v22 }
0x1136   :  { %v641_v38 = vmul.f32 %v625_v31, %v622_v37 }
0x1138   :  { %642 = vadd.xlane.f32.xlu0 %v641_v38 }
0x11a7   :  { %v609_v39 = vpop.xlane.xlu1 %608 }
0x11a8   :  { %v610_v40 = vsel %vm606_vm0, %v609_v39, %v588_v25 }
0x11a9   :  { %v629_v41 = vmul.f32 %v625_v31, %v610_v40 }
0x11ab   :  { %630 = vadd.xlane.f32.xlu1 %v629_v41  ;;  %v617_v42 = vpop.xlane.xlu1 %616 }
0x11ac   :  { %v618_v44 = vsel %vm606_vm0, %v617_v42, %v596_v27 }
0x11ad   :  { %v637_v46 = vmul.f32 %v625_v31, %v618_v44 }
0x11af   :  { %638 = vadd.xlane.f32.xlu1 %v637_v46 }
0x11c1   :  { %v635_v47 = vpop.xlane.xlu0 %634 }
0x11c2   :  { %v636_v48 = vsel %vm628_vm2, %v635_v47, %v614_v32 }
0x11c3   :  { %v651_v49 = vmul.f32 %v781_v45, %v636_v48 }
0x11c5   :  { %v653_v50 = vsel %vm652_vm3, %v636_v48, %v651_v49  ;;  %v643_v51 = vpop.xlane.xlu0 %642 }
0x11c6   :  { %704 = vst [vmem:[%s885_s1 + $0x8] sm:$0xff] %v653_v50  ;;  %v644_v52 = vsel %vm628_vm2, %v643_v51, %v622_v37 }
0x11c7   :  { %v663_v54 = vmul.f32 %v838_v36, %v644_v52 }
0x11c9   :  { %v665_v55 = vsel %vm664_vm4, %v644_v52, %v663_v54 }
0x11ca   :  { %708 = vst [vmem:[%s885_s1 + $0x18] sm:$0xff] %v665_v55 }
0x1238   :  { %v631_v45 = vpop.xlane.xlu1 %630 }
0x1239   :  { %v632_v43 = vsel %vm628_vm2, %v631_v45, %v610_v40 }
0x123a   :  { %v646_v56 = vmul.f32 %v759_v7, %v632_v43 }
0x123c   :  { %v648_v57 = vsel %vm647_vm5, %v632_v43, %v646_v56  ;;  %v639_v58 = vpop.xlane.xlu1 %638 }
0x123d   :  { %702 = vst [vmem:[%s885_s1] sm:$0xff] %v648_v57  ;;  %v640_v34 = vsel %vm628_vm2, %v639_v58, %v618_v44 }
0x123e   :  { %v657_v36 = vmul.f32 %v806_v0, %v640_v34 }
0x1240   :  { %v659_v59 = vsel %vm658_vm6, %v640_v34, %v657_v36 }
0x1241   :  { %706 = vst [vmem:[%s885_s1 + $0x10] sm:$0xff] %v659_v59 }

// kernel: custom-call.22
= control target key start
LH: loop header
LB: loop body
LE: loop exit
PB: predicated region body
PF: predicated region fallthrough
CT: control target
= control target key end

     0   :  { %s3478_s0 = inlined_call_operand.vmem [shape: f32[16,16], index: 0, kind: input, shape index: {}]   ;;  %s3479_s1 = inlined_call_operand.vmem [shape: f32[16,16], index: 1, kind: input, shape index: {}]   ;;  %s3480_s2 = inlined_call_operand.vmem [shape: f32[16,16], index: 2, kind: input, shape index: {}]   ;;  %s3481_s3 = inlined_call_operand.vmem [shape: f32[16,16], index: 3, kind: input, shape index: {}]   ;;  %s3482_s4 = inlined_call_operand.vmem [shape: f32[16], index: 4, kind: output, shape index: {0}]   ;;  %s3483_s5 = inlined_call_operand.vmem [shape: f32[16], index: 5, kind: output, shape index: {1}]   ;;  %s3484_s6 = inlined_call_operand.vmem [shape: f32[16,16], index: 6, kind: output, shape index: {2}]   ;;  %s3485_s7 = inlined_call_operand.vmem [shape: f32[16,16], index: 7, kind: output, shape index: {3}]   ;;  %s3486_s8 = inlined_call_operand.vmem [shape: f32[16,16], index: 8, kind: output, shape index: {4}]   ;;  %s3487_s9 = inlined_call_operand.vmem [shape: f32[16,16], index: 9, kind: output, shape index: {5}]  }
   0x1   :  { %s24_s11 = scalar_lea.vmem %s3478_s0, 8 }
   0x2   :  { %p1741_p0 = scmp.gt.s32.totalorder %s3478_s0, %s24_s11 }
   0x3   :  { %s2918_s14 = smov (!%p1741_p0), [#allocation0]   ;;  %s2922_s17 = smov (!%p1741_p0), %s3478_s0  }
   0x4   :  { %1742 = sbr.rel (%p1741_p0) target bundleno = 21 (0x15), region = 421 }
   0xb LB: > { %v58_v0 = vld [vmem:[%s2924_s17] sm:$0xff]  ;;  %s60_s17 = scalar_lea.vmem %s2924_s17, 8   ;;  %s2924_s17 = sphi %s2922_s17, %s60_s17   ;;  %s2920_s14 = sphi %s2918_s14, %s61_s14  }
   0xc   : > { %59 = vst [vmem:[%s2920_s14] sm:$0xff] %v58_v0  ;;  %s61_s14 = scalar_lea.vmem %s2920_s14, 8   ;;  %p55_p1 = scmp.gt.s32.totalorder %s60_s17, %s24_s11 }
   0xe   :  { %57 = sbr.rel (!%p55_p1) target bundleno = 11 (0xb), region = 427 }
  0x15 PF:  { %s86_s20 = scalar_lea.vmem %s3479_s1, 8 }
  0x16   :  { %p1761_p2 = scmp.gt.s32.totalorder %s3479_s1, %s86_s20 }
  0x17   :  { %s2926_s0 = smov (!%p1761_p2), [#allocation1]   ;;  %s2930_s25 = smov (!%p1761_p2), %s3479_s1  }
  0x18   :  { %1762 = sbr.rel (%p1761_p2) target bundleno = 41 (0x29), region = 443 }
  0x1f LB: > { %v120_v1 = vld [vmem:[%s2932_s25] sm:$0xff]  ;;  %s122_s25 = scalar_lea.vmem %s2932_s25, 8   ;;  %s2932_s25 = sphi %s2930_s25, %s122_s25   ;;  %s2928_s0 = sphi %s2926_s0, %s123_s0  }
  0x20   : > { %121 = vst [vmem:[%s2928_s0] sm:$0xff] %v120_v1  ;;  %s123_s0 = scalar_lea.vmem %s2928_s0, 8   ;;  %p117_p3 = scmp.gt.s32.totalorder %s122_s25, %s86_s20 }
  0x22   :  { %119 = sbr.rel (!%p117_p3) target bundleno = 31 (0x1f), region = 449 }
  0x29 PF:  { %s148_s28 = scalar_lea.vmem %s3480_s2, 8 }
  0x2a   :  { %p1781_p4 = scmp.gt.s32.totalorder %s3480_s2, %s148_s28 }
  0x2b   :  { %s2934_s1 = smov (!%p1781_p4), [#allocation2]   ;;  %s2938_s12 = smov (!%p1781_p4), %s3480_s2  }
  0x2c   :  { %1782 = sbr.rel (%p1781_p4) target bundleno = 61 (0x3d), region = 465 }
  0x33 LB: > { %v182_v2 = vld [vmem:[%s2940_s12] sm:$0xff]  ;;  %s184_s12 = scalar_lea.vmem %s2940_s12, 8   ;;  %s2940_s12 = sphi %s2938_s12, %s184_s12   ;;  %s2936_s1 = sphi %s2934_s1, %s185_s1  }
  0x34   : > { %183 = vst [vmem:[%s2936_s1] sm:$0xff] %v182_v2  ;;  %s185_s1 = scalar_lea.vmem %s2936_s1, 8   ;;  %p179_p5 = scmp.gt.s32.totalorder %s184_s12, %s148_s28 }
  0x36   :  { %181 = sbr.rel (!%p179_p5) target bundleno = 51 (0x33), region = 471 }
  0x3d PF:  { %s210_s15 = scalar_lea.vmem %s3481_s3, 8 }
  0x3e   :  { %p1801_p6 = scmp.gt.s32.totalorder %s3481_s3, %s210_s15 }
  0x3f   :  { %s2942_s2 = smov (!%p1801_p6), [#allocation3]   ;;  %s2946_s20 = smov (!%p1801_p6), %s3481_s3  }
  0x40   :  { %1802 = sbr.rel (%p1801_p6) target bundleno = 81 (0x51), region = 487 }
  0x47 LB: > { %v244_v3 = vld [vmem:[%s2948_s20] sm:$0xff]  ;;  %s246_s20 = scalar_lea.vmem %s2948_s20, 8   ;;  %s2948_s20 = sphi %s2946_s20, %s246_s20   ;;  %s2944_s2 = sphi %s2942_s2, %s247_s2  }
  0x48   : > { %245 = vst [vmem:[%s2944_s2] sm:$0xff] %v244_v3  ;;  %s247_s2 = scalar_lea.vmem %s2944_s2, 8   ;;  %p241_p7 = scmp.gt.s32.totalorder %s246_s20, %s210_s15 }
  0x4a   :  { %243 = sbr.rel (!%p241_p7) target bundleno = 71 (0x47), region = 493 }
  0x51 PF:  { %s259_s21 = smov [#allocation12]  ;;  %v260_v4 = vld [vmem:[#allocation0] sm:$0xff]  ;;  %v264_v5 = vld [vmem:[#allocation0 + $0x8] sm:$0xff]  ;;  %s266_s22 = smov [#allocation13]  ;;  %v267_v6 = vld [vmem:[#allocation1] sm:$0xff]  ;;  %v300_v7 = vlaneseq  ;;  %v2990_v11 = vmov 0.0  }
  0x52   :  { %261 = vst [vmem:[%s259_s21] sm:$0xff] %v260_v4  ;;  %2066 = vst [vmem:[%s259_s21 + $0x8] sm:$0xff] %v264_v5  ;;  %v271_v8 = vld [vmem:[#allocation1 + $0x8] sm:$0xff]  ;;  %s273_s3 = smov [#allocation14]  ;;  %v274_v9 = vld [vmem:[#allocation2] sm:$0xff]  ;;  %s280_s0 = smov [#allocation15] }
  0x53   :  { %268 = vst [vmem:[%s266_s22] sm:$0xff] %v267_v6  ;;  %v278_v10 = vld [vmem:[#allocation2 + $0x8] sm:$0xff]  ;;  %287 = vst [vmem:[#allocation8] sm:$0xff] %v2990_v11  ;;  %v281_v12 = vld [vmem:[#allocation3] sm:$0xff]  ;;  %v3079_v14 = vand.u32 127, %v300_v7  ;;  %v3081_v15 = vshrl.u32 %v300_v7, 7  ;;  %s299_s23 = smov [#allocation8] }
  0x54   :  { %289 = vst [vmem:[#allocation8 + $0x8] sm:$0xff] %v2990_v11  ;;  %290 = vst [vmem:[#allocation9] sm:$0xff] %v2990_v11  ;;  %v285_v13 = vld [vmem:[#allocation3 + $0x8] sm:$0xff]  ;;  %s319_s24 = smov [#allocation11]  ;;  %s1819_s25 = smov [#allocation12] }
  0x55   :  { %292 = vst [vmem:[#allocation9 + $0x8] sm:$0xff] %v2990_v11  ;;  %293 = vst [vmem:[#allocation10] sm:$0xff] %v2990_v11  ;;  %v302_v14 = vmov %v3079_v14  ;;  %v305_v15 = vmov %v3081_v15  ;;  %vm1823_vm4 = vcmp.lt.s32.totalorder %v3079_v14, 16  ;;  %s1845_s26 = smov [#allocation13]  ;;  %s1868_s27 = smov [#allocation14] }
  0x56   :  { %295 = vst [vmem:[#allocation10 + $0x8] sm:$0xff] %v2990_v11  ;;  %296 = vst [vmem:[#allocation11] sm:$0xff] %v2990_v11  ;;  %v322_v14 = vmov %v3079_v14  ;;  %v325_v15 = vmov %v3081_v15  ;;  %v315_v16 = vadd.s32 8, %v305_v15  ;;  %vm309_vm0 = vcmp.eq.s32.totalorder %v305_v15, %v302_v14  ;;  %s1891_s28 = smov [#allocation15] }
  0x57   :  { %298 = vst [vmem:[#allocation11 + $0x8] sm:$0xff] %v2990_v11  ;;  %2067 = vst [vmem:[%s266_s22 + $0x8] sm:$0xff] %v271_v8  ;;  %v335_v17 = vadd.s32 8, %v325_v15  ;;  %vm329_vm1 = vcmp.eq.s32.totalorder %v325_v15, %v322_v14  ;;  %v1818_v15 = vmov %v3081_v15 }
  0x58   :  { %275 = vst [vmem:[%s273_s3] sm:$0xff] %v274_v9  ;;  %2068 = vst [vmem:[%s273_s3 + $0x8] sm:$0xff] %v278_v10  ;;  %vm316_vm2 = vcmp.eq.s32.totalorder %v315_v16, %v302_v14  ;;  %v1834_v34 = vadd.s32 8, %v1818_v15 }
  0x59   :  { %282 = vst [vmem:[%s280_s0] sm:$0xff] %v281_v12  ;;  %2069 = vst [vmem:[%s280_s0 + $0x8] sm:$0xff] %v285_v13  ;;  %vm336_vm3 = vcmp.eq.s32.totalorder %v335_v17, %v322_v14  ;;  %v1815_v14 = vmov %v3079_v14  ;;  %v1825_v26 = vld [vmem:[%s1819_s25] sm:$0xff]  ;;  %v2074_v27 = vld [vmem:[%s1819_s25 + $0x8] sm:$0xff] }
  0x5a   :  { %vm1828_vm5 = vcmp.eq.s32.totalorder %v1818_v15, %v1815_v14  ;;  %v1841_v14 = vmov %v3079_v14  ;;  %v1826_v29 = vsel %vm1823_vm4, %v1825_v26, 0.0  ;;  %v1832_v30 = vsel %vm1823_vm4, %v2074_v27, 0.0 }
  0x5b   :  { %v306_v18 = vld [vmem:[%s299_s23] sm:$0xff]  ;;  %v2070_v19 = vld [vmem:[%s299_s23 + $0x8] sm:$0xff]  ;;  %v1827_v35 = vmul.f32 %v1826_v29, %v1826_v29  ;;  %v1833_v36 = vmul.f32 %v1832_v30, %v1832_v30  ;;  %vm1835_vm6 = vcmp.eq.s32.totalorder %v1834_v34, %v1815_v14  ;;  %v1890_v15 = vmov %v3081_v15 }
  0x5c   :  { %v310_v21 = vsel %vm309_vm0, 1.0, %v306_v18  ;;  %v317_v22 = vsel %vm316_vm2, 1.0, %v2070_v19  ;;  %v1844_v15 = vmov %v3081_v15  ;;  %v1864_v14 = vmov %v3079_v14 }
  0x5d   :  { %311 = vst [vmem:[%s299_s23] sm:$0xff] %v310_v21  ;;  %2071 = vst [vmem:[%s299_s23 + $0x8] sm:$0xff] %v317_v22  ;;  %v1838_v41 = vadd.f32 %v1833_v36, %v1827_v35  ;;  %v1829_v45 = vsel %vm1828_vm5, 0.0, %v1827_v35  ;;  %v1836_v49 = vsel %vm1835_vm6, 0.0, %v1833_v36  ;;  %v1887_v14 = vmov %v3079_v14 }
  0x5e   :  { %v326_v20 = vld [vmem:[%s319_s24] sm:$0xff]  ;;  %v2072_v24 = vld [vmem:[%s319_s24 + $0x8] sm:$0xff]  ;;  %v1837_v51 = vadd.f32 %v1836_v49, %v1829_v45  ;;  %v1867_v15 = vmov %v3081_v15  ;;  %v1908_v56 = vadd.s32 8, %v1890_v15  ;;  %vm1900_vm7 = vcmp.eq.s32.totalorder %v1890_v15, %v1887_v14 }
  0x5f   :  { %v330_v23 = vsel %vm329_vm1, 1.0, %v326_v20  ;;  %v337_v25 = vsel %vm336_vm3, 1.0, %v2072_v24  ;;  %v1851_v28 = vld [vmem:[%s1845_s26] sm:$0xff]  ;;  %v2075_v32 = vld [vmem:[%s1845_s26 + $0x8] sm:$0xff] }
  0x60   :  { %331 = vst [vmem:[%s319_s24] sm:$0xff] %v330_v23  ;;  %2073 = vst [vmem:[%s319_s24 + $0x8] sm:$0xff] %v337_v25  ;;  %v1852_v31 = vsel %vm1823_vm4, %v1851_v28, 0.0  ;;  %v1874_v33 = vld [vmem:[%s1868_s27] sm:$0xff]  ;;  %v1858_v38 = vsel %vm1823_vm4, %v2075_v32, 0.0  ;;  %v2076_v39 = vld [vmem:[%s1868_s27 + $0x8] sm:$0xff]  ;;  %vm1909_vm8 = vcmp.eq.s32.totalorder %v1908_v56, %v1887_v14 }
  0x61   :  { %v1853_v37 = vmul.f32 %v1852_v31, %v1852_v31  ;;  %v1875_v40 = vsel %vm1823_vm4, %v1874_v33, 0.0  ;;  %v1859_v42 = vmul.f32 %v1858_v38, %v1858_v38  ;;  %v1897_v43 = vld [vmem:[%s1891_s28] sm:$0xff]  ;;  %v1881_v44 = vsel %vm1823_vm4, %v2076_v39, 0.0  ;;  %v2077_v48 = vld [vmem:[%s1891_s28 + $0x8] sm:$0xff] }
  0x62   :  { %v1876_v47 = vmul.f32 %v1875_v40, %v1875_v40  ;;  %v1898_v50 = vsel %vm1823_vm4, %v1897_v43, 0.0  ;;  %v1882_v53 = vmul.f32 %v1881_v44, %v1881_v44  ;;  %v1906_v54 = vsel %vm1823_vm4, %v2077_v48, 0.0 }
  0x63   :  { %v1855_v46 = vadd.f32 %v1853_v37, %v1838_v41  ;;  %v1854_v55 = vadd.f32 %v1853_v37, %v1837_v51  ;;  %v1899_v58 = vmul.f32 %v1898_v50, %v1898_v50  ;;  %v1907_v61 = vmul.f32 %v1906_v54, %v1906_v54 }
  0x65   :  { %v1861_v52 = vadd.f32 %v1859_v42, %v1855_v46  ;;  %v1860_v59 = vadd.f32 %v1859_v42, %v1854_v55  ;;  %v1901_v0 = vsel %vm1900_vm7, 0.0, %v1899_v58  ;;  %v1910_v3 = vsel %vm1909_vm8, 0.0, %v1907_v61 }
  0x67   :  { %v1878_v57 = vadd.f32 %v1876_v47, %v1861_v52  ;;  %v1877_v62 = vadd.f32 %v1876_v47, %v1860_v59 }
  0x69   :  { %v1884_v60 = vadd.f32 %v1882_v53, %v1878_v57  ;;  %v1883_v1 = vadd.f32 %v1882_v53, %v1877_v62 }
  0x6b   :  { %v1903_v63 = vadd.f32 %v1899_v58, %v1884_v60  ;;  %v1902_v4 = vadd.f32 %v1901_v0, %v1883_v1 }
  0x6d   :  { %v1912_v2 = vadd.f32 %v1907_v61, %v1903_v63  ;;  %v1911_v5 = vadd.f32 %v1910_v3, %v1902_v4 }
  0x6f   :  { %1913 = vadd.xlane.f32.xlu0 %v1912_v2 }
  0x73   :  { %1921 = vadd.xlane.f32.xlu0 %v1911_v5 }
  0xfc   :  { %v1914_v6 = vpop.xlane.xlu0 %1913 }
  0xfd   :  { %v1915_v7 = vrot.slane %v1914_v6, 4 }
  0xff   :  { %v1916_v8 = vadd.f32 %v1915_v7, %v1914_v6 }
 0x100   :  { %v1922_v9 = vpop.xlane.xlu0 %1921 }
 0x101   :  { %v1917_v10 = vrot.slane %v1916_v8, 2  ;;  %v1923_v11 = vrot.slane %v1922_v9, 4 }
 0x103   :  { %v1924_v12 = vadd.f32 %v1923_v11, %v1922_v9  ;;  %v1918_v13 = vadd.f32 %v1917_v10, %v1916_v8 }
 0x105   :  { %v1925_v16 = vrot.slane %v1924_v12, 2  ;;  %v1919_v18 = vrot.slane %v1918_v13, 1 }
 0x107   :  { %v1926_v17 = vadd.f32 %v1925_v16, %v1924_v12  ;;  %v1920_v21 = vadd.f32 %v1919_v18, %v1918_v13 }
 0x109   :  { %v1927_v19 = vrot.slane %v1926_v17, 1 }
 0x10b   :  { %v1928_v20 = vadd.f32 %v1927_v19, %v1926_v17 }
 0x10d   :  { %2199 = vpush %v1928_v20 }
 0x10e   :  { %2201 = vpush %v1920_v21 }
 0x13e   :  { %s2200_s29 = spop %2199 }
 0x13f   :  { %s2202_s30 = spop %2201 }
 0x140   :  { %s1931_s1 = smul.f32 1e-10, %s2202_s30 }
 0x142   :  { %p1932_p8 = scmp.le.f32.partialorder %s2200_s29, %s1931_s1 }
 0x143   :  { %s3113_s10 = smov (!%p1932_p8), 0  }
 0x144   :  { %1935 = sbr.rel (%p1932_p8) target bundleno = 1051 (0x41b), region = 509 }
 0x14b LB: > { %s3118_s11 = smov 0   ;;  %s2952_s10 = sphi %s3113_s10, %s3488_s10  }
 0x14c LB: >> { %s475_s12 = smov [#allocation12]  ;;  %v479_v14 = vmov %v3079_v14  ;;  %v482_v15 = vmov %v3081_v15  ;;  %s501_s13 = smov [#allocation13]  ;;  %vm1008_vm8 = vcmp.eq.s32.totalorder %v3081_v15, 0  ;;  %s2956_s11 = sphi %s3118_s11, %s474_s11  }
 0x14d   : >> { %v505_v14 = vmov %v3079_v14  ;;  %v508_v15 = vmov %v3081_v15  ;;  %v483_v22 = vld [vmem:[%s475_s12] sm:$0xff]  ;;  %vm486_vm9 = vcmp.eq.s32.totalorder %v482_v15, %v479_v14  ;;  %v2078_v23 = vld [vmem:[%s475_s12 + $0x8] sm:$0xff]  ;;  %v491_v24 = vadd.s32 8, %v482_v15  ;;  %s527_s14 = smov [#allocation15]  ;;  %s476_s15 = smov [#allocation16] }
 0x14e   : >> { %vm512_vm10 = vcmp.eq.s32.totalorder %v508_v15, %v505_v14  ;;  %v517_v25 = vadd.s32 8, %v508_v15  ;;  %v487_v26 = vsel %vm486_vm9, %v483_v22, 0.0  ;;  %v509_v27 = vld [vmem:[%s501_s13] sm:$0xff]  ;;  %v2079_v28 = vld [vmem:[%s501_s13 + $0x8] sm:$0xff]  ;;  %v531_v14 = vmov %v3079_v14  ;;  %s502_s16 = smov [#allocation17]  ;;  %s528_s17 = smov [#allocation18] }
 0x14f   : >> { %v534_v15 = vmov %v3081_v15  ;;  %vm492_vm11 = vcmp.eq.s32.totalorder %v491_v24, %v479_v14  ;;  %v513_v29 = vsel %vm512_vm10, %v509_v27, 0.0  ;;  %v535_v30 = vld [vmem:[%s527_s14] sm:$0xff]  ;;  %v2080_v34 = vld [vmem:[%s527_s14 + $0x8] sm:$0xff]  ;;  %s557_s2 = smov [#allocation17]  ;;  %s555_s18 = smov [#allocation16]  ;;  %vm1032_vm9 = vcmp.eq.s32.totalorder %v3081_v15, 7 }
 0x150   : >> { %vm518_vm12 = vcmp.eq.s32.totalorder %v517_v25, %v505_v14  ;;  %vm538_vm13 = vcmp.eq.s32.totalorder %v534_v15, %v531_v14  ;;  %v493_v31 = vsel %vm492_vm11, %v2078_v23, %v487_v26  ;;  %v543_v35 = vadd.s32 8, %v534_v15  ;;  %s559_s19 = smov [#allocation18]  ;;  %s594_s20 = smov [#allocation19] }
 0x151   : >> { %v519_v32 = vsel %vm518_vm12, %v2079_v28, %v513_v29  ;;  %v539_v33 = vsel %vm538_vm13, %v535_v30, 0.0  ;;  %v494_v36 = vrot.slane %v493_v31, 4  ;;  %s596_s21 = smov [#allocation20]  ;;  %s553_s22 = smov [#allocation21]  ;;  %v624_v15 = vmov %v3081_v15 }
 0x152   : >> { %v520_v37 = vrot.slane %v519_v32, 4  ;;  %vm544_vm14 = vcmp.eq.s32.totalorder %v543_v35, %v531_v14  ;;  %s554_s3 = smov [#allocation22]  ;;  %s598_s22 = smov %s553_s22  ;;  %v655_v15 = vmov %v3081_v15  ;;  %v625_v24 = vadd.s32 8, %v624_v15 }
 0x153   : >> { %v495_v38 = vadd.f32 %v494_v36, %v493_v31  ;;  %v545_v40 = vsel %vm544_vm14, %v2080_v34, %v539_v33  ;;  %s600_s3 = smov %s554_s3  ;;  %v606_v14 = vmov %v3079_v14  ;;  %v609_v15 = vmov %v3081_v15  ;;  %s602_s0 = smov [#allocation21] }
 0x154   : >> { %v521_v39 = vadd.f32 %v520_v37, %v519_v32  ;;  %v546_v41 = vrot.slane %v545_v40, 4  ;;  %v621_v14 = vmov %v3079_v14  ;;  %v656_v25 = vadd.s32 8, %v655_v15  ;;  %s617_s23 = smov [#allocation21]  ;;  %s633_s24 = smov [#allocation22] }
 0x155   : >> { %v496_v42 = vrot.slane %v495_v38, 2  ;;  %v637_v14 = vmov %v3079_v14  ;;  %v640_v15 = vmov %v3081_v15  ;;  %vm611_vm3 = vcmp.eq.s32.totalorder %v609_v15, %v606_v14  ;;  %s648_s25 = smov [#allocation22]  ;;  %s615_s26 = smov [#allocation23] }
 0x156   : >> { %v522_v43 = vrot.slane %v521_v39, 2  ;;  %v547_v44 = vadd.f32 %v546_v41, %v545_v40  ;;  %v652_v14 = vmov %v3079_v14  ;;  %vm626_vm5 = vcmp.eq.s32.totalorder %v625_v24, %v621_v14  ;;  %s630_s27 = smov [#allocation23]  ;;  %s664_s28 = smov [#allocation23] }
 0x157   : >> { %v497_v45 = vadd.f32 %v496_v42, %v495_v38  ;;  %vm642_vm6 = vcmp.eq.s32.totalorder %v640_v15, %v637_v14  ;;  %vm657_vm7 = vcmp.eq.s32.totalorder %v656_v25, %v652_v14  ;;  %s646_s29 = smov [#allocation24]  ;;  %s3137_s30 = smov [#allocation12]  ;;  %v811_v15 = vmov %v3081_v15 }
 0x158   : >> { %v523_v46 = vadd.f32 %v522_v43, %v521_v39  ;;  %v548_v47 = vrot.slane %v547_v44, 2  ;;  %s661_s1 = smov [#allocation24]  ;;  %s3139_s12 = smov [#allocation13]  ;;  %v672_v38 = vld [vmem:[%s3137_s30] sm:$0xff]  ;;  %v789_v15 = vmov %v3081_v15  ;;  %v808_v14 = vmov %v3079_v14 }
 0x159   : >> { %v498_v48 = vrot.slane %v497_v45, 1  ;;  %s3141_s13 = smov [#allocation14]  ;;  %s3143_s14 = smov [#allocation15]  ;;  %v673_v39 = vld [vmem:[%s3139_s12] sm:$0xff]  ;;  %v831_v15 = vmov %v3081_v15  ;;  %v786_v14 = vmov %v3079_v14  ;;  %vm815_vm10 = vcmp.eq.s32.totalorder %v811_v15, %v808_v14 }
 0x15a   : >> { %v524_v49 = vrot.slane %v523_v46, 1  ;;  %v549_v50 = vadd.f32 %v548_v47, %v547_v44  ;;  %v674_v40 = vld [vmem:[%s3141_s13] sm:$0xff]  ;;  %v852_v15 = vmov %v3081_v15  ;;  %v828_v14 = vmov %v3079_v14  ;;  %s474_s11 = sadd.s32 1, %s2956_s11  }
 0x15b   : >> { %v499_v51 = vadd.f32 %v498_v48, %v497_v45  ;;  %v675_v41 = vld [vmem:[%s3143_s14] sm:$0xff]  ;;  %v849_v14 = vmov %v3079_v14  ;;  %vm794_vm12 = vcmp.eq.s32.totalorder %v789_v15, %v786_v14  ;;  %vm835_vm14 = vcmp.eq.s32.totalorder %v831_v15, %v828_v14  ;;  %p471_p9 = scmp.ge.s32.totalorder %s474_s11, 31  }
 0x15c   : >> { %v525_v52 = vadd.f32 %v524_v49, %v523_v46  ;;  %v550_v53 = vrot.slane %v549_v50, 1  ;;  %s422_s11 = smov (%p471_p9), [#allocation15] }
 0x15d   : >> { %500 = vst [vmem:[%s476_s15] sm:$0x1] %v499_v51  ;;  %s1088_s15 = smov [#allocation23] }
 0x15e   : >> { %526 = vst [vmem:[%s502_s16] sm:$0x1] %v525_v52  ;;  %v551_v54 = vadd.f32 %v550_v53, %v549_v50  ;;  %s3145_s16 = smov [#allocation8] }
 0x15f   : >> { %v1096_v42 = vld [vmem:[%s3145_s16] sm:$0xff] }
 0x160   : >> { %552 = vst [vmem:[%s528_s17] sm:$0x1] %v551_v54  ;;  %s3147_s17 = smov [#allocation9] }
 0x161   : >> { %v1097_v43 = vld [vmem:[%s3147_s17] sm:$0xff] }
 0x164   : >> { %v556_v57 = vld [vmem:[%s555_s18] sm:$0xff]  ;;  %s3152_s18 = smov [#allocation11] }
 0x165   : >> { %v558_v55 = vld [vmem:[%s557_s2] sm:$0xff]  ;;  %v579_v6 = vand.u32 2147483647, %v556_v57  ;;  %s3150_s2 = smov [#allocation10] }
 0x166   : >> { %v562_v56 = vmul.f32 2.0, %v558_v55  ;;  %v580_v11 = vand.u32 2147483647, %v558_v55  ;;  %v1098_v45 = vld [vmem:[%s3150_s2] sm:$0xff] }
 0x167   : >> { %v560_v58 = vld [vmem:[%s559_s19] sm:$0xff]  ;;  %s666_s19 = smov [#allocation24] }
 0x168   : >> { %2678 = vrcp.f32 %v562_v56  ;;  %v561_v59 = vsub.f32 %v560_v58, %v556_v57  ;;  %v581_v7 = vand.u32 2147483647, %v560_v58  ;;  %v1099_v46 = vld [vmem:[%s3152_s18] sm:$0xff] }
 0x16a   : >> { %v582_v10 = vmin.f32 %v579_v6, %v581_v7 }
 0x16c   : >> { %v583_v12 = vmul.f32 1.1920929e-08, %v582_v10 }
 0x16e   : >> { %vm584_vm2 = vcmp.le.f32.partialorder %v580_v11, %v583_v12 }
 0x172   : >> { %v2679_v60 = vpop.eup %2678 }
 0x173   : >> { %v564_v61 = vmul.f32 %v2679_v60, %v561_v59 }
 0x175   : >> { %v566_v62 = vmul.f32 %v564_v61, %v564_v61  ;;  %vm565_vm1 = vcmp.ge.f32.partialorder %v564_v61, 0.0 }
 0x177   : >> { %v567_v63 = vadd.f32 1.0, %v566_v62 }
 0x179   : >> { %2680 = vrsqrt.f32 %v567_v63  ;;  %vm570_vm15 = vcmp.eq.f32.partialorder %v567_v63, inf  ;;  %v573_v1 = vand.u32 2147483648, %v567_v63  ;;  %vm572_vm0 = vcmp.eq.f32.partialorder %v567_v63, 0.0 }
 0x183   : >> { %v2681_v0 = vpop.eup %2680 }
 0x184   : >> { %v569_v2 = vmul.f32 %v2681_v0, %v567_v63 }
 0x186   : >> { %v571_v3 = vsel %vm570_vm15, %v567_v63, %v569_v2 }
 0x187   : >> { %v574_v4 = vsel %vm572_vm0, %v573_v1, %v571_v3  ;;  %vm857_vm0 = vcmp.eq.s32.totalorder %v852_v15, %v849_v14 }
 0x188   : >> { %v575_v5 = vxor.u32 2147483648, %v574_v4 }
 0x18a   : >> { %v576_v8 = vsel %vm565_vm1, %v574_v4, %v575_v5 }
 0x18b   : >> { %v577_v9 = vadd.f32 %v576_v8, %v564_v61 }
 0x18d   : >> { %2682 = vrcp.f32 %v577_v9 }
 0x197   : >> { %v2683_v13 = vpop.eup %2682 }
 0x198   : >> { %v585_v16 = vsel %vm584_vm2, 0.0, %v2683_v13  ;;  %vm879_vm2 = vcmp.eq.s32.totalorder %v3079_v14, 0 }
 0x199   : >> { %v586_v17 = vmul.f32 %v585_v16, %v585_v16  ;;  %v590_v18 = vmul.f32 %v585_v16, %v558_v55 }
 0x19b   : >> { %v587_v19 = vadd.f32 1.0, %v586_v17  ;;  %v591_v20 = vsub.f32 %v556_v57, %v590_v18  ;;  %v593_v21 = vadd.f32 %v590_v18, %v560_v58 }
 0x19d   : >> { %2684 = vrsqrt.f32 %v587_v19  ;;  %595 = vst [vmem:[%s594_s20] sm:$0xff] %v591_v20  ;;  %597 = vst [vmem:[%s596_s21] sm:$0xff] %v593_v21  ;;  %s1090_s20 = smov [#allocation24]  ;;  %s692_s21 = smov [#allocation23] }
 0x1a7   : >> { %v2685_v22 = vpop.eup %2684 }
 0x1a8   : >> { %599 = vst [vmem:[%s598_s22] sm:$0xff] %v2685_v22  ;;  %v589_v23 = vmul.f32 %v2685_v22, %v585_v16  ;;  %s1116_s22 = smov [#allocation23] }
 0x1aa   : >> { %601 = vst [vmem:[%s600_s3] sm:$0xff] %v589_v23  ;;  %s695_s3 = smov [#allocation24] }
 0x1af   : >> { %v603_v26 = vld [vmem:[%s602_s0] ss:$0 sm:$0xff]  ;;  %s3169_s0 = smov [#allocation12] }
 0x1b0   : >> { %v618_v27 = vld [vmem:[%s617_s23] ss:$0 sm:$0xff]  ;;  %v612_v28 = vsel %vm611_vm3, %v603_v26, 0.0  ;;  %s3171_s23 = smov [#allocation14]  ;;  %vm883_vm3 = vcmp.eq.s32.totalorder %v3079_v14, 1 }
 0x1b1   : >> { %v627_v29 = vsel %vm626_vm5, %v618_v27, 0.0  ;;  %613 = vadd.xlane.f32.xlu0 %v612_v28  ;;  %v634_v30 = vld [vmem:[%s633_s24] ss:$0 sm:$0xff]  ;;  %s1119_s24 = smov [#allocation24]  ;;  %vm896_vm5 = vcmp.eq.s32.totalorder %v3079_v14, 15 }
 0x1b2   : >> { %628 = vadd.xlane.f32.xlu1 %v627_v29  ;;  %v649_v31 = vld [vmem:[%s648_s25] ss:$0 sm:$0xff]  ;;  %v643_v32 = vsel %vm642_vm6, %v634_v30, 0.0  ;;  %s3173_s25 = smov [#allocation15] }
 0x1b3   : >> { %v658_v33 = vsel %vm657_vm7, %v649_v31, 0.0 }
 0x1b5   : >> { %644 = vadd.xlane.f32.xlu0 %v643_v32 }
 0x1b6   : >> { %659 = vadd.xlane.f32.xlu1 %v658_v33 }
 0x23e   : >> { %v614_v34 = vpop.xlane.xlu0 %613 }
 0x23f   : >> { %v629_v35 = vpop.xlane.xlu1 %628  ;;  %616 = vst [vmem:[%s615_s26] sm:$0xff] %v614_v34  ;;  %s3175_s26 = smov [#allocation8] }
 0x240   : >> { %2081 = vst [vmem:[%s630_s27 + $0x8] sm:$0xff] %v629_v35  ;;  %s3177_s27 = smov [#allocation9] }
 0x242   : >> { %v645_v36 = vpop.xlane.xlu0 %644 }
 0x243   : >> { %v660_v37 = vpop.xlane.xlu1 %659  ;;  %647 = vst [vmem:[%s646_s29] sm:$0xff] %v645_v36  ;;  %s3181_s29 = smov [#allocation11] }
 0x244   : >> { %2082 = vst [vmem:[%s661_s1 + $0x8] sm:$0xff] %v660_v37  ;;  %s3197_s1 = smov [#allocation8] }
 0x247   : >> { %v665_v44 = vld [vmem:[%s664_s28] sm:$0xff]  ;;  %v2083_v10 = vld [vmem:[%s692_s21 + $0x8] sm:$0xff]  ;;  %s3179_s28 = smov [#allocation10]  ;;  %s756_s21 = smov [#allocation13] }
 0x248   : >> { %v1089_v47 = vld [vmem:[%s1088_s15] sm:$0xff]  ;;  %v676_v48 = vmul.f32 %v672_v38, %v665_v44  ;;  %v679_v49 = vmul.f32 %v673_v39, %v665_v44  ;;  %v683_v50 = vmul.f32 %v674_v40, %v665_v44  ;;  %v686_v51 = vmul.f32 %v675_v41, %v665_v44  ;;  %v2141_v11 = vld [vmem:[%s1116_s22 + $0x8] sm:$0xff]  ;;  %s728_s15 = smov [#allocation22]  ;;  %s758_s22 = smov [#allocation14] }
 0x249   : >> { %v1100_v52 = vmul.f32 %v1096_v42, %v1089_v47  ;;  %v1103_v53 = vmul.f32 %v1097_v43, %v1089_v47  ;;  %v1107_v54 = vmul.f32 %v1098_v45, %v1089_v47  ;;  %v1110_v55 = vmul.f32 %v1099_v46, %v1089_v47 }
 0x24b   : >> { %v667_v56 = vld [vmem:[%s666_s19] sm:$0xff]  ;;  %v2084_v12 = vld [vmem:[%s695_s3 + $0x8] sm:$0xff]  ;;  %s3217_s19 = smov [#allocation15]  ;;  %s760_s3 = smov [#allocation15] }
 0x24c   : >> { %v1091_v57 = vld [vmem:[%s1090_s20] sm:$0xff]  ;;  %v677_v58 = vmul.f32 %v674_v40, %v667_v56  ;;  %v680_v59 = vmul.f32 %v675_v41, %v667_v56  ;;  %v682_v60 = vmul.f32 %v672_v38, %v667_v56  ;;  %v685_v61 = vmul.f32 %v673_v39, %v667_v56  ;;  %v2142_v13 = vld [vmem:[%s1119_s24 + $0x8] sm:$0xff]  ;;  %s754_s20 = smov [#allocation12]  ;;  %s805_s24 = smov [#allocation13] }
 0x24d   : >> { %v1101_v62 = vmul.f32 %v1098_v45, %v1091_v57  ;;  %v1104_v63 = vmul.f32 %v1099_v46, %v1091_v57  ;;  %v1106_v0 = vmul.f32 %v1096_v42, %v1091_v57  ;;  %v1109_v1 = vmul.f32 %v1097_v43, %v1091_v57 }
 0x24e   : >> { %v678_v2 = vsub.f32 %v676_v48, %v677_v58  ;;  %v681_v3 = vsub.f32 %v679_v49, %v680_v59  ;;  %v684_v4 = vadd.f32 %v683_v50, %v682_v60  ;;  %v687_v5 = vadd.f32 %v686_v51, %v685_v61 }
 0x24f   : >> { %v1102_v6 = vsub.f32 %v1100_v52, %v1101_v62  ;;  %v1105_v7 = vsub.f32 %v1103_v53, %v1104_v63  ;;  %v1108_v8 = vadd.f32 %v1107_v54, %v1106_v0  ;;  %v1111_v9 = vadd.f32 %v1110_v55, %v1109_v1  ;;  %v3224_v52 = vld [vmem:[%s728_s15] ss:$0 sm:$0xff]  ;;  %s3325_s15 = smov [#allocation13] }
 0x250   : >> { %688 = vst [vmem:[%s3137_s30] sm:$0xff] %v678_v2  ;;  %690 = vst [vmem:[%s3141_s13] sm:$0xff] %v684_v4  ;;  %s3183_s30 = smov [#allocation13]  ;;  %s3202_s13 = smov [#allocation9] }
 0x251   : >> { %691 = vst [vmem:[%s3143_s14] sm:$0xff] %v687_v5  ;;  %689 = vst [vmem:[%s3139_s12] sm:$0xff] %v681_v3  ;;  %s3199_s12 = smov [#allocation10]  ;;  %s726_s14 = smov [#allocation21] }
 0x252   : >> { %1112 = vst [vmem:[%s3145_s16] sm:$0xff] %v1102_v6  ;;  %1113 = vst [vmem:[%s3147_s17] sm:$0xff] %v1105_v7  ;;  %s3207_s16 = smov [#allocation12]  ;;  %s3210_s17 = smov [#allocation11]  ;;  %v3222_v51 = vld [vmem:[%s726_s14] ss:$0 sm:$0xff] }
 0x253   : >> { %1114 = vst [vmem:[%s3150_s2] sm:$0xff] %v1108_v8  ;;  %1115 = vst [vmem:[%s3152_s18] sm:$0xff] %v1111_v9  ;;  %s3212_s2 = smov [#allocation13]  ;;  %s3215_s18 = smov [#allocation14] }
 0x254   : >> { %s3321_s14 = smov [#allocation15] }
 0x257   : >> { %v2085_v16 = vld [vmem:[%s3169_s0 + $0x8] sm:$0xff] }
 0x258   : >> { %v2087_v17 = vld [vmem:[%s3171_s23 + $0x8] sm:$0xff]  ;;  %v710_v19 = vmul.f32 %v2085_v16, %v2083_v10  ;;  %v716_v22 = vmul.f32 %v2085_v16, %v2084_v12 }
 0x259   : >> { %v2088_v18 = vld [vmem:[%s3173_s25 + $0x8] sm:$0xff]  ;;  %v711_v20 = vmul.f32 %v2087_v17, %v2084_v12  ;;  %v717_v26 = vmul.f32 %v2087_v17, %v2083_v10 }
 0x25a   : >> { %v714_v21 = vmul.f32 %v2088_v18, %v2084_v12  ;;  %v2143_v23 = vld [vmem:[%s3175_s26 + $0x8] sm:$0xff]  ;;  %v720_v27 = vmul.f32 %v2088_v18, %v2083_v10 }
 0x25b   : >> { %v2144_v24 = vld [vmem:[%s3177_s27 + $0x8] sm:$0xff]  ;;  %v1134_v29 = vmul.f32 %v2143_v23, %v2141_v11  ;;  %v712_v32 = vsub.f32 %v710_v19, %v711_v20  ;;  %v1140_v35 = vmul.f32 %v2143_v23, %v2142_v13  ;;  %v718_v36 = vadd.f32 %v717_v26, %v716_v22 }
 0x25c   : >> { %v2145_v25 = vld [vmem:[%s3179_s28 + $0x8] sm:$0xff]  ;;  %v1137_v33 = vmul.f32 %v2144_v24, %v2141_v11  ;;  %v1143_v39 = vmul.f32 %v2144_v24, %v2142_v13 }
 0x25d   : >> { %v2146_v28 = vld [vmem:[%s3181_s29 + $0x8] sm:$0xff]  ;;  %v1135_v30 = vmul.f32 %v2145_v25, %v2142_v13  ;;  %v1141_v38 = vmul.f32 %v2145_v25, %v2141_v11  ;;  %2089 = vst [vmem:[%s3169_s0 + $0x8] sm:$0xff] %v712_v32  ;;  %2091 = vst [vmem:[%s3171_s23 + $0x8] sm:$0xff] %v718_v36  ;;  %s783_s0 = smov [#allocation19]  ;;  %s846_s23 = smov [#allocation20] }
 0x25e   : >> { %v2086_v31 = vld [vmem:[%s3183_s30 + $0x8] sm:$0xff]  ;;  %v1138_v34 = vmul.f32 %v2146_v28, %v2142_v13  ;;  %v1144_v41 = vmul.f32 %v2146_v28, %v2141_v11 }
 0x25f   : >> { %v1136_v37 = vsub.f32 %v1134_v29, %v1135_v30  ;;  %v713_v42 = vmul.f32 %v2086_v31, %v2083_v10  ;;  %v719_v43 = vmul.f32 %v2086_v31, %v2084_v12  ;;  %v1142_v44 = vadd.f32 %v1141_v38, %v1140_v35 }
 0x260   : >> { %v1139_v40 = vsub.f32 %v1137_v33, %v1138_v34  ;;  %v1145_v45 = vadd.f32 %v1144_v41, %v1143_v39 }
 0x261   : >> { %2147 = vst [vmem:[%s3175_s26 + $0x8] sm:$0xff] %v1136_v37  ;;  %v715_v46 = vsub.f32 %v713_v42, %v714_v21  ;;  %v721_v47 = vadd.f32 %v720_v27, %v719_v43  ;;  %2149 = vst [vmem:[%s3179_s28 + $0x8] sm:$0xff] %v1142_v44  ;;  %s825_s26 = smov [#allocation14]  ;;  %s3310_s28 = smov [#allocation13] }
 0x262   : >> { %2148 = vst [vmem:[%s3177_s27 + $0x8] sm:$0xff] %v1139_v40  ;;  %2150 = vst [vmem:[%s3181_s29 + $0x8] sm:$0xff] %v1145_v45  ;;  %s845_s27 = smov [#allocation15]  ;;  %s3312_s29 = smov [#allocation12] }
 0x263   : >> { %2090 = vst [vmem:[%s3183_s30 + $0x8] sm:$0xff] %v715_v46  ;;  %2092 = vst [vmem:[%s3173_s25 + $0x8] sm:$0xff] %v721_v47  ;;  %v821_v46 = vadd.s32 8, %v811_v15  ;;  %v801_v47 = vadd.s32 8, %v789_v15  ;;  %s3298_s25 = smov [#allocation12]  ;;  %s2991_s30 = smov 1  }
 0x264   : >> { %v734_v53 = vld [vmem:[%s3207_s16] sm:$0xff] }
 0x265   : >> { %v738_v11 = vmul.f32 %v734_v53, %v3222_v51  ;;  %v741_v12 = vmul.f32 %v734_v53, %v3224_v52  ;;  %v736_v18 = vld [vmem:[%s3215_s18] sm:$0xff]  ;;  %vm822_vm11 = vcmp.eq.s32.totalorder %v821_v46, %v808_v14  ;;  %vm802_vm13 = vcmp.eq.s32.totalorder %v801_v47, %v786_v14 }
 0x266   : >> { %v744_v22 = vmul.f32 %v736_v18, %v3222_v51  ;;  %v747_v24 = vmul.f32 %v736_v18, %v3224_v52 }
 0x268   : >> { %v1152_v48 = vld [vmem:[%s3197_s1] ss:$0 sm:$0xff]  ;;  %v2152_v50 = vld [vmem:[%s3197_s1 + $0x7] ss:$0 sm:$0xff]  ;;  %v2153_v55 = vld [vmem:[%s3197_s1 + $0x7] sm:$0xfe] }
 0x269   : >> { %v2151_v49 = vld [vmem:[%s3197_s1 - $0x1] sm:$0xfe]  ;;  %v2154_v56 = vld [vmem:[%s3197_s1 + $0xf] ss:$0 sm:$0xff]  ;;  %v1170_v58 = vsel %vm1008_vm8, %v2152_v50, %v2153_v55  ;;  %v2158_v61 = vld [vmem:[%s3199_s12 + $0x8] ss:$0 sm:$0xff] }
 0x26a   : >> { %v1159_v54 = vsel %vm1008_vm8, %v1152_v48, %v2151_v49  ;;  %v1196_v57 = vld [vmem:[%s3202_s13] ss:$0 sm:$0xff]  ;;  %v2157_v60 = vld [vmem:[%s3199_s12 + $0x9] sm:$0x7f]  ;;  %2155 = vst [vmem:[%s3197_s1 + $0x8] sm:$0xff] %v1170_v58  ;;  %v841_v48 = vadd.s32 8, %v831_v15 }
 0x26b   : >> { %1162 = vst [vmem:[%s3197_s1] sm:$0xff] %v1159_v54  ;;  %v1174_v59 = vld [vmem:[%s3199_s12] ss:$0 sm:$0xff]  ;;  %v1183_v62 = vsel %vm1032_vm9, %v2154_v56, %v2157_v60  ;;  %v2160_v63 = vld [vmem:[%s3199_s12 + $0x1] sm:$0x7f]  ;;  %v2163_v4 = vld [vmem:[%s3202_s13 + $0x7] sm:$0xfe] }
 0x26c   : >> { %2156 = vst [vmem:[%s3197_s1 + $0x1] sm:$0x1] %v1174_v59  ;;  %v2161_v0 = vld [vmem:[%s3202_s13 - $0x1] sm:$0xfe]  ;;  %v2162_v1 = vld [vmem:[%s3202_s13 + $0x7] ss:$0 sm:$0xff]  ;;  %v1191_v2 = vsel %vm1032_vm9, %v2158_v61, %v2160_v63  ;;  %vm842_vm15 = vcmp.eq.s32.totalorder %v841_v48, %v828_v14 }
 0x26d   : >> { %2159 = vst [vmem:[%s3199_s12 + $0x8] sm:$0xff] %v1183_v62  ;;  %v1203_v3 = vsel %vm1008_vm8, %v1196_v57, %v2161_v0  ;;  %v2164_v5 = vld [vmem:[%s3202_s13 + $0xf] ss:$0 sm:$0xff]  ;;  %v1218_v6 = vld [vmem:[%s3210_s17] ss:$0 sm:$0xff]  ;;  %1193 = vst [vmem:[%s3199_s12] sm:$0xff] %v1191_v2  ;;  %v1214_v7 = vsel %vm1008_vm8, %v2162_v1, %v2163_v4  ;;  %v864_v49 = vadd.s32 8, %v852_v15  ;;  %v346_v15 = vmov (%p471_p9), %v3081_v15 }
 0x26e   : >> { %1206 = vst [vmem:[%s3202_s13] sm:$0xff] %v1203_v3  ;;  %v2167_v8 = vld [vmem:[%s3210_s17 + $0x9] sm:$0x7f]  ;;  %v2168_v9 = vld [vmem:[%s3210_s17 + $0x8] ss:$0 sm:$0xff]  ;;  %v2170_v10 = vld [vmem:[%s3210_s17 + $0x1] sm:$0x7f] }
 0x26f   : >> { %2165 = vst [vmem:[%s3202_s13 + $0x8] sm:$0xff] %v1214_v7  ;;  %2166 = vst [vmem:[%s3202_s13 + $0x1] sm:$0x1] %v1218_v6  ;;  %v1227_v13 = vsel %vm1032_vm9, %v2164_v5, %v2167_v8  ;;  %v1235_v16 = vsel %vm1032_vm9, %v2168_v9, %v2170_v10  ;;  %v735_v17 = vld [vmem:[%s3212_s2] sm:$0xff]  ;;  %vm865_vm1 = vcmp.eq.s32.totalorder %v864_v49, %v849_v14  ;;  %s3316_s1 = smov [#allocation12]  ;;  %s3319_s12 = smov [#allocation14]  ;;  %v343_v14 = vmov (%p471_p9), %v3079_v14 }
 0x270   : >> { %v737_v19 = vld [vmem:[%s3217_s19] sm:$0xff]  ;;  %2169 = vst [vmem:[%s3210_s17 + $0x8] sm:$0xff] %v1227_v13  ;;  %1237 = vst [vmem:[%s3210_s17] sm:$0xff] %v1235_v16  ;;  %v739_v20 = vmul.f32 %v735_v17, %v3224_v52  ;;  %v742_v21 = vmul.f32 %v735_v17, %v3222_v51  ;;  %s2992_s13 = smov 127   ;;  %s3330_s17 = smov [#allocation15]  ;;  %vm358_vm6 = vcmp.eq.s32.totalorder (%p471_p9), %v346_v15, %v343_v14  ;;  %v372_v14 = vmov (%p471_p9), %v3079_v14 }
 0x271   : >> { %v745_v23 = vmul.f32 %v737_v19, %v3224_v52  ;;  %v748_v25 = vmul.f32 %v737_v19, %v3222_v51  ;;  %v790_v50 = vld [vmem:[%s783_s0] ss:$0 sm:$0xff]  ;;  %s399_s0 = smov (%p471_p9), [#allocation14] }
 0x272   : >> { %v740_v26 = vsub.f32 %v738_v11, %v739_v20  ;;  %v743_v27 = vadd.f32 %v742_v21, %v741_v12 }
 0x273   : >> { %v746_v28 = vsub.f32 %v744_v22, %v745_v23  ;;  %v749_v29 = vadd.f32 %v748_v25, %v747_v24 }
 0x274   : >> { %750 = vst [vmem:[%s3207_s16] sm:$0xff] %v740_v26  ;;  %751 = vst [vmem:[%s3212_s2] sm:$0xff] %v743_v27  ;;  %s3328_s16 = smov [#allocation14]  ;;  %s3368_s2 = smov [#allocation12] }
 0x275   : >> { %752 = vst [vmem:[%s3215_s18] sm:$0xff] %v746_v28  ;;  %753 = vst [vmem:[%s3217_s19] sm:$0xff] %v749_v29  ;;  %s3372_s18 = smov [#allocation13]  ;;  %s3377_s19 = smov [#allocation14] }
 0x27b   : >> { %v2093_v30 = vld [vmem:[%s754_s20 + $0x8] sm:$0xff] }
 0x27c   : >> { %v2094_v31 = vld [vmem:[%s756_s21 + $0x8] sm:$0xff]  ;;  %v769_v34 = vmul.f32 %v2093_v30, %v3224_v52  ;;  %v766_v36 = vmul.f32 %v2093_v30, %v3222_v51 }
 0x27d   : >> { %v2095_v32 = vld [vmem:[%s758_s22 + $0x8] sm:$0xff]  ;;  %v767_v33 = vmul.f32 %v2094_v31, %v3224_v52  ;;  %v770_v35 = vmul.f32 %v2094_v31, %v3222_v51 }
 0x27e   : >> { %v2096_v37 = vld [vmem:[%s760_s3 + $0x8] sm:$0xff]  ;;  %v772_v38 = vmul.f32 %v2095_v32, %v3222_v51  ;;  %v775_v40 = vmul.f32 %v2095_v32, %v3224_v52 }
 0x27f   : >> { %v773_v39 = vmul.f32 %v2096_v37, %v3224_v52  ;;  %v776_v41 = vmul.f32 %v2096_v37, %v3222_v51  ;;  %v771_v42 = vadd.f32 %v770_v35, %v769_v34  ;;  %v768_v43 = vsub.f32 %v766_v36, %v767_v33  ;;  %v853_v51 = vld [vmem:[%s846_s23] ss:$0 sm:$0xff] }
 0x281   : >> { %v774_v44 = vsub.f32 %v772_v38, %v773_v39  ;;  %v777_v45 = vadd.f32 %v776_v41, %v775_v40  ;;  %2098 = vst [vmem:[%s756_s21 + $0x8] sm:$0xff] %v771_v42  ;;  %2097 = vst [vmem:[%s754_s20 + $0x8] sm:$0xff] %v768_v43  ;;  %s1045_s20 = smov [#allocation15]  ;;  %s1238_s21 = sadd.s32 (%p471_p9), 1, %s2952_s10  }
 0x282   : > { %p467_p10 = scmp.ge.s32.totalorder (%p471_p9), %s1238_s21, 15  ;;  %s3488_s10 = smov (%p471_p9), %s1238_s21 }
 0x283   : >> { %2099 = vst [vmem:[%s758_s22 + $0x8] sm:$0xff] %v774_v44  ;;  %2100 = vst [vmem:[%s760_s3 + $0x8] sm:$0xff] %v777_v45  ;;  %s347_s22 = smov (%p471_p9), [#allocation12]  ;;  %s376_s3 = smov (%p471_p9), [#allocation13] }
 0x288   : >> { %v812_v52 = vld [vmem:[%s805_s24] sm:$0xff]  ;;  %v2103_v53 = vld [vmem:[%s805_s24 + $0x8] sm:$0xff] }
 0x289   : >> { %v791_v54 = vld [vmem:[%s3298_s25] sm:$0xff]  ;;  %v816_v55 = vsel %vm815_vm10, 0.0, %v812_v52  ;;  %v823_v56 = vsel %vm822_vm11, 0.0, %v2103_v53  ;;  %v2101_v58 = vld [vmem:[%s3298_s25 + $0x8] sm:$0xff] }
 0x28a   : >> { %v795_v57 = vsel %vm794_vm12, %v790_v50, %v791_v54  ;;  %v832_v59 = vld [vmem:[%s825_s26] sm:$0xff]  ;;  %v2105_v60 = vld [vmem:[%s825_s26 + $0x8] sm:$0xff]  ;;  %817 = vst [vmem:[%s805_s24] sm:$0xff] %v816_v55  ;;  %2104 = vst [vmem:[%s805_s24 + $0x8] sm:$0xff] %v823_v56  ;;  %v803_v61 = vsel %vm802_vm13, %v790_v50, %v2101_v58 }
 0x28b   : >> { %796 = vst [vmem:[%s3298_s25] sm:$0xff] %v795_v57  ;;  %v836_v62 = vsel %vm835_vm14, 0.0, %v832_v59  ;;  %v843_v63 = vsel %vm842_vm15, 0.0, %v2105_v60  ;;  %v854_v0 = vld [vmem:[%s845_s27] sm:$0xff]  ;;  %v2107_v1 = vld [vmem:[%s845_s27 + $0x8] sm:$0xff]  ;;  %2102 = vst [vmem:[%s3298_s25 + $0x8] sm:$0xff] %v803_v61 }
 0x28c   : >> { %837 = vst [vmem:[%s825_s26] sm:$0xff] %v836_v62  ;;  %2106 = vst [vmem:[%s825_s26 + $0x8] sm:$0xff] %v843_v63  ;;  %v858_v2 = vsel %vm857_vm0, %v853_v51, %v854_v0  ;;  %v866_v3 = vsel %vm865_vm1, %v853_v51, %v2107_v1 }
 0x28d   : >> { %859 = vst [vmem:[%s845_s27] sm:$0xff] %v858_v2  ;;  %2108 = vst [vmem:[%s845_s27 + $0x8] sm:$0xff] %v866_v3 }
 0x291   : >> { %v870_v4 = vld [vmem:[%s3310_s28] sm:$0xff]  ;;  %v2109_v9 = vld [vmem:[%s3325_s15 + $0x8] sm:$0xff] }
 0x292   : >> { %871 = vrot.lane.b32.xlu1 %v870_v4, %s2991_s30  ;;  %v874_v5 = vld [vmem:[%s3312_s29] sm:$0xff]  ;;  %v2111_v6 = vld [vmem:[%s3316_s1 + $0x8] sm:$0xff] }
 0x293   : >> { %875 = vrot.lane.b32.xlu0 %v874_v5, %s2991_s30  ;;  %v940_v7 = vld [vmem:[%s3319_s12] sm:$0xff]  ;;  %v2117_v10 = vld [vmem:[%s3328_s16 + $0x8] sm:$0xff] }
 0x294   : >> { %v936_v8 = vld [vmem:[%s3321_s14] sm:$0xff]  ;;  %v2115_v11 = vld [vmem:[%s3330_s17 + $0x8] sm:$0xff] }
 0x296   : >> { %907 = vrot.lane.b32.xlu1 %v2111_v6, %s2991_s30 }
 0x297   : >> { %892 = vrot.lane.b32.xlu0 %v870_v4, %s2992_s13 }
 0x29a   : >> { %941 = vrot.lane.b32.xlu1 %v940_v7, %s2991_s30 }
 0x29b   : >> { %937 = vrot.lane.b32.xlu0 %v936_v8, %s2991_s30 }
 0x29e   : >> { %903 = vrot.lane.b32.xlu1 %v2109_v9, %s2991_s30 }
 0x29f   : >> { %924 = vrot.lane.b32.xlu0 %v2109_v9, %s2992_s13 }
 0x2a2   : >> { %973 = vrot.lane.b32.xlu1 %v2117_v10, %s2991_s30 }
 0x2a3   : >> { %969 = vrot.lane.b32.xlu0 %v2115_v11, %s2991_s30 }
 0x2a6   : >> { %958 = vrot.lane.b32.xlu1 %v936_v8, %s2992_s13 }
 0x2aa   : >> { %990 = vrot.lane.b32.xlu1 %v2115_v11, %s2992_s13 }
 0x304   : >> { %v872_v12 = vpop.permute.xlu1 %871 }
 0x305   : >> { %v876_v13 = vpop.permute.xlu0 %875 }
 0x306   : >> { %v880_v16 = vsel %vm879_vm2, %v874_v5, %v876_v13 }
 0x307   : >> { %v884_v17 = vsel %vm883_vm3, %v872_v12, %v880_v16 }
 0x308   : >> { %v890_v18 = vsel %vm1823_vm4, %v884_v17, 0.0  ;;  %v908_v19 = vpop.permute.xlu1 %907 }
 0x309   : >> { %v893_v20 = vpop.permute.xlu0 %892  ;;  %930 = vst [vmem:[%s3312_s29] sm:$0xff] %v890_v18  ;;  %v912_v27 = vsel %vm879_vm2, %v2111_v6, %v908_v19 }
 0x30a   : >> { %v897_v21 = vsel %vm896_vm5, %v874_v5, %v893_v20 }
 0x30b   : >> { %931 = vst [vmem:[%s3310_s28] sm:$0xff] %v897_v21 }
 0x30c   : >> { %v942_v22 = vpop.permute.xlu1 %941 }
 0x30d   : >> { %v946_v23 = vsel %vm879_vm2, %v940_v7, %v942_v22  ;;  %v938_v24 = vpop.permute.xlu0 %937 }
 0x30e   : >> { %v950_v25 = vsel %vm883_vm3, %v938_v24, %v946_v23 }
 0x30f   : >> { %v956_v26 = vsel %vm1823_vm4, %v950_v25, 0.0 }
 0x310   : >> { %v904_v28 = vpop.permute.xlu1 %903  ;;  %996 = vst [vmem:[%s3319_s12] sm:$0xff] %v956_v26 }
 0x311   : >> { %v916_v29 = vsel %vm883_vm3, %v904_v28, %v912_v27  ;;  %v925_v30 = vpop.permute.xlu0 %924 }
 0x312   : >> { %v922_v31 = vsel %vm1823_vm4, %v916_v29, 0.0  ;;  %v929_v32 = vsel %vm896_vm5, %v2111_v6, %v925_v30 }
 0x313   : >> { %2113 = vst [vmem:[%s3316_s1 + $0x8] sm:$0xff] %v922_v31  ;;  %2114 = vst [vmem:[%s3325_s15 + $0x8] sm:$0xff] %v929_v32 }
 0x314   : >> { %v974_v33 = vpop.permute.xlu1 %973 }
 0x315   : >> { %v978_v34 = vsel %vm879_vm2, %v2117_v10, %v974_v33  ;;  %v970_v35 = vpop.permute.xlu0 %969 }
 0x316   : >> { %v982_v36 = vsel %vm883_vm3, %v970_v35, %v978_v34 }
 0x317   : >> { %v988_v37 = vsel %vm1823_vm4, %v982_v36, 0.0 }
 0x318   : >> { %v959_v38 = vpop.permute.xlu1 %958  ;;  %2119 = vst [vmem:[%s3328_s16 + $0x8] sm:$0xff] %v988_v37 }
 0x319   : >> { %v963_v39 = vsel %vm896_vm5, %v940_v7, %v959_v38  ;;  %v365_v7 = vadd.s32 (%p471_p9), 8, %v346_v15  ;;  %v375_v15 = vmov (%p471_p9), %v3081_v15 }
 0x31a   : >> { %v1002_v40 = vld [vmem:[%s3368_s2] ss:$0 sm:$0xff]  ;;  %v2122_v42 = vld [vmem:[%s3368_s2 + $0x7] ss:$0 sm:$0xff]  ;;  %997 = vst [vmem:[%s3321_s14] sm:$0xff] %v963_v39  ;;  %v2123_v44 = vld [vmem:[%s3368_s2 + $0x7] sm:$0xfe]  ;;  %v421_v15 = vmov (%p471_p9), %v3081_v15 }
 0x31b   : >> { %v2121_v41 = vld [vmem:[%s3368_s2 - $0x1] sm:$0xfe]  ;;  %v1020_v47 = vsel %vm1008_vm8, %v2122_v42, %v2123_v44  ;;  %v2132_v49 = vld [vmem:[%s3372_s18 + $0x7] ss:$0 sm:$0xff]  ;;  %v2133_v50 = vld [vmem:[%s3372_s18 + $0x7] sm:$0xfe]  ;;  %vm366_vm7 = vcmp.eq.s32.totalorder (%p471_p9), %v365_v7, %v343_v14  ;;  %v395_v14 = vmov (%p471_p9), %v3079_v14  ;;  %v398_v15 = vmov (%p471_p9), %v3081_v15 }
 0x31c   : >> { %v1009_v43 = vsel %vm1008_vm8, %v1002_v40, %v2121_v41  ;;  %v1046_v45 = vld [vmem:[%s3372_s18] ss:$0 sm:$0xff]  ;;  %v2134_v51 = vld [vmem:[%s3372_s18 + $0xf] ss:$0 sm:$0xff]  ;;  %v991_v52 = vpop.permute.xlu1 %990  ;;  %v1064_v53 = vsel %vm1008_vm8, %v2132_v49, %v2133_v50  ;;  %v418_v14 = vmov (%p471_p9), %v3079_v14  ;;  %v442_v36 = vadd.s32 (%p471_p9), 8, %v421_v15 }
 0x31d   : >> { %v2131_v46 = vld [vmem:[%s3372_s18 - $0x1] sm:$0xfe]  ;;  %1012 = vst [vmem:[%s3368_s2] sm:$0xff] %v1009_v43  ;;  %v995_v54 = vsel %vm896_vm5, %v2117_v10, %v991_v52  ;;  %v2124_v55 = vld [vmem:[%s3368_s2 + $0xf] ss:$0 sm:$0xff]  ;;  %2135 = vst [vmem:[%s3372_s18 + $0x8] sm:$0xff] %v1064_v53 }
 0x31e   : >> { %v1053_v48 = vsel %vm1008_vm8, %v1046_v45, %v2131_v46  ;;  %2120 = vst [vmem:[%s3330_s17 + $0x8] sm:$0xff] %v995_v54  ;;  %2125 = vst [vmem:[%s3368_s2 + $0x8] sm:$0xff] %v1020_v47  ;;  %vm433_vm8 = vcmp.eq.s32.totalorder (%p471_p9), %v421_v15, %v418_v14 }
 0x31f   : >> { %1056 = vst [vmem:[%s3372_s18] sm:$0xff] %v1053_v48  ;;  %v1024_v56 = vld [vmem:[%s3377_s19] ss:$0 sm:$0xff]  ;;  %v2127_v57 = vld [vmem:[%s3377_s19 + $0x9] sm:$0x7f]  ;;  %v2128_v58 = vld [vmem:[%s3377_s19 + $0x8] ss:$0 sm:$0xff] }
 0x320   : >> { %2126 = vst [vmem:[%s3368_s2 + $0x1] sm:$0x1] %v1024_v56  ;;  %v1033_v59 = vsel %vm1032_vm9, %v2124_v55, %v2127_v57  ;;  %v2130_v60 = vld [vmem:[%s3377_s19 + $0x1] sm:$0x7f] }
 0x321   : >> { %2129 = vst [vmem:[%s3377_s19 + $0x8] sm:$0xff] %v1033_v59  ;;  %v1041_v61 = vsel %vm1032_vm9, %v2128_v58, %v2130_v60 }
 0x322   : >> { %1043 = vst [vmem:[%s3377_s19] sm:$0xff] %v1041_v61 }
 0x324   : > { %473 = sbr.rel (!%p471_p9) target bundleno = 332 (0x14c), region = 504 }
 0x325   : >> { %v1068_v62 = vld [vmem:[%s1045_s20] ss:$0 sm:$0xff]  ;;  %v2137_v63 = vld [vmem:[%s1045_s20 + $0x9] sm:$0x7f]  ;;  %v2138_v0 = vld [vmem:[%s1045_s20 + $0x8] ss:$0 sm:$0xff] }
 0x326   : >> { %2136 = vst [vmem:[%s3372_s18 + $0x1] sm:$0x1] %v1068_v62  ;;  %v1077_v1 = vsel %vm1032_vm9, %v2134_v51, %v2137_v63  ;;  %v2140_v2 = vld [vmem:[%s1045_s20 + $0x1] sm:$0x7f] }
 0x327   : >> { %2139 = vst [vmem:[%s1045_s20 + $0x8] sm:$0xff] %v1077_v1  ;;  %v1085_v3 = vsel %vm1032_vm9, %v2138_v0, %v2140_v2  ;;  %v353_v4 = vld [vmem:[%s347_s22] sm:$0xff] (%p471_p9)  ;;  %v2171_v5 = vld [vmem:[%s347_s22 + $0x8] sm:$0xff] (%p471_p9)  ;;  %vm443_vm9 = vcmp.eq.s32.totalorder (%p471_p9), %v442_v36, %v418_v14 }
 0x328   : >> { %1087 = vst [vmem:[%s1045_s20] sm:$0xff] %v1085_v3  ;;  %v354_v8 = vsel (%p471_p9), %vm1823_vm4, %v353_v4, 0.0  ;;  %v362_v9 = vsel (%p471_p9), %vm1823_vm4, %v2171_v5, 0.0 }
 0x329   : > { %v405_v12 = vld [vmem:[%s399_s0] sm:$0xff] (%p471_p9)  ;;  %v355_v13 = vmul.f32 (%p471_p9), %v354_v8, %v354_v8  ;;  %v363_v16 = vmul.f32 (%p471_p9), %v362_v9, %v362_v9  ;;  %v2173_v19 = vld [vmem:[%s399_s0 + $0x8] sm:$0xff] (%p471_p9) }
 0x32a   : > { %v406_v20 = vsel (%p471_p9), %vm1823_vm4, %v405_v12, 0.0  ;;  %v412_v24 = vsel (%p471_p9), %vm1823_vm4, %v2173_v19, 0.0 }
 0x32b   : > { %v369_v21 = vadd.f32 %v363_v16, %v355_v13  ;;  %v359_v25 = vsel %vm358_vm6, 0.0, %v355_v13  ;;  %v407_v27 = vmul.f32 %v406_v20, %v406_v20  ;;  %v367_v29 = vsel %vm366_vm7, 0.0, %v363_v16 }
 0x32c   : > { %v368_v31 = vadd.f32 %v367_v29, %v359_v25  ;;  %v413_v33 = vmul.f32 %v412_v24, %v412_v24 }
 0x32d   : > { %v382_v6 = vld [vmem:[%s376_s3] sm:$0xff]  ;;  %v2172_v11 = vld [vmem:[%s376_s3 + $0x8] sm:$0xff] }
 0x32e   : > { %v383_v10 = vsel %vm1823_vm4, %v382_v6, 0.0  ;;  %v389_v18 = vsel %vm1823_vm4, %v2172_v11, 0.0 }
 0x32f   : > { %v384_v17 = vmul.f32 %v383_v10, %v383_v10  ;;  %v390_v22 = vmul.f32 %v389_v18, %v389_v18  ;;  %v428_v23 = vld [vmem:[%s422_s11] sm:$0xff]  ;;  %v2174_v28 = vld [vmem:[%s422_s11 + $0x8] sm:$0xff] }
 0x330   : > { %v429_v30 = vsel %vm1823_vm4, %v428_v23, 0.0  ;;  %v439_v34 = vsel %vm1823_vm4, %v2174_v28, 0.0 }
 0x331   : > { %v386_v26 = vadd.f32 %v384_v17, %v369_v21  ;;  %v385_v35 = vadd.f32 %v384_v17, %v368_v31  ;;  %v430_v38 = vmul.f32 %v429_v30, %v429_v30  ;;  %v440_v41 = vmul.f32 %v439_v34, %v439_v34 }
 0x333   : > { %v392_v32 = vadd.f32 %v390_v22, %v386_v26  ;;  %v391_v39 = vadd.f32 %v390_v22, %v385_v35  ;;  %v434_v44 = vsel %vm433_vm8, 0.0, %v430_v38  ;;  %v444_v47 = vsel %vm443_vm9, 0.0, %v440_v41 }
 0x335   : > { %v409_v37 = vadd.f32 %v407_v27, %v392_v32  ;;  %v408_v42 = vadd.f32 %v407_v27, %v391_v39 }
 0x337   : > { %v415_v40 = vadd.f32 %v413_v33, %v409_v37  ;;  %v414_v45 = vadd.f32 %v413_v33, %v408_v42 }
 0x339   : > { %v436_v43 = vadd.f32 %v430_v38, %v415_v40  ;;  %v435_v48 = vadd.f32 %v434_v44, %v414_v45 }
 0x33b   : > { %v446_v46 = vadd.f32 %v440_v41, %v436_v43  ;;  %v445_v49 = vadd.f32 %v444_v47, %v435_v48 }
 0x33d   : > { %447 = vadd.xlane.f32.xlu0 %v446_v46 }
 0x341   : > { %455 = vadd.xlane.f32.xlu0 %v445_v49 }
 0x3ca   : > { %v448_v50 = vpop.xlane.xlu0 %447 }
 0x3cb   : > { %v449_v51 = vrot.slane %v448_v50, 4 }
 0x3cd   : > { %v450_v52 = vadd.f32 %v449_v51, %v448_v50 }
 0x3ce   : > { %v456_v53 = vpop.xlane.xlu0 %455 }
 0x3cf   : > { %v451_v54 = vrot.slane %v450_v52, 2  ;;  %v457_v55 = vrot.slane %v456_v53, 4 }
 0x3d1   : > { %v458_v56 = vadd.f32 %v457_v55, %v456_v53  ;;  %v452_v57 = vadd.f32 %v451_v54, %v450_v52 }
 0x3d3   : > { %v459_v58 = vrot.slane %v458_v56, 2  ;;  %v453_v60 = vrot.slane %v452_v57, 1 }
 0x3d5   : > { %v460_v59 = vadd.f32 %v459_v58, %v458_v56  ;;  %v454_v63 = vadd.f32 %v453_v60, %v452_v57 }
 0x3d7   : > { %v461_v61 = vrot.slane %v460_v59, 1 }
 0x3d9   : > { %v462_v62 = vadd.f32 %v461_v61, %v460_v59 }
 0x3db   : > { %2203 = vpush %v462_v62 }
 0x3dc   : > { %2205 = vpush %v454_v63 }
 0x40c   : > { %s2204_s23 = spop %2203 }
 0x40d   : > { %s2206_s24 = spop %2205 }
 0x40e   : > { %s465_s25 = smul.f32 1e-10, %s2206_s24 }
 0x410   : > { %p466_p11 = scmp.le.f32.partialorder %s2204_s23, %s465_s25 }
 0x412   : > { %p468_p12 = por %p467_p10, %p466_p11 }
 0x414   :  { %1240 = sbr.rel (!%p468_p12) target bundleno = 331 (0x14b), region = 515 }
 0x41b PF:  { %s1241_s26 = smov [#allocation12]  ;;  %v1245_v14 = vmov %v3079_v14  ;;  %v1248_v15 = vmov %v3081_v15  ;;  %s1267_s27 = smov [#allocation15] }
 0x41c   :  { %v1271_v14 = vmov %v3079_v14  ;;  %v1274_v15 = vmov %v3081_v15  ;;  %v1249_v0 = vld [vmem:[%s1241_s26] sm:$0xff]  ;;  %vm1252_vm10 = vcmp.eq.s32.totalorder %v1248_v15, %v1245_v14  ;;  %v2175_v1 = vld [vmem:[%s1241_s26 + $0x8] sm:$0xff]  ;;  %v1257_v2 = vadd.s32 8, %v1248_v15  ;;  %s1242_s10 = smov [#allocation4]  ;;  %s1268_s28 = smov [#allocation6] }
 0x41d   :  { %vm1278_vm11 = vcmp.eq.s32.totalorder %v1274_v15, %v1271_v14  ;;  %v1283_v3 = vadd.s32 8, %v1274_v15  ;;  %v1253_v4 = vsel %vm1252_vm10, %v1249_v0, 0.0  ;;  %v1275_v5 = vld [vmem:[%s1267_s27] sm:$0xff]  ;;  %v2176_v6 = vld [vmem:[%s1267_s27 + $0x8] sm:$0xff]  ;;  %s2958_s15 = smov %s3484_s6   ;;  %s2962_s16 = smov [#allocation8]  }
 0x41e   :  { %vm1258_vm4 = vcmp.eq.s32.totalorder %v1257_v2, %v1245_v14  ;;  %v1279_v7 = vsel %vm1278_vm11, %v1275_v5, 0.0 }
 0x41f   :  { %vm1284_vm12 = vcmp.eq.s32.totalorder %v1283_v3, %v1271_v14  ;;  %v1259_v8 = vsel %vm1258_vm4, %v2175_v1, %v1253_v4 }
 0x420   :  { %v1285_v9 = vsel %vm1284_vm12, %v2176_v6, %v1279_v7  ;;  %v1260_v10 = vrot.slane %v1259_v8, 4 }
 0x421   :  { %v1286_v11 = vrot.slane %v1285_v9, 4 }
 0x422   :  { %v1261_v12 = vadd.f32 %v1260_v10, %v1259_v8 }
 0x423   :  { %v1287_v13 = vadd.f32 %v1286_v11, %v1285_v9 }
 0x424   :  { %v1262_v16 = vrot.slane %v1261_v12, 2 }
 0x425   :  { %v1288_v17 = vrot.slane %v1287_v13, 2 }
 0x426   :  { %v1263_v18 = vadd.f32 %v1262_v16, %v1261_v12 }
 0x427   :  { %v1289_v19 = vadd.f32 %v1288_v17, %v1287_v13 }
 0x428   :  { %v1264_v20 = vrot.slane %v1263_v18, 1 }
 0x429   :  { %v1290_v21 = vrot.slane %v1289_v19, 1 }
 0x42a   :  { %v1265_v15 = vadd.f32 %v1264_v20, %v1263_v18 }
 0x42b   :  { %v1291_v22 = vadd.f32 %v1290_v21, %v1289_v19 }
 0x42c   :  { %1266 = vst [vmem:[%s1242_s10] sm:$0x1] %v1265_v15 }
 0x42d   :  { %1292 = vst [vmem:[%s1268_s28] sm:$0x1] %v1291_v22 }
 0x433   :  { %v1296_v23 = vld [vmem:[#allocation4] sm:$0x1] }
 0x434   :  { %v1302_v14 = vld [vmem:[#allocation6] sm:$0x1]  ;;  %1298 = vst [vmem:[#allocation5] sm:$0x1] %v1296_v23 }
 0x435   :  { %1304 = vst [vmem:[#allocation7] sm:$0x1] %v1302_v14 }
 0x43b   :  { %v1367_v24 = vld [vmem:[#allocation5] sm:$0x1] }
 0x43c   :  { %v1431_v25 = vld [vmem:[#allocation7] sm:$0x1]  ;;  %1368 = vst [vmem:[%s3482_s4] sm:$0x1] %v1367_v24 }
 0x43d   :  { %1432 = vst [vmem:[%s3483_s5] sm:$0x1] %v1431_v25 }
 0x43e LB: > { %v1480_v26 = vld [vmem:[%s2964_s16] sm:$0xff]  ;;  %s1482_s16 = scalar_lea.vmem %s2964_s16, 8   ;;  %s2964_s16 = sphi %s2962_s16, %s1482_s16   ;;  %s2960_s15 = sphi %s2958_s15, %s1483_s15  }
 0x43f   : > { %1481 = vst [vmem:[%s2960_s15] sm:$0xff] %v1480_v26  ;;  %s1483_s15 = scalar_lea.vmem %s2960_s15, 8   ;;  %p1477_p13 = scmp.gt.s32.totalorder %s1482_s16, [#allocation8 + $0x8] }
 0x440   :  { %s2966_s5 = smov (%p1477_p13), %s3485_s7   ;;  %s2970_s2 = smov (%p1477_p13), [#allocation9]  }
 0x441   :  { %1479 = sbr.rel (!%p1477_p13) target bundleno = 1086 (0x43e), region = 581 }
 0x448 LB: > { %v1542_v27 = vld [vmem:[%s2972_s2] sm:$0xff]  ;;  %s1544_s2 = scalar_lea.vmem %s2972_s2, 8   ;;  %s2972_s2 = sphi %s2970_s2, %s1544_s2   ;;  %s2968_s5 = sphi %s2966_s5, %s1545_s5  }
 0x449   : > { %1543 = vst [vmem:[%s2968_s5] sm:$0xff] %v1542_v27  ;;  %s1545_s5 = scalar_lea.vmem %s2968_s5, 8   ;;  %p1539_p0 = scmp.gt.s32.totalorder %s1544_s2, [#allocation9 + $0x8] }
 0x44a   :  { %s2974_s19 = smov (%p1539_p0), %s3486_s8   ;;  %s2978_s20 = smov (%p1539_p0), [#allocation10]  }
 0x44b   :  { %1541 = sbr.rel (!%p1539_p0) target bundleno = 1096 (0x448), region = 603 }
 0x452 LB: > { %v1604_v28 = vld [vmem:[%s2980_s20] sm:$0xff]  ;;  %s1606_s20 = scalar_lea.vmem %s2980_s20, 8   ;;  %s2980_s20 = sphi %s2978_s20, %s1606_s20   ;;  %s2976_s19 = sphi %s2974_s19, %s1607_s19  }
 0x453   : > { %1605 = vst [vmem:[%s2976_s19] sm:$0xff] %v1604_v28  ;;  %s1607_s19 = scalar_lea.vmem %s2976_s19, 8   ;;  %p1601_p1 = scmp.gt.s32.totalorder %s1606_s20, [#allocation10 + $0x8] }
 0x454   :  { %s2982_s22 = smov (%p1601_p1), %s3487_s9   ;;  %s2986_s3 = smov (%p1601_p1), [#allocation11]  }
 0x455   :  { %1603 = sbr.rel (!%p1601_p1) target bundleno = 1106 (0x452), region = 625 }
 0x45c LB: > { %v1666_v29 = vld [vmem:[%s2988_s3] sm:$0xff]  ;;  %s1668_s3 = scalar_lea.vmem %s2988_s3, 8   ;;  %s2988_s3 = sphi %s2986_s3, %s1668_s3   ;;  %s2984_s22 = sphi %s2982_s22, %s1669_s22  }
 0x45d   : > { %1667 = vst [vmem:[%s2984_s22] sm:$0xff] %v1666_v29  ;;  %s1669_s22 = scalar_lea.vmem %s2984_s22, 8   ;;  %p1663_p2 = scmp.gt.s32.totalorder %s1668_s3, [#allocation11 + $0x8] }
 0x45f   :  { %1665 = sbr.rel (!%p1663_p2) target bundleno = 1116 (0x45c), region = 647 }

// kernel: reverse
= control target key start
LH: loop header
LB: loop body
LE: loop exit
PB: predicated region body
PF: predicated region fallthrough
CT: control target
= control target key end

     0   :  { %v2_v0 = vlaneseq  ;;  %s123_s0 = inlined_call_operand.vmem [shape: f32[32], index: 0, kind: input, shape index: {}]   ;;  %s124_s1 = inlined_call_operand.vmem [shape: f32[32], index: 1, kind: output, shape index: {}]  }
   0x2   :  { %v3_v1 = vsub.s32 31, %v2_v0 }
   0x4   :  { %4 = vset.pattern.permute.xlu0 %v3_v1 }
   0x5   :  { %v43_v2 = vld [vmem:[#allocation1] sm:$0x1]  ;;  %v21_v3 = vld [vmem:[%s123_s0] sm:$0x1]  ;;  %v58_v10 = vshrl.u32 %v2_v0, 7 }
   0x6   :  { %44 = vst [vmem:[#allocation0] sm:$0x1] %v43_v2  ;;  %22 = vst [vmem:[#allocation1 + $0x1] sm:$0x1] %v21_v3 }
   0x7   :  { %vm59_vm0 = vcmp.lt.s32.totalorder %v58_v10, 1 }
   0xd   :  { %v46_v4 = vld [vmem:[#allocation0 + $0x7] ss:$-1 sm:$0xff]  ;;  %v40_v5 = vld [vmem:[#allocation1 + $0x1] sm:$0x1] }
   0xe   :  { %v47_v6 = vrot.slane %v46_v4, 7  ;;  %42 = vst [vmem:[#allocation0 + $0x8] sm:$0x1] %v40_v5 }
  0x10   :  { %48 = vperm.xlu0 %4, %v47_v6  }
  0x15   :  { %v53_v7 = vld [vmem:[#allocation0 + $0xf] ss:$-1 sm:$0xff] }
  0x16   :  { %v54_v8 = vrot.slane %v53_v7, 7 }
  0x18   :  { %55 = vperm.xlu0 %4, %v54_v8  }
  0x8f   :  { %v49_v9 = vpop.permute.xlu0 %48 }
  0x90   :  { %50 = vst [vmem:[#allocation2] sm:$0xff] %v49_v9 }
  0x97   :  { %v56_v11 = vpop.permute.xlu0 %55 }
  0x98   :  { %60 = vst.msk [vmem:[#allocation2] sm:$0xff] %vm59_vm0, %v56_v11 }
  0x9f   :  { %v64_v12 = vld [vmem:[#allocation2] sm:$0x1] }
  0xa0   :  { %66 = vst [vmem:[#allocation3] sm:$0x1] %v64_v12 }
  0xa7   :  { %v82_v13 = vld [vmem:[#allocation3] sm:$0x1] }
  0xa8   :  { %83 = vst [vmem:[%s124_s1] sm:$0x1] %v82_v13 }

// kernel: nascon_dino_forward.2
= control target key start
LH: loop header
LB: loop body
LE: loop exit
PB: predicated region body
PF: predicated region fallthrough
CT: control target
= control target key end

     0   :  { %vm102_vm0 = vcmask 392192   ;;  %v175_v9 = vlaneseq  ;;  %vm167_vm1 = vcmask 1040384   ;;  %vm194_vm2 = vcmask 261120   ;;  %s6223_s1 = inlined_call_operand.vmem [shape: bf16[48,32], index: 1, kind: input, shape index: {}]   ;;  %s6224_s0 = inlined_call_operand.vmem [shape: f32[32,48], index: 0, kind: input, shape index: {}]   ;;  %s6225_s3 = inlined_call_operand.vmem [shape: f32[16,32], index: 3, kind: input, shape index: {}]   ;;  %s6226_s2 = inlined_call_operand.vmem [shape: f32[1,32], index: 2, kind: input, shape index: {}]   ;;  %s6227_s6 = inlined_call_operand.vmem [shape: bf16[4,32,16], index: 6, kind: input, shape index: {}]   ;;  %s6228_s8 = inlined_call_operand.vmem [shape: bf16[4,32,16], index: 8, kind: input, shape index: {}]   ;;  %s6229_s10 = inlined_call_operand.vmem [shape: bf16[4,32,16], index: 10, kind: input, shape index: {}]   ;;  %s6230_s4 = inlined_call_operand.vmem [shape: f32[2,1,32], index: 4, kind: input, shape index: {}]   ;;  %s6231_s5 = inlined_call_operand.vmem [shape: f32[2,1,32], index: 5, kind: input, shape index: {}]   ;;  %s6232_s7 = inlined_call_operand.vmem [shape: f32[4,1,16], index: 7, kind: input, shape index: {}]   ;;  %s6233_s9 = inlined_call_operand.vmem [shape: f32[4,1,16], index: 9, kind: input, shape index: {}]   ;;  %s6234_s11 = inlined_call_operand.vmem [shape: f32[4,1,16], index: 11, kind: input, shape index: {}]   ;;  %s6235_s12 = inlined_call_operand.vmem [shape: bf16[2,32,32], index: 12, kind: input, shape index: {}]   ;;  %s6236_s13 = inlined_call_operand.vmem [shape: f32[2,1,32], index: 13, kind: input, shape index: {}]   ;;  %s6237_s16 = inlined_call_operand.vmem [shape: bf16[2,32,128], index: 16, kind: input, shape index: {}]   ;;  %s6238_s14 = inlined_call_operand.vmem [shape: f32[2,1,32], index: 14, kind: input, shape index: {}]   ;;  %s6239_s15 = inlined_call_operand.vmem [shape: f32[2,1,32], index: 15, kind: input, shape index: {}]   ;;  %s6240_s18 = inlined_call_operand.vmem [shape: bf16[2,128,32], index: 18, kind: input, shape index: {}]   ;;  %s6241_s17 = inlined_call_operand.vmem [shape: f32[2,1,128], index: 17, kind: input, shape index: {}]   ;;  %s6242_s19 = inlined_call_operand.vmem [shape: f32[2,1,32], index: 19, kind: input, shape index: {}]   ;;  %s6243_s20 = inlined_call_operand.vmem [shape: f32[1,32], index: 20, kind: input, shape index: {}]   ;;  %s6244_s21 = inlined_call_operand.vmem [shape: f32[1,32], index: 21, kind: input, shape index: {}]   ;;  %s6245_s22 = inlined_call_operand.vmem [shape: f32[34,32], index: 22, kind: output, shape index: {}]  }
   0x1   :  { %6252 = sst [smem:[#allocation2_spill]] %s6223_s1  ;;  %vm182_vm3 = vcmask 1041408   ;;  %vm207_vm4 = vcmask 254976   ;;  %vm5069_vm5 = vmmov 0   ;;  %vm780_vm6 = vcmask 130048  }
   0x2   :  { %6253 = sst [smem:[#allocation3_spill]] %s6224_s0  ;;  %s6259_s29 = sld [smem:[#allocation2_spill]]  ;;  %v176_v10 = vshrl.u32 %v175_v9, 7  ;;  %vm1122_vm7 = vsmask.f32 7424  ;;  %vm844_vm8 = vcmask 138240  }
   0x3   :  { %6254 = sst [smem:[#allocation4_spill]] %s6225_s3  ;;  %s6260_s0 = sld [smem:[#allocation3_spill]]  ;;  %vm851_vm9 = vcmask 131072  }
   0x4   :  { %6255 = sst [smem:[#allocation5_spill]] %s6226_s2  ;;  %v177_v14 = vsub.s32 0, %v176_v10  ;;  %s5071_s2 = smov 16  }
   0x5   :  { %6256 = sst [smem:[#allocation6_spill]] %s6227_s6 }
   0x6   :  { %6257 = sst [smem:[#allocation7_spill]] %s6228_s8  ;;  %s6263_s25 = sld [smem:[#allocation6_spill]] }
   0x7   :  { %6258 = sst [smem:[#allocation8_spill]] %s6229_s10  ;;  %s6264_s27 = sld [smem:[#allocation7_spill]] }
   0x8   :  { %v4851_v0 = vld [vmem:[%s6259_s29] sm:$0xff]   ;;  %v4852_v1 = vld [vmem:[%s6259_s29 + $0x8] sm:$0xff]   ;;  %v4853_v4 = vld [vmem:[%s6259_s29 + $0x10] sm:$0xff]   ;;  %s6261_s29 = sld [smem:[#allocation4_spill]]  ;;  %s6265_s10 = sld [smem:[#allocation8_spill]] }
   0x9   :  { %4361 = vmatprep.subr.bf16.mxu1 %v4851_v0  ;;  %v72_v2 = vld [vmem:[%s6260_s0] sm:$0xff]  ;;  %v73_v3 = vld [vmem:[%s6260_s0 + $0x8] sm:$0xff]  ;;  %v74_v6 = vld [vmem:[%s6260_s0 + $0x10] sm:$0xff] }
   0xa   :  { %4362 = vmatpush3.bf16.msra.mxu1 %v4851_v0  ;;  %v82_v5 = vpack.c.bf16 %v73_v3, %v72_v2  ;;  %v75_v7 = vld [vmem:[%s6260_s0 + $0x18] sm:$0xff]  ;;  %s6262_s0 = sld [smem:[#allocation5_spill]]  ;;  %v5068_v0 = vmov 0.0  }
   0xb   :  { %4363 = vmatprep.subr.bf16.mxu1 %v4852_v1  ;;  %v83_v8 = vpack.c.bf16 %v75_v7, %v74_v6  ;;  %4387 = vmatprep.subr.bf16.mxu0 %v5068_v0 }
   0xc   :  { %4367 = vmatprep.mubr.msk.bf16.mxu1 %vm102_vm0, %v82_v5  ;;  %v4854_v63 = vld [vmem:[%s6263_s25] sm:$0xff]   ;;  %v4856_v2 = vld [vmem:[%s6263_s25 + $0x8] sm:$0xff]   ;;  %4391 = vmatprep.mubr.msk.bf16.mxu0 %vm5069_vm5, %v5068_v0 }
   0xd   :  { %v4857_v3 = vld [vmem:[%s6264_s27 + $0x8] sm:$0xff]  }
   0xe   :  { %4364 = vmatpush3.bf16.msra.mxu1 %v4852_v1  ;;  %v159_v11 = vld [vmem:[%s6261_s29] sm:$0xff]  ;;  %v160_v13 = vld [vmem:[%s6261_s29 + $0x8] sm:$0xff] }
   0xf   :  { %4365 = vmatprep.subr.bf16.mxu1 %v4853_v4  ;;  %v4855_v1 = vld [vmem:[%s6264_s27] sm:$0xff]  }
  0x10   :  { %v158_v16 = vld [vmem:[%s6262_s0] sm:$0x1]  ;;  %4388 = vmatpush3.bf16.msra.mxu0 %v4855_v1 }
  0x11   :  { %v178_v24 = vrot.slane %v158_v16, %v177_v14  ;;  %4389 = vmatprep.subr.bf16.mxu0 %v5068_v0 }
  0x12   :  { %4366 = vmatpush3.bf16.msra.mxu1 %v4853_v4 }
  0x13   :  { %4371 = vmatprep.subr.bf16.mxu1 %v5068_v0 }
  0x14   :  { %4390 = vmatpush3.bf16.msra.mxu0 %v4857_v3 }
  0x15   :  { %4368 = vmatmul.mubr.msk.bf16.vlgmr.msra.gmra.mrb[0].mxu1 %vm102_vm0, %v83_v8  ;;  %4419 = vmatprep.subr.bf16.mxu0 %v5068_v0 }
  0x16   :  { %4372 = vmatpush3.bf16.msra.mxu1 %v4854_v63  ;;  %4375 = vmatprep.mubr.msk.bf16.mxu1 %vm5069_vm5, %v5068_v0 }
  0x17   :  { %4373 = vmatprep.subr.bf16.mxu1 %v5068_v0 }
  0x1a   :  { %4374 = vmatpush3.bf16.msra.mxu1 %v4856_v2 }
  0x1b   :  { %4403 = vmatprep.subr.bf16.mxu1 %v5068_v0 }
  0xe8   :  { %v4369_v12 = vpop.f32.mrb[0].mxu1 }
  0xe9   :  { %v143_v15 = vpop.f32.mrb[1].mxu1  ;;  %v163_v19 = vadd.f32 %v4369_v12, %v159_v11 }
  0xea   :  { %v161_v17 = vadd.f32 %v159_v11, %v143_v15  ;;  %v4370_v18 = vpop.f32.mrb[2].mxu1 }
  0xeb   :  { %v164_v20 = vadd.f32 %v4370_v18, %v160_v13  ;;  %v146_v21 = vpop.f32.mrb[3].mxu1  ;;  %v183_v27 = vrot.slane %v163_v19, 6 }
  0xec   :  { %v168_v22 = vrot.slane %v161_v17, 7  ;;  %v162_v23 = vadd.f32 %v160_v13, %v146_v21  ;;  %v3958_v21 = vld [vmem:[%s6230_s4] ss:$0 sm:$0xff] }
  0xed   :  { %v5220_v28 = vrot.slane %v164_v20, 6 }
  0xee   :  { %v169_v25 = vrot.slane %v162_v23, 7  ;;  %v5218_v26 = vsel %vm167_vm1, %v158_v16, %v168_v22 }
  0xef   :  { %v195_v29 = vsel %vm194_vm2, %v5218_v26, 0.0  ;;  %v5235_v35 = vsel %vm182_vm3, %v183_v27, %v5220_v28  ;;  %v208_v37 = vsel %vm207_vm4, %v5220_v28, 0.0 }
  0xf0   :  { %196 = vadd.xlane.f32.xlu0 %v195_v29  ;;  %v190_v30 = vsel %vm167_vm1, %v169_v25, %v178_v24  ;;  %v5226_v31 = vsel %vm167_vm1, %v168_v22, %v169_v25  ;;  %v204_v36 = vsel %vm194_vm2, %v5235_v35, 0.0 }
  0xf1   :  { %v5228_v32 = vsel %vm182_vm3, %v190_v30, %v183_v27  ;;  %v198_v34 = vsel %vm194_vm2, %v5226_v31, 0.0  ;;  %v3959_v27 = vld [vmem:[%s6231_s5] ss:$0 sm:$0xff] }
  0xf2   :  { %v201_v33 = vsel %vm194_vm2, %v5228_v32, 0.0 }
  0xf3   :  { %202 = vadd.xlane.f32.xlu1 %v201_v33 }
  0xf4   :  { %199 = vadd.xlane.f32.xlu0 %v198_v34 }
  0xf7   :  { %205 = vadd.xlane.f32.xlu1 %v204_v36 }
  0xf8   :  { %209 = vadd.xlane.f32.xlu0 %v208_v37 }
 0x17d   :  { %v197_v38 = vpop.xlane.xlu0 %196 }
 0x17e   :  { %v212_v39 = vmul.f32 0.03125, %v197_v38 }
 0x180   :  { %v5242_v40 = vsub.f32 %v5218_v26, %v212_v39  ;;  %v203_v41 = vpop.xlane.xlu1 %202 }
 0x181   :  { %v214_v42 = vmul.f32 0.03125, %v203_v41  ;;  %v200_v43 = vpop.xlane.xlu0 %199  ;;  %v4859_v41 = vld [vmem:[%s6263_s25 + $0x10] sm:$0xff]  }
 0x182   :  { %v213_v44 = vmul.f32 0.03125, %v200_v43  ;;  %v222_v45 = vmul.f32 %v5242_v40, %v5242_v40 }
 0x183   :  { %v5247_v46 = vsub.f32 %v5228_v32, %v214_v42 }
 0x184   :  { %v5250_v47 = vsub.f32 %v5226_v31, %v213_v44  ;;  %v206_v48 = vpop.xlane.xlu1 %205  ;;  %v227_v49 = vsel %vm194_vm2, %v222_v45, 0.0 }
 0x185   :  { %v215_v50 = vmul.f32 0.03125, %v206_v48  ;;  %228 = vadd.xlane.f32.xlu1 %v227_v49  ;;  %v210_v51 = vpop.xlane.xlu0 %209  ;;  %v224_v52 = vmul.f32 %v5247_v46, %v5247_v46 }
 0x186   :  { %v216_v53 = vmul.f32 0.03125, %v210_v51  ;;  %v223_v54 = vmul.f32 %v5250_v47, %v5250_v47 }
 0x187   :  { %v5258_v55 = vsub.f32 %v5235_v35, %v215_v50  ;;  %v233_v56 = vsel %vm194_vm2, %v224_v52, 0.0 }
 0x188   :  { %v5262_v57 = vsub.f32 %v5220_v28, %v216_v53  ;;  %v230_v58 = vsel %vm194_vm2, %v223_v54, 0.0  ;;  %v4862_v53 = vld [vmem:[%s6264_s27 + $0x10] sm:$0xff]  }
 0x189   :  { %234 = vadd.xlane.f32.xlu1 %v233_v56  ;;  %231 = vadd.xlane.f32.xlu0 %v230_v58  ;;  %v225_v59 = vmul.f32 %v5258_v55, %v5258_v55  ;;  %v4863_v54 = vld [vmem:[%s6265_s10 + $0x10] sm:$0xff]   ;;  %v4865_v56 = vld [vmem:[%s6265_s10 + $0x18] sm:$0xff]  }
 0x18a   :  { %v226_v60 = vmul.f32 %v5262_v57, %v5262_v57 }
 0x18b   :  { %v236_v61 = vsel %vm194_vm2, %v225_v59, 0.0  ;;  %v3966_v59 = vld [vmem:[%s6233_s9] ss:$0 sm:$0xff] }
 0x18c   :  { %v239_v62 = vsel %vm207_vm4, %v226_v60, 0.0 }
 0x18d   :  { %237 = vadd.xlane.f32.xlu0 %v236_v61  ;;  %240 = vadd.xlane.f32.xlu1 %v239_v62 }
 0x212   :  { %v229_v4 = vpop.xlane.xlu1 %228 }
 0x213   :  { %v242_v5 = vmul.f32 0.03125, %v229_v4 }
 0x215   :  { %v247_v6 = vadd.f32 1e-06, %v242_v5 }
 0x216   :  { %v235_v7 = vpop.xlane.xlu1 %234  ;;  %v232_v8 = vpop.xlane.xlu0 %231 }
 0x217   :  { %4902 = vrsqrt.f32 %v247_v6  ;;  %v244_v9 = vmul.f32 0.03125, %v235_v7  ;;  %v243_v10 = vmul.f32 0.03125, %v232_v8 }
 0x219   :  { %v248_v11 = vadd.f32 1e-06, %v243_v10  ;;  %v249_v12 = vadd.f32 1e-06, %v244_v9 }
 0x21a   :  { %v241_v13 = vpop.xlane.xlu1 %240  ;;  %v238_v14 = vpop.xlane.xlu0 %237 }
 0x21b   :  { %v245_v15 = vmul.f32 0.03125, %v238_v14  ;;  %4904 = vrsqrt.f32 %v248_v11  ;;  %v246_v16 = vmul.f32 0.03125, %v241_v13 }
 0x21c   :  { %4906 = vrsqrt.f32 %v249_v12 }
 0x21d   :  { %v250_v17 = vadd.f32 1e-06, %v245_v15  ;;  %v251_v18 = vadd.f32 1e-06, %v246_v16 }
 0x21f   :  { %4908 = vrsqrt.f32 %v250_v17 }
 0x220   :  { %4910 = vrsqrt.f32 %v251_v18 }
 0x221   :  { %v4903_v19 = vpop.eup %4902 }
 0x222   :  { %v257_v20 = vmul.f32 %v4903_v19, %v5242_v40  ;;  %v4858_v40 = vld [vmem:[%s6265_s10] sm:$0xff]  }
 0x224   :  { %v268_v23 = vmul.f32 %v3958_v21, %v257_v20 }
 0x225   :  { %v4905_v22 = vpop.eup %4904 }
 0x226   :  { %v258_v24 = vmul.f32 %v4905_v22, %v5250_v47  ;;  %v4907_v25 = vpop.eup %4906  ;;  %v279_v33 = vadd.f32 %v3959_v27, %v268_v23  ;;  %v4861_v47 = vld [vmem:[%s6263_s25 + $0x18] sm:$0xff]  }
 0x227   :  { %v259_v34 = vmul.f32 %v4907_v25, %v5247_v46  ;;  %v4860_v46 = vld [vmem:[%s6265_s10 + $0x8] sm:$0xff]  }
 0x228   :  { %v269_v29 = vmul.f32 %v3958_v21, %v258_v24 }
 0x229   :  { %v4909_v30 = vpop.eup %4908  ;;  %v270_v43 = vmul.f32 %v3958_v21, %v259_v34 }
 0x22a   :  { %v280_v36 = vadd.f32 %v3959_v27, %v269_v29  ;;  %v260_v37 = vmul.f32 %v4909_v30, %v5258_v55  ;;  %v4911_v42 = vpop.eup %4910  ;;  %v4864_v55 = vld [vmem:[%s6264_s27 + $0x18] sm:$0xff]  }
 0x22b   :  { %v261_v44 = vmul.f32 %v4911_v42, %v5262_v57  ;;  %v281_v48 = vadd.f32 %v3959_v27, %v270_v43  ;;  %v3960_v57 = vld [vmem:[%s6232_s7] ss:$0 sm:$0xff] }
 0x22c   :  { %v271_v38 = vmul.f32 %v3958_v21, %v260_v37  ;;  %v288_v39 = vpack.c.bf16 %v280_v36, %v279_v33 }
 0x22d   :  { %v272_v49 = vmul.f32 %v3958_v21, %v261_v44 }
 0x22e   :  { %4376 = vmatmul.mubr.msk.bf16.vlgmr.msra.gmra.mrb[4].mxu1 %vm194_vm2, %v288_v39  ;;  %4392 = vmatmul.mubr.msk.bf16.vlgmr.msra.gmra.mrb[0].mxu0 %vm194_vm2, %v288_v39  ;;  %v282_v45 = vadd.f32 %v3959_v27, %v271_v38 }
 0x22f   :  { %4379 = vmatprep.mubr.msk.bf16.mxu1 %vm5069_vm5, %v5068_v0  ;;  %4395 = vmatprep.mubr.msk.bf16.mxu0 %vm5069_vm5, %v5068_v0  ;;  %v283_v51 = vadd.f32 %v3959_v27, %v272_v49 }
 0x230   :  { %4404 = vmatpush3.bf16.msra.mxu1 %v4858_v40  ;;  %4420 = vmatpush3.bf16.msra.mxu0 %v4859_v41  ;;  %v289_v50 = vpack.c.bf16 %v282_v45, %v281_v48 }
 0x231   :  { %4405 = vmatprep.subr.bf16.mxu1 %v5068_v0  ;;  %4421 = vmatprep.subr.bf16.mxu0 %v5068_v0  ;;  %v290_v52 = vpack.c.bf16 %v283_v51, %v283_v51 }
 0x234   :  { %4406 = vmatpush3.bf16.msra.mxu1 %v4860_v46  ;;  %4422 = vmatpush3.bf16.msra.mxu0 %v4861_v47 }
 0x235   :  { %4435 = vmatprep.subr.bf16.mxu1 %v5068_v0  ;;  %4451 = vmatprep.subr.bf16.mxu0 %v5068_v0 }
 0x236   :  { %4380 = vmatmul.mubr.msk.bf16.gmra.mrb[8].mxu1 %vm194_vm2, %v289_v50  ;;  %4396 = vmatmul.mubr.msk.bf16.gmra.mrb[4].mxu0 %vm194_vm2, %v289_v50 }
 0x237   :  { %4383 = vmatprep.mubr.msk.bf16.mxu1 %vm5069_vm5, %v5068_v0  ;;  %4399 = vmatprep.mubr.msk.bf16.mxu0 %vm5069_vm5, %v5068_v0 }
 0x23e   :  { %4384 = vmatmul.mubr.msk.bf16.gmra.mrb[12].mxu1 %vm194_vm2, %v290_v52  ;;  %4400 = vmatmul.mubr.msk.bf16.gmra.mrb[8].mxu0 %vm194_vm2, %v290_v52 }
 0x23f   :  { %4407 = vmatprep.mubr.msk.bf16.mxu1 %vm5069_vm5, %v5068_v0  ;;  %4423 = vmatprep.mubr.msk.bf16.mxu0 %vm5069_vm5, %v5068_v0 }
 0x246   :  { %4408 = vmatmul.mubr.msk.bf16.vlgmr.msra.gmra.mrb[16].mxu1 %vm194_vm2, %v288_v39  ;;  %4424 = vmatmul.mubr.msk.bf16.vlgmr.msra.gmra.mrb[12].mxu0 %vm194_vm2, %v288_v39 }
 0x247   :  { %4411 = vmatprep.mubr.msk.bf16.mxu1 %vm5069_vm5, %v5068_v0  ;;  %4427 = vmatprep.mubr.msk.bf16.mxu0 %vm5069_vm5, %v5068_v0 }
 0x248   :  { %4436 = vmatpush3.bf16.msra.mxu1 %v4862_v53  ;;  %4452 = vmatpush3.bf16.msra.mxu0 %v4863_v54 }
 0x249   :  { %4437 = vmatprep.subr.bf16.mxu1 %v5068_v0  ;;  %4453 = vmatprep.subr.bf16.mxu0 %v5068_v0 }
 0x24c   :  { %4438 = vmatpush3.bf16.msra.mxu1 %v4864_v55  ;;  %4454 = vmatpush3.bf16.msra.mxu0 %v4865_v56 }
 0x24e   :  { %4412 = vmatmul.mubr.msk.bf16.gmra.mrb[20].mxu1 %vm194_vm2, %v289_v50  ;;  %4428 = vmatmul.mubr.msk.bf16.gmra.mrb[16].mxu0 %vm194_vm2, %v289_v50 }
 0x24f   :  { %4415 = vmatprep.mubr.msk.bf16.mxu1 %vm5069_vm5, %v5068_v0  ;;  %4431 = vmatprep.mubr.msk.bf16.mxu0 %vm5069_vm5, %v5068_v0 }
 0x256   :  { %4416 = vmatmul.mubr.msk.bf16.gmra.mrb[24].mxu1 %vm194_vm2, %v290_v52  ;;  %4432 = vmatmul.mubr.msk.bf16.gmra.mrb[20].mxu0 %vm194_vm2, %v290_v52 }
 0x257   :  { %4439 = vmatprep.mubr.msk.bf16.mxu1 %vm5069_vm5, %v5068_v0  ;;  %4455 = vmatprep.mubr.msk.bf16.mxu0 %vm5069_vm5, %v5068_v0 }
 0x25e   :  { %4440 = vmatmul.mubr.msk.bf16.vlgmr.msra.gmra.mrb[28].mxu1 %vm194_vm2, %v288_v39  ;;  %4456 = vmatmul.mubr.msk.bf16.vlgmr.msra.gmra.mrb[24].mxu0 %vm194_vm2, %v288_v39 }
 0x25f   :  { %4443 = vmatprep.mubr.msk.bf16.mxu1 %vm5069_vm5, %v5068_v0  ;;  %4459 = vmatprep.mubr.msk.bf16.mxu0 %vm5069_vm5, %v5068_v0 }
 0x266   :  { %4444 = vmatmul.mubr.msk.bf16.gmra.mrb[32].mxu1 %vm194_vm2, %v289_v50  ;;  %4460 = vmatmul.mubr.msk.bf16.gmra.mrb[28].mxu0 %vm194_vm2, %v289_v50 }
 0x267   :  { %4447 = vmatprep.mubr.msk.bf16.mxu1 %vm5069_vm5, %v5068_v0  ;;  %4463 = vmatprep.mubr.msk.bf16.mxu0 %vm5069_vm5, %v5068_v0 }
 0x26e   :  { %4448 = vmatmul.mubr.msk.bf16.gmra.mrb[36].mxu1 %vm194_vm2, %v290_v52  ;;  %4464 = vmatmul.mubr.msk.bf16.gmra.mrb[32].mxu0 %vm194_vm2, %v290_v52 }
 0x301   :  { %v353_v58 = vpop.f32.mrb[4].mxu1  ;;  %v432_v60 = vpop.f32.mrb[0].mxu0 }
 0x302   :  { %v4377_v61 = vpop.f32.mrb[5].mxu1  ;;  %v4393_v62 = vpop.f32.mrb[1].mxu0  ;;  %v354_v2 = vadd.f32 %v3960_v57, %v353_v58  ;;  %v433_v3 = vadd.f32 %v3966_v59, %v432_v60 }
 0x303   :  { %v356_v63 = vpop.f32.mrb[6].mxu1  ;;  %v435_v1 = vpop.f32.mrb[2].mxu0 }
 0x304   :  { %v357_v4 = vadd.f32 %v3960_v57, %v356_v63  ;;  %v436_v5 = vadd.f32 %v3966_v59, %v435_v1  ;;  %v4378_v6 = vpop.f32.mrb[7].mxu1  ;;  %v4394_v7 = vpop.f32.mrb[3].mxu0 }
 0x306   :  { %v776_v8 = vpack.c.bf16 %v357_v4, %v354_v2  ;;  %v778_v9 = vpack.c.bf16 %v436_v5, %v433_v3 }
 0x308   :  { %4811 = vmatprep.subr.msk.bf16.mxu1 %vm780_vm6, %v778_v9  ;;  %4471 = vmatprep.mubr.msk.bf16.mxu1 %vm780_vm6, %v776_v8  ;;  %v788_v10 = vsel %vm780_vm6, %v778_v9, 0 }
 0x309   :  { %v361_v11 = vpop.f32.mrb[8].mxu1  ;;  %v440_v12 = vpop.f32.mrb[4].mxu0  ;;  %4468 = vmatpush3.bf16.xpose.msra.mxu1 %v788_v10 }
 0x30a   :  { %v441_v13 = vadd.f32 %v3966_v59, %v440_v12  ;;  %v4381_v14 = vpop.f32.mrb[9].mxu1  ;;  %v4397_v15 = vpop.f32.mrb[5].mxu0  ;;  %v362_v18 = vadd.f32 %v3960_v57, %v361_v11 }
 0x30b   :  { %v364_v16 = vpop.f32.mrb[10].mxu1  ;;  %v443_v17 = vpop.f32.mrb[6].mxu0 }
 0x30c   :  { %v779_v19 = vpack.c.bf16 %v441_v13, %v441_v13  ;;  %v365_v20 = vadd.f32 %v3960_v57, %v364_v16  ;;  %v444_v21 = vadd.f32 %v3966_v59, %v443_v17  ;;  %v4382_v22 = vpop.f32.mrb[11].mxu1  ;;  %v4398_v23 = vpop.f32.mrb[7].mxu0  ;;  %v777_v48 = vpack.c.bf16 %v362_v18, %v362_v18 }
 0x30e   :  { %v1118_v24 = vpack.c.bf16 %v365_v20, %v362_v18  ;;  %v1120_v25 = vpack.c.bf16 %v444_v21, %v441_v13  ;;  %4812 = vmatprep.subr.msk.bf16.mxu1 %vm780_vm6, %v779_v19  ;;  %v791_v30 = vsel %vm780_vm6, %v779_v19, 0  ;;  %v5070_v19 = vmov 0  }
 0x30f   :  { %v5416_v20 = vsel %vm167_vm1, 65535, %v5070_v19 }
 0x310   :  { %v1126_v27 = vshll.u32 %v1118_v24, 16  ;;  %v1140_v29 = vshll.u32 %v1120_v25, 16  ;;  %v1124_v49 = vshrl.u32 %v1118_v24, 16  ;;  %v1138_v50 = vshrl.u32 %v1120_v25, 16 }
 0x311   :  { %v369_v33 = vpop.f32.mrb[12].mxu1  ;;  %v448_v34 = vpop.f32.mrb[8].mxu0  ;;  %4470 = vmatpush3.bf16.xpose.msra.mxu1 %v791_v30 }
 0x312   :  { %v370_v36 = vadd.f32 %v3960_v57, %v369_v33  ;;  %v449_v37 = vadd.f32 %v3966_v59, %v448_v34  ;;  %v4385_v38 = vpop.f32.mrb[13].mxu1  ;;  %v4401_v39 = vpop.f32.mrb[9].mxu0  ;;  %v1128_v42 = vrot.slane %v1126_v27, 1  ;;  %v1142_v43 = vrot.slane %v1140_v29, 1  ;;  %v3972_v57 = vld [vmem:[%s6234_s11] ss:$0 sm:$0xff] }
 0x313   :  { %v372_v40 = vpop.f32.mrb[14].mxu1  ;;  %v451_v41 = vpop.f32.mrb[10].mxu0  ;;  %v3983_v59 = vld [vmem:[%s6232_s7 + $0x1] ss:$0 sm:$0xff] }
 0x314   :  { %v5395_v44 = vpack.c.bf16 %v370_v36, %v370_v36  ;;  %v5397_v45 = vpack.c.bf16 %v449_v37, %v449_v37  ;;  %v4386_v46 = vpop.f32.mrb[15].mxu1  ;;  %v4402_v47 = vpop.f32.mrb[11].mxu0  ;;  %v1129_v53 = vor.u32 %v1128_v42, %v1124_v49  ;;  %v1143_v54 = vor.u32 %v1142_v43, %v1138_v50 }
 0x316   :  { %v1131_v51 = vshll.u32 %v5395_v44, 16  ;;  %v1145_v52 = vshll.u32 %v5397_v45, 16 }
 0x318   :  { %v1133_v55 = vrot.slane %v1131_v51, 1  ;;  %v1147_v56 = vrot.slane %v1145_v52, 1  ;;  %4472 = vmatmul.mubr.msk.bf16.vlgmr.msra.gmra.mrb[40].mxu1 %vm780_vm6, %v777_v48 }
 0x319   :  { %v511_v58 = vpop.f32.mrb[16].mxu1  ;;  %v592_v60 = vpop.f32.mrb[12].mxu0 }
 0x31a   :  { %v4409_v61 = vpop.f32.mrb[17].mxu1  ;;  %v4425_v62 = vpop.f32.mrb[13].mxu0  ;;  %v5409_v63 = vsel %vm1122_vm7, %v1143_v54, %v1147_v56  ;;  %v5412_v1 = vsel %vm1122_vm7, %v1129_v53, %v1133_v55  ;;  %v512_v4 = vadd.f32 %v3972_v57, %v511_v58  ;;  %v593_v5 = vadd.f32 %v3983_v59, %v592_v60 }
 0x31b   :  { %v514_v2 = vpop.f32.mrb[18].mxu1  ;;  %v595_v3 = vpop.f32.mrb[14].mxu0  ;;  %v3994_v61 = vld [vmem:[%s6233_s9 + $0x1] ss:$0 sm:$0xff] }
 0x31c   :  { %v515_v6 = vadd.f32 %v3972_v57, %v514_v2  ;;  %v596_v7 = vadd.f32 %v3983_v59, %v595_v3  ;;  %v4410_v8 = vpop.f32.mrb[19].mxu1  ;;  %v4426_v9 = vpop.f32.mrb[15].mxu0  ;;  %v4005_v2 = vld [vmem:[%s6234_s11 + $0x1] ss:$0 sm:$0xff] }
 0x31e   :  { %v881_v10 = vpack.c.bf16 %v515_v6, %v512_v4  ;;  %v942_v11 = vpack.c.bf16 %v596_v7, %v593_v5 }
 0x320   :  { %4475 = vmatprep.subr.bf16.mxu1 %v881_v10  ;;  %4487 = vmatprep.mubr.msk.bf16.mxu0 %vm780_vm6, %v942_v11 }
 0x321   :  { %v519_v12 = vpop.f32.mrb[20].mxu1  ;;  %v600_v13 = vpop.f32.mrb[16].mxu0  ;;  %4476 = vmatpush3.bf16.msra.mxu1 %v881_v10 }
 0x322   :  { %v520_v14 = vadd.f32 %v3972_v57, %v519_v12  ;;  %v4413_v15 = vpop.f32.mrb[21].mxu1  ;;  %v4429_v16 = vpop.f32.mrb[17].mxu0  ;;  %v5418_v22 = vadd.f32 %v3983_v59, %v600_v13 }
 0x323   :  { %v522_v17 = vpop.f32.mrb[22].mxu1  ;;  %v603_v18 = vpop.f32.mrb[18].mxu0 }
 0x324   :  { %v882_v21 = vpack.c.bf16 %v520_v14, %v520_v14  ;;  %v523_v23 = vadd.f32 %v3972_v57, %v522_v17  ;;  %v604_v24 = vadd.f32 %v3983_v59, %v603_v18  ;;  %v4414_v25 = vpop.f32.mrb[23].mxu1  ;;  %v4430_v27 = vpop.f32.mrb[19].mxu0 }
 0x326   :  { %v1249_v29 = vpack.c.bf16 %v523_v23, %v520_v14  ;;  %v1323_v30 = vpack.c.bf16 %v604_v24, %v5418_v22  ;;  %v892_v33 = vand.u32 %v5416_v20, %v882_v21 }
 0x328   :  { %v1254_v34 = vshll.u32 %v1249_v29, 16  ;;  %v1330_v36 = vshll.u32 %v1323_v30, 16  ;;  %4477 = vmatprep.subr.bf16.mxu1 %v892_v33  ;;  %v1252_v53 = vshrl.u32 %v1249_v29, 16  ;;  %v1328_v54 = vshrl.u32 %v1323_v30, 16 }
 0x329   :  { %v527_v37 = vpop.f32.mrb[24].mxu1  ;;  %v608_v38 = vpop.f32.mrb[20].mxu0  ;;  %4478 = vmatpush3.bf16.msra.mxu1 %v892_v33 }
 0x32a   :  { %v528_v39 = vadd.f32 %v3972_v57, %v527_v37  ;;  %v609_v40 = vadd.f32 %v3983_v59, %v608_v38  ;;  %v4417_v41 = vpop.f32.mrb[25].mxu1  ;;  %v4433_v42 = vpop.f32.mrb[21].mxu0  ;;  %v1256_v47 = vrot.slane %v1254_v34, 1  ;;  %v1332_v48 = vrot.slane %v1330_v36, 1 }
 0x32b   :  { %v530_v43 = vpop.f32.mrb[26].mxu1  ;;  %v611_v46 = vpop.f32.mrb[22].mxu0 }
 0x32c   :  { %v5422_v49 = vpack.c.bf16 %v528_v39, %v528_v39  ;;  %v5424_v50 = vpack.c.bf16 %v609_v40, %v609_v40  ;;  %v4418_v51 = vpop.f32.mrb[27].mxu1  ;;  %v4434_v52 = vpop.f32.mrb[23].mxu0  ;;  %v1333_v57 = vor.u32 %v1332_v48, %v1328_v54  ;;  %v1257_v60 = vor.u32 %v1256_v47, %v1252_v53 }
 0x32e   :  { %v1259_v55 = vshll.u32 %v5422_v49, 16  ;;  %v1335_v56 = vshll.u32 %v5424_v50, 16 }
 0x330   :  { %v1261_v58 = vrot.slane %v1259_v55, 1  ;;  %v1337_v59 = vrot.slane %v1335_v56, 1 }
 0x331   :  { %v673_v62 = vpop.f32.mrb[28].mxu1  ;;  %v754_v3 = vpop.f32.mrb[24].mxu0 }
 0x332   :  { %v4441_v4 = vpop.f32.mrb[29].mxu1  ;;  %v4457_v5 = vpop.f32.mrb[25].mxu0  ;;  %v5435_v6 = vsel %vm1122_vm7, %v1257_v60, %v1261_v58  ;;  %v5438_v7 = vsel %vm1122_vm7, %v1333_v57, %v1337_v59  ;;  %v674_v10 = vadd.f32 %v3994_v61, %v673_v62  ;;  %v755_v11 = vadd.f32 %v4005_v2, %v754_v3 }
 0x333   :  { %v676_v8 = vpop.f32.mrb[30].mxu1  ;;  %v757_v9 = vpop.f32.mrb[26].mxu0  ;;  %v943_v3 = vpack.c.bf16 %v5418_v22, %v5418_v22 }
 0x334   :  { %v677_v12 = vadd.f32 %v3994_v61, %v676_v8  ;;  %v758_v13 = vadd.f32 %v4005_v2, %v757_v9  ;;  %v4442_v14 = vpop.f32.mrb[31].mxu1  ;;  %v4458_v15 = vpop.f32.mrb[27].mxu0  ;;  %v1149_v8 = vshrl.u32 %v5397_v45, 16  ;;  %v1158_v9 = vsel %vm780_vm6, %v5409_v63, 0 }
 0x335   :  { %v1135_v15 = vshrl.u32 %v5395_v44, 16 }
 0x336   :  { %v944_v16 = vpack.c.bf16 %v677_v12, %v674_v10  ;;  %v5440_v17 = vpack.c.bf16 %v758_v13, %v755_v11  ;;  %v1161_v45 = vsel %vm780_vm6, %v1149_v8, 0 }
 0x338   :  { %4813 = vmatprep.subr.msk.bf16.mxu0 %vm780_vm6, %v944_v16  ;;  %4491 = vmatprep.subr.bf16.mxu1 %v5440_v17  ;;  %v953_v18 = vsel %vm780_vm6, %v944_v16, 0 }
 0x339   :  { %v681_v19 = vpop.f32.mrb[32].mxu1  ;;  %v762_v21 = vpop.f32.mrb[28].mxu0  ;;  %4484 = vmatpush3.bf16.xpose.msra.mxu0 %v953_v18 }
 0x33a   :  { %v682_v23 = vadd.f32 %v3994_v61, %v681_v19  ;;  %v4445_v24 = vpop.f32.mrb[33].mxu1  ;;  %v4461_v25 = vpop.f32.mrb[29].mxu0  ;;  %v5445_v33 = vadd.f32 %v4005_v2, %v762_v21 }
 0x33b   :  { %v684_v27 = vpop.f32.mrb[34].mxu1  ;;  %v765_v29 = vpop.f32.mrb[30].mxu0 }
 0x33c   :  { %v945_v30 = vpack.c.bf16 %v682_v23, %v682_v23  ;;  %v685_v34 = vadd.f32 %v3994_v61, %v684_v27  ;;  %v766_v36 = vadd.f32 %v4005_v2, %v765_v29  ;;  %v4446_v37 = vpop.f32.mrb[35].mxu1  ;;  %v4462_v38 = vpop.f32.mrb[31].mxu0 }
 0x33e   :  { %v1325_v39 = vpack.c.bf16 %v685_v34, %v682_v23  ;;  %v1453_v40 = vpack.c.bf16 %v766_v36, %v5445_v33  ;;  %4814 = vmatprep.subr.msk.bf16.mxu0 %vm780_vm6, %v945_v30  ;;  %v956_v43 = vsel %vm780_vm6, %v945_v30, 0 }
 0x340   :  { %v1344_v41 = vshll.u32 %v1325_v39, 16  ;;  %v1458_v42 = vshll.u32 %v1453_v40, 16  ;;  %v1342_v4 = vshrl.u32 %v1325_v39, 16 }
 0x341   :  { %v689_v46 = vpop.f32.mrb[36].mxu1  ;;  %v770_v47 = vpop.f32.mrb[32].mxu0  ;;  %4486 = vmatpush3.bf16.xpose.msra.mxu0 %v956_v43 }
 0x342   :  { %v690_v48 = vadd.f32 %v3994_v61, %v689_v46  ;;  %v771_v51 = vadd.f32 %v4005_v2, %v770_v47  ;;  %v4449_v52 = vpop.f32.mrb[37].mxu1  ;;  %v4465_v53 = vpop.f32.mrb[33].mxu0  ;;  %4815 = vmatprep.subr.msk.bf16.mxu0 %vm780_vm6, %v5409_v63  ;;  %v1346_v56 = vrot.slane %v1344_v41, 1  ;;  %v1460_v57 = vrot.slane %v1458_v42, 1 }
 0x343   :  { %v692_v54 = vpop.f32.mrb[38].mxu1  ;;  %v773_v55 = vpop.f32.mrb[34].mxu0  ;;  %v1456_v61 = vshrl.u32 %v1453_v40, 16 }
 0x344   :  { %v5452_v58 = vpack.c.bf16 %v690_v48, %v690_v48  ;;  %v1454_v59 = vpack.c.bf16 %v771_v51, %v771_v51  ;;  %v4450_v60 = vpop.f32.mrb[39].mxu1  ;;  %v4466_v62 = vpop.f32.mrb[35].mxu0  ;;  %v1347_v10 = vor.u32 %v1346_v56, %v1342_v4 }
 0x345   :  { %v1461_v13 = vor.u32 %v1460_v57, %v1456_v61 }
 0x346   :  { %v1349_v2 = vshll.u32 %v5452_v58, 16  ;;  %v1463_v5 = vshll.u32 %v1454_v59, 16  ;;  %v1467_v63 = vshrl.u32 %v1454_v59, 16 }
 0x348   :  { %v1351_v11 = vrot.slane %v1349_v2, 1  ;;  %v1465_v12 = vrot.slane %v1463_v5, 1  ;;  %4488 = vmatmul.mubr.msk.bf16.vlgmr.msra.gmra.mrb[36].mxu0 %vm780_vm6, %v943_v3  ;;  %v1477_v16 = vand.u32 %v1467_v63, %v5416_v20 }
 0x349   :  { %4500 = vmatpush3.bf16.xpose.msra.mxu0 %v1158_v9  ;;  %4503 = vmatprep.mubr.msk.bf16.mxu0 %vm780_vm6, %v5412_v1 }
 0x34a   :  { %4816 = vmatprep.subr.msk.bf16.mxu0 %vm780_vm6, %v1149_v8  ;;  %v1466_v22 = vsel %vm1122_vm7, %v1461_v13, %v1465_v12  ;;  %v5466_v14 = vsel %vm1122_vm7, %v1347_v10, %v1351_v11 }
 0x351   :  { %4502 = vmatpush3.bf16.xpose.msra.mxu0 %v1161_v45 }
 0x352   :  { %4523 = vmatprep.subr.bf16.mxu0 %v1466_v22 }
 0x358   :  { %4504 = vmatmul.mubr.msk.bf16.vlgmr.msra.gmra.mrb[40].mxu0 %vm780_vm6, %v1135_v15 }
 0x359   :  { %4524 = vmatpush3.bf16.msra.mxu0 %v1466_v22 }
 0x35a   :  { %4525 = vmatprep.subr.bf16.mxu0 %v1477_v16 }
 0x35d   :  { %4526 = vmatpush3.bf16.msra.mxu0 %v1477_v16 }
 0x35e   :  { %4531 = vmatprep.subr.bf16.mxu0 %v5068_v0 }
 0x3eb   :  { %v4473_v1 = vpop.f32.mrb[40].mxu1 }
 0x3ec   :  { %v827_v18 = vpop.f32.mrb[41].mxu1  ;;  %v843_v24 = vmul.f32 0.25, %v4473_v1 }
 0x3ed   :  { %v841_v19 = vmul.f32 0.25, %v827_v18  ;;  %v4474_v21 = vpop.f32.mrb[42].mxu1 }
 0x3ee   :  { %v830_v23 = vpop.f32.mrb[43].mxu1  ;;  %v852_v29 = vsel %vm851_vm9, %v843_v24, -inf }
 0x3ef   :  { %v842_v25 = vmul.f32 0.25, %v830_v23  ;;  %v845_v27 = vsel %vm844_vm8, %v841_v19, -inf }
 0x3f0   :  { %846 = vmax.xlane.f32.xlu0 %v845_v27 }
 0x3f1   :  { %v848_v44 = vsel %vm844_vm8, %v842_v25, -inf }
 0x3f2   :  { %849 = vmax.xlane.f32.xlu1 %v848_v44 }
 0x3f4   :  { %853 = vmax.xlane.f32.xlu0 %v852_v29 }
 0x41b   :  { %v4489_v30 = vpop.f32.mrb[36].mxu0 }
 0x41c   :  { %v992_v34 = vpop.f32.mrb[37].mxu0  ;;  %v1008_v39 = vmul.f32 0.25, %v4489_v30 }
 0x41d   :  { %v1006_v36 = vmul.f32 0.25, %v992_v34  ;;  %v4490_v37 = vpop.f32.mrb[38].mxu0 }
 0x41e   :  { %v995_v38 = vpop.f32.mrb[39].mxu0  ;;  %v1015_v43 = vsel %vm851_vm9, %v1008_v39, -inf }
 0x41f   :  { %v1007_v40 = vmul.f32 0.25, %v995_v38  ;;  %v1009_v41 = vsel %vm844_vm8, %v1006_v36, -inf }
 0x420   :  { %1010 = vmax.xlane.f32.xlu1 %v1009_v41 }
 0x421   :  { %v1012_v42 = vsel %vm844_vm8, %v1007_v40, -inf }
 0x422   :  { %1013 = vmax.xlane.f32.xlu0 %v1012_v42 }
 0x424   :  { %1016 = vmax.xlane.f32.xlu1 %v1015_v43 }
 0x42b   :  { %v4505_v46 = vpop.f32.mrb[40].mxu0 }
 0x42c   :  { %v1197_v47 = vpop.f32.mrb[41].mxu0  ;;  %v1213_v53 = vmul.f32 0.25, %v4505_v46 }
 0x42d   :  { %v1211_v48 = vmul.f32 0.25, %v1197_v47  ;;  %v4506_v51 = vpop.f32.mrb[42].mxu0 }
 0x42e   :  { %v1200_v52 = vpop.f32.mrb[43].mxu0  ;;  %v1220_v57 = vsel %vm851_vm9, %v1213_v53, -inf }
 0x42f   :  { %v1212_v54 = vmul.f32 0.25, %v1200_v52  ;;  %v1214_v55 = vsel %vm844_vm8, %v1211_v48, -inf }
 0x430   :  { %1215 = vmax.xlane.f32.xlu0 %v1214_v55 }
 0x431   :  { %v1217_v56 = vsel %vm844_vm8, %v1212_v54, -inf }
 0x432   :  { %1218 = vmax.xlane.f32.xlu1 %v1217_v56 }
 0x434   :  { %1221 = vmax.xlane.f32.xlu0 %v1220_v57 }
 0x47d   :  { %v847_v59 = vpop.xlane.xlu0 %846 }
 0x47e   :  { %v855_v60 = vsub.f32 %v841_v19, %v847_v59 }
 0x47f   :  { %v850_v62 = vpop.xlane.xlu1 %849 }
 0x480   :  { %v858_v3 = vmul.f32 1.442695, %v855_v60  ;;  %v856_v4 = vsub.f32 %v842_v25, %v850_v62 }
 0x481   :  { %v854_v61 = vpop.xlane.xlu0 %853 }
 0x482   :  { %4912 = vpow2.f32 %v858_v3  ;;  %v860_v2 = vmul.f32 1.442695, %v856_v4  ;;  %v857_v5 = vsub.f32 %v843_v24, %v854_v61  ;;  %v1045_v4 = vpack.c.bf16 %v5445_v33, %v5445_v33 }
 0x484   :  { %4914 = vpow2.f32 %v860_v2  ;;  %v862_v8 = vmul.f32 1.442695, %v857_v5 }
 0x486   :  { %4916 = vpow2.f32 %v862_v8  ;;  %v1053_v8 = vand.u32 %v1045_v4, %v5416_v20 }
 0x48c   :  { %v4913_v9 = vpop.eup %4912 }
 0x48d   :  { %v864_v10 = vsel %vm844_vm8, %v4913_v9, 0.0 }
 0x48e   :  { %v4915_v11 = vpop.eup %4914  ;;  %865 = vadd.xlane.f32.xlu1 %v864_v10 }
 0x48f   :  { %v867_v12 = vsel %vm844_vm8, %v4915_v11, 0.0 }
 0x490   :  { %v4917_v13 = vpop.eup %4916  ;;  %868 = vadd.xlane.f32.xlu0 %v867_v12 }
 0x491   :  { %v870_v22 = vsel %vm851_vm9, %v4917_v13, 0.0 }
 0x492   :  { %871 = vadd.xlane.f32.xlu1 %v870_v22 }
 0x4ad   :  { %v1011_v45 = vpop.xlane.xlu1 %1010 }
 0x4ae   :  { %v1018_v63 = vsub.f32 %v1006_v36, %v1011_v45 }
 0x4af   :  { %v1014_v15 = vpop.xlane.xlu0 %1013 }
 0x4b0   :  { %v1021_v16 = vmul.f32 1.442695, %v1018_v63  ;;  %v1019_v1 = vsub.f32 %v1007_v40, %v1014_v15  ;;  %v1263_v63 = vshrl.u32 %v5422_v49, 16 }
 0x4b1   :  { %v1017_v18 = vpop.xlane.xlu1 %1016 }
 0x4b2   :  { %4918 = vpow2.f32 %v1021_v16  ;;  %v1023_v19 = vmul.f32 1.442695, %v1019_v1  ;;  %v1020_v21 = vsub.f32 %v1008_v39, %v1017_v18 }
 0x4b4   :  { %4920 = vpow2.f32 %v1023_v19  ;;  %v1025_v23 = vmul.f32 1.442695, %v1020_v21  ;;  %v1273_v21 = vand.u32 %v1263_v63, %v5416_v20 }
 0x4b6   :  { %4922 = vpow2.f32 %v1025_v23 }
 0x4bc   :  { %v4919_v24 = vpop.eup %4918 }
 0x4bd   :  { %v1216_v25 = vpop.xlane.xlu0 %1215  ;;  %v1027_v27 = vsel %vm844_vm8, %v4919_v24, 0.0 }
 0x4be   :  { %v4921_v44 = vpop.eup %4920  ;;  %v1223_v29 = vsub.f32 %v1211_v48, %v1216_v25  ;;  %1028 = vadd.xlane.f32.xlu0 %v1027_v27 }
 0x4bf   :  { %v1219_v30 = vpop.xlane.xlu1 %1218  ;;  %v1030_v34 = vsel %vm844_vm8, %v4921_v44, 0.0 }
 0x4c0   :  { %v4923_v36 = vpop.eup %4922  ;;  %v1226_v37 = vmul.f32 1.442695, %v1223_v29  ;;  %v1224_v38 = vsub.f32 %v1212_v54, %v1219_v30  ;;  %1031 = vadd.xlane.f32.xlu1 %v1030_v34  ;;  %v1353_v34 = vshrl.u32 %v5452_v58, 16 }
 0x4c1   :  { %v1222_v40 = vpop.xlane.xlu0 %1221  ;;  %v1033_v39 = vsel %vm851_vm9, %v4923_v36, 0.0 }
 0x4c2   :  { %4924 = vpow2.f32 %v1226_v37  ;;  %v1228_v41 = vmul.f32 1.442695, %v1224_v38  ;;  %v1225_v42 = vsub.f32 %v1213_v53, %v1222_v40  ;;  %1034 = vadd.xlane.f32.xlu0 %v1033_v39  ;;  %v1339_v37 = vshrl.u32 %v5424_v50, 16 }
 0x4c4   :  { %4926 = vpow2.f32 %v1228_v41  ;;  %v1230_v43 = vmul.f32 1.442695, %v1225_v42 }
 0x4c6   :  { %4928 = vpow2.f32 %v1230_v43 }
 0x4cc   :  { %v4925_v46 = vpop.eup %4924 }
 0x4cd   :  { %v1232_v47 = vsel %vm844_vm8, %v4925_v46, 0.0 }
 0x4ce   :  { %v4927_v48 = vpop.eup %4926  ;;  %1233 = vadd.xlane.f32.xlu1 %v1232_v47 }
 0x4cf   :  { %v1235_v51 = vsel %vm844_vm8, %v4927_v48, 0.0 }
 0x4d0   :  { %v4929_v52 = vpop.eup %4928  ;;  %1236 = vadd.xlane.f32.xlu0 %v1235_v51 }
 0x4d1   :  { %v1238_v54 = vsel %vm851_vm9, %v4929_v52, 0.0 }
 0x4d2   :  { %1239 = vadd.xlane.f32.xlu1 %v1238_v54 }
 0x51b   :  { %v866_v55 = vpop.xlane.xlu1 %865 }
 0x51c   :  { %4930 = vrcp.f32 %v866_v55 }
 0x51d   :  { %v869_v56 = vpop.xlane.xlu0 %868 }
 0x51e   :  { %4932 = vrcp.f32 %v869_v56 }
 0x51f   :  { %v872_v53 = vpop.xlane.xlu1 %871 }
 0x520   :  { %4934 = vrcp.f32 %v872_v53 }
 0x526   :  { %v4931_v57 = vpop.eup %4930 }
 0x527   :  { %v876_v60 = vmul.f32 %v4931_v57, %v4913_v9 }
 0x528   :  { %v4933_v59 = vpop.eup %4932 }
 0x529   :  { %v877_v62 = vmul.f32 %v4933_v59, %v4915_v11 }
 0x52a   :  { %v4935_v3 = vpop.eup %4934 }
 0x52b   :  { %v878_v61 = vmul.f32 %v4935_v3, %v4917_v13  ;;  %v879_v2 = vpack.c.bf16 %v877_v62, %v876_v60 }
 0x52d   :  { %4479 = vmatprep.mubr.msk.bf16.mxu1 %vm844_vm8, %v879_v2  ;;  %v880_v5 = vpack.c.bf16 %v878_v61, %v878_v61 }
 0x52f   :  { %4480 = vmatmul.mubr.msk.bf16.vlgmr.msra.gmra.mrb[44].mxu1 %vm844_vm8, %v880_v5 }
 0x530   :  { %4492 = vmatpush3.bf16.msra.mxu1 %v5440_v17 }
 0x531   :  { %4493 = vmatprep.subr.bf16.mxu1 %v1053_v8 }
 0x534   :  { %4494 = vmatpush3.bf16.msra.mxu1 %v1053_v8 }
 0x535   :  { %4507 = vmatprep.subr.bf16.mxu1 %v5435_v6 }
 0x54b   :  { %v1029_v9 = vpop.xlane.xlu0 %1028 }
 0x54c   :  { %4936 = vrcp.f32 %v1029_v9 }
 0x54d   :  { %v1032_v10 = vpop.xlane.xlu1 %1031 }
 0x54e   :  { %4938 = vrcp.f32 %v1032_v10 }
 0x54f   :  { %v1035_v33 = vpop.xlane.xlu0 %1034 }
 0x550   :  { %4940 = vrcp.f32 %v1035_v33 }
 0x556   :  { %v4937_v11 = vpop.eup %4936 }
 0x557   :  { %v1039_v13 = vmul.f32 %v4937_v11, %v4919_v24 }
 0x558   :  { %v4939_v12 = vpop.eup %4938 }
 0x559   :  { %v1040_v22 = vmul.f32 %v4939_v12, %v4921_v44 }
 0x55a   :  { %v4941_v45 = vpop.eup %4940 }
 0x55b   :  { %v1041_v15 = vmul.f32 %v4941_v45, %v4923_v36  ;;  %v1234_v16 = vpop.xlane.xlu1 %1233  ;;  %v1042_v17 = vpack.c.bf16 %v1040_v22, %v1039_v13  ;;  %v1365_v36 = vsel %vm780_vm6, %v1353_v34, 0 }
 0x55c   :  { %4942 = vrcp.f32 %v1234_v16 }
 0x55d   :  { %v1237_v1 = vpop.xlane.xlu0 %1236  ;;  %4495 = vmatprep.mubr.msk.bf16.mxu1 %vm844_vm8, %v1042_v17  ;;  %v1043_v18 = vpack.c.bf16 %v1041_v15, %v1041_v15 }
 0x55e   :  { %4944 = vrcp.f32 %v1237_v1 }
 0x55f   :  { %4496 = vmatmul.mubr.msk.bf16.vlgmr.msra.gmra.mrb[48].mxu1 %vm844_vm8, %v1043_v18  ;;  %v1240_v19 = vpop.xlane.xlu1 %1239 }
 0x560   :  { %4508 = vmatpush3.bf16.msra.mxu1 %v5435_v6  ;;  %4946 = vrcp.f32 %v1240_v19  ;;  %v1362_v6 = vsel %vm780_vm6, %v5466_v14, 0 }
 0x561   :  { %4509 = vmatprep.subr.bf16.mxu1 %v1273_v21 }
 0x564   :  { %4510 = vmatpush3.bf16.msra.mxu1 %v1273_v21 }
 0x565   :  { %4817 = vmatprep.subr.msk.bf16.mxu1 %vm780_vm6, %v5466_v14 }
 0x566   :  { %v4943_v49 = vpop.eup %4942 }
 0x567   :  { %v1244_v24 = vmul.f32 %v4943_v49, %v4925_v46 }
 0x568   :  { %v4945_v23 = vpop.eup %4944 }
 0x569   :  { %v1245_v25 = vmul.f32 %v4945_v23, %v4927_v48 }
 0x56a   :  { %v4947_v27 = vpop.eup %4946 }
 0x56b   :  { %v1246_v44 = vmul.f32 %v4947_v27, %v4929_v52  ;;  %v1247_v29 = vpack.c.bf16 %v1245_v25, %v1244_v24 }
 0x56d   :  { %4511 = vmatprep.mubr.msk.bf16.mxu1 %vm844_vm8, %v1247_v29  ;;  %v1248_v30 = vpack.c.bf16 %v1246_v44, %v1246_v44 }
 0x56f   :  { %4512 = vmatmul.mubr.msk.bf16.vlgmr.msra.gmra.mrb[52].mxu1 %vm844_vm8, %v1248_v30 }
 0x570   :  { %4516 = vmatpush3.bf16.xpose.msra.mxu1 %v1362_v6  ;;  %4519 = vmatprep.mubr.msk.bf16.mxu1 %vm780_vm6, %v5438_v7  ;;  %v4866_v6 = vld [vmem:[%s6235_s12] sm:$0xff]  }
 0x571   :  { %4818 = vmatprep.subr.msk.bf16.mxu1 %vm780_vm6, %v1353_v34 }
 0x578   :  { %4518 = vmatpush3.bf16.xpose.msra.mxu1 %v1365_v36 }
 0x579   :  { %4547 = vmatprep.subr.bf16.mxu1 %v5068_v0 }
 0x57f   :  { %4520 = vmatmul.mubr.msk.bf16.vlgmr.msra.gmra.mrb[56].mxu1 %vm780_vm6, %v1339_v37  ;;  %v4867_v37 = vld [vmem:[%s6235_s12 + $0x8] sm:$0xff]  }
 0x580   :  { %4551 = vmatprep.mubr.msk.bf16.mxu1 %vm5069_vm5, %v5068_v0 }
 0x602   :  { %v5519_v58 = vpop.f32.mrb[44].mxu1 }
 0x603   :  { %v928_v14 = vpop.f32.mrb[45].mxu1 }
 0x604   :  { %v4482_v38 = vpop.f32.mrb[46].mxu1 }
 0x605   :  { %v931_v40 = vpop.f32.mrb[47].mxu1 }
 0x632   :  { %v5521_v7 = vpop.f32.mrb[48].mxu1 }
 0x633   :  { %v1089_v39 = vpop.f32.mrb[49].mxu1 }
 0x634   :  { %v4498_v41 = vpop.f32.mrb[50].mxu1 }
 0x635   :  { %v1092_v42 = vpop.f32.mrb[51].mxu1 }
 0x636   :  { %v4831_v43 = vpack.i.bf16 %v1092_v42, %v1089_v39 }
 0x642   :  { %v5523_v46 = vpop.f32.mrb[52].mxu1 }
 0x643   :  { %v5525_v47 = vpop.f32.mrb[53].mxu1 }
 0x644   :  { %v4514_v50 = vpop.f32.mrb[54].mxu1 }
 0x645   :  { %v5527_v48 = vpop.f32.mrb[55].mxu1 }
 0x652   :  { %v4521_v51 = vpop.f32.mrb[56].mxu1 }
 0x653   :  { %v1401_v52 = vpop.f32.mrb[57].mxu1  ;;  %v1417_v53 = vmul.f32 0.25, %v4521_v51 }
 0x654   :  { %v1415_v54 = vmul.f32 0.25, %v1401_v52  ;;  %v4522_v55 = vpop.f32.mrb[58].mxu1 }
 0x655   :  { %v1404_v56 = vpop.f32.mrb[59].mxu1  ;;  %v1424_v62 = vsel %vm851_vm9, %v1417_v53, -inf }
 0x656   :  { %v1416_v57 = vmul.f32 0.25, %v1404_v56  ;;  %v1418_v59 = vsel %vm844_vm8, %v1415_v54, -inf }
 0x657   :  { %1419 = vmax.xlane.f32.xlu0 %v1418_v59 }
 0x658   :  { %v1421_v60 = vsel %vm844_vm8, %v1416_v57, -inf }
 0x659   :  { %1422 = vmax.xlane.f32.xlu1 %v1421_v60 }
 0x65b   :  { %1425 = vmax.xlane.f32.xlu0 %v1424_v62 }
 0x6e4   :  { %v1420_v3 = vpop.xlane.xlu0 %1419 }
 0x6e5   :  { %v1427_v4 = vsub.f32 %v1415_v54, %v1420_v3 }
 0x6e6   :  { %v1423_v61 = vpop.xlane.xlu1 %1422 }
 0x6e7   :  { %v1430_v2 = vmul.f32 1.442695, %v1427_v4  ;;  %v1428_v5 = vsub.f32 %v1416_v57, %v1423_v61 }
 0x6e8   :  { %v1426_v8 = vpop.xlane.xlu0 %1425 }
 0x6e9   :  { %4948 = vpow2.f32 %v1430_v2  ;;  %v1432_v9 = vmul.f32 1.442695, %v1428_v5  ;;  %v1429_v10 = vsub.f32 %v1417_v53, %v1426_v8 }
 0x6eb   :  { %4950 = vpow2.f32 %v1432_v9  ;;  %v1434_v33 = vmul.f32 1.442695, %v1429_v10 }
 0x6ed   :  { %4952 = vpow2.f32 %v1434_v33 }
 0x6f3   :  { %v4949_v11 = vpop.eup %4948 }
 0x6f4   :  { %v1436_v12 = vsel %vm844_vm8, %v4949_v11, 0.0 }
 0x6f5   :  { %v4951_v13 = vpop.eup %4950  ;;  %1437 = vadd.xlane.f32.xlu1 %v1436_v12 }
 0x6f6   :  { %v1439_v22 = vsel %vm844_vm8, %v4951_v13, 0.0 }
 0x6f7   :  { %v4953_v45 = vpop.eup %4952  ;;  %1440 = vadd.xlane.f32.xlu0 %v1439_v22 }
 0x6f8   :  { %v1442_v63 = vsel %vm851_vm9, %v4953_v45, 0.0 }
 0x6f9   :  { %1443 = vadd.xlane.f32.xlu1 %v1442_v63 }
 0x70d   :  { %4832 = vrot.lane.b32.xlu0 %v4831_v43, %s5071_s2  ;;  %v4032_v43 = vld [vmem:[%s6236_s13] ss:$0 sm:$0xff] }
 0x782   :  { %v1438_v15 = vpop.xlane.xlu1 %1437 }
 0x783   :  { %4954 = vrcp.f32 %v1438_v15 }
 0x784   :  { %v1441_v16 = vpop.xlane.xlu0 %1440 }
 0x785   :  { %4956 = vrcp.f32 %v1441_v16 }
 0x786   :  { %v1444_v17 = vpop.xlane.xlu1 %1443 }
 0x787   :  { %4958 = vrcp.f32 %v1444_v17 }
 0x788   :  { %v4833_v1 = vpop.permute.xlu0 %4832 }
 0x789   :  { %v4835_v18 = vunpack.i.h.bf16 %v4833_v1  ;;  %v4834_v19 = vunpack.i.l.bf16 %v4833_v1 }
 0x78b   :  { %v1116_v21 = vsel %vm780_vm6, %v931_v40, %v4835_v18  ;;  %v1115_v49 = vsel %vm780_vm6, %v928_v14, %v4834_v19 }
 0x78c   :  { %v1558_v23 = vpack.c.bf16 %v1116_v21, %v1115_v49 }
 0x78d   :  { %v4955_v24 = vpop.eup %4954 }
 0x78e   :  { %v1448_v27 = vmul.f32 %v4955_v24, %v4949_v11 }
 0x78f   :  { %v4957_v25 = vpop.eup %4956 }
 0x790   :  { %v1449_v44 = vmul.f32 %v4957_v25, %v4951_v13 }
 0x791   :  { %v4959_v29 = vpop.eup %4958 }
 0x792   :  { %v1450_v30 = vmul.f32 %v4959_v29, %v4953_v45  ;;  %v1451_v34 = vpack.c.bf16 %v1449_v44, %v1448_v27 }
 0x794   :  { %4527 = vmatprep.mubr.msk.bf16.mxu0 %vm844_vm8, %v1451_v34  ;;  %v1452_v36 = vpack.c.bf16 %v1450_v30, %v1450_v30 }
 0x796   :  { %4528 = vmatmul.mubr.msk.bf16.vlgmr.msra.gmra.mrb[44].mxu0 %vm844_vm8, %v1452_v36 }
 0x797   :  { %4532 = vmatpush3.bf16.msra.mxu0 %v4866_v6  ;;  %4535 = vmatprep.mubr.msk.bf16.mxu0 %vm5069_vm5, %v5068_v0 }
 0x798   :  { %4533 = vmatprep.subr.bf16.mxu0 %v5068_v0 }
 0x79b   :  { %4534 = vmatpush3.bf16.msra.mxu0 %v4867_v37  ;;  %v4869_v37 = vld [vmem:[%s6237_s16 + $0x8] sm:$0xff]  }
 0x79c   :  { %4563 = vmatprep.subr.bf16.mxu0 %v5068_v0 }
 0x79e   :  { %4536 = vmatmul.mubr.msk.bf16.vlgmr.msra.gmra.mrb[48].mxu0 %vm194_vm2, %v1558_v23 }
 0x79f   :  { %4539 = vmatprep.mubr.msk.bf16.mxu0 %vm5069_vm5, %v5068_v0 }
 0x869   :  { %v4529_v14 = vpop.f32.mrb[44].mxu0 }
 0x86a   :  { %v1513_v38 = vpop.f32.mrb[45].mxu0 }
 0x86b   :  { %v4530_v40 = vpop.f32.mrb[46].mxu0 }
 0x86c   :  { %v1516_v39 = vpop.f32.mrb[47].mxu0 }
 0x86d   :  { %v4836_v41 = vpack.i.bf16 %v1516_v39, %v1513_v38 }
 0x86f   :  { %4837 = vrot.lane.b32.xlu1 %v4836_v41, %s5071_s2 }
 0x871   :  { %v1616_v42 = vpop.f32.mrb[48].mxu0 }
 0x872   :  { %v1638_v50 = vadd.f32 %v1616_v42, %v5218_v26  ;;  %v4537_v51 = vpop.f32.mrb[49].mxu0 }
 0x873   :  { %1110 = vrot.lane.b32.xlu1 %v5521_v7, %s5071_s2  ;;  %v1619_v52 = vpop.f32.mrb[50].mxu0 }
 0x874   :  { %v5560_v54 = vadd.f32 %v4032_v43, %v1638_v50  ;;  %v4538_v55 = vpop.f32.mrb[51].mxu0  ;;  %v1639_v53 = vadd.f32 %v1619_v52, %v5226_v31 }
 0x876   :  { %v1657_v56 = vsel %vm194_vm2, %v5560_v54, 0.0  ;;  %v5566_v57 = vadd.f32 %v4032_v43, %v1639_v53 }
 0x877   :  { %1534 = vrot.lane.b32.xlu1 %v4529_v14, %s5071_s2  ;;  %1658 = vadd.xlane.f32.xlu0 %v1657_v56 }
 0x878   :  { %v1660_v26 = vsel %vm194_vm2, %v5566_v57, 0.0 }
 0x89b   :  { %1661 = vadd.xlane.f32.xlu1 %v1660_v26 }
 0x8e1   :  { %v4838_v59 = vpop.permute.xlu1 %4837 }
 0x8e2   :  { %v4840_v7 = vunpack.i.h.bf16 %v4838_v59  ;;  %v4839_v60 = vunpack.i.l.bf16 %v4838_v59 }
 0x8e4   :  { %v1540_v62 = vsel %vm780_vm6, %v5527_v48, %v4840_v7  ;;  %v1539_v3 = vsel %vm780_vm6, %v5525_v47, %v4839_v60 }
 0x8e5   :  { %v1546_v4 = vrot.slane %v1540_v62, 7  ;;  %v1545_v61 = vrot.slane %v1539_v3, 7  ;;  %v1111_v2 = vpop.permute.xlu1 %1110 }
 0x8e6   :  { %v1117_v31 = vsel %vm780_vm6, %v5519_v58, %v1111_v2 }
 0x8e7   :  { %v1547_v5 = vsel %vm167_vm1, %v1545_v61, %v1546_v4  ;;  %v1553_v8 = vsel %vm167_vm1, %v1117_v31, %v1545_v61 }
 0x8e8   :  { %v1559_v9 = vpack.c.bf16 %v1547_v5, %v1553_v8  ;;  %v4033_v5 = vld [vmem:[%s6238_s14] ss:$0 sm:$0xff] }
 0x8e9   :  { %v1535_v10 = vpop.permute.xlu1 %1534 }
 0x8ea   :  { %v1541_v33 = vsel %vm780_vm6, %v5523_v46, %v1535_v10  ;;  %4540 = vmatmul.mubr.msk.bf16.gmra.mrb[52].mxu0 %vm194_vm2, %v1559_v9 }
 0x8eb   :  { %v1548_v48 = vrot.slane %v1541_v33, 7  ;;  %4543 = vmatprep.mubr.msk.bf16.mxu0 %vm5069_vm5, %v5068_v0  ;;  %v4034_v33 = vld [vmem:[%s6239_s15] ss:$0 sm:$0xff] }
 0x8ed   :  { %v1549_v47 = vsel %vm167_vm1, %v1546_v4, %v1548_v48 }
 0x8ee   :  { %v1560_v11 = vpack.c.bf16 %v1549_v47, %v1549_v47 }
 0x8f2   :  { %4544 = vmatmul.mubr.msk.bf16.gmra.mrb[56].mxu0 %vm194_vm2, %v1560_v11 }
 0x8f3   :  { %4579 = vmatprep.mubr.msk.bf16.mxu0 %vm5069_vm5, %v5068_v0 }
 0x904   :  { %v1659_v58 = vpop.xlane.xlu0 %1658 }
 0x905   :  { %v1672_v12 = vmul.f32 0.03125, %v1659_v58 }
 0x907   :  { %v5588_v13 = vsub.f32 %v5560_v54, %v1672_v12  ;;  %v4870_v12 = vld [vmem:[%s6240_s18] sm:$0xff]  }
 0x908   :  { %4564 = vmatpush3.bf16.msra.mxu0 %v4870_v12 }
 0x909   :  { %v1682_v46 = vmul.f32 %v5588_v13, %v5588_v13  ;;  %4565 = vmatprep.subr.bf16.mxu0 %v5068_v0 }
 0x90b   :  { %v1687_v22 = vsel %vm194_vm2, %v1682_v46, 0.0  ;;  %v4872_v46 = vld [vmem:[%s6240_s18 + $0x10] sm:$0xff]  }
 0x90c   :  { %1688 = vadd.xlane.f32.xlu1 %v1687_v22  ;;  %v4873_v22 = vld [vmem:[%s6240_s18 + $0x18] sm:$0xff]  }
 0x928   :  { %v1662_v16 = vpop.xlane.xlu1 %1661 }
 0x929   :  { %v1673_v21 = vmul.f32 0.03125, %v1662_v16  ;;  %v4877_v16 = vld [vmem:[%s6240_s18 + $0x38] sm:$0xff]  }
 0x92b   :  { %v1678_v25 = vsub.f32 %v5566_v57, %v1673_v21 }
 0x92d   :  { %v1683_v6 = vmul.f32 %v1678_v25, %v1678_v25 }
 0x92f   :  { %v1690_v36 = vsel %vm194_vm2, %v1683_v6, 0.0 }
 0x999   :  { %v1689_v14 = vpop.xlane.xlu1 %1688 }
 0x99a   :  { %v1702_v39 = vmul.f32 0.03125, %v1689_v14 }
 0x99c   :  { %v1707_v51 = vadd.f32 1e-06, %v1702_v39 }
 0x99e   :  { %4960 = vrsqrt.f32 %v1707_v51 }
 0x9a8   :  { %v4961_v2 = vpop.eup %4960 }
 0x9a9   :  { %v1717_v31 = vmul.f32 %v4961_v2, %v5588_v13  ;;  %v4871_v13 = vld [vmem:[%s6240_s18 + $0x8] sm:$0xff]  }
 0x9aa   :  { %4566 = vmatpush3.bf16.msra.mxu0 %v4871_v13 }
 0x9ab   :  { %v1728_v9 = vmul.f32 %v4033_v5, %v1717_v31  ;;  %4567 = vmatprep.subr.bf16.mxu0 %v5068_v0 }
 0x9ad   :  { %v1739_v47 = vadd.f32 %v4034_v33, %v1728_v9 }
 0x9ae   :  { %4568 = vmatpush3.bf16.msra.mxu0 %v4872_v46 }
 0x9af   :  { %4569 = vmatprep.subr.bf16.mxu0 %v5068_v0 }
 0x9b2   :  { %4570 = vmatpush3.bf16.msra.mxu0 %v4873_v22 }
 0x9b3   :  { %4571 = vmatprep.subr.bf16.mxu0 %v5068_v0 }
 0x9bd   :  { %v1624_v45 = vpop.f32.mrb[52].mxu0 }
 0x9be   :  { %v1640_v63 = vadd.f32 %v1624_v45, %v5228_v32  ;;  %v4541_v15 = vpop.f32.mrb[53].mxu0  ;;  %v4874_v45 = vld [vmem:[%s6240_s18 + $0x20] sm:$0xff]  }
 0x9bf   :  { %v1627_v17 = vpop.f32.mrb[54].mxu0  ;;  %4572 = vmatpush3.bf16.msra.mxu0 %v4874_v45  ;;  %v4876_v15 = vld [vmem:[%s6240_s18 + $0x30] sm:$0xff]  }
 0x9c0   :  { %v5594_v1 = vadd.f32 %v4032_v43, %v1640_v63  ;;  %v1641_v18 = vadd.f32 %v1627_v17, %v5235_v35  ;;  %v4542_v19 = vpop.f32.mrb[55].mxu0  ;;  %v4875_v63 = vld [vmem:[%s6240_s18 + $0x28] sm:$0xff]   ;;  %4573 = vmatprep.subr.bf16.mxu0 %v5068_v0 }
 0x9c2   :  { %v5597_v49 = vadd.f32 %v4032_v43, %v1641_v18  ;;  %v1663_v23 = vsel %vm194_vm2, %v5594_v1, 0.0 }
 0x9c3   :  { %1664 = vadd.xlane.f32.xlu0 %v1663_v23  ;;  %4574 = vmatpush3.bf16.msra.mxu0 %v4875_v63 }
 0x9c4   :  { %v1666_v44 = vsel %vm194_vm2, %v5597_v49, 0.0  ;;  %4575 = vmatprep.subr.bf16.mxu0 %v5068_v0 }
 0x9c5   :  { %v1632_v24 = vpop.f32.mrb[56].mxu0 }
 0x9c6   :  { %v1642_v32 = vadd.f32 %v1632_v24, %v5220_v28  ;;  %v4545_v27 = vpop.f32.mrb[57].mxu0  ;;  %v4868_v28 = vld [vmem:[%s6237_s16] sm:$0xff]  }
 0x9c7   :  { %1667 = vadd.xlane.f32.xlu0 %v1666_v44  ;;  %v1635_v29 = vpop.f32.mrb[58].mxu0  ;;  %4548 = vmatpush3.bf16.msra.mxu1 %v4868_v28 }
 0x9c8   :  { %v5605_v35 = vadd.f32 %v4032_v43, %v1642_v32  ;;  %v4546_v30 = vpop.f32.mrb[59].mxu0  ;;  %4549 = vmatprep.subr.bf16.mxu1 %v5068_v0  ;;  %4576 = vmatpush3.bf16.msra.mxu0 %v4876_v15 }
 0x9c9   :  { %4577 = vmatprep.subr.bf16.mxu0 %v5068_v0 }
 0x9ca   :  { %v1669_v34 = vsel %vm207_vm4, %v5605_v35, 0.0 }
 0x9cb   :  { %1670 = vadd.xlane.f32.xlu0 %v1669_v34  ;;  %4550 = vmatpush3.bf16.msra.mxu1 %v4869_v37 }
 0x9cc   :  { %4591 = vmatprep.subr.bf16.mxu1 %v5068_v0  ;;  %4578 = vmatpush3.bf16.msra.mxu0 %v4877_v16 }
 0x9cd   :  { %4623 = vmatprep.subr.bf16.mxu0 %v5068_v0 }
 0x9cf   :  { %1691 = vadd.xlane.f32.xlu0 %v1690_v36 }
 0xa50   :  { %v1665_v38 = vpop.xlane.xlu0 %1664 }
 0xa51   :  { %v1674_v40 = vmul.f32 0.03125, %v1665_v38 }
 0xa53   :  { %v5619_v41 = vsub.f32 %v5594_v1, %v1674_v40 }
 0xa54   :  { %v1668_v42 = vpop.xlane.xlu0 %1667 }
 0xa55   :  { %v1675_v43 = vmul.f32 0.03125, %v1668_v42  ;;  %v1684_v50 = vmul.f32 %v5619_v41, %v5619_v41 }
 0xa57   :  { %v5624_v52 = vsub.f32 %v5597_v49, %v1675_v43  ;;  %v1693_v55 = vsel %vm194_vm2, %v1684_v50, 0.0 }
 0xa58   :  { %1694 = vadd.xlane.f32.xlu1 %v1693_v55  ;;  %v1671_v56 = vpop.xlane.xlu0 %1670 }
 0xa59   :  { %v1676_v53 = vmul.f32 0.03125, %v1671_v56  ;;  %v1685_v26 = vmul.f32 %v5624_v52, %v5624_v52 }
 0xa5b   :  { %v5630_v59 = vsub.f32 %v5605_v35, %v1676_v53  ;;  %v1696_v7 = vsel %vm194_vm2, %v1685_v26, 0.0 }
 0xa5c   :  { %1697 = vadd.xlane.f32.xlu0 %v1696_v7  ;;  %v1692_v60 = vpop.xlane.xlu0 %1691 }
 0xa5d   :  { %v1703_v62 = vmul.f32 0.03125, %v1692_v60  ;;  %v1686_v3 = vmul.f32 %v5630_v59, %v5630_v59 }
 0xa5f   :  { %v1708_v4 = vadd.f32 1e-06, %v1703_v62  ;;  %v1699_v61 = vsel %vm207_vm4, %v1686_v3, 0.0 }
 0xa60   :  { %1700 = vadd.xlane.f32.xlu1 %v1699_v61 }
 0xa61   :  { %4962 = vrsqrt.f32 %v1708_v4 }
 0xa6b   :  { %v4963_v8 = vpop.eup %4962 }
 0xa6c   :  { %v1718_v10 = vmul.f32 %v4963_v8, %v1678_v25 }
 0xa6e   :  { %v1729_v48 = vmul.f32 %v4033_v5, %v1718_v10 }
 0xa70   :  { %v1740_v11 = vadd.f32 %v4034_v33, %v1729_v48 }
 0xa72   :  { %v1748_v58 = vpack.c.bf16 %v1740_v11, %v1739_v47 }
 0xa74   :  { %4552 = vmatmul.mubr.msk.bf16.vlgmr.msra.gmra.mrb[60].mxu1 %vm194_vm2, %v1748_v58 }
 0xa75   :  { %4555 = vmatprep.mubr.msk.bf16.mxu1 %vm5069_vm5, %v5068_v0 }
 0xae5   :  { %v1695_v17 = vpop.xlane.xlu1 %1694 }
 0xae6   :  { %v1704_v18 = vmul.f32 0.03125, %v1695_v17 }
 0xae8   :  { %v1709_v19 = vadd.f32 1e-06, %v1704_v18 }
 0xae9   :  { %v1698_v21 = vpop.xlane.xlu0 %1697 }
 0xaea   :  { %4964 = vrsqrt.f32 %v1709_v19  ;;  %v1705_v23 = vmul.f32 0.03125, %v1698_v21 }
 0xaec   :  { %v1710_v24 = vadd.f32 1e-06, %v1705_v23 }
 0xaed   :  { %v1701_v25 = vpop.xlane.xlu1 %1700 }
 0xaee   :  { %4966 = vrsqrt.f32 %v1710_v24  ;;  %v1706_v32 = vmul.f32 0.03125, %v1701_v25 }
 0xaf0   :  { %v1711_v27 = vadd.f32 1e-06, %v1706_v32 }
 0xaf2   :  { %4968 = vrsqrt.f32 %v1711_v27 }
 0xaf4   :  { %v4965_v44 = vpop.eup %4964 }
 0xaf5   :  { %v1719_v29 = vmul.f32 %v4965_v44, %v5619_v41  ;;  %v4035_v41 = vld [vmem:[%s6241_s17] ss:$0 sm:$0xff] }
 0xaf7   :  { %v1730_v6 = vmul.f32 %v4033_v5, %v1719_v29 }
 0xaf8   :  { %v4967_v30 = vpop.eup %4966 }
 0xaf9   :  { %v1720_v34 = vmul.f32 %v4967_v30, %v5624_v52  ;;  %v1741_v37 = vadd.f32 %v4034_v33, %v1730_v6 }
 0xafb   :  { %v1731_v36 = vmul.f32 %v4033_v5, %v1720_v34 }
 0xafc   :  { %v4969_v28 = vpop.eup %4968 }
 0xafd   :  { %v1742_v14 = vadd.f32 %v4034_v33, %v1731_v36  ;;  %v1721_v38 = vmul.f32 %v4969_v28, %v5630_v59 }
 0xaff   :  { %v1749_v40 = vpack.c.bf16 %v1742_v14, %v1741_v37  ;;  %v1732_v39 = vmul.f32 %v4033_v5, %v1721_v38 }
 0xb01   :  { %4556 = vmatmul.mubr.msk.bf16.gmra.mrb[64].mxu1 %vm194_vm2, %v1749_v40  ;;  %v1743_v42 = vadd.f32 %v4034_v33, %v1732_v39 }
 0xb02   :  { %4559 = vmatprep.mubr.msk.bf16.mxu1 %vm5069_vm5, %v5068_v0 }
 0xb03   :  { %v1750_v43 = vpack.c.bf16 %v1743_v42, %v1743_v42 }
 0xb09   :  { %4560 = vmatmul.mubr.msk.bf16.gmra.mrb[68].mxu1 %vm194_vm2, %v1750_v43 }
 0xb0a   :  { %4595 = vmatprep.mubr.msk.bf16.mxu1 %vm5069_vm5, %v5068_v0 }
 0xb47   :  { %v1813_v50 = vpop.f32.mrb[60].mxu1 }
 0xb48   :  { %v1814_v51 = vadd.f32 %v4035_v41, %v1813_v50  ;;  %v4553_v52 = vpop.f32.mrb[61].mxu1 }
 0xb49   :  { %v1816_v55 = vpop.f32.mrb[62].mxu1 }
 0xb4a   :  { %v1840_v56 = vmul.f32 0.044715, %v1814_v51  ;;  %v1817_v53 = vadd.f32 %v4035_v41, %v1816_v55  ;;  %v4554_v26 = vpop.f32.mrb[63].mxu1  ;;  %v1835_v10 = vmul.f32 0.5, %v1814_v51 }
 0xb4c   :  { %v1845_v59 = vmul.f32 %v1840_v56, %v1814_v51  ;;  %v1841_v7 = vmul.f32 0.044715, %v1817_v53  ;;  %v1836_v33 = vmul.f32 0.5, %v1817_v53 }
 0xb4e   :  { %v1850_v60 = vmul.f32 %v1845_v59, %v1814_v51  ;;  %v1846_v62 = vmul.f32 %v1841_v7, %v1817_v53 }
 0xb50   :  { %v1855_v3 = vadd.f32 %v1850_v60, %v1814_v51  ;;  %v1851_v4 = vmul.f32 %v1846_v62, %v1817_v53  ;;  %v4049_v60 = vld [vmem:[%s6242_s19] ss:$0 sm:$0xff] }
 0xb52   :  { %v1860_v61 = vmul.f32 0.7978846, %v1855_v3  ;;  %v1856_v2 = vadd.f32 %v1851_v4, %v1817_v53 }
 0xb54   :  { %4970 = vtanh.f32 %v1860_v61  ;;  %v1861_v31 = vmul.f32 0.7978846, %v1856_v2 }
 0xb56   :  { %4972 = vtanh.f32 %v1861_v31 }
 0xb5e   :  { %v4971_v5 = vpop.eup %4970 }
 0xb5f   :  { %v1870_v8 = vadd.f32 1.0, %v4971_v5 }
 0xb60   :  { %v4973_v9 = vpop.eup %4972 }
 0xb61   :  { %v1871_v48 = vadd.f32 1.0, %v4973_v9  ;;  %v1875_v47 = vmul.f32 %v1870_v8, %v1835_v10 }
 0xb63   :  { %v1876_v11 = vmul.f32 %v1871_v48, %v1836_v33 }
 0xb65   :  { %v1896_v58 = vpack.c.bf16 %v1876_v11, %v1875_v47 }
 0xb67   :  { %4580 = vmatmul.mubr.bf16.vlgmr.msra.gmra.mrb[60].mxu0 %v1896_v58 }
 0xb68   :  { %4583 = vmatprep.mubr.msk.bf16.mxu0 %vm5069_vm5, %v5068_v0 }
 0xbd4   :  { %v1821_v12 = vpop.f32.mrb[64].mxu1 }
 0xbd5   :  { %v1822_v13 = vadd.f32 %v4035_v41, %v1821_v12  ;;  %v4557_v46 = vpop.f32.mrb[65].mxu1 }
 0xbd6   :  { %v1824_v22 = vpop.f32.mrb[66].mxu1 }
 0xbd7   :  { %v1842_v45 = vmul.f32 0.044715, %v1822_v13  ;;  %v1825_v63 = vadd.f32 %v4035_v41, %v1824_v22  ;;  %v4558_v15 = vpop.f32.mrb[67].mxu1  ;;  %v1837_v42 = vmul.f32 0.5, %v1822_v13 }
 0xbd9   :  { %v1847_v16 = vmul.f32 %v1842_v45, %v1822_v13  ;;  %v1843_v17 = vmul.f32 0.044715, %v1825_v63  ;;  %v1838_v43 = vmul.f32 0.5, %v1825_v63 }
 0xbdb   :  { %v1852_v18 = vmul.f32 %v1847_v16, %v1822_v13  ;;  %v1848_v19 = vmul.f32 %v1843_v17, %v1825_v63 }
 0xbdc   :  { %v1829_v21 = vpop.f32.mrb[68].mxu1 }
 0xbdd   :  { %v1853_v23 = vmul.f32 %v1848_v19, %v1825_v63  ;;  %v1830_v24 = vadd.f32 %v4035_v41, %v1829_v21  ;;  %v4561_v25 = vpop.f32.mrb[69].mxu1  ;;  %v1857_v32 = vadd.f32 %v1852_v18, %v1822_v13 }
 0xbde   :  { %v1832_v27 = vpop.f32.mrb[70].mxu1 }
 0xbdf   :  { %v1844_v44 = vmul.f32 0.044715, %v1830_v24  ;;  %v4562_v29 = vpop.f32.mrb[71].mxu1  ;;  %v1858_v30 = vadd.f32 %v1853_v23, %v1825_v63  ;;  %v1862_v34 = vmul.f32 0.7978846, %v1857_v32  ;;  %v1839_v56 = vmul.f32 0.5, %v1830_v24 }
 0xbe0   :  { %v4880_v29 = vld [vmem:[%s6263_s25 + $0x28] sm:$0xff]  }
 0xbe1   :  { %v1849_v6 = vmul.f32 %v1844_v44, %v1830_v24  ;;  %v1863_v36 = vmul.f32 0.7978846, %v1858_v30  ;;  %4974 = vtanh.f32 %v1862_v34  ;;  %v4879_v44 = vld [vmem:[%s6265_s10 + $0x20] sm:$0xff]   ;;  %v4881_v30 = vld [vmem:[%s6265_s10 + $0x28] sm:$0xff]  }
 0xbe2   :  { %4624 = vmatpush3.bf16.msra.mxu0 %v4879_v44 }
 0xbe3   :  { %4976 = vtanh.f32 %v1863_v36  ;;  %v1854_v28 = vmul.f32 %v1849_v6, %v1830_v24  ;;  %4625 = vmatprep.subr.bf16.mxu0 %v5068_v0 }
 0xbe5   :  { %v1859_v37 = vadd.f32 %v1854_v28, %v1830_v24 }
 0xbe6   :  { %4626 = vmatpush3.bf16.msra.mxu0 %v4881_v30 }
 0xbe7   :  { %v1864_v14 = vmul.f32 0.7978846, %v1859_v37  ;;  %4655 = vmatprep.subr.bf16.mxu0 %v5068_v0 }
 0xbe9   :  { %4978 = vtanh.f32 %v1864_v14 }
 0xbeb   :  { %v4975_v38 = vpop.eup %4974 }
 0xbec   :  { %v1872_v40 = vadd.f32 1.0, %v4975_v38 }
 0xbed   :  { %v4977_v39 = vpop.eup %4976 }
 0xbee   :  { %v1873_v41 = vadd.f32 1.0, %v4977_v39  ;;  %v1877_v50 = vmul.f32 %v1872_v40, %v1837_v42 }
 0xbf0   :  { %v1878_v51 = vmul.f32 %v1873_v41, %v1838_v43 }
 0xbf2   :  { %v1897_v52 = vpack.c.bf16 %v1878_v51, %v1877_v50 }
 0xbf3   :  { %v4979_v55 = vpop.eup %4978 }
 0xbf4   :  { %4584 = vmatmul.mubr.bf16.gmra.mrb[64].mxu0 %v1897_v52  ;;  %v1874_v53 = vadd.f32 1.0, %v4979_v55 }
 0xbf5   :  { %4587 = vmatprep.mubr.msk.bf16.mxu0 %vm5069_vm5, %v5068_v0 }
 0xbf6   :  { %v1879_v26 = vmul.f32 %v1874_v53, %v1839_v56 }
 0xbf8   :  { %v1898_v59 = vpack.c.bf16 %v1879_v26, %v1879_v26 }
 0xbfc   :  { %4588 = vmatmul.mubr.bf16.gmra.mrb[68].mxu0 %v1898_v59 }
 0xbfd   :  { %4627 = vmatprep.mubr.msk.bf16.mxu0 %vm5069_vm5, %v5068_v0 }
 0xc3a   :  { %v1981_v7 = vpop.f32.mrb[60].mxu0 }
 0xc3b   :  { %v2003_v62 = vadd.f32 %v1981_v7, %v5560_v54  ;;  %v4581_v3 = vpop.f32.mrb[61].mxu0 }
 0xc3c   :  { %v1984_v4 = vpop.f32.mrb[62].mxu0  ;;  %v4052_v3 = vld [vmem:[%s6230_s4 + $0x1] ss:$0 sm:$0xff] }
 0xc3d   :  { %v5700_v61 = vadd.f32 %v4049_v60, %v2003_v62  ;;  %v2004_v2 = vadd.f32 %v1984_v4, %v5566_v57  ;;  %v4582_v31 = vpop.f32.mrb[63].mxu0 }
 0xc3f   :  { %v5703_v5 = vadd.f32 %v4049_v60, %v2004_v2  ;;  %v2024_v8 = vsel %vm194_vm2, %v5700_v61, 0.0 }
 0xc40   :  { %2025 = vadd.xlane.f32.xlu0 %v2024_v8  ;;  %v4053_v8 = vld [vmem:[%s6231_s5 + $0x1] ss:$0 sm:$0xff] }
 0xc41   :  { %v2027_v9 = vsel %vm194_vm2, %v5703_v5, 0.0 }
 0xc42   :  { %2028 = vadd.xlane.f32.xlu1 %v2027_v9 }
 0xcc7   :  { %v1989_v10 = vpop.f32.mrb[64].mxu0 }
 0xcc8   :  { %v2005_v54 = vadd.f32 %v1989_v10, %v5594_v1  ;;  %v4585_v33 = vpop.f32.mrb[65].mxu0 }
 0xcc9   :  { %v1992_v48 = vpop.f32.mrb[66].mxu0 }
 0xcca   :  { %v5710_v47 = vadd.f32 %v4049_v60, %v2005_v54  ;;  %v2006_v57 = vadd.f32 %v1992_v48, %v5597_v49  ;;  %v4586_v11 = vpop.f32.mrb[67].mxu0  ;;  %v4882_v48 = vld [vmem:[%s6264_s27 + $0x20] sm:$0xff]  }
 0xccb   :  { %v4884_v11 = vld [vmem:[%s6264_s27 + $0x28] sm:$0xff]  }
 0xccc   :  { %v5713_v58 = vadd.f32 %v4049_v60, %v2006_v57  ;;  %v2030_v12 = vsel %vm194_vm2, %v5710_v47, 0.0  ;;  %v4883_v57 = vld [vmem:[%s6264_s27 + $0x30] sm:$0xff]  }
 0xccd   :  { %v2026_v13 = vpop.xlane.xlu0 %2025  ;;  %2031 = vadd.xlane.f32.xlu0 %v2030_v12  ;;  %v4885_v12 = vld [vmem:[%s6264_s27 + $0x38] sm:$0xff]  }
 0xcce   :  { %v2039_v46 = vmul.f32 0.03125, %v2026_v13  ;;  %v2033_v22 = vsel %vm194_vm2, %v5713_v58, 0.0 }
 0xccf   :  { %v2029_v45 = vpop.xlane.xlu1 %2028  ;;  %2034 = vadd.xlane.f32.xlu1 %v2033_v22  ;;  %v1997_v1 = vpop.f32.mrb[68].mxu0 }
 0xcd0   :  { %v2044_v63 = vsub.f32 %v5700_v61, %v2039_v46  ;;  %v2040_v15 = vmul.f32 0.03125, %v2029_v45  ;;  %v2007_v49 = vadd.f32 %v1997_v1, %v5605_v35  ;;  %v4589_v16 = vpop.f32.mrb[69].mxu0  ;;  %v4878_v35 = vld [vmem:[%s6263_s25 + $0x20] sm:$0xff]  }
 0xcd1   :  { %v2000_v17 = vpop.f32.mrb[70].mxu0  ;;  %4592 = vmatpush3.bf16.msra.mxu1 %v4878_v35 }
 0xcd2   :  { %v2045_v18 = vsub.f32 %v5703_v5, %v2040_v15  ;;  %v5722_v19 = vadd.f32 %v4049_v60, %v2007_v49  ;;  %v4590_v21 = vpop.f32.mrb[71].mxu0  ;;  %v2049_v23 = vmul.f32 %v2044_v63, %v2044_v63  ;;  %4593 = vmatprep.subr.bf16.mxu1 %v5068_v0 }
 0xcd4   :  { %v2054_v24 = vsel %vm194_vm2, %v2049_v23, 0.0  ;;  %v2036_v25 = vsel %vm207_vm4, %v5722_v19, 0.0  ;;  %v2050_v32 = vmul.f32 %v2045_v18, %v2045_v18 }
 0xcd5   :  { %2055 = vadd.xlane.f32.xlu1 %v2054_v24  ;;  %2037 = vadd.xlane.f32.xlu0 %v2036_v25 }
 0xcd6   :  { %v2057_v27 = vsel %vm194_vm2, %v2050_v32, 0.0  ;;  %4594 = vmatpush3.bf16.msra.mxu1 %v4880_v29 }
 0xcd7   :  { %4607 = vmatprep.subr.bf16.mxu1 %v5068_v0 }
 0xcd9   :  { %2058 = vadd.xlane.f32.xlu0 %v2057_v27 }
 0xd5a   :  { %v2032_v34 = vpop.xlane.xlu0 %2031 }
 0xd5b   :  { %v2041_v6 = vmul.f32 0.03125, %v2032_v34 }
 0xd5c   :  { %v2035_v36 = vpop.xlane.xlu1 %2034 }
 0xd5d   :  { %v2046_v28 = vsub.f32 %v5710_v47, %v2041_v6  ;;  %v2042_v37 = vmul.f32 0.03125, %v2035_v36  ;;  %v4886_v36 = vld [vmem:[%s6263_s25 + $0x30] sm:$0xff]  }
 0xd5f   :  { %v5746_v14 = vsub.f32 %v5713_v58, %v2042_v37  ;;  %v2051_v38 = vmul.f32 %v2046_v28, %v2046_v28  ;;  %v4888_v37 = vld [vmem:[%s6265_s10 + $0x30] sm:$0xff]  }
 0xd61   :  { %v2060_v40 = vsel %vm194_vm2, %v2051_v38, 0.0  ;;  %v2052_v39 = vmul.f32 %v5746_v14, %v5746_v14  ;;  %v4059_v38 = vld [vmem:[%s6232_s7 + $0x2] ss:$0 sm:$0xff] }
 0xd62   :  { %2061 = vadd.xlane.f32.xlu1 %v2060_v40  ;;  %v2056_v42 = vpop.xlane.xlu1 %2055  ;;  %v2038_v43 = vpop.xlane.xlu0 %2037 }
 0xd63   :  { %v2069_v41 = vmul.f32 0.03125, %v2056_v42  ;;  %v2043_v50 = vmul.f32 0.03125, %v2038_v43  ;;  %v2063_v51 = vsel %vm194_vm2, %v2052_v39, 0.0  ;;  %v4081_v39 = vld [vmem:[%s6234_s11 + $0x2] ss:$0 sm:$0xff] }
 0xd64   :  { %2064 = vadd.xlane.f32.xlu0 %v2063_v51 }
 0xd65   :  { %v2074_v52 = vadd.f32 1e-06, %v2069_v41  ;;  %v2048_v55 = vsub.f32 %v5722_v19, %v2043_v50 }
 0xd66   :  { %v2059_v56 = vpop.xlane.xlu0 %2058 }
 0xd67   :  { %4980 = vrsqrt.f32 %v2074_v52  ;;  %v2070_v53 = vmul.f32 0.03125, %v2059_v56  ;;  %v2053_v26 = vmul.f32 %v2048_v55, %v2048_v55 }
 0xd69   :  { %v2075_v59 = vadd.f32 1e-06, %v2070_v53  ;;  %v2066_v7 = vsel %vm207_vm4, %v2053_v26, 0.0 }
 0xd6a   :  { %2067 = vadd.xlane.f32.xlu1 %v2066_v7 }
 0xd6b   :  { %4982 = vrsqrt.f32 %v2075_v59 }
 0xd71   :  { %v4981_v60 = vpop.eup %4980 }
 0xd72   :  { %v2084_v62 = vmul.f32 %v4981_v60, %v2044_v63 }
 0xd74   :  { %v2095_v2 = vmul.f32 %v4052_v3, %v2084_v62 }
 0xd75   :  { %v4983_v4 = vpop.eup %4982 }
 0xd76   :  { %v2085_v31 = vmul.f32 %v4983_v4, %v2045_v18  ;;  %v2106_v10 = vadd.f32 %v4053_v8, %v2095_v2 }
 0xd78   :  { %v2096_v9 = vmul.f32 %v4052_v3, %v2085_v31 }
 0xd7a   :  { %v2107_v54 = vadd.f32 %v4053_v8, %v2096_v9 }
 0xd7c   :  { %v5760_v33 = vpack.c.bf16 %v2107_v54, %v2106_v10 }
 0xd7e   :  { %4596 = vmatmul.mubr.msk.bf16.vlgmr.msra.gmra.mrb[72].mxu1 %vm194_vm2, %v5760_v33  ;;  %4628 = vmatmul.mubr.msk.bf16.vlgmr.msra.gmra.mrb[72].mxu0 %vm194_vm2, %v5760_v33 }
 0xd7f   :  { %4599 = vmatprep.mubr.msk.bf16.mxu1 %vm5069_vm5, %v5068_v0  ;;  %4631 = vmatprep.mubr.msk.bf16.mxu0 %vm5069_vm5, %v5068_v0 }
 0xd80   :  { %4608 = vmatpush3.bf16.msra.mxu1 %v4882_v48  ;;  %4656 = vmatpush3.bf16.msra.mxu0 %v4883_v57 }
 0xd81   :  { %4609 = vmatprep.subr.bf16.mxu1 %v5068_v0  ;;  %4657 = vmatprep.subr.bf16.mxu0 %v5068_v0 }
 0xd84   :  { %4610 = vmatpush3.bf16.msra.mxu1 %v4884_v11  ;;  %4658 = vmatpush3.bf16.msra.mxu0 %v4885_v12 }
 0xd85   :  { %4639 = vmatprep.subr.bf16.mxu1 %v5068_v0 }
 0xdef   :  { %v2062_v13 = vpop.xlane.xlu1 %2061 }
 0xdf0   :  { %v2071_v46 = vmul.f32 0.03125, %v2062_v13 }
 0xdf1   :  { %v2065_v22 = vpop.xlane.xlu0 %2064 }
 0xdf2   :  { %v2076_v45 = vadd.f32 1e-06, %v2071_v46  ;;  %v2072_v1 = vmul.f32 0.03125, %v2065_v22 }
 0xdf4   :  { %4984 = vrsqrt.f32 %v2076_v45  ;;  %v2077_v63 = vadd.f32 1e-06, %v2072_v1 }
 0xdf6   :  { %4986 = vrsqrt.f32 %v2077_v63 }
 0xdf7   :  { %v2068_v15 = vpop.xlane.xlu1 %2067 }
 0xdf8   :  { %v2073_v49 = vmul.f32 0.03125, %v2068_v15 }
 0xdfa   :  { %v2078_v16 = vadd.f32 1e-06, %v2073_v49 }
 0xdfc   :  { %4988 = vrsqrt.f32 %v2078_v16 }
 0xdfe   :  { %v4985_v17 = vpop.eup %4984 }
 0xdff   :  { %v2086_v18 = vmul.f32 %v4985_v17, %v2046_v28  ;;  %v4887_v28 = vld [vmem:[%s6263_s25 + $0x38] sm:$0xff]  }
 0xe00   :  { %v4987_v21 = vpop.eup %4986 }
 0xe01   :  { %v2097_v23 = vmul.f32 %v4052_v3, %v2086_v18  ;;  %v2087_v24 = vmul.f32 %v4987_v21, %v5746_v14  ;;  %v4889_v14 = vld [vmem:[%s6265_s10 + $0x38] sm:$0xff]  }
 0xe03   :  { %v2098_v25 = vmul.f32 %v4052_v3, %v2087_v24  ;;  %v2108_v32 = vadd.f32 %v4053_v8, %v2097_v23 }
 0xe05   :  { %v2109_v27 = vadd.f32 %v4053_v8, %v2098_v25 }
 0xe06   :  { %v4989_v35 = vpop.eup %4988 }
 0xe07   :  { %v2088_v44 = vmul.f32 %v4989_v35, %v2048_v55  ;;  %v2117_v29 = vpack.c.bf16 %v2109_v27, %v2108_v32 }
 0xe09   :  { %v2099_v30 = vmul.f32 %v4052_v3, %v2088_v44  ;;  %4600 = vmatmul.mubr.msk.bf16.gmra.mrb[76].mxu1 %vm194_vm2, %v2117_v29  ;;  %4632 = vmatmul.mubr.msk.bf16.gmra.mrb[76].mxu0 %vm194_vm2, %v2117_v29 }
 0xe0a   :  { %4603 = vmatprep.mubr.msk.bf16.mxu1 %vm5069_vm5, %v5068_v0  ;;  %4635 = vmatprep.mubr.msk.bf16.mxu0 %vm5069_vm5, %v5068_v0 }
 0xe0b   :  { %v2110_v34 = vadd.f32 %v4053_v8, %v2099_v30 }
 0xe0d   :  { %v2118_v6 = vpack.c.bf16 %v2110_v34, %v2110_v34 }
 0xe11   :  { %4604 = vmatmul.mubr.msk.bf16.gmra.mrb[80].mxu1 %vm194_vm2, %v2118_v6  ;;  %4636 = vmatmul.mubr.msk.bf16.gmra.mrb[80].mxu0 %vm194_vm2, %v2118_v6 }
 0xe12   :  { %4611 = vmatprep.mubr.msk.bf16.mxu1 %vm5069_vm5, %v5068_v0  ;;  %4659 = vmatprep.mubr.msk.bf16.mxu0 %vm5069_vm5, %v5068_v0 }
 0xe19   :  { %4612 = vmatmul.mubr.msk.bf16.vlgmr.msra.gmra.mrb[84].mxu1 %vm194_vm2, %v5760_v33  ;;  %4660 = vmatmul.mubr.msk.bf16.vlgmr.msra.gmra.mrb[84].mxu0 %vm194_vm2, %v5760_v33 }
 0xe1a   :  { %4615 = vmatprep.mubr.msk.bf16.mxu1 %vm5069_vm5, %v5068_v0  ;;  %4663 = vmatprep.mubr.msk.bf16.mxu0 %vm5069_vm5, %v5068_v0 }
 0xe1b   :  { %4640 = vmatpush3.bf16.msra.mxu1 %v4886_v36 }
 0xe1c   :  { %4641 = vmatprep.subr.bf16.mxu1 %v5068_v0 }
 0xe1f   :  { %4642 = vmatpush3.bf16.msra.mxu1 %v4887_v28  ;;  %v4070_v28 = vld [vmem:[%s6233_s9 + $0x2] ss:$0 sm:$0xff] }
 0xe20   :  { %4671 = vmatprep.subr.bf16.mxu1 %v5068_v0 }
 0xe21   :  { %4616 = vmatmul.mubr.msk.bf16.gmra.mrb[88].mxu1 %vm194_vm2, %v2117_v29  ;;  %4664 = vmatmul.mubr.msk.bf16.gmra.mrb[88].mxu0 %vm194_vm2, %v2117_v29 }
 0xe22   :  { %4619 = vmatprep.mubr.msk.bf16.mxu1 %vm5069_vm5, %v5068_v0  ;;  %4667 = vmatprep.mubr.msk.bf16.mxu0 %vm5069_vm5, %v5068_v0 }
 0xe29   :  { %4620 = vmatmul.mubr.msk.bf16.gmra.mrb[92].mxu1 %vm194_vm2, %v2118_v6  ;;  %4668 = vmatmul.mubr.msk.bf16.gmra.mrb[92].mxu0 %vm194_vm2, %v2118_v6 }
 0xe2a   :  { %4643 = vmatprep.mubr.msk.bf16.mxu1 %vm5069_vm5, %v5068_v0 }
 0xe31   :  { %4644 = vmatmul.mubr.msk.bf16.vlgmr.msra.gmra.mrb[96].mxu1 %vm194_vm2, %v5760_v33 }
 0xe32   :  { %4647 = vmatprep.mubr.msk.bf16.mxu1 %vm5069_vm5, %v5068_v0  ;;  %4672 = vmatpush3.bf16.msra.mxu1 %v4888_v37 }
 0xe33   :  { %4673 = vmatprep.subr.bf16.mxu1 %v5068_v0 }
 0xe36   :  { %4674 = vmatpush3.bf16.msra.mxu1 %v4889_v14  ;;  %v4103_v14 = vld [vmem:[%s6233_s9 + $0x3] ss:$0 sm:$0xff] }
 0xe39   :  { %4648 = vmatmul.mubr.msk.bf16.gmra.mrb[100].mxu1 %vm194_vm2, %v2117_v29 }
 0xe3a   :  { %4651 = vmatprep.mubr.msk.bf16.mxu1 %vm5069_vm5, %v5068_v0 }
 0xe41   :  { %4652 = vmatmul.mubr.msk.bf16.gmra.mrb[104].mxu1 %vm194_vm2, %v2118_v6 }
 0xe42   :  { %4675 = vmatprep.mubr.msk.bf16.mxu1 %vm5069_vm5, %v5068_v0 }
 0xe49   :  { %4676 = vmatmul.mubr.msk.bf16.vlgmr.msra.gmra.mrb[108].mxu1 %vm194_vm2, %v5760_v33 }
 0xe4a   :  { %4679 = vmatprep.mubr.msk.bf16.mxu1 %vm5069_vm5, %v5068_v0 }
 0xe51   :  { %v2182_v40 = vpop.f32.mrb[72].mxu1  ;;  %v2344_v42 = vpop.f32.mrb[72].mxu0  ;;  %4680 = vmatmul.mubr.msk.bf16.gmra.mrb[112].mxu1 %vm194_vm2, %v2117_v29 }
 0xe52   :  { %v4597_v43 = vpop.f32.mrb[73].mxu1  ;;  %v4629_v41 = vpop.f32.mrb[73].mxu0  ;;  %4683 = vmatprep.mubr.msk.bf16.mxu1 %vm5069_vm5, %v5068_v0  ;;  %v2183_v52 = vadd.f32 %v4059_v38, %v2182_v40  ;;  %v2345_v55 = vadd.f32 %v4081_v39, %v2344_v42 }
 0xe53   :  { %v2185_v50 = vpop.f32.mrb[74].mxu1  ;;  %v2347_v51 = vpop.f32.mrb[74].mxu0 }
 0xe54   :  { %v2186_v56 = vadd.f32 %v4059_v38, %v2185_v50  ;;  %v2348_v53 = vadd.f32 %v4081_v39, %v2347_v51  ;;  %v4598_v26 = vpop.f32.mrb[75].mxu1  ;;  %v4630_v59 = vpop.f32.mrb[75].mxu0 }
 0xe56   :  { %v2609_v7 = vpack.c.bf16 %v2186_v56, %v2183_v52  ;;  %v5854_v60 = vpack.c.bf16 %v2348_v53, %v2345_v55 }
 0xe58   :  { %4691 = vmatprep.mubr.msk.bf16.mxu0 %vm780_vm6, %v2609_v7 }
 0xe59   :  { %4684 = vmatmul.mubr.msk.bf16.gmra.mrb[116].mxu1 %vm194_vm2, %v2118_v6 }
 0xedc   :  { %v2190_v62 = vpop.f32.mrb[76].mxu1  ;;  %v2352_v3 = vpop.f32.mrb[76].mxu0 }
 0xedd   :  { %v4601_v4 = vpop.f32.mrb[77].mxu1  ;;  %v4633_v2 = vpop.f32.mrb[77].mxu0  ;;  %v5858_v9 = vadd.f32 %v4059_v38, %v2190_v62  ;;  %v5860_v10 = vadd.f32 %v4081_v39, %v2352_v3 }
 0xede   :  { %v2193_v31 = vpop.f32.mrb[78].mxu1  ;;  %v2355_v8 = vpop.f32.mrb[78].mxu0 }
 0xedf   :  { %v2194_v54 = vadd.f32 %v4059_v38, %v2193_v31  ;;  %v2356_v33 = vadd.f32 %v4081_v39, %v2355_v8  ;;  %v4602_v48 = vpop.f32.mrb[79].mxu1  ;;  %v4634_v57 = vpop.f32.mrb[79].mxu0 }
 0xee1   :  { %v2946_v11 = vpack.c.bf16 %v2194_v54, %v5858_v9  ;;  %v3076_v12 = vpack.c.bf16 %v2356_v33, %v5860_v10 }
 0xee3   :  { %v2953_v13 = vshll.u32 %v2946_v11, 16  ;;  %v3081_v46 = vshll.u32 %v3076_v12, 16  ;;  %v2951_v27 = vshrl.u32 %v2946_v11, 16  ;;  %v3079_v35 = vshrl.u32 %v3076_v12, 16 }
 0xee4   :  { %v2198_v22 = vpop.f32.mrb[80].mxu1  ;;  %v2360_v45 = vpop.f32.mrb[80].mxu0 }
 0xee5   :  { %v2199_v1 = vadd.f32 %v4059_v38, %v2198_v22  ;;  %v2361_v63 = vadd.f32 %v4081_v39, %v2360_v45  ;;  %v4605_v15 = vpop.f32.mrb[81].mxu1  ;;  %v4637_v49 = vpop.f32.mrb[81].mxu0  ;;  %v2955_v18 = vrot.slane %v2953_v13, 1  ;;  %v3083_v21 = vrot.slane %v3081_v46, 1 }
 0xee6   :  { %v2201_v16 = vpop.f32.mrb[82].mxu1  ;;  %v2363_v17 = vpop.f32.mrb[82].mxu0 }
 0xee7   :  { %v5864_v23 = vpack.c.bf16 %v2199_v1, %v2199_v1  ;;  %v5866_v24 = vpack.c.bf16 %v2361_v63, %v2361_v63  ;;  %v4606_v25 = vpop.f32.mrb[83].mxu1  ;;  %v4638_v32 = vpop.f32.mrb[83].mxu0  ;;  %v2956_v30 = vor.u32 %v2955_v18, %v2951_v27  ;;  %v3084_v36 = vor.u32 %v3083_v21, %v3079_v35 }
 0xee9   :  { %v2958_v44 = vshll.u32 %v5864_v23, 16  ;;  %v3086_v29 = vshll.u32 %v5866_v24, 16 }
 0xeeb   :  { %v2960_v34 = vrot.slane %v2958_v44, 1  ;;  %v3088_v6 = vrot.slane %v3086_v29, 1  ;;  %v2712_v44 = vpack.c.bf16 %v5860_v10, %v5860_v10 }
 0xeec   :  { %v2263_v37 = vpop.f32.mrb[84].mxu1  ;;  %v2506_v38 = vpop.f32.mrb[84].mxu0 }
 0xeed   :  { %v4613_v40 = vpop.f32.mrb[85].mxu1  ;;  %v4661_v39 = vpop.f32.mrb[85].mxu0  ;;  %v5877_v42 = vsel %vm1122_vm7, %v3084_v36, %v3088_v6  ;;  %v5880_v43 = vsel %vm1122_vm7, %v2956_v30, %v2960_v34  ;;  %v2264_v51 = vadd.f32 %v4070_v28, %v2263_v37  ;;  %v2507_v52 = vadd.f32 %v4103_v14, %v2506_v38 }
 0xeee   :  { %v2266_v41 = vpop.f32.mrb[86].mxu1  ;;  %v2509_v50 = vpop.f32.mrb[86].mxu0  ;;  %v2720_v10 = vand.u32 %v2712_v44, %v5416_v20 }
 0xeef   :  { %v2267_v55 = vadd.f32 %v4070_v28, %v2266_v41  ;;  %v2510_v56 = vadd.f32 %v4103_v14, %v2509_v50  ;;  %v4614_v53 = vpop.f32.mrb[87].mxu1  ;;  %v4662_v26 = vpop.f32.mrb[87].mxu0 }
 0xef0   :  { %v4092_v53 = vld [vmem:[%s6232_s7 + $0x3] ss:$0 sm:$0xff] }
 0xef1   :  { %v2611_v59 = vpack.c.bf16 %v2267_v55, %v2264_v51  ;;  %v2772_v7 = vpack.c.bf16 %v2510_v56, %v2507_v52 }
 0xef3   :  { %4819 = vmatprep.subr.msk.bf16.mxu0 %vm780_vm6, %v2611_v59  ;;  %4821 = vmatprep.subr.msk.bf16.mxu1 %vm780_vm6, %v2772_v7  ;;  %v2620_v62 = vsel %vm780_vm6, %v2611_v59, 0  ;;  %v2781_v3 = vsel %vm780_vm6, %v2772_v7, 0 }
 0xef4   :  { %v2271_v4 = vpop.f32.mrb[88].mxu1  ;;  %v2514_v2 = vpop.f32.mrb[88].mxu0  ;;  %4688 = vmatpush3.bf16.xpose.msra.mxu0 %v2620_v62  ;;  %4704 = vmatpush3.bf16.xpose.msra.mxu1 %v2781_v3 }
 0xef5   :  { %v2272_v31 = vadd.f32 %v4070_v28, %v2271_v4  ;;  %v2515_v8 = vadd.f32 %v4103_v14, %v2514_v2  ;;  %v4617_v54 = vpop.f32.mrb[89].mxu1  ;;  %v4665_v33 = vpop.f32.mrb[89].mxu0 }
 0xef6   :  { %v2274_v48 = vpop.f32.mrb[90].mxu1  ;;  %v2517_v57 = vpop.f32.mrb[90].mxu0  ;;  %v3090_v54 = vshrl.u32 %v5866_v24, 16 }
 0xef7   :  { %v2612_v11 = vpack.c.bf16 %v2272_v31, %v2272_v31  ;;  %v2773_v12 = vpack.c.bf16 %v2515_v8, %v2515_v8  ;;  %v2275_v13 = vadd.f32 %v4070_v28, %v2274_v48  ;;  %v2518_v46 = vadd.f32 %v4103_v14, %v2517_v57  ;;  %v4618_v22 = vpop.f32.mrb[91].mxu1  ;;  %v4666_v45 = vpop.f32.mrb[91].mxu0 }
 0xef9   :  { %v2948_v1 = vpack.c.bf16 %v2275_v13, %v2272_v31  ;;  %v3152_v63 = vpack.c.bf16 %v2518_v46, %v2515_v8  ;;  %4820 = vmatprep.subr.msk.bf16.mxu0 %vm780_vm6, %v2612_v11  ;;  %4822 = vmatprep.subr.msk.bf16.mxu1 %vm780_vm6, %v2773_v12  ;;  %v2623_v16 = vsel %vm780_vm6, %v2612_v11, 0  ;;  %v2784_v17 = vsel %vm780_vm6, %v2773_v12, 0 }
 0xefa   :  { %v3100_v46 = vand.u32 %v3090_v54, %v5416_v20 }
 0xefb   :  { %v2967_v15 = vshll.u32 %v2948_v1, 16  ;;  %v3171_v49 = vshll.u32 %v3152_v63, 16  ;;  %v2965_v40 = vshrl.u32 %v2948_v1, 16  ;;  %v3169_v39 = vshrl.u32 %v3152_v63, 16 }
 0xefc   :  { %v2279_v18 = vpop.f32.mrb[92].mxu1  ;;  %v2522_v21 = vpop.f32.mrb[92].mxu0  ;;  %4690 = vmatpush3.bf16.xpose.msra.mxu0 %v2623_v16  ;;  %4706 = vmatpush3.bf16.xpose.msra.mxu1 %v2784_v17 }
 0xefd   :  { %v2280_v25 = vadd.f32 %v4070_v28, %v2279_v18  ;;  %v2523_v32 = vadd.f32 %v4103_v14, %v2522_v21  ;;  %v4621_v27 = vpop.f32.mrb[93].mxu1  ;;  %v4669_v35 = vpop.f32.mrb[93].mxu0  ;;  %4695 = vmatprep.subr.bf16.mxu0 %v5854_v60  ;;  %4727 = vmatprep.subr.bf16.mxu1 %v5877_v42  ;;  %v2969_v34 = vrot.slane %v2967_v15, 1  ;;  %v3173_v6 = vrot.slane %v3171_v49, 1 }
 0xefe   :  { %v2282_v29 = vpop.f32.mrb[94].mxu1  ;;  %v2525_v30 = vpop.f32.mrb[94].mxu0  ;;  %v2610_v14 = vpack.c.bf16 %v5858_v9, %v5858_v9 }
 0xeff   :  { %v5894_v36 = vpack.c.bf16 %v2280_v25, %v2280_v25  ;;  %v5896_v37 = vpack.c.bf16 %v2523_v32, %v2523_v32  ;;  %v4622_v38 = vpop.f32.mrb[95].mxu1  ;;  %v4670_v28 = vpop.f32.mrb[95].mxu0  ;;  %v2970_v51 = vor.u32 %v2969_v34, %v2965_v40  ;;  %v3174_v52 = vor.u32 %v3173_v6, %v3169_v39 }
 0xf01   :  { %v2972_v41 = vshll.u32 %v5894_v36, 16  ;;  %v3176_v50 = vshll.u32 %v5896_v37, 16 }
 0xf03   :  { %v2974_v55 = vrot.slane %v2972_v41, 1  ;;  %v3178_v56 = vrot.slane %v3176_v50, 1  ;;  %4692 = vmatmul.mubr.msk.bf16.vlgmr.msra.gmra.mrb[96].mxu0 %vm780_vm6, %v2610_v14 }
 0xf04   :  { %v2425_v26 = vpop.f32.mrb[96].mxu1  ;;  %4696 = vmatpush3.bf16.msra.mxu0 %v5854_v60 }
 0xf05   :  { %v4645_v9 = vpop.f32.mrb[97].mxu1  ;;  %4697 = vmatprep.subr.bf16.mxu0 %v2720_v10  ;;  %v5909_v59 = vsel %vm1122_vm7, %v3174_v52, %v3178_v56  ;;  %v5912_v7 = vsel %vm1122_vm7, %v2970_v51, %v2974_v55  ;;  %v2426_v3 = vadd.f32 %v4092_v53, %v2425_v26 }
 0xf06   :  { %v2428_v62 = vpop.f32.mrb[98].mxu1 }
 0xf07   :  { %v2429_v4 = vadd.f32 %v4092_v53, %v2428_v62  ;;  %v4646_v2 = vpop.f32.mrb[99].mxu1 }
 0xf08   :  { %4698 = vmatpush3.bf16.msra.mxu0 %v2720_v10 }
 0xf09   :  { %v2770_v31 = vpack.c.bf16 %v2429_v4, %v2426_v3 }
 0xf0b   :  { %4707 = vmatprep.mubr.msk.bf16.mxu1 %vm780_vm6, %v2770_v31 }
 0xf0c   :  { %v2433_v8 = vpop.f32.mrb[100].mxu1 }
 0xf0d   :  { %v2434_v60 = vadd.f32 %v4092_v53, %v2433_v8  ;;  %v4649_v33 = vpop.f32.mrb[101].mxu1 }
 0xf0e   :  { %v2436_v48 = vpop.f32.mrb[102].mxu1 }
 0xf0f   :  { %v2771_v57 = vpack.c.bf16 %v2434_v60, %v2434_v60  ;;  %v2437_v11 = vadd.f32 %v4092_v53, %v2436_v48  ;;  %v4650_v12 = vpop.f32.mrb[103].mxu1 }
 0xf11   :  { %v3150_v13 = vpack.c.bf16 %v2437_v11, %v2434_v60  ;;  %4708 = vmatmul.mubr.msk.bf16.vlgmr.msra.gmra.mrb[120].mxu1 %vm780_vm6, %v2771_v57 }
 0xf12   :  { %4728 = vmatpush3.bf16.msra.mxu1 %v5877_v42  ;;  %v4114_v42 = vld [vmem:[%s6234_s11 + $0x3] ss:$0 sm:$0xff] }
 0xf13   :  { %v3157_v22 = vshll.u32 %v3150_v13, 16  ;;  %4729 = vmatprep.subr.bf16.mxu1 %v3100_v46  ;;  %v3155_v17 = vshrl.u32 %v3150_v13, 16 }
 0xf14   :  { %v2441_v45 = vpop.f32.mrb[104].mxu1 }
 0xf15   :  { %v2442_v1 = vadd.f32 %v4092_v53, %v2441_v45  ;;  %v4653_v63 = vpop.f32.mrb[105].mxu1  ;;  %v3159_v15 = vrot.slane %v3157_v22, 1 }
 0xf16   :  { %4730 = vmatpush3.bf16.msra.mxu1 %v3100_v46  ;;  %v2444_v24 = vpop.f32.mrb[106].mxu1 }
 0xf17   :  { %v5919_v49 = vpack.c.bf16 %v2442_v1, %v2442_v1  ;;  %4825 = vmatprep.subr.msk.bf16.mxu1 %vm780_vm6, %v5909_v59  ;;  %v4654_v16 = vpop.f32.mrb[107].mxu1  ;;  %v3160_v21 = vor.u32 %v3159_v15, %v3155_v17 }
 0xf19   :  { %v3162_v18 = vshll.u32 %v5919_v49, 16 }
 0xf1b   :  { %v3164_v25 = vrot.slane %v3162_v18, 1 }
 0xf1c   :  { %v2587_v32 = vpop.f32.mrb[108].mxu1 }
 0xf1d   :  { %v4677_v27 = vpop.f32.mrb[109].mxu1  ;;  %v5928_v35 = vsel %vm1122_vm7, %v3160_v21, %v3164_v25  ;;  %v2588_v29 = vadd.f32 %v4114_v42, %v2587_v32 }
 0xf1e   :  { %v2590_v44 = vpop.f32.mrb[110].mxu1 }
 0xf1f   :  { %v2591_v30 = vadd.f32 %v4114_v42, %v2590_v44  ;;  %v4678_v34 = vpop.f32.mrb[111].mxu1 }
 0xf21   :  { %v5930_v6 = vpack.c.bf16 %v2591_v30, %v2588_v29 }
 0xf23   :  { %4711 = vmatprep.subr.bf16.mxu0 %v5930_v6 }
 0xf24   :  { %v2595_v38 = vpop.f32.mrb[112].mxu1 }
 0xf25   :  { %v5933_v28 = vadd.f32 %v4114_v42, %v2595_v38  ;;  %v4681_v14 = vpop.f32.mrb[113].mxu1 }
 0xf26   :  { %v2598_v40 = vpop.f32.mrb[114].mxu1 }
 0xf27   :  { %v2599_v39 = vadd.f32 %v4114_v42, %v2598_v40  ;;  %v4682_v41 = vpop.f32.mrb[115].mxu1 }
 0xf29   :  { %v3280_v50 = vpack.c.bf16 %v2599_v39, %v5933_v28 }
 0xf2b   :  { %v3285_v10 = vshll.u32 %v3280_v50, 16  ;;  %v3283_v62 = vshrl.u32 %v3280_v50, 16 }
 0xf2c   :  { %v2603_v51 = vpop.f32.mrb[116].mxu1 }
 0xf2d   :  { %v2604_v52 = vadd.f32 %v4114_v42, %v2603_v51  ;;  %v4685_v55 = vpop.f32.mrb[117].mxu1  ;;  %v3287_v53 = vrot.slane %v3285_v10, 1 }
 0xf2e   :  { %v2606_v56 = vpop.f32.mrb[118].mxu1 }
 0xf2f   :  { %v5936_v26 = vpack.c.bf16 %v2604_v52, %v2604_v52  ;;  %v4686_v9 = vpop.f32.mrb[119].mxu1  ;;  %v3288_v2 = vor.u32 %v3287_v53, %v3283_v62 }
 0xf31   :  { %v3290_v3 = vshll.u32 %v5936_v26, 16 }
 0xf33   :  { %v3292_v4 = vrot.slane %v3290_v3, 1 }
 0xf35   :  { %v5940_v31 = vsel %vm1122_vm7, %v3288_v2, %v3292_v4 }
 0xfd6   :  { %v4693_v8 = vpop.f32.mrb[96].mxu0 }
 0xfd7   :  { %v2659_v54 = vpop.f32.mrb[97].mxu0  ;;  %v2675_v57 = vmul.f32 0.25, %v4693_v8 }
 0xfd8   :  { %v2673_v60 = vmul.f32 0.25, %v2659_v54  ;;  %v4694_v33 = vpop.f32.mrb[98].mxu0 }
 0xfd9   :  { %v2662_v48 = vpop.f32.mrb[99].mxu0  ;;  %v2682_v46 = vsel %vm851_vm9, %v2675_v57, -inf }
 0xfda   :  { %v2674_v11 = vmul.f32 0.25, %v2662_v48  ;;  %v2676_v12 = vsel %vm844_vm8, %v2673_v60, -inf }
 0xfdb   :  { %2677 = vmax.xlane.f32.xlu0 %v2676_v12 }
 0xfdc   :  { %v2679_v13 = vsel %vm844_vm8, %v2674_v11, -inf }
 0xfdd   :  { %2680 = vmax.xlane.f32.xlu1 %v2679_v13 }
 0xfdf   :  { %2683 = vmax.xlane.f32.xlu0 %v2682_v46 }
 0xfe4   :  { %v4709_v22 = vpop.f32.mrb[120].mxu1 }
 0xfe5   :  { %v2820_v45 = vpop.f32.mrb[121].mxu1  ;;  %v2836_v15 = vmul.f32 0.25, %v4709_v22 }
 0xfe6   :  { %v2834_v1 = vmul.f32 0.25, %v2820_v45  ;;  %v4710_v63 = vpop.f32.mrb[122].mxu1 }
 0xfe7   :  { %v2823_v24 = vpop.f32.mrb[123].mxu1  ;;  %v2843_v21 = vsel %vm851_vm9, %v2836_v15, -inf }
 0xfe8   :  { %v2835_v16 = vmul.f32 0.25, %v2823_v24  ;;  %v2837_v17 = vsel %vm844_vm8, %v2834_v1, -inf  ;;  %v2873_v24 = vpack.c.bf16 %v5933_v28, %v5933_v28 }
 0xfe9   :  { %2838 = vmax.xlane.f32.xlu1 %v2837_v17 }
 0xfea   :  { %v2840_v18 = vsel %vm844_vm8, %v2835_v16, -inf }
 0xfeb   :  { %2841 = vmax.xlane.f32.xlu0 %v2840_v18 }
 0xfed   :  { %2844 = vmax.xlane.f32.xlu1 %v2843_v21 }
0x1068   :  { %v2678_v25 = vpop.xlane.xlu0 %2677 }
0x1069   :  { %v2685_v42 = vsub.f32 %v2673_v60, %v2678_v25  ;;  %v2881_v25 = vand.u32 %v2873_v24, %v5416_v20 }
0x106a   :  { %v2681_v32 = vpop.xlane.xlu1 %2680 }
0x106b   :  { %v2688_v27 = vmul.f32 1.442695, %v2685_v42  ;;  %v2686_v44 = vsub.f32 %v2674_v11, %v2681_v32 }
0x106c   :  { %v2684_v29 = vpop.xlane.xlu0 %2683 }
0x106d   :  { %4990 = vpow2.f32 %v2688_v27  ;;  %v2690_v30 = vmul.f32 1.442695, %v2686_v44  ;;  %v2687_v34 = vsub.f32 %v2675_v57, %v2684_v29 }
0x106f   :  { %4992 = vpow2.f32 %v2690_v30  ;;  %v2692_v38 = vmul.f32 1.442695, %v2687_v34 }
0x1071   :  { %4994 = vpow2.f32 %v2692_v38  ;;  %v2976_v38 = vshrl.u32 %v5894_v36, 16  ;;  %v2962_v36 = vshrl.u32 %v5864_v23, 16 }
0x1076   :  { %v2839_v14 = vpop.xlane.xlu1 %2838 }
0x1077   :  { %v4991_v40 = vpop.eup %4990  ;;  %v2846_v39 = vsub.f32 %v2834_v1, %v2839_v14  ;;  %v2988_v14 = vsel %vm780_vm6, %v2976_v38, 0 }
0x1078   :  { %v2842_v41 = vpop.xlane.xlu0 %2841  ;;  %v2694_v50 = vsel %vm844_vm8, %v4991_v40, 0.0 }
0x1079   :  { %v4993_v10 = vpop.eup %4992  ;;  %v2849_v51 = vmul.f32 1.442695, %v2846_v39  ;;  %v2847_v52 = vsub.f32 %v2835_v16, %v2842_v41  ;;  %2695 = vadd.xlane.f32.xlu0 %v2694_v50 }
0x107a   :  { %v2845_v55 = vpop.xlane.xlu1 %2844  ;;  %v2697_v56 = vsel %vm844_vm8, %v4993_v10, 0.0 }
0x107b   :  { %v4995_v53 = vpop.eup %4994  ;;  %4996 = vpow2.f32 %v2849_v51  ;;  %v2851_v9 = vmul.f32 1.442695, %v2847_v52  ;;  %v2848_v62 = vsub.f32 %v2836_v15, %v2845_v55  ;;  %2698 = vadd.xlane.f32.xlu1 %v2697_v56 }
0x107c   :  { %v2700_v3 = vsel %vm851_vm9, %v4995_v53, 0.0 }
0x107d   :  { %4998 = vpow2.f32 %v2851_v9  ;;  %v2853_v4 = vmul.f32 1.442695, %v2848_v62  ;;  %2701 = vadd.xlane.f32.xlu0 %v2700_v3 }
0x107f   :  { %5000 = vpow2.f32 %v2853_v4 }
0x1085   :  { %v4997_v2 = vpop.eup %4996 }
0x1086   :  { %v2855_v8 = vsel %vm844_vm8, %v4997_v2, 0.0 }
0x1087   :  { %v4999_v54 = vpop.eup %4998  ;;  %2856 = vadd.xlane.f32.xlu1 %v2855_v8 }
0x1088   :  { %v2858_v60 = vsel %vm844_vm8, %v4999_v54, 0.0 }
0x1089   :  { %v5001_v33 = vpop.eup %5000  ;;  %2859 = vadd.xlane.f32.xlu0 %v2858_v60 }
0x108a   :  { %v2861_v48 = vsel %vm851_vm9, %v5001_v33, 0.0 }
0x108b   :  { %2862 = vadd.xlane.f32.xlu1 %v2861_v48 }
0x1106   :  { %v2696_v57 = vpop.xlane.xlu0 %2695 }
0x1107   :  { %5002 = vrcp.f32 %v2696_v57 }
0x1108   :  { %v2699_v11 = vpop.xlane.xlu1 %2698 }
0x1109   :  { %5004 = vrcp.f32 %v2699_v11 }
0x110a   :  { %v2702_v12 = vpop.xlane.xlu0 %2701 }
0x110b   :  { %5006 = vrcp.f32 %v2702_v12 }
0x1111   :  { %v5003_v13 = vpop.eup %5002 }
0x1112   :  { %v2706_v45 = vmul.f32 %v5003_v13, %v4991_v40  ;;  %v3294_v40 = vshrl.u32 %v5936_v26, 16 }
0x1113   :  { %v5005_v46 = vpop.eup %5004 }
0x1114   :  { %v2857_v22 = vpop.xlane.xlu1 %2856  ;;  %v2707_v1 = vmul.f32 %v5005_v46, %v4993_v10  ;;  %v3304_v39 = vand.u32 %v3294_v40, %v5416_v20 }
0x1115   :  { %v5007_v63 = vpop.eup %5006  ;;  %5008 = vrcp.f32 %v2857_v22 }
0x1116   :  { %v2708_v15 = vmul.f32 %v5007_v63, %v4995_v53  ;;  %v2860_v16 = vpop.xlane.xlu0 %2859  ;;  %v2709_v17 = vpack.c.bf16 %v2707_v1, %v2706_v45 }
0x1117   :  { %5010 = vrcp.f32 %v2860_v16 }
0x1118   :  { %4699 = vmatprep.mubr.msk.bf16.mxu0 %vm844_vm8, %v2709_v17  ;;  %v2863_v18 = vpop.xlane.xlu1 %2862  ;;  %v2710_v21 = vpack.c.bf16 %v2708_v15, %v2708_v15 }
0x1119   :  { %5012 = vrcp.f32 %v2863_v18 }
0x111a   :  { %4700 = vmatmul.mubr.msk.bf16.vlgmr.msra.gmra.mrb[100].mxu0 %vm844_vm8, %v2710_v21 }
0x111b   :  { %4712 = vmatpush3.bf16.msra.mxu0 %v5930_v6  ;;  %v2985_v6 = vsel %vm780_vm6, %v5912_v7, 0 }
0x111c   :  { %4713 = vmatprep.subr.bf16.mxu0 %v2881_v25 }
0x111f   :  { %v5009_v42 = vpop.eup %5008  ;;  %4714 = vmatpush3.bf16.msra.mxu0 %v2881_v25 }
0x1120   :  { %4823 = vmatprep.subr.msk.bf16.mxu0 %vm780_vm6, %v5912_v7  ;;  %v2867_v32 = vmul.f32 %v5009_v42, %v4997_v2 }
0x1121   :  { %v5011_v28 = vpop.eup %5010 }
0x1122   :  { %v2868_v27 = vmul.f32 %v5011_v28, %v4999_v54 }
0x1123   :  { %v5013_v44 = vpop.eup %5012 }
0x1124   :  { %v2869_v29 = vmul.f32 %v5013_v44, %v5001_v33  ;;  %v2870_v30 = vpack.c.bf16 %v2868_v27, %v2867_v32 }
0x1126   :  { %4715 = vmatprep.mubr.msk.bf16.mxu0 %vm844_vm8, %v2870_v30  ;;  %v2871_v34 = vpack.c.bf16 %v2869_v29, %v2869_v29  ;;  %v3180_v29 = vshrl.u32 %v5896_v37, 16  ;;  %v3189_v30 = vsel %vm780_vm6, %v5909_v59, 0 }
0x1128   :  { %4716 = vmatmul.mubr.msk.bf16.vlgmr.msra.gmra.mrb[104].mxu0 %vm844_vm8, %v2871_v34  ;;  %v3192_v34 = vsel %vm780_vm6, %v3180_v29, 0 }
0x1129   :  { %4720 = vmatpush3.bf16.xpose.msra.mxu0 %v2985_v6  ;;  %4723 = vmatprep.mubr.msk.bf16.mxu0 %vm780_vm6, %v5880_v43 }
0x112a   :  { %4824 = vmatprep.subr.msk.bf16.mxu0 %vm780_vm6, %v2976_v38  ;;  %v3166_v38 = vshrl.u32 %v5919_v49, 16 }
0x1131   :  { %4722 = vmatpush3.bf16.xpose.msra.mxu0 %v2988_v14 }
0x1132   :  { %4743 = vmatprep.subr.bf16.mxu0 %v5940_v31 }
0x1138   :  { %4724 = vmatmul.mubr.msk.bf16.vlgmr.msra.gmra.mrb[108].mxu0 %vm780_vm6, %v2962_v36 }
0x1139   :  { %4744 = vmatpush3.bf16.msra.mxu0 %v5940_v31 }
0x113a   :  { %4745 = vmatprep.subr.bf16.mxu0 %v3304_v39 }
0x113d   :  { %4746 = vmatpush3.bf16.msra.mxu0 %v3304_v39 }
0x113e   :  { %4751 = vmatprep.subr.bf16.mxu0 %v5068_v0 }
0x11ed   :  { %v5978_v43 = vpop.f32.mrb[100].mxu0 }
0x11ee   :  { %v5980_v7 = vpop.f32.mrb[101].mxu0 }
0x11ef   :  { %v4702_v41 = vpop.f32.mrb[102].mxu0 }
0x11f0   :  { %v5982_v50 = vpop.f32.mrb[103].mxu0 }
0x11fb   :  { %v5984_v26 = vpop.f32.mrb[104].mxu0 }
0x11fc   :  { %v5986_v23 = vpop.f32.mrb[105].mxu0 }
0x11fd   :  { %v4718_v10 = vpop.f32.mrb[106].mxu0 }
0x11fe   :  { %v5988_v51 = vpop.f32.mrb[107].mxu0 }
0x11ff   :  { %v4841_v20 = vpack.i.bf16 %v5988_v51, %v5986_v23 }
0x120b   :  { %v4725_v31 = vpop.f32.mrb[108].mxu0 }
0x120c   :  { %v3024_v52 = vpop.f32.mrb[109].mxu0  ;;  %v3040_v9 = vmul.f32 0.25, %v4725_v31 }
0x120d   :  { %v3038_v55 = vmul.f32 0.25, %v3024_v52  ;;  %v4726_v56 = vpop.f32.mrb[110].mxu0 }
0x120e   :  { %v3027_v53 = vpop.f32.mrb[111].mxu0  ;;  %v3047_v2 = vsel %vm851_vm9, %v3040_v9, -inf }
0x120f   :  { %v3039_v62 = vmul.f32 0.25, %v3027_v53  ;;  %v3041_v3 = vsel %vm844_vm8, %v3038_v55, -inf }
0x1210   :  { %3042 = vmax.xlane.f32.xlu0 %v3041_v3 }
0x1211   :  { %v3044_v4 = vsel %vm844_vm8, %v3039_v62, -inf }
0x1212   :  { %3045 = vmax.xlane.f32.xlu1 %v3044_v4 }
0x1214   :  { %3048 = vmax.xlane.f32.xlu0 %v3047_v2 }
0x129d   :  { %v3043_v8 = vpop.xlane.xlu0 %3042 }
0x129e   :  { %v3050_v54 = vsub.f32 %v3038_v55, %v3043_v8 }
0x129f   :  { %v3046_v60 = vpop.xlane.xlu1 %3045 }
0x12a0   :  { %v3053_v33 = vmul.f32 1.442695, %v3050_v54  ;;  %v3051_v48 = vsub.f32 %v3039_v62, %v3046_v60 }
0x12a1   :  { %v3049_v57 = vpop.xlane.xlu0 %3048 }
0x12a2   :  { %5014 = vpow2.f32 %v3053_v33  ;;  %v3055_v11 = vmul.f32 1.442695, %v3051_v48  ;;  %v3052_v12 = vsub.f32 %v3040_v9, %v3049_v57 }
0x12a4   :  { %5016 = vpow2.f32 %v3055_v11  ;;  %v3057_v13 = vmul.f32 1.442695, %v3052_v12 }
0x12a6   :  { %5018 = vpow2.f32 %v3057_v13 }
0x12ac   :  { %v5015_v46 = vpop.eup %5014 }
0x12ad   :  { %v3059_v22 = vsel %vm844_vm8, %v5015_v46, 0.0 }
0x12ae   :  { %v5017_v45 = vpop.eup %5016  ;;  %3060 = vadd.xlane.f32.xlu1 %v3059_v22 }
0x12af   :  { %v3062_v1 = vsel %vm844_vm8, %v5017_v45, 0.0 }
0x12b0   :  { %v5019_v63 = vpop.eup %5018  ;;  %3063 = vadd.xlane.f32.xlu0 %v3062_v1 }
0x12b1   :  { %v3065_v24 = vsel %vm851_vm9, %v5019_v63, 0.0 }
0x12b2   :  { %3066 = vadd.xlane.f32.xlu1 %v3065_v24 }
0x133b   :  { %v3061_v15 = vpop.xlane.xlu1 %3060 }
0x133c   :  { %5020 = vrcp.f32 %v3061_v15 }
0x133d   :  { %v3064_v16 = vpop.xlane.xlu0 %3063 }
0x133e   :  { %5022 = vrcp.f32 %v3064_v16 }
0x133f   :  { %v3067_v17 = vpop.xlane.xlu1 %3066 }
0x1340   :  { %5024 = vrcp.f32 %v3067_v17 }
0x1346   :  { %v5021_v18 = vpop.eup %5020 }
0x1347   :  { %v3071_v25 = vmul.f32 %v5021_v18, %v5015_v46 }
0x1348   :  { %v5023_v21 = vpop.eup %5022 }
0x1349   :  { %v3072_v42 = vmul.f32 %v5023_v21, %v5017_v45 }
0x134a   :  { %v5025_v28 = vpop.eup %5024 }
0x134b   :  { %v3073_v32 = vmul.f32 %v5025_v28, %v5019_v63  ;;  %v3074_v27 = vpack.c.bf16 %v3072_v42, %v3071_v25  ;;  %v4890_v42 = vld [vmem:[%s6235_s12 + $0x10] sm:$0xff]  }
0x134d   :  { %4731 = vmatprep.mubr.msk.bf16.mxu1 %vm844_vm8, %v3074_v27  ;;  %v3075_v44 = vpack.c.bf16 %v3073_v32, %v3073_v32 }
0x134f   :  { %4732 = vmatmul.mubr.msk.bf16.vlgmr.msra.gmra.mrb[124].mxu1 %vm844_vm8, %v3075_v44 }
0x1350   :  { %4736 = vmatpush3.bf16.xpose.msra.mxu1 %v3189_v30  ;;  %4739 = vmatprep.mubr.msk.bf16.mxu1 %vm780_vm6, %v5928_v35 }
0x1351   :  { %4826 = vmatprep.subr.msk.bf16.mxu1 %vm780_vm6, %v3180_v29 }
0x1358   :  { %4738 = vmatpush3.bf16.xpose.msra.mxu1 %v3192_v34  ;;  %v4146_v34 = vld [vmem:[%s6236_s13 + $0x1] ss:$0 sm:$0xff] }
0x1359   :  { %4767 = vmatprep.subr.bf16.mxu1 %v5068_v0 }
0x135f   :  { %4740 = vmatmul.mubr.msk.bf16.vlgmr.msra.gmra.mrb[128].mxu1 %vm780_vm6, %v3166_v38 }
0x1360   :  { %4771 = vmatprep.mubr.msk.bf16.mxu1 %vm5069_vm5, %v5068_v0 }
0x1422   :  { %v6012_v37 = vpop.f32.mrb[124].mxu1 }
0x1423   :  { %v6014_v59 = vpop.f32.mrb[125].mxu1 }
0x1424   :  { %v4734_v6 = vpop.f32.mrb[126].mxu1 }
0x1425   :  { %v6016_v35 = vpop.f32.mrb[127].mxu1 }
0x1432   :  { %v4741_v14 = vpop.f32.mrb[128].mxu1 }
0x1433   :  { %v3228_v40 = vpop.f32.mrb[129].mxu1  ;;  %v3244_v10 = vmul.f32 0.25, %v4741_v14 }
0x1434   :  { %v3242_v36 = vmul.f32 0.25, %v3228_v40  ;;  %v4742_v39 = vpop.f32.mrb[130].mxu1 }
0x1435   :  { %v3231_v41 = vpop.f32.mrb[131].mxu1  ;;  %v3251_v55 = vsel %vm851_vm9, %v3244_v10, -inf }
0x1436   :  { %v3243_v31 = vmul.f32 0.25, %v3231_v41  ;;  %v3245_v49 = vsel %vm844_vm8, %v3242_v36, -inf }
0x1437   :  { %3246 = vmax.xlane.f32.xlu0 %v3245_v49 }
0x1438   :  { %v3248_v52 = vsel %vm844_vm8, %v3243_v31, -inf }
0x1439   :  { %3249 = vmax.xlane.f32.xlu1 %v3248_v52 }
0x143b   :  { %3252 = vmax.xlane.f32.xlu0 %v3251_v55 }
0x14c4   :  { %v3247_v56 = vpop.xlane.xlu0 %3246 }
0x14c5   :  { %v3254_v53 = vsub.f32 %v3242_v36, %v3247_v56 }
0x14c6   :  { %v3250_v9 = vpop.xlane.xlu1 %3249 }
0x14c7   :  { %v3257_v62 = vmul.f32 1.442695, %v3254_v53  ;;  %v3255_v3 = vsub.f32 %v3243_v31, %v3250_v9 }
0x14c8   :  { %v3253_v4 = vpop.xlane.xlu0 %3252 }
0x14c9   :  { %5026 = vpow2.f32 %v3257_v62  ;;  %v3259_v2 = vmul.f32 1.442695, %v3255_v3  ;;  %v3256_v8 = vsub.f32 %v3244_v10, %v3253_v4 }
0x14cb   :  { %5028 = vpow2.f32 %v3259_v2  ;;  %v3261_v54 = vmul.f32 1.442695, %v3256_v8 }
0x14cd   :  { %5030 = vpow2.f32 %v3261_v54 }
0x14d3   :  { %v5027_v60 = vpop.eup %5026 }
0x14d4   :  { %v3263_v33 = vsel %vm844_vm8, %v5027_v60, 0.0 }
0x14d5   :  { %v5029_v48 = vpop.eup %5028  ;;  %3264 = vadd.xlane.f32.xlu1 %v3263_v33 }
0x14d6   :  { %v3266_v57 = vsel %vm844_vm8, %v5029_v48, 0.0 }
0x14d7   :  { %v5031_v11 = vpop.eup %5030  ;;  %3267 = vadd.xlane.f32.xlu0 %v3266_v57 }
0x14d8   :  { %v3269_v12 = vsel %vm851_vm9, %v5031_v11, 0.0 }
0x14d9   :  { %3270 = vadd.xlane.f32.xlu1 %v3269_v12 }
0x14ed   :  { %4842 = vrot.lane.b32.xlu0 %v4841_v20, %s5071_s2 }
0x1562   :  { %v3265_v13 = vpop.xlane.xlu1 %3264 }
0x1563   :  { %5032 = vrcp.f32 %v3265_v13 }
0x1564   :  { %v3268_v46 = vpop.xlane.xlu0 %3267 }
0x1565   :  { %5034 = vrcp.f32 %v3268_v46 }
0x1566   :  { %v3271_v22 = vpop.xlane.xlu1 %3270 }
0x1567   :  { %5036 = vrcp.f32 %v3271_v22 }
0x1568   :  { %v4843_v45 = vpop.permute.xlu0 %4842 }
0x1569   :  { %v4845_v1 = vunpack.i.h.bf16 %v4843_v45  ;;  %v4844_v63 = vunpack.i.l.bf16 %v4843_v45 }
0x156b   :  { %v2944_v24 = vsel %vm780_vm6, %v5982_v50, %v4845_v1  ;;  %v2943_v15 = vsel %vm780_vm6, %v5980_v7, %v4844_v63  ;;  %v4891_v7 = vld [vmem:[%s6235_s12 + $0x18] sm:$0xff]  }
0x156c   :  { %v3386_v16 = vpack.c.bf16 %v2944_v24, %v2943_v15 }
0x156d   :  { %v5033_v17 = vpop.eup %5032 }
0x156e   :  { %v3275_v23 = vmul.f32 %v5033_v17, %v5027_v60 }
0x156f   :  { %v5035_v18 = vpop.eup %5034 }
0x1570   :  { %v3276_v51 = vmul.f32 %v5035_v18, %v5029_v48 }
0x1571   :  { %v5037_v20 = vpop.eup %5036 }
0x1572   :  { %v3277_v21 = vmul.f32 %v5037_v20, %v5031_v11  ;;  %v3278_v25 = vpack.c.bf16 %v3276_v51, %v3275_v23 }
0x1574   :  { %4747 = vmatprep.mubr.msk.bf16.mxu0 %vm844_vm8, %v3278_v25  ;;  %v3279_v28 = vpack.c.bf16 %v3277_v21, %v3277_v21 }
0x1576   :  { %4748 = vmatmul.mubr.msk.bf16.vlgmr.msra.gmra.mrb[112].mxu0 %vm844_vm8, %v3279_v28  ;;  %v4893_v28 = vld [vmem:[%s6237_s16 + $0x18] sm:$0xff]  }
0x1577   :  { %4752 = vmatpush3.bf16.msra.mxu0 %v4890_v42  ;;  %4755 = vmatprep.mubr.msk.bf16.mxu0 %vm5069_vm5, %v5068_v0 }
0x1578   :  { %4753 = vmatprep.subr.bf16.mxu0 %v5068_v0 }
0x157b   :  { %4754 = vmatpush3.bf16.msra.mxu0 %v4891_v7 }
0x157c   :  { %4783 = vmatprep.subr.bf16.mxu0 %v5068_v0 }
0x157e   :  { %4756 = vmatmul.mubr.msk.bf16.vlgmr.msra.gmra.mrb[116].mxu0 %vm194_vm2, %v3386_v16 }
0x157f   :  { %4759 = vmatprep.mubr.msk.bf16.mxu0 %vm5069_vm5, %v5068_v0 }
0x1649   :  { %v4749_v50 = vpop.f32.mrb[112].mxu0 }
0x164a   :  { %v3340_v32 = vpop.f32.mrb[113].mxu0 }
0x164b   :  { %v4750_v27 = vpop.f32.mrb[114].mxu0 }
0x164c   :  { %v3343_v44 = vpop.f32.mrb[115].mxu0 }
0x164d   :  { %v4846_v29 = vpack.i.bf16 %v3343_v44, %v3340_v32 }
0x164f   :  { %4847 = vrot.lane.b32.xlu1 %v4846_v29, %s5071_s2 }
0x1651   :  { %v3444_v30 = vpop.f32.mrb[116].mxu0 }
0x1652   :  { %v3466_v38 = vadd.f32 %v3444_v30, %v5700_v61  ;;  %v4757_v6 = vpop.f32.mrb[117].mxu0 }
0x1653   :  { %2938 = vrot.lane.b32.xlu1 %v5984_v26, %s5071_s2  ;;  %v3447_v14 = vpop.f32.mrb[118].mxu0 }
0x1654   :  { %v6054_v40 = vadd.f32 %v4146_v34, %v3466_v38  ;;  %v4758_v36 = vpop.f32.mrb[119].mxu0  ;;  %v3467_v41 = vadd.f32 %v3447_v14, %v5703_v5 }
0x1656   :  { %v3488_v39 = vsel %vm194_vm2, %v6054_v40, 0.0  ;;  %v6060_v10 = vadd.f32 %v4146_v34, %v3467_v41 }
0x1657   :  { %3361 = vrot.lane.b32.xlu1 %v4749_v50, %s5071_s2  ;;  %3489 = vadd.xlane.f32.xlu0 %v3488_v39 }
0x1658   :  { %v3491_v61 = vsel %vm194_vm2, %v6060_v10, 0.0 }
0x167b   :  { %3492 = vadd.xlane.f32.xlu1 %v3491_v61 }
0x16c1   :  { %v4848_v31 = vpop.permute.xlu1 %4847 }
0x16c2   :  { %v4850_v26 = vunpack.i.h.bf16 %v4848_v31  ;;  %v4849_v49 = vunpack.i.l.bf16 %v4848_v31 }
0x16c4   :  { %v3367_v52 = vsel %vm780_vm6, %v6016_v35, %v4850_v26  ;;  %v3366_v55 = vsel %vm780_vm6, %v6014_v59, %v4849_v49 }
0x16c5   :  { %v3373_v56 = vrot.slane %v3367_v52, 7  ;;  %v3372_v53 = vrot.slane %v3366_v55, 7  ;;  %v2939_v9 = vpop.permute.xlu1 %2938 }
0x16c6   :  { %v2945_v5 = vsel %vm780_vm6, %v5978_v43, %v2939_v9 }
0x16c7   :  { %v3374_v62 = vsel %vm167_vm1, %v3372_v53, %v3373_v56  ;;  %v3380_v3 = vsel %vm167_vm1, %v2945_v5, %v3372_v53  ;;  %v4149_v5 = vld [vmem:[%s6238_s14 + $0x1] ss:$0 sm:$0xff] }
0x16c8   :  { %v3387_v4 = vpack.c.bf16 %v3374_v62, %v3380_v3 }
0x16c9   :  { %v3362_v2 = vpop.permute.xlu1 %3361 }
0x16ca   :  { %v3368_v8 = vsel %vm780_vm6, %v6012_v37, %v3362_v2  ;;  %4760 = vmatmul.mubr.msk.bf16.gmra.mrb[120].mxu0 %vm194_vm2, %v3387_v4  ;;  %v4150_v2 = vld [vmem:[%s6239_s15 + $0x1] ss:$0 sm:$0xff] }
0x16cb   :  { %v3375_v35 = vrot.slane %v3368_v8, 7  ;;  %4763 = vmatprep.mubr.msk.bf16.mxu0 %vm5069_vm5, %v5068_v0 }
0x16cd   :  { %v3376_v59 = vsel %vm167_vm1, %v3373_v56, %v3375_v35 }
0x16ce   :  { %v3388_v54 = vpack.c.bf16 %v3376_v59, %v3376_v59 }
0x16d2   :  { %4764 = vmatmul.mubr.msk.bf16.gmra.mrb[124].mxu0 %vm194_vm2, %v3388_v54 }
0x16d3   :  { %4799 = vmatprep.mubr.msk.bf16.mxu0 %vm5069_vm5, %v5068_v0 }
0x16e4   :  { %v3490_v43 = vpop.xlane.xlu0 %3489 }
0x16e5   :  { %v3503_v60 = vmul.f32 0.03125, %v3490_v43  ;;  %v4894_v43 = vld [vmem:[%s6240_s18 + $0x40] sm:$0xff]  }
0x16e6   :  { %4784 = vmatpush3.bf16.msra.mxu0 %v4894_v43 }
0x16e7   :  { %v3508_v33 = vsub.f32 %v6054_v40, %v3503_v60  ;;  %4785 = vmatprep.subr.bf16.mxu0 %v5068_v0  ;;  %v4895_v60 = vld [vmem:[%s6240_s18 + $0x48] sm:$0xff]  }
0x16e9   :  { %v3513_v48 = vmul.f32 %v3508_v33, %v3508_v33 }
0x16ea   :  { %4786 = vmatpush3.bf16.msra.mxu0 %v4895_v60 }
0x16eb   :  { %v3518_v37 = vsel %vm194_vm2, %v3513_v48, 0.0  ;;  %4787 = vmatprep.subr.bf16.mxu0 %v5068_v0  ;;  %v4897_v48 = vld [vmem:[%s6240_s18 + $0x58] sm:$0xff]  }
0x16ec   :  { %3519 = vadd.xlane.f32.xlu1 %v3518_v37  ;;  %v4898_v37 = vld [vmem:[%s6240_s18 + $0x60] sm:$0xff]  }
0x1708   :  { %v3493_v13 = vpop.xlane.xlu1 %3492 }
0x1709   :  { %v3504_v63 = vmul.f32 0.03125, %v3493_v13 }
0x170b   :  { %v3509_v17 = vsub.f32 %v6060_v10, %v3504_v63 }
0x170d   :  { %v3514_v25 = vmul.f32 %v3509_v17, %v3509_v17 }
0x170f   :  { %v3521_v42 = vsel %vm194_vm2, %v3514_v25, 0.0 }
0x1779   :  { %v3520_v7 = vpop.xlane.xlu1 %3519 }
0x177a   :  { %v3533_v27 = vmul.f32 0.03125, %v3520_v7 }
0x177c   :  { %v3538_v38 = vadd.f32 1e-06, %v3533_v27 }
0x177e   :  { %5038 = vrsqrt.f32 %v3538_v38 }
0x1788   :  { %v5039_v53 = vpop.eup %5038 }
0x1789   :  { %v3548_v9 = vmul.f32 %v5039_v53, %v3508_v33  ;;  %v4896_v33 = vld [vmem:[%s6240_s18 + $0x50] sm:$0xff]  }
0x178a   :  { %4788 = vmatpush3.bf16.msra.mxu0 %v4896_v33 }
0x178b   :  { %v3559_v3 = vmul.f32 %v4149_v5, %v3548_v9  ;;  %4789 = vmatprep.subr.bf16.mxu0 %v5068_v0 }
0x178d   :  { %v3570_v35 = vadd.f32 %v4150_v2, %v3559_v3 }
0x178e   :  { %4790 = vmatpush3.bf16.msra.mxu0 %v4897_v48 }
0x178f   :  { %4791 = vmatprep.subr.bf16.mxu0 %v5068_v0 }
0x1792   :  { %4792 = vmatpush3.bf16.msra.mxu0 %v4898_v37 }
0x1793   :  { %4793 = vmatprep.subr.bf16.mxu0 %v5068_v0 }
0x179d   :  { %v3452_v57 = vpop.f32.mrb[120].mxu0 }
0x179e   :  { %v3468_v11 = vadd.f32 %v3452_v57, %v5710_v47  ;;  %v4761_v12 = vpop.f32.mrb[121].mxu0  ;;  %v4899_v57 = vld [vmem:[%s6240_s18 + $0x68] sm:$0xff]  }
0x179f   :  { %v3455_v46 = vpop.f32.mrb[122].mxu0  ;;  %4794 = vmatpush3.bf16.msra.mxu0 %v4899_v57  ;;  %v4901_v12 = vld [vmem:[%s6240_s18 + $0x78] sm:$0xff]  }
0x17a0   :  { %v6084_v22 = vadd.f32 %v4146_v34, %v3468_v11  ;;  %v3469_v45 = vadd.f32 %v3455_v46, %v5713_v58  ;;  %v4762_v1 = vpop.f32.mrb[123].mxu0  ;;  %v4900_v11 = vld [vmem:[%s6240_s18 + $0x70] sm:$0xff]   ;;  %4795 = vmatprep.subr.bf16.mxu0 %v5068_v0 }
0x17a2   :  { %v6087_v24 = vadd.f32 %v4146_v34, %v3469_v45  ;;  %v3494_v15 = vsel %vm194_vm2, %v6084_v22, 0.0 }
0x17a3   :  { %3495 = vadd.xlane.f32.xlu0 %v3494_v15  ;;  %4796 = vmatpush3.bf16.msra.mxu0 %v4900_v11 }
0x17a4   :  { %v3497_v23 = vsel %vm194_vm2, %v6087_v24, 0.0  ;;  %4797 = vmatprep.subr.bf16.mxu0 %v5068_v0 }
0x17a5   :  { %v3460_v16 = vpop.f32.mrb[124].mxu0 }
0x17a6   :  { %v3470_v47 = vadd.f32 %v3460_v16, %v5722_v19  ;;  %v4765_v18 = vpop.f32.mrb[125].mxu0  ;;  %v4892_v19 = vld [vmem:[%s6237_s16 + $0x10] sm:$0xff]  }
0x17a7   :  { %3498 = vadd.xlane.f32.xlu0 %v3497_v23  ;;  %v3463_v51 = vpop.f32.mrb[126].mxu0  ;;  %4768 = vmatpush3.bf16.msra.mxu1 %v4892_v19 }
0x17a8   :  { %v6095_v58 = vadd.f32 %v4146_v34, %v3470_v47  ;;  %v4766_v20 = vpop.f32.mrb[127].mxu0  ;;  %4769 = vmatprep.subr.bf16.mxu1 %v5068_v0  ;;  %4798 = vmatpush3.bf16.msra.mxu0 %v4901_v12 }
0x17aa   :  { %v3500_v21 = vsel %vm207_vm4, %v6095_v58, 0.0 }
0x17ab   :  { %3501 = vadd.xlane.f32.xlu0 %v3500_v21  ;;  %4770 = vmatpush3.bf16.msra.mxu1 %v4893_v28 }
0x17af   :  { %3522 = vadd.xlane.f32.xlu0 %v3521_v42 }
0x1830   :  { %v3496_v50 = vpop.xlane.xlu0 %3495 }
0x1831   :  { %v3505_v32 = vmul.f32 0.03125, %v3496_v50 }
0x1833   :  { %v6108_v44 = vsub.f32 %v6084_v22, %v3505_v32 }
0x1834   :  { %v3499_v29 = vpop.xlane.xlu0 %3498 }
0x1835   :  { %v3506_v30 = vmul.f32 0.03125, %v3499_v29  ;;  %v3515_v34 = vmul.f32 %v6108_v44, %v6108_v44 }
0x1837   :  { %v6113_v6 = vsub.f32 %v6087_v24, %v3506_v30  ;;  %v3524_v14 = vsel %vm194_vm2, %v3515_v34, 0.0 }
0x1838   :  { %3525 = vadd.xlane.f32.xlu1 %v3524_v14  ;;  %v3502_v36 = vpop.xlane.xlu0 %3501 }
0x1839   :  { %v3507_v39 = vmul.f32 0.03125, %v3502_v36  ;;  %v3516_v41 = vmul.f32 %v6113_v6, %v6113_v6 }
0x183b   :  { %v6119_v61 = vsub.f32 %v6095_v58, %v3507_v39  ;;  %v3527_v31 = vsel %vm194_vm2, %v3516_v41, 0.0 }
0x183c   :  { %3528 = vadd.xlane.f32.xlu0 %v3527_v31  ;;  %v3523_v26 = vpop.xlane.xlu0 %3522 }
0x183d   :  { %v3534_v49 = vmul.f32 0.03125, %v3523_v26  ;;  %v3517_v52 = vmul.f32 %v6119_v61, %v6119_v61 }
0x183f   :  { %v3539_v55 = vadd.f32 1e-06, %v3534_v49  ;;  %v3530_v56 = vsel %vm207_vm4, %v3517_v52, 0.0 }
0x1840   :  { %3531 = vadd.xlane.f32.xlu1 %v3530_v56 }
0x1841   :  { %5040 = vrsqrt.f32 %v3539_v55 }
0x184b   :  { %v5041_v62 = vpop.eup %5040 }
0x184c   :  { %v3549_v4 = vmul.f32 %v5041_v62, %v3509_v17 }
0x184e   :  { %v3560_v8 = vmul.f32 %v4149_v5, %v3549_v4 }
0x1850   :  { %v3571_v59 = vadd.f32 %v4150_v2, %v3560_v8 }
0x1852   :  { %v3580_v54 = vpack.c.bf16 %v3571_v59, %v3570_v35 }
0x1854   :  { %4772 = vmatmul.mubr.msk.bf16.vlgmr.msra.gmra.mrb[132].mxu1 %vm194_vm2, %v3580_v54 }
0x1855   :  { %4775 = vmatprep.mubr.msk.bf16.mxu1 %vm5069_vm5, %v5068_v0 }
0x18c5   :  { %v3526_v13 = vpop.xlane.xlu1 %3525 }
0x18c6   :  { %v3535_v46 = vmul.f32 0.03125, %v3526_v13 }
0x18c8   :  { %v3540_v45 = vadd.f32 1e-06, %v3535_v46 }
0x18c9   :  { %v3529_v1 = vpop.xlane.xlu0 %3528 }
0x18ca   :  { %5042 = vrsqrt.f32 %v3540_v45  ;;  %v3536_v63 = vmul.f32 0.03125, %v3529_v1 }
0x18cc   :  { %v3541_v15 = vadd.f32 1e-06, %v3536_v63 }
0x18cd   :  { %v3532_v16 = vpop.xlane.xlu1 %3531 }
0x18ce   :  { %5044 = vrsqrt.f32 %v3541_v15  ;;  %v3537_v17 = vmul.f32 0.03125, %v3532_v16 }
0x18d0   :  { %v3542_v47 = vadd.f32 1e-06, %v3537_v17 }
0x18d2   :  { %5046 = vrsqrt.f32 %v3542_v47 }
0x18d4   :  { %v5043_v18 = vpop.eup %5042 }
0x18d5   :  { %v3550_v23 = vmul.f32 %v5043_v18, %v6108_v44  ;;  %v4156_v44 = vld [vmem:[%s6241_s17 + $0x1] ss:$0 sm:$0xff] }
0x18d7   :  { %v3561_v21 = vmul.f32 %v4149_v5, %v3550_v23 }
0x18d8   :  { %v5045_v51 = vpop.eup %5044 }
0x18d9   :  { %v3551_v20 = vmul.f32 %v5045_v51, %v6113_v6  ;;  %v3572_v19 = vadd.f32 %v4150_v2, %v3561_v21 }
0x18db   :  { %v3562_v25 = vmul.f32 %v4149_v5, %v3551_v20 }
0x18dc   :  { %v5047_v42 = vpop.eup %5046 }
0x18dd   :  { %v3573_v28 = vadd.f32 %v4150_v2, %v3562_v25  ;;  %v3552_v7 = vmul.f32 %v5047_v42, %v6119_v61 }
0x18df   :  { %v3581_v50 = vpack.c.bf16 %v3573_v28, %v3572_v19  ;;  %v3563_v32 = vmul.f32 %v4149_v5, %v3552_v7 }
0x18e1   :  { %4776 = vmatmul.mubr.msk.bf16.gmra.mrb[136].mxu1 %vm194_vm2, %v3581_v50  ;;  %v3574_v27 = vadd.f32 %v4150_v2, %v3563_v32 }
0x18e2   :  { %4779 = vmatprep.mubr.msk.bf16.mxu1 %vm5069_vm5, %v5068_v0 }
0x18e3   :  { %v3582_v29 = vpack.c.bf16 %v3574_v27, %v3574_v27 }
0x18e9   :  { %4780 = vmatmul.mubr.msk.bf16.gmra.mrb[140].mxu1 %vm194_vm2, %v3582_v29 }
0x1927   :  { %v3646_v30 = vpop.f32.mrb[132].mxu1 }
0x1928   :  { %v3647_v34 = vadd.f32 %v4156_v44, %v3646_v30  ;;  %v4773_v38 = vpop.f32.mrb[133].mxu1 }
0x1929   :  { %v3649_v6 = vpop.f32.mrb[134].mxu1 }
0x192a   :  { %v3673_v14 = vmul.f32 0.044715, %v3647_v34  ;;  %v3650_v36 = vadd.f32 %v4156_v44, %v3649_v6  ;;  %v4774_v39 = vpop.f32.mrb[135].mxu1  ;;  %v3668_v3 = vmul.f32 0.5, %v3647_v34 }
0x192c   :  { %v3678_v41 = vmul.f32 %v3673_v14, %v3647_v34  ;;  %v3674_v61 = vmul.f32 0.044715, %v3650_v36  ;;  %v3669_v4 = vmul.f32 0.5, %v3650_v36 }
0x192e   :  { %v3683_v31 = vmul.f32 %v3678_v41, %v3647_v34  ;;  %v3679_v26 = vmul.f32 %v3674_v61, %v3650_v36  ;;  %v4187_v61 = vld [vmem:[%s6242_s19 + $0x1] ss:$0 sm:$0xff] }
0x1930   :  { %v3688_v49 = vadd.f32 %v3683_v31, %v3647_v34  ;;  %v3684_v52 = vmul.f32 %v3679_v26, %v3650_v36 }
0x1932   :  { %v3693_v55 = vmul.f32 0.7978846, %v3688_v49  ;;  %v3689_v56 = vadd.f32 %v3684_v52, %v3650_v36 }
0x1934   :  { %5048 = vtanh.f32 %v3693_v55  ;;  %v3694_v53 = vmul.f32 0.7978846, %v3689_v56 }
0x1936   :  { %5050 = vtanh.f32 %v3694_v53 }
0x193e   :  { %v5049_v9 = vpop.eup %5048 }
0x193f   :  { %v3703_v5 = vadd.f32 1.0, %v5049_v9 }
0x1940   :  { %v5051_v62 = vpop.eup %5050 }
0x1941   :  { %v3704_v2 = vadd.f32 1.0, %v5051_v62  ;;  %v3708_v8 = vmul.f32 %v3703_v5, %v3668_v3 }
0x1943   :  { %v3709_v35 = vmul.f32 %v3704_v2, %v3669_v4 }
0x1945   :  { %v3730_v59 = vpack.c.bf16 %v3709_v35, %v3708_v8 }
0x1947   :  { %4800 = vmatmul.mubr.bf16.vlgmr.msra.gmra.mrb[128].mxu0 %v3730_v59 }
0x1948   :  { %4803 = vmatprep.mubr.msk.bf16.mxu0 %vm5069_vm5, %v5068_v0 }
0x19b4   :  { %v3654_v54 = vpop.f32.mrb[136].mxu1 }
0x19b5   :  { %v3655_v43 = vadd.f32 %v4156_v44, %v3654_v54  ;;  %v4777_v60 = vpop.f32.mrb[137].mxu1 }
0x19b6   :  { %v3657_v33 = vpop.f32.mrb[138].mxu1 }
0x19b7   :  { %v3675_v48 = vmul.f32 0.044715, %v3655_v43  ;;  %v3658_v37 = vadd.f32 %v4156_v44, %v3657_v33  ;;  %v4778_v57 = vpop.f32.mrb[139].mxu1  ;;  %v3670_v32 = vmul.f32 0.5, %v3655_v43 }
0x19b9   :  { %v3680_v11 = vmul.f32 %v3675_v48, %v3655_v43  ;;  %v3676_v12 = vmul.f32 0.044715, %v3658_v37  ;;  %v3671_v27 = vmul.f32 0.5, %v3658_v37 }
0x19bb   :  { %v3685_v13 = vmul.f32 %v3680_v11, %v3655_v43  ;;  %v3681_v46 = vmul.f32 %v3676_v12, %v3658_v37 }
0x19bc   :  { %v3662_v45 = vpop.f32.mrb[140].mxu1 }
0x19bd   :  { %v3686_v1 = vmul.f32 %v3681_v46, %v3658_v37  ;;  %v3663_v63 = vadd.f32 %v4156_v44, %v3662_v45  ;;  %v4781_v15 = vpop.f32.mrb[141].mxu1  ;;  %v3690_v16 = vadd.f32 %v3685_v13, %v3655_v43 }
0x19be   :  { %v3665_v17 = vpop.f32.mrb[142].mxu1 }
0x19bf   :  { %v3677_v47 = vmul.f32 0.044715, %v3663_v63  ;;  %v4782_v18 = vpop.f32.mrb[143].mxu1  ;;  %v3691_v23 = vadd.f32 %v3686_v1, %v3658_v37  ;;  %v3695_v51 = vmul.f32 0.7978846, %v3690_v16  ;;  %v3672_v6 = vmul.f32 0.5, %v3663_v63 }
0x19c1   :  { %v3682_v20 = vmul.f32 %v3677_v47, %v3663_v63  ;;  %v3696_v21 = vmul.f32 0.7978846, %v3691_v23  ;;  %5052 = vtanh.f32 %v3695_v51 }
0x19c3   :  { %5054 = vtanh.f32 %v3696_v21  ;;  %v3687_v25 = vmul.f32 %v3682_v20, %v3663_v63 }
0x19c5   :  { %v3692_v42 = vadd.f32 %v3687_v25, %v3663_v63 }
0x19c7   :  { %v3697_v19 = vmul.f32 0.7978846, %v3692_v42 }
0x19c9   :  { %5056 = vtanh.f32 %v3697_v19 }
0x19cb   :  { %v5053_v28 = vpop.eup %5052 }
0x19cc   :  { %v3705_v7 = vadd.f32 1.0, %v5053_v28 }
0x19cd   :  { %v5055_v50 = vpop.eup %5054 }
0x19ce   :  { %v3706_v29 = vadd.f32 1.0, %v5055_v50  ;;  %v3710_v44 = vmul.f32 %v3705_v7, %v3670_v32 }
0x19d0   :  { %v3711_v30 = vmul.f32 %v3706_v29, %v3671_v27 }
0x19d2   :  { %v3731_v34 = vpack.c.bf16 %v3711_v30, %v3710_v44 }
0x19d3   :  { %v5057_v38 = vpop.eup %5056 }
0x19d4   :  { %4804 = vmatmul.mubr.bf16.gmra.mrb[132].mxu0 %v3731_v34  ;;  %v3707_v14 = vadd.f32 1.0, %v5057_v38 }
0x19d5   :  { %4807 = vmatprep.mubr.msk.bf16.mxu0 %vm5069_vm5, %v5068_v0 }
0x19d6   :  { %v3712_v36 = vmul.f32 %v3707_v14, %v3672_v6  ;;  %v4188_v6 = vld [vmem:[%s6243_s20] ss:$0 sm:$0xff] }
0x19d8   :  { %v3732_v39 = vpack.c.bf16 %v3712_v36, %v3712_v36  ;;  %v4189_v36 = vld [vmem:[%s6244_s21] ss:$0 sm:$0xff] }
0x19dc   :  { %4808 = vmatmul.mubr.bf16.gmra.mrb[136].mxu0 %v3732_v39 }
0x1a1a   :  { %v3815_v41 = vpop.f32.mrb[128].mxu0 }
0x1a1b   :  { %v3837_v31 = vadd.f32 %v3815_v41, %v6054_v40  ;;  %v4801_v26 = vpop.f32.mrb[129].mxu0 }
0x1a1c   :  { %v3818_v49 = vpop.f32.mrb[130].mxu0 }
0x1a1d   :  { %v3838_v52 = vadd.f32 %v3818_v49, %v6060_v10  ;;  %v4802_v55 = vpop.f32.mrb[131].mxu0  ;;  %v3850_v56 = vadd.f32 %v4187_v61, %v3837_v31 }
0x1a1f   :  { %v3857_v53 = vsel %vm194_vm2, %v3850_v56, 0.0  ;;  %v3851_v9 = vadd.f32 %v4187_v61, %v3838_v52 }
0x1a20   :  { %3858 = vadd.xlane.f32.xlu0 %v3857_v53 }
0x1a21   :  { %v3860_v0 = vsel %vm194_vm2, %v3851_v9, 0.0 }
0x1a22   :  { %3861 = vadd.xlane.f32.xlu1 %v3860_v0 }
0x1aa7   :  { %v3823_v5 = vpop.f32.mrb[132].mxu0 }
0x1aa8   :  { %v3839_v62 = vadd.f32 %v3823_v5, %v6084_v22  ;;  %v4805_v3 = vpop.f32.mrb[133].mxu0 }
0x1aa9   :  { %v3826_v4 = vpop.f32.mrb[134].mxu0 }
0x1aaa   :  { %v3852_v2 = vadd.f32 %v4187_v61, %v3839_v62  ;;  %v3840_v40 = vadd.f32 %v3826_v4, %v6087_v24  ;;  %v4806_v8 = vpop.f32.mrb[135].mxu0 }
0x1aac   :  { %v3853_v35 = vadd.f32 %v4187_v61, %v3840_v40  ;;  %v3863_v10 = vsel %vm194_vm2, %v3852_v2, 0.0 }
0x1aad   :  { %v3859_v59 = vpop.xlane.xlu0 %3858  ;;  %3864 = vadd.xlane.f32.xlu0 %v3863_v10 }
0x1aae   :  { %v3872_v54 = vmul.f32 0.03125, %v3859_v59  ;;  %v3866_v43 = vsel %vm194_vm2, %v3853_v35, 0.0 }
0x1aaf   :  { %v3862_v60 = vpop.xlane.xlu1 %3861  ;;  %3867 = vadd.xlane.f32.xlu1 %v3866_v43  ;;  %v3831_v33 = vpop.f32.mrb[136].mxu0 }
0x1ab0   :  { %v3877_v48 = vsub.f32 %v3850_v56, %v3872_v54  ;;  %v3873_v37 = vmul.f32 0.03125, %v3862_v60  ;;  %v3841_v22 = vadd.f32 %v3831_v33, %v6095_v58  ;;  %v4809_v57 = vpop.f32.mrb[137].mxu0 }
0x1ab1   :  { %v3834_v11 = vpop.f32.mrb[138].mxu0 }
0x1ab2   :  { %v3878_v12 = vsub.f32 %v3851_v9, %v3873_v37  ;;  %v3854_v24 = vadd.f32 %v4187_v61, %v3841_v22  ;;  %v4810_v13 = vpop.f32.mrb[139].mxu0  ;;  %v3882_v46 = vmul.f32 %v3877_v48, %v3877_v48 }
0x1ab4   :  { %v3887_v45 = vsel %vm194_vm2, %v3882_v46, 0.0  ;;  %v3869_v1 = vsel %vm207_vm4, %v3854_v24, 0.0  ;;  %v3883_v63 = vmul.f32 %v3878_v12, %v3878_v12 }
0x1ab5   :  { %3888 = vadd.xlane.f32.xlu1 %v3887_v45  ;;  %3870 = vadd.xlane.f32.xlu0 %v3869_v1 }
0x1ab6   :  { %v3890_v15 = vsel %vm194_vm2, %v3883_v63, 0.0 }
0x1ab9   :  { %3891 = vadd.xlane.f32.xlu0 %v3890_v15 }
0x1b3a   :  { %v3865_v16 = vpop.xlane.xlu0 %3864 }
0x1b3b   :  { %v3874_v17 = vmul.f32 0.03125, %v3865_v16 }
0x1b3c   :  { %v3868_v47 = vpop.xlane.xlu1 %3867 }
0x1b3d   :  { %v3879_v58 = vsub.f32 %v3852_v2, %v3874_v17  ;;  %v3875_v18 = vmul.f32 0.03125, %v3868_v47 }
0x1b3f   :  { %v3880_v23 = vsub.f32 %v3853_v35, %v3875_v18  ;;  %v3884_v51 = vmul.f32 %v3879_v58, %v3879_v58 }
0x1b41   :  { %v3893_v20 = vsel %vm194_vm2, %v3884_v51, 0.0  ;;  %v3885_v21 = vmul.f32 %v3880_v23, %v3880_v23 }
0x1b42   :  { %3894 = vadd.xlane.f32.xlu1 %v3893_v20  ;;  %v3889_v25 = vpop.xlane.xlu1 %3888  ;;  %v3871_v42 = vpop.xlane.xlu0 %3870 }
0x1b43   :  { %v3902_v19 = vmul.f32 0.03125, %v3889_v25  ;;  %v3876_v28 = vmul.f32 0.03125, %v3871_v42  ;;  %v3896_v7 = vsel %vm194_vm2, %v3885_v21, 0.0 }
0x1b44   :  { %3897 = vadd.xlane.f32.xlu0 %v3896_v7 }
0x1b45   :  { %v3907_v50 = vadd.f32 1e-06, %v3902_v19  ;;  %v3881_v32 = vsub.f32 %v3854_v24, %v3876_v28 }
0x1b46   :  { %v3892_v27 = vpop.xlane.xlu0 %3891 }
0x1b47   :  { %5058 = vrsqrt.f32 %v3907_v50  ;;  %v3903_v29 = vmul.f32 0.03125, %v3892_v27  ;;  %v3886_v44 = vmul.f32 %v3881_v32, %v3881_v32 }
0x1b49   :  { %v3908_v30 = vadd.f32 1e-06, %v3903_v29  ;;  %v3899_v34 = vsel %vm207_vm4, %v3886_v44, 0.0 }
0x1b4a   :  { %3900 = vadd.xlane.f32.xlu1 %v3899_v34 }
0x1b4b   :  { %5060 = vrsqrt.f32 %v3908_v30 }
0x1b51   :  { %v5059_v38 = vpop.eup %5058 }
0x1b52   :  { %v3917_v14 = vmul.f32 %v5059_v38, %v3877_v48 }
0x1b54   :  { %v3928_v39 = vmul.f32 %v4188_v6, %v3917_v14 }
0x1b55   :  { %v5061_v41 = vpop.eup %5060 }
0x1b56   :  { %v3939_v61 = vadd.f32 %v4189_v36, %v3928_v39  ;;  %v3918_v31 = vmul.f32 %v5061_v41, %v3878_v12 }
0x1b58   :  { %3944 = vst.msk [vmem:[%s6245_s22] sm:$0xff] %vm194_vm2, %v3939_v61  ;;  %v3929_v26 = vmul.f32 %v4188_v6, %v3918_v31 }
0x1b5a   :  { %v3940_v49 = vadd.f32 %v4189_v36, %v3929_v26 }
0x1b5c   :  { %3945 = vst.msk [vmem:[%s6245_s22 + $0x8] sm:$0xff] %vm194_vm2, %v3940_v49 }
0x1bcf   :  { %v3895_v52 = vpop.xlane.xlu1 %3894 }
0x1bd0   :  { %v3904_v55 = vmul.f32 0.03125, %v3895_v52 }
0x1bd1   :  { %v3898_v56 = vpop.xlane.xlu0 %3897 }
0x1bd2   :  { %v3909_v53 = vadd.f32 1e-06, %v3904_v55  ;;  %v3905_v9 = vmul.f32 0.03125, %v3898_v56 }
0x1bd4   :  { %5062 = vrsqrt.f32 %v3909_v53  ;;  %v3910_v0 = vadd.f32 1e-06, %v3905_v9 }
0x1bd6   :  { %5064 = vrsqrt.f32 %v3910_v0 }
0x1bd7   :  { %v3901_v5 = vpop.xlane.xlu1 %3900 }
0x1bd8   :  { %v3906_v62 = vmul.f32 0.03125, %v3901_v5 }
0x1bda   :  { %v3911_v3 = vadd.f32 1e-06, %v3906_v62 }
0x1bdc   :  { %5066 = vrsqrt.f32 %v3911_v3 }
0x1bde   :  { %v5063_v4 = vpop.eup %5062 }
0x1bdf   :  { %v3919_v2 = vmul.f32 %v5063_v4, %v3879_v58 }
0x1be0   :  { %v5065_v40 = vpop.eup %5064 }
0x1be1   :  { %v3930_v8 = vmul.f32 %v4188_v6, %v3919_v2  ;;  %v3920_v35 = vmul.f32 %v5065_v40, %v3880_v23 }
0x1be3   :  { %v3941_v10 = vadd.f32 %v4189_v36, %v3930_v8  ;;  %v3931_v59 = vmul.f32 %v4188_v6, %v3920_v35 }
0x1be5   :  { %3946 = vst.msk [vmem:[%s6245_s22 + $0x10] sm:$0xff] %vm194_vm2, %v3941_v10  ;;  %v3942_v54 = vadd.f32 %v4189_v36, %v3931_v59 }
0x1be6   :  { %v5067_v43 = vpop.eup %5066 }
0x1be7   :  { %3947 = vst.msk [vmem:[%s6245_s22 + $0x18] sm:$0xff] %vm194_vm2, %v3942_v54  ;;  %v3921_v60 = vmul.f32 %v5067_v43, %v3881_v32 }
0x1be9   :  { %v3932_v33 = vmul.f32 %v4188_v6, %v3921_v60 }
0x1beb   :  { %v3943_v48 = vadd.f32 %v4189_v36, %v3932_v33 }
0x1bed   :  { %3948 = vst.msk [vmem:[%s6245_s22 + $0x20] sm:$0x3] %vm207_vm4, %v3943_v48 }

// kernel: nascon_dino_forward.3
= control target key start
LH: loop header
LB: loop body
LE: loop exit
PB: predicated region body
PF: predicated region fallthrough
CT: control target
= control target key end

     0   :  { %v281_v1 = vmov 0.0   ;;  %vm282_vm0 = vmmov 0   ;;  %s385_s0 = inlined_call_operand.vmem [shape: f32[34,32], index: 0, kind: input, shape index: {}]   ;;  %s386_s1 = inlined_call_operand.vmem [shape: bf16[32,16], index: 1, kind: input, shape index: {}]   ;;  %s387_s2 = inlined_call_operand.vmem [shape: f32[1,16], index: 2, kind: input, shape index: {}]   ;;  %s388_s3 = inlined_call_operand.vmem [shape: bf16[16,10], index: 3, kind: input, shape index: {}]   ;;  %s389_s4 = inlined_call_operand.vmem [shape: f32[1,10], index: 4, kind: input, shape index: {}]   ;;  %s390_s5 = inlined_call_operand.vmem [shape: f32[34,16], index: 5, kind: output, shape index: {0}]   ;;  %s391_s6 = inlined_call_operand.hbm [shape: f32[2,10], index: 6, kind: output, shape index: {1}]  }
   0x1   :  { %v254_v0 = vld [vmem:[%s386_s1] sm:$0xff]   ;;  %225 = vmatprep.subr.bf16.mxu0 %v281_v1  ;;  %247 = vmatprep.subr.bf16.mxu1 %v281_v1  ;;  %v255_v2 = vld [vmem:[%s386_s1 + $0x8] sm:$0xff]  }
   0x2   :  { %226 = vmatpush3.bf16.msra.mxu0 %v254_v0  ;;  %229 = vmatprep.mubr.msk.bf16.mxu0 %vm282_vm0, %v281_v1  ;;  %v24_v3 = vld [vmem:[%s385_s0] sm:$0xff]  ;;  %v25_v4 = vld [vmem:[%s385_s0 + $0x8] sm:$0xff] }
   0x3   :  { %227 = vmatprep.subr.bf16.mxu0 %v281_v1  ;;  %249 = vmatpush3.bf16.msra.mxu1 %v254_v0 }
   0x4   :  { %248 = vmatprep.subr.bf16.mxu1 %v281_v1  ;;  %237 = vmatprep.mubr.msk.bf16.mxu1 %vm282_vm0, %v281_v1 }
   0x5   :  { %12 = vsyncpa [#allocation3], 0  ;;  %v33_v5 = vpack.c.bf16 %v25_v4, %v24_v3  ;;  %vm55_vm1 = vcmask 261120   ;;  %v26_v6 = vld [vmem:[%s385_s0 + $0x10] sm:$0xff]  ;;  %v27_v7 = vld [vmem:[%s385_s0 + $0x18] sm:$0xff]  ;;  %vm121_vm2 = vcmask 130048  }
   0x6   :  { %228 = vmatpush3.bf16.msra.mxu0 %v255_v2  ;;  %v34_v8 = vpack.c.bf16 %v27_v7, %v26_v6  ;;  %v28_v9 = vld [vmem:[%s385_s0 + $0x20] sm:$0x3]  ;;  %vm128_vm3 = vcmask 1040384   ;;  %vm126_vm4 = vcmask 123904   ;;  %s283_s23 = smov [#allocation2]   ;;  %vm189_vm5 = vcmask 74752  }
   0x7   :  { %250 = vmatpush3.bf16.msra.mxu1 %v255_v2  ;;  %v35_v10 = vpack.c.bf16 %v28_v9, %v28_v9  ;;  %v256_v11 = vld [vmem:[%s388_s3] sm:$0xff]   ;;  %s199_s24 = sshll.u32 %s283_s23, 4  ;;  %s200_s24 = int_to_ptr.vmem [resolvable:$true] %s199_s24 }
   0x8   :  { %241 = vmatprep.subr.bf16.mxu1 %v281_v1  ;;  %v209_v12 = vld [vmem:[%s387_s2] ss:$0 sm:$0xff]  ;;  %s257_s25 = scalar_lea.vmem %s200_s24, 32  ;;  %p262_p1 = scmp.lt.s32.totalorder %s200_s24, %s200_s24 }
   0x9   :  { %230 = vmatmul.mubr.msk.bf16.vlgmr.msra.gmra.mrb[0].mxu0 %vm55_vm1, %v33_v5  ;;  %v215_v32 = vld [vmem:[%s389_s4] ss:$0 sm:$0xff]  ;;  %p258_p0 = scmp.ne.s32.totalorder %s200_s24, %s257_s25  ;;  %p263_p2 = scmp.lt.s32.totalorder %s257_s25, %s257_s25 }
   0xa   :  { %233 = vmatprep.mubr.msk.bf16.mxu0 %vm282_vm0, %v281_v1  ;;  %238 = vmatmul.mubr.msk.bf16.vlgmr.msra.gmra.mrb[0].mxu1 %vm55_vm1, %v35_v10 }
   0xb   :  { %243 = vmatprep.mubr.msk.bf16.mxu1 %vm282_vm0, %v281_v1  ;;  %242 = vmatpush3.bf16.msra.mxu1 %v256_v11  ;;  %p264_p3 = por %p263_p2, %p262_p1 }
   0xd   :  { %p265_p4 = pnand %p264_p3, %p258_p0 }
  0x11   :  { %234 = vmatmul.mubr.msk.bf16.gmra.mrb[4].mxu0 %vm55_vm1, %v34_v8 }
  0xdc   :  { %v99_v13 = vpop.f32.mrb[0].mxu0 }
  0xdd   :  { %v100_v14 = vadd.f32 %v209_v12, %v99_v13  ;;  %v231_v15 = vpop.f32.mrb[1].mxu0  ;;  %v115_v27 = vpop.f32.mrb[0].mxu1 }
  0xde   :  { %v102_v16 = vpop.f32.mrb[2].mxu0  ;;  %v116_v28 = vadd.f32 %v209_v12, %v115_v27  ;;  %v239_v29 = vpop.f32.mrb[1].mxu1 }
  0xdf   :  { %122 = vst.msk [vmem:[%s390_s5] sm:$0xff] %vm121_vm2, %v100_v14  ;;  %v103_v17 = vadd.f32 %v209_v12, %v102_v16  ;;  %v232_v18 = vpop.f32.mrb[3].mxu0  ;;  %v118_v30 = vpop.f32.mrb[2].mxu1 }
  0xe0   :  { %127 = vst.msk [vmem:[%s390_s5 + $0x20] sm:$0x3] %vm126_vm4, %v116_v28  ;;  %v240_v31 = vpop.f32.mrb[3].mxu1 }
  0xe1   :  { %123 = vst.msk [vmem:[%s390_s5 + $0x8] sm:$0xff] %vm121_vm2, %v103_v17 }
  0xe4   :  { %v107_v19 = vpop.f32.mrb[4].mxu0 }
  0xe5   :  { %v108_v20 = vadd.f32 %v209_v12, %v107_v19  ;;  %v235_v21 = vpop.f32.mrb[5].mxu0 }
  0xe6   :  { %v110_v22 = vpop.f32.mrb[6].mxu0 }
  0xe7   :  { %124 = vst.msk [vmem:[%s390_s5 + $0x10] sm:$0xff] %vm121_vm2, %v108_v20  ;;  %v129_v23 = vsel %vm128_vm3, %v100_v14, %v108_v20  ;;  %v111_v24 = vadd.f32 %v209_v12, %v110_v22  ;;  %v236_v25 = vpop.f32.mrb[7].mxu0 }
  0xe8   :  { %v132_v26 = vpack.c.bf16 %v129_v23, %v129_v23 }
  0xe9   :  { %125 = vst.msk [vmem:[%s390_s5 + $0x18] sm:$0xff] %vm121_vm2, %v111_v24 }
  0xea   :  { %244 = vmatmul.mubr.msk.bf16.vlgmr.msra.gmra.mrb[4].mxu1 %vm121_vm2, %v132_v26 }
 0x1bd   :  { %v183_v33 = vpop.f32.mrb[4].mxu1 }
 0x1be   :  { %v184_v34 = vadd.f32 %v215_v32, %v183_v33  ;;  %v245_v35 = vpop.f32.mrb[5].mxu1 }
 0x1bf   :  { %v186_v36 = vpop.f32.mrb[6].mxu1 }
 0x1c0   :  { %v246_v37 = vpop.f32.mrb[7].mxu1  ;;  %190 = vst.msk [vmem:[#allocation2] sm:$0x3] %vm189_vm5, %v184_v34 }
 0x1c1   :  { %268 = shalt.err (!%p265_p4)
}
 0x1c2   :  { %s269_s4 = scalar_lea.hbm %s391_s6, 32 }
 0x1c3   :  { %p270_p5 = scmp.ne.s32.totalorder %s391_s6, %s269_s4  ;;  %p273_p6 = scmp.lt.u32.totalorder %s269_s4, %s391_s6 }
 0x1c5   :  { %p275_p7 = pnand %p273_p6, %p270_p5 }
 0x1c7   :  { %278 = shalt.err (!%p275_p7)
}
 0x1c8   :  { %202 = dma.vmem_to_hbm [thread:$0]  %s200_s24, 32, %s391_s6, [#allocation3]  }
 0x1c9   :  { %279 = dma.done.wait [#allocation3], 32  }
 0x1ca   :  { %280 = vsyncadd [#allocation3], 4294967264 }
 0x1cb   :  { %208 = vsyncpa [#allocation3], 1 }

</bundles_post_ra>
